<compile_context>
chip_gen: v7x
topology: tpu7x:2x2x1
jax: 0.10.0
libtpu: 0.0.40
codegen_flags: <defaults>
</compile_context>

<pallas_src>
import functools

import jax
import jax.numpy as jnp
from jax.experimental import pallas as pl
from jax.experimental.pallas import tpu as pltpu


# ---------------------------------------------------------------------------
# Fused kernel: 3x3x3 conv + InstanceNorm(affine) + PReLU + 1x1 skip conv.
# Grid = (N,); one whole sample per step, everything lane-dense on D*H*W.
# ---------------------------------------------------------------------------
def _fused_kernel(x_ref, w9_ref, b3_ref, mask_ref, g_ref, bt_ref, a_ref,
                  w1_ref, b1_ref, o_ref, xpad_ref,
                  *, D, H, W, Cin, Cout):
    # x_ref    : (1, Cin, D*H*W)      input sample, lane-dense
    # w9_ref   : (9, Cout, 3*Cin)     conv taps grouped by (kh,kw); K = kd*Cin+c
    # b3_ref   : (Cout, 1)            conv bias
    # mask_ref : (9, D*H*W)           h/w halo validity per (kh,kw) tap
    # g/bt_ref : (Cout, 1)            InstanceNorm gamma / beta
    # a_ref    : (1, 1)               PReLU shared weight
    # w1_ref   : (Cout, Cin)          1x1 skip conv weight
    # b1_ref   : (Cout, 1)            1x1 skip conv bias
    # o_ref    : (1, Cout, D*H*W)     output sample, lane-dense
    # xpad_ref : VMEM (Cin, (D+2)*H*W)  depth-zero-padded staging scratch
    HW = H * W
    DHW = D * HW

    x = x_ref[0]                                           # (Cin, DHW)

    # Stage a depth-zero-padded copy of the sample in VMEM.  All offsets are
    # multiples of HW (lane-aligned); the two halo planes are real zeros so no
    # depth mask is needed anywhere below.
    xpad_ref[:, 0:HW] = jnp.zeros((Cin, HW), jnp.float32)
    xpad_ref[:, (D + 1) * HW:(D + 2) * HW] = jnp.zeros((Cin, HW), jnp.float32)
    xpad_ref[:, HW:(D + 1) * HW] = x

    # Depth-stacked operand: Y[kd*Cin + c, p] = xpad[c, kd*HW + p]
    #   == x[c, plane p_d + kd - 1] (zero outside the volume).
    Y = jnp.concatenate(
        [xpad_ref[:, kd * HW:kd * HW + DHW] for kd in range(3)], axis=0)

    masks = mask_ref[...]                                  # (9, DHW)

    # 3x3x3 conv: 9 lane-rolled taps, contraction depth K = 3*Cin per dot.
    # Bias folded into the accumulator; accumulate in registers, store once.
    acc = jnp.broadcast_to(b3_ref[...], (Cout, DHW)).astype(jnp.float32)
    for kh in range(3):
        for kw in range(3):
            t = kh * 3 + kw
            shw = (kh - 1) * W + (kw - 1)                  # flat h/w offset
            if shw == 0:
                Ys = Y
            else:
                # result[p] = Y[(p + shw) mod DHW]; wrapped / cross-row lanes
                # are exactly the ones zeroed by masks[t] below.
                Ys = pltpu.roll(Y, shift=(-shw) % DHW, axis=1)
            part = jnp.dot(w9_ref[t], Ys,
                           preferred_element_type=jnp.float32)  # (Cout, DHW)
            acc = acc + part * masks[t][None, :]

    # InstanceNorm3d (affine, eps=1e-5) -- numerically stable two-pass stats.
    inv_cnt = 1.0 / float(DHW)
    mean = jnp.sum(acc, axis=1, keepdims=True) * inv_cnt   # (Cout, 1)
    zc = acc - mean
    var = jnp.sum(zc * zc, axis=1, keepdims=True) * inv_cnt
    scale = g_ref[...] * jax.lax.rsqrt(var + 1e-5)
    y = zc * scale + bt_ref[...]

    # PReLU (single shared weight).
    y = jnp.where(y >= 0.0, y, y * a_ref[...])

    # 1x1 skip conv: ONE lane-dense matmul, fused add, single store.
    skip = jnp.dot(w1_ref[...], x,
                   preferred_element_type=jnp.float32) + b1_ref[...]
    o_ref[0] = (y + skip).astype(o_ref.dtype)


# ---------------------------------------------------------------------------
# Host-side helpers
# ---------------------------------------------------------------------------
def _hw_masks(D, H, W):
    """(9, D*H*W) f32: 1.0 where the (kh,kw) tap reads inside the H/W extent."""
    HW = H * W
    p = jnp.arange(D * HW, dtype=jnp.int32)
    ph = (p // W) % H
    pw = p % W
    rows = []
    for kh in range(3):
        for kw in range(3):
            ok_h = (ph + (kh - 1) >= 0) & (ph + (kh - 1) <= H - 1)
            ok_w = (pw + (kw - 1) >= 0) & (pw + (kw - 1) <= W - 1)
            rows.append((ok_h & ok_w).astype(jnp.float32))
    return jnp.stack(rows, axis=0)


def conv3d_x1_forward(x, w3, b3, gamma, beta, alpha, w1, b1):
    """x: (N, Cin, D, H, W) f32  ->  (N, Cout, D, H, W) f32 (NCDHW)."""
    N, Cin, D, H, W = x.shape
    Cout = w3.shape[0]
    HW = H * W
    DHW = D * HW

    # Activations: metadata-only reshapes (contiguous dim merge), no copies.
    xf = x.reshape(N, Cin, DHW)

    # Tiny parameter relayouts (weights only).
    # w9[kh*3+kw, o, kd*Cin + c] = w3[o, c, kd, kh, kw]
    w9 = jnp.transpose(w3, (3, 4, 0, 2, 1)).reshape(9, Cout, 3 * Cin)
    w9 = w9.astype(jnp.float32)
    b3c = b3.reshape(Cout, 1)
    gc = gamma.reshape(Cout, 1)
    btc = beta.reshape(Cout, 1)
    ac = jnp.asarray(alpha, jnp.float32).reshape(1, 1)
    w1c = w1.reshape(Cout, Cin)
    b1c = b1.reshape(Cout, 1)
    mask9 = _hw_masks(D, H, W)

    kernel = functools.partial(_fused_kernel, D=D, H=H, W=W,
                               Cin=Cin, Cout=Cout)

    const2 = lambda n: (0, 0)
    const3 = lambda n: (0, 0, 0)

    out = pl.pallas_call(
        kernel,
        out_shape=jax.ShapeDtypeStruct((N, Cout, DHW), jnp.float32),
        grid_spec=pltpu.PrefetchScalarGridSpec(
            num_scalar_prefetch=0,
            grid=(N,),
            in_specs=[
                pl.BlockSpec((1, Cin, DHW), lambda n: (n, 0, 0)),   # x
                pl.BlockSpec((9, Cout, 3 * Cin), const3),           # w9
                pl.BlockSpec((Cout, 1), const2),                    # b3
                pl.BlockSpec((9, DHW), const2),                     # masks
                pl.BlockSpec((Cout, 1), const2),                    # gamma
                pl.BlockSpec((Cout, 1), const2),                    # beta
                pl.BlockSpec((1, 1), const2),                       # alpha
                pl.BlockSpec((Cout, Cin), const2),                  # w1
                pl.BlockSpec((Cout, 1), const2),                    # b1
            ],
            out_specs=pl.BlockSpec((1, Cout, DHW), lambda n: (n, 0, 0)),
            scratch_shapes=[pltpu.VMEM((Cin, (D + 2) * HW), jnp.float32)],
        ),
        compiler_params=pltpu.CompilerParams(
            dimension_semantics=("parallel",)),
        cost_estimate=pl.CostEstimate(
            flops=2 * N * DHW * Cout * Cin * 28,        # 27 conv taps + 1x1 skip
            transcendentals=N * Cout,
            bytes_accessed=4 * (N * Cin * DHW + N * Cout * DHW + 9 * DHW)),
    )(xf, w9, b3c, mask9, gc, btc, ac, w1c, b1c)

    return out.reshape(N, Cout, D, H, W)                # metadata-only


# ---------------------------------------------------------------------------
# Pure-JAX reference (same math, no Pallas) for a correctness check.
# ---------------------------------------------------------------------------
def _reference(x, w3, b3, gamma, beta, alpha, w1, b1):
    N, Cin, D, H, W = x.shape
    Cout = w3.shape[0]
    xp = jnp.pad(x, ((0, 0), (0, 0), (1, 1), (1, 1), (1, 1)))
    z = jnp.zeros((N, Cout, D, H, W), jnp.float32)
    for kd in range(3):
        for kh in range(3):
            for kw in range(3):
                z = z + jnp.einsum('oc,ncdhw->nodhw', w3[:, :, kd, kh, kw],
                                   xp[:, :, kd:kd + D, kh:kh + H, kw:kw + W])
    z = z + b3[None, :, None, None, None]
    mean = jnp.mean(z, axis=(2, 3, 4), keepdims=True)
    var = jnp.mean((z - mean) ** 2, axis=(2, 3, 4), keepdims=True)
    zn = (z - mean) * jax.lax.rsqrt(var + 1e-5)
    zn = zn * gamma[None, :, None, None, None] + beta[None, :, None, None, None]
    a = jnp.asarray(alpha, jnp.float32)
    zr = jnp.where(zn >= 0, zn, a * zn)
    skip = jnp.einsum('oc,ncdhw->nodhw', w1.reshape(Cout, Cin), x)
    skip = skip + b1[None, :, None, None, None]
    return zr + skip


if __name__ == "__main__":
    key = jax.random.PRNGKey(0)
    ks = jax.random.split(key, 7)

    N, Cin, Cout = 2, 8, 4
    D = H = W = 16

    x = jax.random.normal(ks[0], (N, Cin, D, H, W), jnp.float32)
    # synthetic parameters with the exact torch module shapes
    w3 = jax.random.normal(ks[1], (Cout, Cin, 3, 3, 3), jnp.float32) * 0.1
    b3 = jax.random.normal(ks[2], (Cout,), jnp.float32) * 0.1
    gamma = 1.0 + 0.1 * jax.random.normal(ks[3], (Cout,), jnp.float32)
    beta = 0.1 * jax.random.normal(ks[4], (Cout,), jnp.float32)
    alpha = jnp.asarray(0.25, jnp.float32)          # nn.PReLU() default init
    w1 = jax.random.normal(ks[5], (Cout, Cin, 1, 1, 1), jnp.float32) * 0.1
    b1 = jax.random.normal(ks[6], (Cout,), jnp.float32) * 0.1

    fwd = jax.jit(conv3d_x1_forward)
    out = jax.block_until_ready(fwd(x, w3, b3, gamma, beta, alpha, w1, b1))

    assert out.shape == (N, Cout, D, H, W), out.shape
    ref = _reference(x, w3, b3, gamma, beta, alpha, w1, b1)
    err = float(jnp.max(jnp.abs(out - ref)))
    assert jnp.allclose(out, ref, atol=2e-3, rtol=2e-3), err

    print("KERNEL_OK")
</pallas_src>

<mosaic_0001>
module attributes {stable_mosaic.version = 11 : i64} {
  func.func @_fused_kernel(%arg0: i32, %arg1: memref<1x8x4096xf32, #tpu.memory_space<vmem>>, %arg2: memref<9x4x24xf32, #tpu.memory_space<vmem>>, %arg3: memref<4x1xf32, #tpu.memory_space<vmem>>, %arg4: memref<9x4096xf32, #tpu.memory_space<vmem>>, %arg5: memref<4x1xf32, #tpu.memory_space<vmem>>, %arg6: memref<4x1xf32, #tpu.memory_space<vmem>>, %arg7: memref<1x1xf32, #tpu.memory_space<vmem>>, %arg8: memref<4x8xf32, #tpu.memory_space<vmem>>, %arg9: memref<4x1xf32, #tpu.memory_space<vmem>>, %arg10: memref<1x4x4096xf32, #tpu.memory_space<vmem>>, %arg11: memref<8x4608xf32, #tpu.memory_space<vmem>>) attributes {dimension_semantics = [#tpu.dimension_semantics<parallel>], iteration_bounds = array<i64: 2>, scalar_prefetch = 0 : i64, scratch_operands = 1 : i64, tpu.core_type = #tpu.core_type<tc>, window_params = [{transform_indices = @transform_0, window_bounds = array<i64: 1, 8, 4096>}, {pipeline_mode = #tpu.pipeline_mode<synchronous>, transform_indices = @transform_1, window_bounds = array<i64: 9, 4, 24>}, {pipeline_mode = #tpu.pipeline_mode<synchronous>, transform_indices = @transform_2, window_bounds = array<i64: 4, 1>}, {pipeline_mode = #tpu.pipeline_mode<synchronous>, transform_indices = @transform_3, window_bounds = array<i64: 9, 4096>}, {pipeline_mode = #tpu.pipeline_mode<synchronous>, transform_indices = @transform_4, window_bounds = array<i64: 4, 1>}, {pipeline_mode = #tpu.pipeline_mode<synchronous>, transform_indices = @transform_5, window_bounds = array<i64: 4, 1>}, {pipeline_mode = #tpu.pipeline_mode<synchronous>, transform_indices = @transform_6, window_bounds = array<i64: 1, 1>}, {pipeline_mode = #tpu.pipeline_mode<synchronous>, transform_indices = @transform_7, window_bounds = array<i64: 4, 8>}, {pipeline_mode = #tpu.pipeline_mode<synchronous>, transform_indices = @transform_8, window_bounds = array<i64: 4, 1>}, {transform_indices = @transform_9, window_bounds = array<i64: 1, 4, 4096>}]} {
    %c0 = arith.constant 0 : index
    %c0_0 = arith.constant 0 : index
    %c0_1 = arith.constant 0 : index
    %0 = vector.load %arg1[%c0, %c0_0, %c0_1] : memref<1x8x4096xf32, #tpu.memory_space<vmem>>, vector<1x8x4096xf32>
    %1 = vector.shape_cast %0 : vector<1x8x4096xf32> to vector<8x4096xf32>
    %cst = arith.constant 0.000000e+00 : f32
    %2 = vector.broadcast %cst : f32 to vector<8x256xf32>
    %c0_2 = arith.constant 0 : index
    %c0_3 = arith.constant 0 : index
    %3 = vector.load %arg11[%c0_2, %c0_3] : memref<8x4608xf32, #tpu.memory_space<vmem>>, vector<8x256xf32>
    tpu.vector_store %arg11[%c0_2, %c0_3], %2 {strides = array<i32>} : memref<8x4608xf32, #tpu.memory_space<vmem>>, vector<8x256xf32>,
    %cst_4 = arith.constant 0.000000e+00 : f32
    %4 = vector.broadcast %cst_4 : f32 to vector<8x256xf32>
    %c0_5 = arith.constant 0 : index
    %c4352 = arith.constant 4352 : index
    %5 = vector.load %arg11[%c0_5, %c4352] : memref<8x4608xf32, #tpu.memory_space<vmem>>, vector<8x256xf32>
    tpu.vector_store %arg11[%c0_5, %c4352], %4 {strides = array<i32>} : memref<8x4608xf32, #tpu.memory_space<vmem>>, vector<8x256xf32>,
    %c0_6 = arith.constant 0 : index
    %c256 = arith.constant 256 : index
    %6 = vector.load %arg11[%c0_6, %c256] : memref<8x4608xf32, #tpu.memory_space<vmem>>, vector<8x4096xf32>
    tpu.vector_store %arg11[%c0_6, %c256], %1 {strides = array<i32>} : memref<8x4608xf32, #tpu.memory_space<vmem>>, vector<8x4096xf32>,
    %c0_7 = arith.constant 0 : index
    %c0_8 = arith.constant 0 : index
    %7 = vector.load %arg11[%c0_7, %c0_8] : memref<8x4608xf32, #tpu.memory_space<vmem>>, vector<8x4096xf32>
    %c0_9 = arith.constant 0 : index
    %c256_10 = arith.constant 256 : index
    %8 = vector.load %arg11[%c0_9, %c256_10] : memref<8x4608xf32, #tpu.memory_space<vmem>>, vector<8x4096xf32>
    %c0_11 = arith.constant 0 : index
    %c512 = arith.constant 512 : index
    %9 = vector.load %arg11[%c0_11, %c512] : memref<8x4608xf32, #tpu.memory_space<vmem>>, vector<8x4096xf32>
    %10 = tpu.concatenate %7, %8, %9 in 0 : vector<8x4096xf32>, vector<8x4096xf32>, vector<8x4096xf32> -> vector<24x4096xf32>
    %c0_12 = arith.constant 0 : index
    %c0_13 = arith.constant 0 : index
    %11 = vector.load %arg4[%c0_12, %c0_13] : memref<9x4096xf32, #tpu.memory_space<vmem>>, vector<9x4096xf32>
    %c0_14 = arith.constant 0 : index
    %c0_15 = arith.constant 0 : index
    %12 = vector.load %arg3[%c0_14, %c0_15] : memref<4x1xf32, #tpu.memory_space<vmem>>, vector<4x1xf32>
    %13 = vector.shape_cast %12 : vector<4x1xf32> to vector<4x1xf32>
    %14 = vector.broadcast %13 : vector<4x1xf32> to vector<4x4096xf32>
    %c17_i32 = arith.constant 17 : i32
    %15 = tpu.dynamic_rotate %10 by %c17_i32 dim 1 : vector<24x4096xf32>, i32 -> vector<24x4096xf32>
    %c0_16 = arith.constant 0 : index
    %c0_17 = arith.constant 0 : index
    %c0_18 = arith.constant 0 : index
    %16 = vector.load %arg2[%c0_16, %c0_17, %c0_18] : memref<9x4x24xf32, #tpu.memory_space<vmem>>, vector<1x4x24xf32>
    %17 = vector.shape_cast %16 : vector<1x4x24xf32> to vector<4x24xf32>
    %cst_19 = arith.constant dense<0.000000e+00> : vector<4x4096xf32>
    %18 = tpu.matmul %17, %15, %cst_19 {dimension_numbers = #tpu.dot_dimension_numbers<[1], [0], [0], [1], [0, 0, 1, 1], [], []>} : vector<4x24xf32>, vector<24x4096xf32>, vector<4x4096xf32> -> vector<4x4096xf32>
    %19 = vector.extract_strided_slice %11 {offsets = [0, 0], sizes = [1, 4096], strides = [1, 1]} : vector<9x4096xf32> to vector<1x4096xf32>
    %20 = vector.shape_cast %19 : vector<1x4096xf32> to vector<4096xf32>
    %21 = vector.shape_cast %20 : vector<4096xf32> to vector<1x4096xf32>
    %22 = vector.broadcast %21 : vector<1x4096xf32> to vector<4x4096xf32>
    %23 = arith.mulf %18, %22 : vector<4x4096xf32>
    %24 = arith.addf %14, %23 : vector<4x4096xf32>
    %c16_i32 = arith.constant 16 : i32
    %25 = tpu.dynamic_rotate %10 by %c16_i32 dim 1 : vector<24x4096xf32>, i32 -> vector<24x4096xf32>
    %c1 = arith.constant 1 : index
    %c0_20 = arith.constant 0 : index
    %c0_21 = arith.constant 0 : index
    %26 = vector.load %arg2[%c1, %c0_20, %c0_21] : memref<9x4x24xf32, #tpu.memory_space<vmem>>, vector<1x4x24xf32>
    %27 = vector.shape_cast %26 : vector<1x4x24xf32> to vector<4x24xf32>
    %cst_22 = arith.constant dense<0.000000e+00> : vector<4x4096xf32>
    %28 = tpu.matmul %27, %25, %cst_22 {dimension_numbers = #tpu.dot_dimension_numbers<[1], [0], [0], [1], [0, 0, 1, 1], [], []>} : vector<4x24xf32>, vector<24x4096xf32>, vector<4x4096xf32> -> vector<4x4096xf32>
    %29 = vector.extract_strided_slice %11 {offsets = [1, 0], sizes = [1, 4096], strides = [1, 1]} : vector<9x4096xf32> to vector<1x4096xf32>
    %30 = vector.shape_cast %29 : vector<1x4096xf32> to vector<4096xf32>
    %31 = vector.shape_cast %30 : vector<4096xf32> to vector<1x4096xf32>
    %32 = vector.broadcast %31 : vector<1x4096xf32> to vector<4x4096xf32>
    %33 = arith.mulf %28, %32 : vector<4x4096xf32>
    %34 = arith.addf %24, %33 : vector<4x4096xf32>
    %c15_i32 = arith.constant 15 : i32
    %35 = tpu.dynamic_rotate %10 by %c15_i32 dim 1 : vector<24x4096xf32>, i32 -> vector<24x4096xf32>
    %c2 = arith.constant 2 : index
    %c0_23 = arith.constant 0 : index
    %c0_24 = arith.constant 0 : index
    %36 = vector.load %arg2[%c2, %c0_23, %c0_24] : memref<9x4x24xf32, #tpu.memory_space<vmem>>, vector<1x4x24xf32>
    %37 = vector.shape_cast %36 : vector<1x4x24xf32> to vector<4x24xf32>
    %cst_25 = arith.constant dense<0.000000e+00> : vector<4x4096xf32>
    %38 = tpu.matmul %37, %35, %cst_25 {dimension_numbers = #tpu.dot_dimension_numbers<[1], [0], [0], [1], [0, 0, 1, 1], [], []>} : vector<4x24xf32>, vector<24x4096xf32>, vector<4x4096xf32> -> vector<4x4096xf32>
    %39 = vector.extract_strided_slice %11 {offsets = [2, 0], sizes = [1, 4096], strides = [1, 1]} : vector<9x4096xf32> to vector<1x4096xf32>
    %40 = vector.shape_cast %39 : vector<1x4096xf32> to vector<4096xf32>
    %41 = vector.shape_cast %40 : vector<4096xf32> to vector<1x4096xf32>
    %42 = vector.broadcast %41 : vector<1x4096xf32> to vector<4x4096xf32>
    %43 = arith.mulf %38, %42 : vector<4x4096xf32>
    %44 = arith.addf %34, %43 : vector<4x4096xf32>
    %c1_i32 = arith.constant 1 : i32
    %45 = tpu.dynamic_rotate %10 by %c1_i32 dim 1 : vector<24x4096xf32>, i32 -> vector<24x4096xf32>
    %c3 = arith.constant 3 : index
    %c0_26 = arith.constant 0 : index
    %c0_27 = arith.constant 0 : index
    %46 = vector.load %arg2[%c3, %c0_26, %c0_27] : memref<9x4x24xf32, #tpu.memory_space<vmem>>, vector<1x4x24xf32>
    %47 = vector.shape_cast %46 : vector<1x4x24xf32> to vector<4x24xf32>
    %cst_28 = arith.constant dense<0.000000e+00> : vector<4x4096xf32>
    %48 = tpu.matmul %47, %45, %cst_28 {dimension_numbers = #tpu.dot_dimension_numbers<[1], [0], [0], [1], [0, 0, 1, 1], [], []>} : vector<4x24xf32>, vector<24x4096xf32>, vector<4x4096xf32> -> vector<4x4096xf32>
    %49 = vector.extract_strided_slice %11 {offsets = [3, 0], sizes = [1, 4096], strides = [1, 1]} : vector<9x4096xf32> to vector<1x4096xf32>
    %50 = vector.shape_cast %49 : vector<1x4096xf32> to vector<4096xf32>
    %51 = vector.shape_cast %50 : vector<4096xf32> to vector<1x4096xf32>
    %52 = vector.broadcast %51 : vector<1x4096xf32> to vector<4x4096xf32>
    %53 = arith.mulf %48, %52 : vector<4x4096xf32>
    %54 = arith.addf %44, %53 : vector<4x4096xf32>
    %c4 = arith.constant 4 : index
    %c0_29 = arith.constant 0 : index
    %c0_30 = arith.constant 0 : index
    %55 = vector.load %arg2[%c4, %c0_29, %c0_30] : memref<9x4x24xf32, #tpu.memory_space<vmem>>, vector<1x4x24xf32>
    %56 = vector.shape_cast %55 : vector<1x4x24xf32> to vector<4x24xf32>
    %cst_31 = arith.constant dense<0.000000e+00> : vector<4x4096xf32>
    %57 = tpu.matmul %56, %10, %cst_31 {dimension_numbers = #tpu.dot_dimension_numbers<[1], [0], [0], [1], [0, 0, 1, 1], [], []>} : vector<4x24xf32>, vector<24x4096xf32>, vector<4x4096xf32> -> vector<4x4096xf32>
    %58 = vector.extract_strided_slice %11 {offsets = [4, 0], sizes = [1, 4096], strides = [1, 1]} : vector<9x4096xf32> to vector<1x4096xf32>
    %59 = vector.shape_cast %58 : vector<1x4096xf32> to vector<4096xf32>
    %60 = vector.shape_cast %59 : vector<4096xf32> to vector<1x4096xf32>
    %61 = vector.broadcast %60 : vector<1x4096xf32> to vector<4x4096xf32>
    %62 = arith.mulf %57, %61 : vector<4x4096xf32>
    %63 = arith.addf %54, %62 : vector<4x4096xf32>
    %c4095_i32 = arith.constant 4095 : i32
    %64 = tpu.dynamic_rotate %10 by %c4095_i32 dim 1 : vector<24x4096xf32>, i32 -> vector<24x4096xf32>
    %c5 = arith.constant 5 : index
    %c0_32 = arith.constant 0 : index
    %c0_33 = arith.constant 0 : index
    %65 = vector.load %arg2[%c5, %c0_32, %c0_33] : memref<9x4x24xf32, #tpu.memory_space<vmem>>, vector<1x4x24xf32>
    %66 = vector.shape_cast %65 : vector<1x4x24xf32> to vector<4x24xf32>
    %cst_34 = arith.constant dense<0.000000e+00> : vector<4x4096xf32>
    %67 = tpu.matmul %66, %64, %cst_34 {dimension_numbers = #tpu.dot_dimension_numbers<[1], [0], [0], [1], [0, 0, 1, 1], [], []>} : vector<4x24xf32>, vector<24x4096xf32>, vector<4x4096xf32> -> vector<4x4096xf32>
    %68 = vector.extract_strided_slice %11 {offsets = [5, 0], sizes = [1, 4096], strides = [1, 1]} : vector<9x4096xf32> to vector<1x4096xf32>
    %69 = vector.shape_cast %68 : vector<1x4096xf32> to vector<4096xf32>
    %70 = vector.shape_cast %69 : vector<4096xf32> to vector<1x4096xf32>
    %71 = vector.broadcast %70 : vector<1x4096xf32> to vector<4x4096xf32>
    %72 = arith.mulf %67, %71 : vector<4x4096xf32>
    %73 = arith.addf %63, %72 : vector<4x4096xf32>
    %c4081_i32 = arith.constant 4081 : i32
    %74 = tpu.dynamic_rotate %10 by %c4081_i32 dim 1 : vector<24x4096xf32>, i32 -> vector<24x4096xf32>
    %c6 = arith.constant 6 : index
    %c0_35 = arith.constant 0 : index
    %c0_36 = arith.constant 0 : index
    %75 = vector.load %arg2[%c6, %c0_35, %c0_36] : memref<9x4x24xf32, #tpu.memory_space<vmem>>, vector<1x4x24xf32>
    %76 = vector.shape_cast %75 : vector<1x4x24xf32> to vector<4x24xf32>
    %cst_37 = arith.constant dense<0.000000e+00> : vector<4x4096xf32>
    %77 = tpu.matmul %76, %74, %cst_37 {dimension_numbers = #tpu.dot_dimension_numbers<[1], [0], [0], [1], [0, 0, 1, 1], [], []>} : vector<4x24xf32>, vector<24x4096xf32>, vector<4x4096xf32> -> vector<4x4096xf32>
    %78 = vector.extract_strided_slice %11 {offsets = [6, 0], sizes = [1, 4096], strides = [1, 1]} : vector<9x4096xf32> to vector<1x4096xf32>
    %79 = vector.shape_cast %78 : vector<1x4096xf32> to vector<4096xf32>
    %80 = vector.shape_cast %79 : vector<4096xf32> to vector<1x4096xf32>
    %81 = vector.broadcast %80 : vector<1x4096xf32> to vector<4x4096xf32>
    %82 = arith.mulf %77, %81 : vector<4x4096xf32>
    %83 = arith.addf %73, %82 : vector<4x4096xf32>
    %c4080_i32 = arith.constant 4080 : i32
    %84 = tpu.dynamic_rotate %10 by %c4080_i32 dim 1 : vector<24x4096xf32>, i32 -> vector<24x4096xf32>
    %c7 = arith.constant 7 : index
    %c0_38 = arith.constant 0 : index
    %c0_39 = arith.constant 0 : index
    %85 = vector.load %arg2[%c7, %c0_38, %c0_39] : memref<9x4x24xf32, #tpu.memory_space<vmem>>, vector<1x4x24xf32>
    %86 = vector.shape_cast %85 : vector<1x4x24xf32> to vector<4x24xf32>
    %cst_40 = arith.constant dense<0.000000e+00> : vector<4x4096xf32>
    %87 = tpu.matmul %86, %84, %cst_40 {dimension_numbers = #tpu.dot_dimension_numbers<[1], [0], [0], [1], [0, 0, 1, 1], [], []>} : vector<4x24xf32>, vector<24x4096xf32>, vector<4x4096xf32> -> vector<4x4096xf32>
    %88 = vector.extract_strided_slice %11 {offsets = [7, 0], sizes = [1, 4096], strides = [1, 1]} : vector<9x4096xf32> to vector<1x4096xf32>
    %89 = vector.shape_cast %88 : vector<1x4096xf32> to vector<4096xf32>
    %90 = vector.shape_cast %89 : vector<4096xf32> to vector<1x4096xf32>
    %91 = vector.broadcast %90 : vector<1x4096xf32> to vector<4x4096xf32>
    %92 = arith.mulf %87, %91 : vector<4x4096xf32>
    %93 = arith.addf %83, %92 : vector<4x4096xf32>
    %c4079_i32 = arith.constant 4079 : i32
    %94 = tpu.dynamic_rotate %10 by %c4079_i32 dim 1 : vector<24x4096xf32>, i32 -> vector<24x4096xf32>
    %c8 = arith.constant 8 : index
    %c0_41 = arith.constant 0 : index
    %c0_42 = arith.constant 0 : index
    %95 = vector.load %arg2[%c8, %c0_41, %c0_42] : memref<9x4x24xf32, #tpu.memory_space<vmem>>, vector<1x4x24xf32>
    %96 = vector.shape_cast %95 : vector<1x4x24xf32> to vector<4x24xf32>
    %cst_43 = arith.constant dense<0.000000e+00> : vector<4x4096xf32>
    %97 = tpu.matmul %96, %94, %cst_43 {dimension_numbers = #tpu.dot_dimension_numbers<[1], [0], [0], [1], [0, 0, 1, 1], [], []>} : vector<4x24xf32>, vector<24x4096xf32>, vector<4x4096xf32> -> vector<4x4096xf32>
    %98 = vector.extract_strided_slice %11 {offsets = [8, 0], sizes = [1, 4096], strides = [1, 1]} : vector<9x4096xf32> to vector<1x4096xf32>
    %99 = vector.shape_cast %98 : vector<1x4096xf32> to vector<4096xf32>
    %100 = vector.shape_cast %99 : vector<4096xf32> to vector<1x4096xf32>
    %101 = vector.broadcast %100 : vector<1x4096xf32> to vector<4x4096xf32>
    %102 = arith.mulf %97, %101 : vector<4x4096xf32>
    %103 = arith.addf %93, %102 : vector<4x4096xf32>
    %cst_44 = arith.constant dense<0.000000e+00> : vector<4xf32>
    %104 = vector.multi_reduction <add>, %103, %cst_44 [1] : vector<4x4096xf32> to vector<4xf32>
    %105 = vector.shape_cast %104 : vector<4xf32> to vector<4x1xf32>
    %cst_45 = arith.constant 2.44140625E-4 : f32
    %106 = vector.broadcast %cst_45 : f32 to vector<4x1xf32>
    %107 = arith.mulf %105, %106 : vector<4x1xf32>
    %108 = vector.broadcast %107 : vector<4x1xf32> to vector<4x4096xf32>
    %109 = arith.subf %103, %108 : vector<4x4096xf32>
    %110 = arith.mulf %109, %109 : vector<4x4096xf32>
    %cst_46 = arith.constant dense<0.000000e+00> : vector<4xf32>
    %111 = vector.multi_reduction <add>, %110, %cst_46 [1] : vector<4x4096xf32> to vector<4xf32>
    %112 = vector.shape_cast %111 : vector<4xf32> to vector<4x1xf32>
    %cst_47 = arith.constant 2.44140625E-4 : f32
    %113 = vector.broadcast %cst_47 : f32 to vector<4x1xf32>
    %114 = arith.mulf %112, %113 : vector<4x1xf32>
    %c0_48 = arith.constant 0 : index
    %c0_49 = arith.constant 0 : index
    %115 = vector.load %arg5[%c0_48, %c0_49] : memref<4x1xf32, #tpu.memory_space<vmem>>, vector<4x1xf32>
    %cst_50 = arith.constant 9.99999974E-6 : f32
    %116 = vector.broadcast %cst_50 : f32 to vector<4x1xf32>
    %117 = arith.addf %114, %116 : vector<4x1xf32>
    %118 = math.rsqrt %117 : vector<4x1xf32>
    %119 = arith.mulf %115, %118 : vector<4x1xf32>
    %120 = vector.broadcast %119 : vector<4x1xf32> to vector<4x4096xf32>
    %121 = arith.mulf %109, %120 : vector<4x4096xf32>
    %c0_51 = arith.constant 0 : index
    %c0_52 = arith.constant 0 : index
    %122 = vector.load %arg6[%c0_51, %c0_52] : memref<4x1xf32, #tpu.memory_space<vmem>>, vector<4x1xf32>
    %123 = vector.broadcast %122 : vector<4x1xf32> to vector<4x4096xf32>
    %124 = arith.addf %121, %123 : vector<4x4096xf32>
    %cst_53 = arith.constant 0.000000e+00 : f32
    %125 = vector.broadcast %cst_53 : f32 to vector<4x4096xf32>
    %126 = arith.cmpf oge, %124, %125 : vector<4x4096xf32>
    %c0_54 = arith.constant 0 : index
    %c0_55 = arith.constant 0 : index
    %127 = vector.load %arg7[%c0_54, %c0_55] : memref<1x1xf32, #tpu.memory_space<vmem>>, vector<1x1xf32>
    %128 = vector.broadcast %127 : vector<1x1xf32> to vector<4x4096xf32>
    %129 = arith.mulf %124, %128 : vector<4x4096xf32>
    %130 = arith.select %126, %124, %129 : vector<4x4096xi1>, vector<4x4096xf32>
    %c0_56 = arith.constant 0 : index
    %c0_57 = arith.constant 0 : index
    %131 = vector.load %arg8[%c0_56, %c0_57] : memref<4x8xf32, #tpu.memory_space<vmem>>, vector<4x8xf32>
    %cst_58 = arith.constant dense<0.000000e+00> : vector<4x4096xf32>
    %132 = tpu.matmul %131, %1, %cst_58 {dimension_numbers = #tpu.dot_dimension_numbers<[1], [0], [0], [1], [0, 0, 1, 1], [], []>} : vector<4x8xf32>, vector<8x4096xf32>, vector<4x4096xf32> -> vector<4x4096xf32>
    %c0_59 = arith.constant 0 : index
    %c0_60 = arith.constant 0 : index
    %133 = vector.load %arg9[%c0_59, %c0_60] : memref<4x1xf32, #tpu.memory_space<vmem>>, vector<4x1xf32>
    %134 = vector.broadcast %133 : vector<4x1xf32> to vector<4x4096xf32>
    %135 = arith.addf %132, %134 : vector<4x4096xf32>
    %136 = arith.addf %130, %135 : vector<4x4096xf32>
    %c0_61 = arith.constant 0 : index
    %c0_62 = arith.constant 0 : index
    %c0_63 = arith.constant 0 : index
    %137 = vector.load %arg10[%c0_61, %c0_62, %c0_63] : memref<1x4x4096xf32, #tpu.memory_space<vmem>>, vector<1x4x4096xf32>
    %138 = vector.shape_cast %137 : vector<1x4x4096xf32> to vector<4x4096xf32>
    %139 = vector.shape_cast %136 : vector<4x4096xf32> to vector<1x4x4096xf32>
    tpu.vector_store %arg10[%c0_61, %c0_62, %c0_63], %139 {strides = array<i32>} : memref<1x4x4096xf32, #tpu.memory_space<vmem>>, vector<1x4x4096xf32>,
    return
  }
  func.func @transform_0(%arg0: i32) -> (i32, i32, i32) {
    %c0_i32 = arith.constant 0 : i32
    %c0_i32_0 = arith.constant 0 : i32
    %c0_i32_1 = arith.constant 0 : i32
    return %arg0, %c0_i32, %c0_i32_0 : i32, i32, i32
  }
  func.func @transform_1(%arg0: i32) -> (i32, i32, i32) {
    %c0_i32 = arith.constant 0 : i32
    %c0_i32_0 = arith.constant 0 : i32
    %c0_i32_1 = arith.constant 0 : i32
    %c0_i32_2 = arith.constant 0 : i32
    return %c0_i32, %c0_i32_0, %c0_i32_1 : i32, i32, i32
  }
  func.func @transform_2(%arg0: i32) -> (i32, i32) {
    %c0_i32 = arith.constant 0 : i32
    %c0_i32_0 = arith.constant 0 : i32
    %c0_i32_1 = arith.constant 0 : i32
    return %c0_i32, %c0_i32_0 : i32, i32
  }
  func.func @transform_3(%arg0: i32) -> (i32, i32) {
    %c0_i32 = arith.constant 0 : i32
    %c0_i32_0 = arith.constant 0 : i32
    %c0_i32_1 = arith.constant 0 : i32
    return %c0_i32, %c0_i32_0 : i32, i32
  }
  func.func @transform_4(%arg0: i32) -> (i32, i32) {
    %c0_i32 = arith.constant 0 : i32
    %c0_i32_0 = arith.constant 0 : i32
    %c0_i32_1 = arith.constant 0 : i32
    return %c0_i32, %c0_i32_0 : i32, i32
  }
  func.func @transform_5(%arg0: i32) -> (i32, i32) {
    %c0_i32 = arith.constant 0 : i32
    %c0_i32_0 = arith.constant 0 : i32
    %c0_i32_1 = arith.constant 0 : i32
    return %c0_i32, %c0_i32_0 : i32, i32
  }
  func.func @transform_6(%arg0: i32) -> (i32, i32) {
    %c0_i32 = arith.constant 0 : i32
    %c0_i32_0 = arith.constant 0 : i32
    %c0_i32_1 = arith.constant 0 : i32
    return %c0_i32, %c0_i32_0 : i32, i32
  }
  func.func @transform_7(%arg0: i32) -> (i32, i32) {
    %c0_i32 = arith.constant 0 : i32
    %c0_i32_0 = arith.constant 0 : i32
    %c0_i32_1 = arith.constant 0 : i32
    return %c0_i32, %c0_i32_0 : i32, i32
  }
  func.func @transform_8(%arg0: i32) -> (i32, i32) {
    %c0_i32 = arith.constant 0 : i32
    %c0_i32_0 = arith.constant 0 : i32
    %c0_i32_1 = arith.constant 0 : i32
    return %c0_i32, %c0_i32_0 : i32, i32
  }
  func.func @transform_9(%arg0: i32) -> (i32, i32, i32) {
    %c0_i32 = arith.constant 0 : i32
    %c0_i32_0 = arith.constant 0 : i32
    %c0_i32_1 = arith.constant 0 : i32
    return %arg0, %c0_i32, %c0_i32_0 : i32, i32, i32
  }
}

</mosaic_0001>

<bundles_post_ra>
// kernel: conv3d_x1_forward.1
= control target key start
LH: loop header
LB: loop body
LE: loop exit
PB: predicated region body
PF: predicated region fallthrough
CT: control target
= control target key end

     0   :  { %s17725_s11 = smov 0   ;;  %s25515_s0 = inlined_call_operand.vmem [shape: f32[2,8,4096], index: 0, kind: input, shape index: {}]   ;;  %s25516_s1 = inlined_call_operand.vmem [shape: f32[9,4,24], index: 1, kind: input, shape index: {}]   ;;  %s25517_s2 = inlined_call_operand.vmem [shape: f32[4,1], index: 2, kind: input, shape index: {}]   ;;  %s25518_s3 = inlined_call_operand.vmem [shape: f32[9,4096], index: 3, kind: input, shape index: {}]   ;;  %s25519_s4 = inlined_call_operand.vmem [shape: f32[4,1], index: 4, kind: input, shape index: {}]   ;;  %s25520_s5 = inlined_call_operand.vmem [shape: f32[4,1], index: 5, kind: input, shape index: {}]   ;;  %s25521_s6 = inlined_call_operand.<no memory space> [shape: f32[1,1], index: 6, kind: input, shape index: {}]   ;;  %s25522_s7 = inlined_call_operand.vmem [shape: f32[4,8], index: 7, kind: input, shape index: {}]   ;;  %s25523_s8 = inlined_call_operand.vmem [shape: f32[4,1], index: 8, kind: input, shape index: {}]   ;;  %s25524_s9 = inlined_call_operand.vmem [shape: f32[2,4,4096], index: 9, kind: output, shape index: {}]  }
   0x1   :  { %v14_v0 = vstv %s25521_s6 }
   0x2   :  { %15 = vst [vmem:[#allocation3] sm:$0x1] %v14_v0 }
   0x3 LB: > { %s15834_s12 = sadd.s32 4294967295, %s17660_s11   ;;  %p15838_p0 = scmp.ge.s32.totalorder %s17660_s11, 1  ;;  %s17660_s11 = sphi %s17725_s11, %s21_s11  }
   0x4   : > { %p289_p1 = scmp.lt.s32.totalorder %s17660_s11, 3 }
   0x6   : > { %p290_p2 = pnand %p15838_p0, %p289_p1 }
   0x8   : > { %293 = sbr.rel (%p290_p2) target bundleno = 1743 (0x6cf), region = 56 }
   0xf   : > { %v533_v1 = vld [vmem:[%s25517_s2] sm:$0xf]  ;;  %p325_p3 = scmp.lt.s32.totalorder %s15834_s12, 1  ;;  %v17662_v2 = vmov 0   ;;  %v25526_v3 = vmov 0.0   ;;  %s17664_s18 = smov 17   ;;  %v25525_v57 = vlaneseq }
  0x10   : > { %16642 = vset.pattern.permute.xlu0 %v17662_v2  ;;  %881 = vmatprep.mubr.f32.mxu1 %v25526_v3  ;;  %s17665_s19 = smov 16   ;;  %vm742_vm1 = vcmask 195584   ;;  %s17666_s22 = smov 15   ;;  %vm14138_vm9 = vcmask 1043456   ;;  %vm14527_vm10 = vcmask 64512  }
  0x11   : > { %536 = vperm.xlu0 %16642, %v533_v1   ;;  %s26173_s12 = smov (!%p325_p3, %s15834_s12), 1  ;;  %810 = vmatprep.mubr.f32.mxu0 %v25526_v3  ;;  %v18031_v61 = vand.u32 127, %v25525_v57  ;;  %s17667_s25 = smov 1  }
  0x12   : > { %17353 = vset.pattern.permute.xlu1 %v17662_v2  ;;  %s16046_s6 = sshll.u32 %s26173_s12, 8  ;;  %s17668_s28 = smov 127  }
  0x13   : > { %s17744_s17 = scalar_lea.vmem %s25515_s0, %s16046_s6  ;;  %vm673_vm0 = vcmp.lt.s32.totalorder %v18031_v61, 17  ;;  %vm2206_vm2 = vcmp.lt.s32.totalorder %v18031_v61, 16  ;;  %vm3739_vm3 = vcmp.lt.s32.totalorder %v18031_v61, 15  ;;  %vm5272_vm4 = vcmp.lt.s32.totalorder %v18031_v61, 1  ;;  %s17669_s20 = smov 113  }
  0x14   : > { %v17747_v4 = vld [vmem:[%s17744_s17 + $0x10] sm:$0xff]  ;;  %v17750_v5 = vld [vmem:[%s17744_s17 + $0x8] sm:$0xff]  ;;  %v17757_v7 = vld [vmem:[%s17744_s17] sm:$0xff]  ;;  %vm8138_vm5 = vcmp.lt.s32.totalorder %v18031_v61, 127  ;;  %s17670_s10 = smov 112   ;;  %vm9671_vm6 = vcmp.lt.s32.totalorder %v18031_v61, 113 }
  0x15   : > { %543 = vrot.lane.b32.xlu1 %v17747_v4, %s17664_s18  ;;  %v16648_v6 = vpack.i.bf16 %v17750_v5, %v25526_v3  ;;  %v17760_v8 = vld [vmem:[%s17744_s17 + $0x18] sm:$0xff]  ;;  %v16643_v9 = vpack.i.bf16 %v17757_v7, %v25526_v3  ;;  %v17775_v11 = vld [vmem:[%s17744_s17 + $0x20] sm:$0xff]  ;;  %v17778_v12 = vld [vmem:[%s17744_s17 + $0x28] sm:$0xff]  ;;  %v17982_v54 = vpack.i.bf16 %v17750_v5, %v17757_v7  ;;  %s17671_s29 = smov 111   ;;  %vm11204_vm7 = vcmp.lt.s32.totalorder %v18031_v61, 112 }
  0x16   : > { %25640 = vst [vmem:[#allocation4_spill] sm:$0xff] %v17760_v8  ;;  %v17768_v10 = vpack.i.bf16 %v17760_v8, %v17747_v4  ;;  %v17784_v13 = vpack.i.bf16 %v17778_v12, %v17775_v11  ;;  %v17789_v14 = vld [vmem:[%s17744_s17 + $0x30] sm:$0xff]  ;;  %v17792_v15 = vld [vmem:[%s17744_s17 + $0x38] sm:$0xff]  ;;  %v17807_v17 = vld [vmem:[%s17744_s17 + $0x40] sm:$0xff]  ;;  %vm12737_vm8 = vcmp.lt.s32.totalorder %v18031_v61, 111 }
  0x17   : > { %16644 = vrot.lane.b32.xlu0 %v16643_v9, %s17664_s18  ;;  %25641 = vst [vmem:[#allocation5_spill] sm:$0xff] %v17789_v14  ;;  %25642 = vst [vmem:[#allocation6_spill] sm:$0xff] %v17792_v15  ;;  %v17800_v16 = vpack.i.bf16 %v17792_v15, %v17789_v14  ;;  %v17810_v18 = vld [vmem:[%s17744_s17 + $0x48] sm:$0xff]  ;;  %v17819_v20 = vld [vmem:[%s17744_s17 + $0x50] sm:$0xff]  ;;  %v18010_v55 = vpack.i.bf16 %v17807_v17, %v25526_v3 }
  0x18   : > { %25643 = vst [vmem:[#allocation7_spill] sm:$0xff] %v17807_v17  ;;  %v16668_v19 = vpack.i.bf16 %v17810_v18, %v17807_v17  ;;  %v17822_v21 = vld [vmem:[%s17744_s17 + $0x58] sm:$0xff]  ;;  %v17833_v23 = vld [vmem:[%s17744_s17 + $0x60] sm:$0xff]  ;;  %v17836_v24 = vld [vmem:[%s17744_s17 + $0x68] sm:$0xff]  ;;  %v18022_v59 = vpack.i.bf16 %v17819_v20, %v17810_v18 }
  0x19   : > { %16649 = vrot.lane.b32.xlu1 %v16648_v6, %s17664_s18  ;;  %25644 = vst [vmem:[#allocation8_spill] sm:$0xff] %v17822_v21  ;;  %v16673_v22 = vpack.i.bf16 %v17822_v21, %v17819_v20  ;;  %25645 = vst [vmem:[#allocation9_spill] sm:$0xff] %v17833_v23  ;;  %v16678_v25 = vpack.i.bf16 %v17836_v24, %v17833_v23  ;;  %v17845_v26 = vld [vmem:[%s17744_s17 + $0x70] sm:$0xff]  ;;  %v17848_v27 = vld [vmem:[%s17744_s17 + $0x78] sm:$0xff]  ;;  %v18028_v60 = vpack.i.bf16 %v17833_v23, %v17822_v21 }
  0x1a   : > { %25646 = vst [vmem:[#allocation10_spill] sm:$0xff] %v17836_v24  ;;  %v16683_v28 = vpack.i.bf16 %v17848_v27, %v17845_v26  ;;  %v17859_v29 = vld [vmem:[%s17744_s17 + $0x80] sm:$0xff]  ;;  %v17862_v30 = vld [vmem:[%s17744_s17 + $0x88] sm:$0xff]  ;;  %v17871_v32 = vld [vmem:[%s17744_s17 + $0x90] sm:$0xff] }
  0x1b   : > { %549 = vrot.lane.b32.xlu0 %v17760_v8, %s17664_s18  ;;  %25647 = vst [vmem:[#allocation11_spill] sm:$0xff] %v17862_v30  ;;  %v16688_v31 = vpack.i.bf16 %v17862_v30, %v17859_v29  ;;  %v17874_v33 = vld [vmem:[%s17744_s17 + $0xe8] sm:$0xff]  ;;  %v17877_v34 = vld [vmem:[%s17744_s17 + $0xf8] sm:$0xff]  ;;  %v16698_v37 = vpack.i.bf16 %v25526_v3, %v17871_v32  ;;  %v17896_v38 = vld [vmem:[%s17744_s17 + $0xa0] sm:$0xff] }
  0x1c   : > { %v17884_v35 = vpack.i.bf16 %v17877_v34, %v17874_v33  ;;  %v17887_v36 = vld [vmem:[%s17744_s17 + $0x98] sm:$0xff]  ;;  %v17906_v40 = vld [vmem:[%s17744_s17 + $0xa8] sm:$0xff]  ;;  %v17909_v41 = vld [vmem:[%s17744_s17 + $0xb0] sm:$0xff]  ;;  %25649 = vst [vmem:[#allocation13_spill] sm:$0xff] %v18022_v59 }
  0x1d   : > { %16654 = vrot.lane.b32.xlu1 %v17768_v10, %s17664_s18  ;;  %v17901_v39 = vpack.i.bf16 %v17896_v38, %v17887_v36  ;;  %v17917_v42 = vpack.i.bf16 %v17909_v41, %v17906_v40  ;;  %v17924_v43 = vld [vmem:[%s17744_s17 + $0xb8] sm:$0xff]  ;;  %v17927_v44 = vld [vmem:[%s17744_s17 + $0xc0] sm:$0xff]  ;;  %v17938_v46 = vld [vmem:[%s17744_s17 + $0xc8] sm:$0xff] }
  0x1e   : > { %v17933_v45 = vpack.i.bf16 %v17927_v44, %v17924_v43  ;;  %v17941_v47 = vld [vmem:[%s17744_s17 + $0xd0] sm:$0xff]  ;;  %v17952_v49 = vld [vmem:[%s17744_s17 + $0xd8] sm:$0xff]  ;;  %v17955_v50 = vld [vmem:[%s17744_s17 + $0xe0] sm:$0xff] }
  0x1f   : > { %553 = vrot.lane.b32.xlu0 %v17775_v11, %s17664_s18  ;;  %25648 = vst [vmem:[#allocation12_spill] sm:$0xff] %v17901_v39  ;;  %v17949_v48 = vpack.i.bf16 %v17941_v47, %v17938_v46  ;;  %v17961_v51 = vpack.i.bf16 %v17955_v50, %v17952_v49  ;;  %v17966_v52 = vld [vmem:[%s17744_s17 + $0xf0] sm:$0xff] }
  0x20   : > { %v17974_v53 = vpack.i.bf16 %v25526_v3, %v17966_v52 }
  0x21   : > { %557 = vrot.lane.b32.xlu1 %v17778_v12, %s17664_s18 }
  0x23   : > { %16659 = vrot.lane.b32.xlu0 %v17784_v13, %s17664_s18 }
  0x25   : > { %561 = vrot.lane.b32.xlu1 %v17789_v14, %s17664_s18 }
  0x27   : > { %565 = vrot.lane.b32.xlu0 %v17792_v15, %s17664_s18 }
  0x29   : > { %16664 = vrot.lane.b32.xlu1 %v17800_v16, %s17664_s18 }
  0x2b   : > { %569 = vrot.lane.b32.xlu0 %v17807_v17, %s17664_s18 }
  0x2d   : > { %573 = vrot.lane.b32.xlu1 %v17810_v18, %s17664_s18 }
  0x2f   : > { %16669 = vrot.lane.b32.xlu0 %v16668_v19, %s17664_s18 }
  0x31   : > { %577 = vrot.lane.b32.xlu1 %v17819_v20, %s17664_s18 }
  0x33   : > { %581 = vrot.lane.b32.xlu0 %v17822_v21, %s17664_s18 }
  0x35   : > { %16674 = vrot.lane.b32.xlu1 %v16673_v22, %s17664_s18 }
  0x37   : > { %585 = vrot.lane.b32.xlu0 %v17833_v23, %s17664_s18 }
  0x39   : > { %589 = vrot.lane.b32.xlu1 %v17836_v24, %s17664_s18 }
  0x3b   : > { %16679 = vrot.lane.b32.xlu0 %v16678_v25, %s17664_s18 }
  0x3d   : > { %593 = vrot.lane.b32.xlu1 %v17845_v26, %s17664_s18 }
  0x3f   : > { %597 = vrot.lane.b32.xlu0 %v17848_v27, %s17664_s18 }
  0x41   : > { %16684 = vrot.lane.b32.xlu1 %v16683_v28, %s17664_s18 }
  0x43   : > { %601 = vrot.lane.b32.xlu0 %v17859_v29, %s17664_s18 }
  0x45   : > { %605 = vrot.lane.b32.xlu1 %v17862_v30, %s17664_s18 }
  0x47   : > { %16689 = vrot.lane.b32.xlu0 %v16688_v31, %s17664_s18 }
  0x49   : > { %609 = vrot.lane.b32.xlu1 %v17871_v32, %s17664_s18 }
  0x4b   : > { %613 = vrot.lane.b32.xlu0 %v17887_v36, %s17664_s18 }
  0x4d   : > { %16694 = vrot.lane.b32.xlu1 %v17884_v35, %s17664_s18 }
  0x4f   : > { %16699 = vrot.lane.b32.xlu0 %v16698_v37, %s17664_s18 }
  0x51   : > { %617 = vrot.lane.b32.xlu1 %v17896_v38, %s17664_s18 }
  0x53   : > { %16704 = vrot.lane.b32.xlu0 %v17901_v39, %s17664_s18 }
  0x55   : > { %621 = vrot.lane.b32.xlu1 %v17906_v40, %s17664_s18 }
  0x57   : > { %625 = vrot.lane.b32.xlu0 %v17909_v41, %s17664_s18 }
  0x59   : > { %16709 = vrot.lane.b32.xlu1 %v17917_v42, %s17664_s18 }
  0x5b   : > { %629 = vrot.lane.b32.xlu0 %v17924_v43, %s17664_s18 }
  0x5d   : > { %633 = vrot.lane.b32.xlu1 %v17927_v44, %s17664_s18 }
  0x5f   : > { %16714 = vrot.lane.b32.xlu0 %v17933_v45, %s17664_s18 }
  0x61   : > { %637 = vrot.lane.b32.xlu1 %v17938_v46, %s17664_s18 }
  0x63   : > { %641 = vrot.lane.b32.xlu0 %v17941_v47, %s17664_s18 }
  0x65   : > { %16719 = vrot.lane.b32.xlu1 %v17949_v48, %s17664_s18 }
  0x67   : > { %16724 = vrot.lane.b32.xlu0 %v17961_v51, %s17664_s18 }
  0x69   : > { %649 = vrot.lane.b32.xlu1 %v17955_v50, %s17664_s18 }
  0x6b   : > { %653 = vrot.lane.b32.xlu0 %v17874_v33, %s17664_s18 }
  0x6d   : > { %16729 = vrot.lane.b32.xlu1 %v17974_v53, %s17664_s18 }
  0x6f   : > { %645 = vrot.lane.b32.xlu0 %v17952_v49, %s17664_s18 }
  0x71   : > { %16734 = vrot.lane.b32.xlu1 %v17982_v54, %s17665_s19 }
  0x73   : > { %16739 = vrot.lane.b32.xlu0 %v17768_v10, %s17665_s19 }
  0x75   : > { %657 = vrot.lane.b32.xlu1 %v17966_v52, %s17664_s18 }
  0x77   : > { %661 = vrot.lane.b32.xlu0 %v17877_v34, %s17664_s18 }
  0x79   : > { %16744 = vrot.lane.b32.xlu1 %v25526_v3, %s17665_s19 }
  0x7b   : > { %16749 = vrot.lane.b32.xlu0 %v17884_v35, %s17665_s19 }
  0x7d   : > { %2088 = vrot.lane.b32.xlu1 %v17775_v11, %s17665_s19 }
  0x7f   : > { %2092 = vrot.lane.b32.xlu0 %v17778_v12, %s17665_s19 }
  0x81   : > { %16754 = vrot.lane.b32.xlu1 %v17784_v13, %s17665_s19 }
  0x83   : > { %16759 = vrot.lane.b32.xlu0 %v17800_v16, %s17665_s19 }
  0x85   : > { %2078 = vrot.lane.b32.xlu1 %v17747_v4, %s17665_s19 }
  0x87   : > { %v18012_v56 = vpop.permute.xlu1 %543  ;;  %2084 = vrot.lane.b32.xlu0 %v17760_v8, %s17665_s19 }
  0x89   : > { %16764 = vrot.lane.b32.xlu1 %v18010_v55, %s17665_s19 }
  0x8b   : > { %v16650_v58 = vpop.permute.xlu1 %16649  ;;  %2104 = vrot.lane.b32.xlu0 %v17807_v17, %s17665_s19 }
  0x8c   : > { %v16652_v0 = vunpack.i.h.bf16 %v16650_v58  ;;  %v16651_v5 = vunpack.i.l.bf16 %v16650_v58 }
  0x8d   : > { %2108 = vrot.lane.b32.xlu1 %v17810_v18, %s17665_s19 }
  0x8f   : > { %v16655_v63 = vpop.permute.xlu1 %16654  ;;  %16769 = vrot.lane.b32.xlu0 %v18022_v59, %s17665_s19 }
  0x90   : > { %v18033_v62 = vpop.permute.xlu0 %536  ;;  %v16657_v1 = vunpack.i.h.bf16 %v16655_v63  ;;  %v16656_v2 = vunpack.i.l.bf16 %v16655_v63 }
  0x91   : > { %25650 = vst [vmem:[#allocation14_spill] sm:$0xff] %v18033_v62  ;;  %16774 = vrot.lane.b32.xlu1 %v18028_v60, %s17665_s19 }
  0x92   : > { %v18050_v22 = vsel %vm673_vm0, %v16656_v2, %v16657_v1  ;;  %v18054_v25 = vsel %vm673_vm0, %v16652_v0, %v16656_v2 }
  0x93   : > { %v18040_v6 = vpop.permute.xlu1 %557  ;;  %2096 = vrot.lane.b32.xlu0 %v17789_v14, %s17665_s19 }
  0x94   : > { %v18042_v7 = vpop.permute.xlu0 %16644 }
  0x95   : > { %v18045_v9 = vunpack.i.h.bf16 %v18042_v7  ;;  %v25528_v19 = vunpack.i.l.bf16 %v18042_v7  ;;  %2100 = vrot.lane.b32.xlu1 %v17792_v15, %s17665_s19 }
  0x97   : > { %v732_v28 = vsel %vm673_vm0, %v18045_v9, %v16652_v0  ;;  %v736_v31 = vsel %vm673_vm0, %v25528_v19, %v16651_v5  ;;  %v734_v37 = vsel %vm673_vm0, %v16651_v5, %v18045_v9  ;;  %v18070_v58 = vpop.permute.xlu1 %561  ;;  %2120 = vrot.lane.b32.xlu0 %v17833_v23, %s17665_s19  ;;  %v18080_v0 = vpack.i.bf16 %v17845_v26, %v17836_v24 }
  0x98   : > { %v18072_v63 = vpop.permute.xlu0 %549  ;;  %v16048_v2 = vpack.c.bf16 %v732_v28, %v736_v31  ;;  %v16052_v57 = vpack.c.bf16 %v18050_v22, %v732_v28  ;;  %v16054_v3 = vpack.c.bf16 %v18054_v25, %v734_v37  ;;  %v18086_v5 = vpack.i.bf16 %v17859_v29, %v17848_v27 }
  0x99   : > { %25651 = vst [vmem:[#allocation15_spill] sm:$0xff] %v18080_v0  ;;  %2124 = vrot.lane.b32.xlu1 %v17836_v24, %s17665_s19 }
  0x9a   : > { %16049 = vmatprep.subr.bf16.mxu0 %v16048_v2  ;;  %25652 = vst [vmem:[#allocation16_spill] sm:$0xff] %v18086_v5  ;;  %16053 = vmatprep.subr.bf16.mxu1 %v16052_v57 }
  0x9b   : > { %16055 = vmatpush1.bf16.msra.mxu1 %v16054_v3  ;;  %v16665_v28 = vpop.permute.xlu1 %16664  ;;  %16779 = vrot.lane.b32.xlu0 %v18080_v0, %s17665_s19  ;;  %v18101_v3 = vld [vmem:[%s25516_s1] sm:$0xf] }
  0x9c   : > { %v554_v31 = vpop.permute.xlu0 %553  ;;  %v16667_v37 = vunpack.i.h.bf16 %v16665_v28  ;;  %v16666_v19 = vunpack.i.l.bf16 %v16665_v28 }
  0x9d   : > { %v733_v62 = vsel %vm673_vm0, %v554_v31, %v18040_v6  ;;  %v735_v23 = vsel %vm673_vm0, %v18072_v63, %v554_v31  ;;  %16784 = vrot.lane.b32.xlu1 %v18086_v5, %s17665_s19 }
  0x9e   : > { %821 = vmatprep.subr.mxu1 %v733_v62  ;;  %v18109_v31 = vsel %vm673_vm0, %v16666_v19, %v16667_v37  ;;  %v25653_v62 = vmov 0.0  }
  0x9f   : > { %822 = vmatpush1.msra.mxu1 %v735_v23  ;;  %v18103_v57 = vpop.permute.xlu1 %573  ;;  %2112 = vrot.lane.b32.xlu0 %v17819_v20, %s17665_s19 }
  0xa0   : > { %v16660_v2 = vpop.permute.xlu0 %16659  ;;  %15844 = vmatmul.mubr.msk.f32.vlgmr.msra.gmra.mrb[0].mxu1 %vm742_vm1, %v18101_v3 }
  0xa1   : > { %v16662_v28 = vunpack.i.h.bf16 %v16660_v2  ;;  %v16661_v14 = vunpack.i.l.bf16 %v16660_v2  ;;  %2116 = vrot.lane.b32.xlu1 %v17822_v21, %s17665_s19  ;;  %1023 = vmatprep.mubr.f32.mxu1 %v25653_v62 }
  0xa3   : > { %v18118_v23 = vsel %vm673_vm0, %v16662_v28, %v16666_v19  ;;  %v18122_v2 = vsel %vm673_vm0, %v16657_v1, %v16661_v14  ;;  %v18126_v0 = vsel %vm673_vm0, %v16661_v14, %v16662_v28  ;;  %v18128_v5 = vpop.permute.xlu1 %577  ;;  %2136 = vrot.lane.b32.xlu0 %v17859_v29, %s17665_s19  ;;  %v16788_v1 = vpack.i.bf16 %v17871_v32, %v17862_v30 }
  0xa4   : > { %v18130_v20 = vpop.permute.xlu0 %565  ;;  %v16060_v21 = vpack.c.bf16 %v18109_v31, %v18126_v0  ;;  %v16062_v59 = vpack.c.bf16 %v18118_v23, %v18122_v2 }
  0xa5   : > { %2140 = vrot.lane.b32.xlu1 %v17862_v30, %s17665_s19 }
  0xa6   : > { %16061 = vmatprep.subr.bf16.mxu1 %v16060_v21 }
  0xa7   : > { %16063 = vmatpush1.bf16.msra.mxu1 %v16062_v59  ;;  %v16675_v14 = vpop.permute.xlu1 %16674  ;;  %16789 = vrot.lane.b32.xlu0 %v16788_v1, %s17665_s19 }
  0xa8   : > { %v570_v19 = vpop.permute.xlu0 %569  ;;  %v16677_v28 = vunpack.i.h.bf16 %v16675_v14  ;;  %v16676_v24 = vunpack.i.l.bf16 %v16675_v14 }
  0xa9   : > { %v725_v17 = vsel %vm673_vm0, %v570_v19, %v18103_v57  ;;  %v727_v29 = vsel %vm673_vm0, %v18130_v20, %v570_v19  ;;  %16794 = vrot.lane.b32.xlu1 %v17901_v39, %s17665_s19 }
  0xaa   : > { %963 = vmatprep.subr.mxu1 %v725_v17  ;;  %v18157_v15 = vsel %vm673_vm0, %v16676_v24, %v16677_v28 }
  0xab   : > { %964 = vmatpush1.msra.mxu1 %v727_v29  ;;  %v18151_v21 = vpop.permute.xlu1 %589  ;;  %2128 = vrot.lane.b32.xlu0 %v17845_v26, %s17665_s19 }
  0xac   : > { %v16670_v59 = vpop.permute.xlu0 %16669  ;;  %15846 = vmatmul.mubr.msk.f32.vlgmr.msra.gmra.mrb[2].mxu1 %vm742_vm1, %v18101_v3 }
  0xad   : > { %v16672_v14 = vunpack.i.h.bf16 %v16670_v59  ;;  %v16671_v30 = vunpack.i.l.bf16 %v16670_v59  ;;  %1165 = vmatprep.mubr.f32.mxu1 %v25653_v62  ;;  %2132 = vrot.lane.b32.xlu1 %v17848_v27, %s17665_s19 }
  0xaf   : > { %v18166_v17 = vsel %vm673_vm0, %v16672_v14, %v16676_v24  ;;  %v18170_v1 = vsel %vm673_vm0, %v16667_v37, %v16671_v30  ;;  %v18174_v19 = vsel %vm673_vm0, %v16671_v30, %v16672_v14  ;;  %v18176_v29 = vpop.permute.xlu1 %593  ;;  %2152 = vrot.lane.b32.xlu0 %v17896_v38, %s17665_s19 }
  0xb0   : > { %v18178_v26 = vpop.permute.xlu0 %581  ;;  %v16068_v59 = vpack.c.bf16 %v18157_v15, %v18174_v19  ;;  %v16070_v27 = vpack.c.bf16 %v18166_v17, %v18170_v1 }
  0xb1   : > { %2156 = vrot.lane.b32.xlu1 %v17906_v40, %s17665_s19 }
  0xb2   : > { %16069 = vmatprep.subr.bf16.mxu1 %v16068_v59 }
  0xb3   : > { %16071 = vmatpush1.bf16.msra.mxu1 %v16070_v27  ;;  %v18188_v24 = vpop.permute.xlu1 %16684  ;;  %16799 = vrot.lane.b32.xlu0 %v17917_v42, %s17665_s19 }
  0xb4   : > { %v586_v30 = vpop.permute.xlu0 %585  ;;  %v16686_v14 = vunpack.i.l.bf16 %v18188_v24  ;;  %v25654_v8 = vunpack.i.h.bf16 %v18188_v24 }
  0xb5   : > { %v717_v39 = vsel %vm673_vm0, %v586_v30, %v18151_v21  ;;  %v719_v38 = vsel %vm673_vm0, %v18178_v26, %v586_v30  ;;  %16804 = vrot.lane.b32.xlu1 %v17933_v45, %s17665_s19 }
  0xb6   : > { %1105 = vmatprep.subr.mxu1 %v717_v39  ;;  %v18210_v30 = vsel %vm673_vm0, %v16686_v14, %v25654_v8 }
  0xb7   : > { %1106 = vmatpush1.msra.mxu1 %v719_v38  ;;  %v18202_v40 = vpop.permute.xlu1 %605  ;;  %2144 = vrot.lane.b32.xlu0 %v17871_v32, %s17665_s19 }
  0xb8   : > { %v16680_v59 = vpop.permute.xlu0 %16679  ;;  %15848 = vmatmul.mubr.msk.f32.vlgmr.msra.gmra.mrb[4].mxu1 %vm742_vm1, %v18101_v3 }
  0xb9   : > { %v16682_v27 = vunpack.i.h.bf16 %v16680_v59  ;;  %v16681_v37 = vunpack.i.l.bf16 %v16680_v59  ;;  %1307 = vmatprep.mubr.f32.mxu1 %v25653_v62  ;;  %2148 = vrot.lane.b32.xlu1 %v17887_v36, %s17665_s19 }
  0xbb   : > { %v18219_v39 = vsel %vm673_vm0, %v16682_v27, %v16686_v14  ;;  %v18223_v42 = vsel %vm673_vm0, %v16677_v28, %v16681_v37  ;;  %v18227_v8 = vsel %vm673_vm0, %v16681_v37, %v16682_v27  ;;  %v18229_v45 = vpop.permute.xlu1 %609  ;;  %2168 = vrot.lane.b32.xlu0 %v17927_v44, %s17665_s19 }
  0xbc   : > { %v18231_v32 = vpop.permute.xlu0 %597  ;;  %v16076_v38 = vpack.c.bf16 %v18210_v30, %v18227_v8  ;;  %v16078_v36 = vpack.c.bf16 %v18219_v39, %v18223_v42 }
  0xbd   : > { %2172 = vrot.lane.b32.xlu1 %v17938_v46, %s17665_s19  ;;  %v25655_v46 = vunpack.i.l.bf16 %v18042_v7  ;;  %v737_v7 = vsel %vm673_vm0, %v18012_v56, %v18072_v63  ;;  %v16056_v63 = vpack.c.bf16 %v18126_v0, %v18050_v22 }
  0xbe   : > { %16077 = vmatprep.subr.bf16.mxu1 %v16076_v38 }
  0xbf   : > { %16079 = vmatpush1.bf16.msra.mxu1 %v16078_v36  ;;  %v18241_v28 = vpop.permute.xlu1 %16694  ;;  %16809 = vrot.lane.b32.xlu0 %v17949_v48, %s17665_s19 }
  0xc0   : > { %v602_v37 = vpop.permute.xlu0 %601  ;;  %v16697_v14 = vunpack.i.h.bf16 %v18241_v28  ;;  %v18245_v59 = vunpack.i.l.bf16 %v18241_v28 }
  0xc1   : > { %v709_v27 = vsel %vm673_vm0, %v602_v37, %v18202_v40  ;;  %v711_v44 = vsel %vm673_vm0, %v18231_v32, %v602_v37  ;;  %16814 = vrot.lane.b32.xlu1 %v17961_v51, %s17665_s19 }
  0xc2   : > { %1247 = vmatprep.subr.mxu1 %v709_v27  ;;  %v738_v38 = vsel %vm673_vm0, %v18245_v59, %v25655_v46  ;;  %v739_v36 = vsel %vm673_vm0, %v16697_v14, %v18045_v9 }
  0xc3   : > { %1248 = vmatpush1.msra.mxu1 %v711_v44  ;;  %v18267_v37 = vpop.permute.xlu1 %617  ;;  %v16050_v51 = vpack.c.bf16 %v739_v36, %v738_v38  ;;  %2160 = vrot.lane.b32.xlu0 %v17909_v41, %s17665_s19 }
  0xc4   : > { %v16690_v48 = vpop.permute.xlu0 %16689  ;;  %15850 = vmatmul.mubr.msk.f32.vlgmr.msra.gmra.mrb[6].mxu1 %vm742_vm1, %v18101_v3 }
  0xc5   : > { %1449 = vmatprep.mubr.f32.mxu1 %v25653_v62  ;;  %2164 = vrot.lane.b32.xlu1 %v17924_v43, %s17665_s19  ;;  %v16692_v46 = vunpack.i.h.bf16 %v16690_v48 }
  0xc6   : > { %16051 = vmatpush1.bf16.msra.mxu0 %v16050_v51 }
  0xc7   : > { %750 = vmatprep.subr.mxu0 %v737_v7  ;;  %v18280_v9 = vpop.permute.xlu1 %621  ;;  %2184 = vrot.lane.b32.xlu0 %v17955_v50, %s17665_s19  ;;  %v16691_v50 = vunpack.i.l.bf16 %v16690_v48  ;;  %v25656_v48 = vunpack.i.h.bf16 %v18188_v24  ;;  %v16066_v24 = vpack.c.bf16 %v18170_v1, %v18118_v23 }
  0xc8   : > { %v18282_v27 = vpop.permute.xlu0 %613 }
  0xc9   : > { %2188 = vrot.lane.b32.xlu1 %v17874_v33, %s17665_s19  ;;  %v18345_v7 = vsel %vm673_vm0, %v25656_v48, %v16691_v50 }
  0xcb   : > { %v18288_v41 = vpop.permute.xlu1 %16709  ;;  %16819 = vrot.lane.b32.xlu0 %v17974_v53, %s17665_s19 }
  0xcc   : > { %v18290_v43 = vpop.permute.xlu0 %16699  ;;  %v16711_v23 = vunpack.i.l.bf16 %v18288_v41 }
  0xcd   : > { %v16702_v44 = vunpack.i.h.bf16 %v18290_v43  ;;  %2176 = vrot.lane.b32.xlu1 %v17941_v47, %s17665_s19  ;;  %v16701_v38 = vunpack.i.l.bf16 %v18290_v43  ;;  %v16058_v47 = vpack.c.bf16 %v18122_v2, %v18054_v25 }
  0xcf   : > { %v740_v33 = vsel %vm673_vm0, %v16702_v44, %v18012_v56  ;;  %v18305_v36 = vpop.permute.xlu1 %633  ;;  %v729_v56 = vsel %vm673_vm0, %v18070_v58, %v18130_v20  ;;  %v18322_v22 = vsel %vm673_vm0, %v16692_v46, %v16701_v38  ;;  %2180 = vrot.lane.b32.xlu0 %v17952_v49, %s17665_s19 }
  0xd0   : > { %v18307_v51 = vpop.permute.xlu0 %16704  ;;  %751 = vmatpush1.msra.mxu0 %v740_v33  ;;  %v16086_v49 = vpack.c.bf16 %v18322_v22, %v18345_v7  ;;  %v723_v33 = vsel %vm673_vm0, %v18103_v57, %v18128_v5 }
  0xd1   : > { %v16706_v53 = vunpack.i.l.bf16 %v18307_v51  ;;  %15843 = vmatmul.mubr.msk.f32.vlgmr.msra.gmra.mrb[0].mxu0 %vm742_vm1, %v18101_v3  ;;  %16057 = vmatprep.subr.bf16.mxu0 %v16056_v63  ;;  %v731_v63 = vsel %vm673_vm0, %v18040_v6, %v18070_v58  ;;  %v16707_v1 = vunpack.i.h.bf16 %v18307_v51  ;;  %v16072_v51 = vpack.c.bf16 %v18227_v8, %v18157_v15 }
  0xd2   : > { %16824 = vrot.lane.b32.xlu1 %v17982_v54, %s17666_s22  ;;  %16059 = vmatpush1.bf16.msra.mxu0 %v16058_v47  ;;  %v18331_v54 = vsel %vm673_vm0, %v16691_v50, %v16692_v46  ;;  %v16064_v46 = vpack.c.bf16 %v18174_v19, %v18109_v31  ;;  %v721_v31 = vsel %vm673_vm0, %v18128_v5, %v18178_v26  ;;  %v16712_v26 = vunpack.i.h.bf16 %v18288_v41 }
  0xd3   : > { %892 = vmatprep.subr.mxu0 %v729_v56  ;;  %952 = vmatprep.mubr.f32.mxu0 %v25653_v62  ;;  %v18327_v25 = vsel %vm673_vm0, %v16701_v38, %v16706_v53  ;;  %v18333_v0 = vpop.permute.xlu1 %637  ;;  %v703_v19 = vsel %vm673_vm0, %v18282_v27, %v18267_v37  ;;  %v713_v15 = vsel %vm673_vm0, %v18176_v29, %v18231_v32 }
  0xd4   : > { %v18335_v2 = vpop.permute.xlu0 %625  ;;  %v16084_v20 = vpack.c.bf16 %v18327_v25, %v18331_v54  ;;  %16829 = vrot.lane.b32.xlu0 %v17768_v10, %s17666_s22  ;;  %v16074_v10 = vpack.c.bf16 %v18223_v42, %v18166_v17  ;;  %v692_v57 = vsel %vm673_vm0, %v16707_v1, %v16711_v23  ;;  %v18413_v17 = vsel %vm673_vm0, %v16711_v23, %v16712_v26 }
  0xd5   : > { %v715_v41 = vsel %vm673_vm0, %v18151_v21, %v18176_v29  ;;  %v16080_v47 = vpack.c.bf16 %v18331_v54, %v18210_v30  ;;  %v705_v54 = vsel %vm673_vm0, %v18229_v45, %v18282_v27 }
  0xd6   : > { %2192 = vrot.lane.b32.xlu1 %v17966_v52, %s17665_s19  ;;  %893 = vmatpush1.msra.mxu0 %v731_v63  ;;  %v701_v52 = vsel %vm673_vm0, %v18267_v37, %v18280_v9 }
  0xd7   : > { %16085 = vmatprep.subr.bf16.mxu1 %v16084_v20  ;;  %15845 = vmatmul.mubr.msk.f32.vlgmr.msra.gmra.mrb[2].mxu0 %vm742_vm1, %v18101_v3  ;;  %v18361_v6 = vpop.permute.xlu1 %16719 }
  0xd8   : > { %16065 = vmatprep.subr.bf16.mxu0 %v16064_v46  ;;  %16087 = vmatpush1.bf16.msra.mxu1 %v16086_v49  ;;  %v18363_v58 = vpop.permute.xlu0 %629  ;;  %v16721_v56 = vunpack.i.l.bf16 %v18361_v6  ;;  %v16722_v30 = vunpack.i.h.bf16 %v18361_v6 }
  0xd9   : > { %16067 = vmatpush1.bf16.msra.mxu0 %v16066_v24  ;;  %1389 = vmatprep.subr.mxu1 %v701_v52 }
  0xda   : > { %1034 = vmatprep.subr.mxu0 %v721_v31  ;;  %16834 = vrot.lane.b32.xlu1 %v25653_v62, %s17666_s22  ;;  %v18477_v49 = vsel %vm673_vm0, %v16721_v56, %v16722_v30 }
  0xdb   : > { %1094 = vmatprep.mubr.f32.mxu0 %v25653_v62  ;;  %v18385_v50 = vpop.permute.xlu1 %649  ;;  %2196 = vrot.lane.b32.xlu0 %v17877_v34, %s17665_s19 }
  0xdc   : > { %1390 = vmatpush1.msra.mxu1 %v703_v19  ;;  %v16715_v38 = vpop.permute.xlu0 %16714 }
  0xdd   : > { %v16716_v37 = vunpack.i.l.bf16 %v16715_v38  ;;  %1035 = vmatpush1.msra.mxu0 %v723_v33  ;;  %15852 = vmatmul.mubr.msk.f32.vlgmr.msra.gmra.mrb[8].mxu1 %vm742_vm1, %v18101_v3  ;;  %v16717_v20 = vunpack.i.h.bf16 %v16715_v38 }
  0xde   : > { %15847 = vmatmul.mubr.msk.f32.vlgmr.msra.gmra.mrb[4].mxu0 %vm742_vm1, %v18101_v3  ;;  %16073 = vmatprep.subr.bf16.mxu0 %v16072_v51 }
  0xdf   : > { %3621 = vrot.lane.b32.xlu1 %v17775_v11, %s17666_s22  ;;  %16075 = vmatpush1.bf16.msra.mxu0 %v16074_v10  ;;  %v18407_v5 = vsel %vm673_vm0, %v16712_v26, %v16716_v37  ;;  %v694_v11 = vsel %vm673_vm0, %v16706_v53, %v16707_v1  ;;  %v18417_v42 = vpop.permute.xlu1 %16729  ;;  %v16082_v53 = vpack.c.bf16 %v18345_v7, %v18219_v39 }
  0xe0   : > { %1176 = vmatprep.subr.mxu0 %v713_v15  ;;  %v18419_v8 = vpop.permute.xlu0 %641  ;;  %v16092_v32 = vpack.c.bf16 %v18407_v5, %v692_v57  ;;  %1236 = vmatprep.mubr.f32.mxu0 %v25653_v62  ;;  %v16094_v34 = vpack.c.bf16 %v18413_v17, %v694_v11  ;;  %v693_v39 = vsel %vm673_vm0, %v18305_v36, %v18333_v0  ;;  %v16732_v19 = vunpack.i.h.bf16 %v18417_v42 }
  0xe1   : > { %1591 = vmatprep.mubr.f32.mxu1 %v25653_v62  ;;  %16839 = vrot.lane.b32.xlu0 %v17884_v35, %s17666_s22  ;;  %v695_v7 = vsel %vm673_vm0, %v18363_v58, %v18305_v36  ;;  %v16088_v35 = vpack.c.bf16 %v692_v57, %v18327_v25  ;;  %v684_v46 = vsel %vm673_vm0, %v16717_v20, %v16721_v56  ;;  %v25658_v56 = vld [vmem:[#allocation6_spill] sm:$0xff] }
  0xe2   : > { %16093 = vmatprep.subr.bf16.mxu1 %v16092_v32  ;;  %v686_v36 = vsel %vm673_vm0, %v16716_v37, %v16717_v20  ;;  %v697_v25 = vsel %vm673_vm0, %v18335_v2, %v18363_v58  ;;  %v16096_v58 = vpack.c.bf16 %v684_v46, %v18407_v5  ;;  %v676_v5 = vsel %vm673_vm0, %v16732_v19, %v16702_v44 }
  0xe3   : > { %16844 = vrot.lane.b32.xlu1 %v17784_v13, %s17666_s22  ;;  %1177 = vmatpush1.msra.mxu0 %v715_v41  ;;  %v18440_v21 = vpop.permute.xlu1 %16734  ;;  %v16102_v6 = vpack.c.bf16 %v18477_v49, %v686_v36  ;;  %v16098_v38 = vpack.c.bf16 %v686_v36, %v18413_v17 }
  0xe4   : > { %15849 = vmatmul.mubr.msk.f32.vlgmr.msra.gmra.mrb[6].mxu0 %vm742_vm1, %v18101_v3  ;;  %16081 = vmatprep.subr.bf16.mxu0 %v16080_v47  ;;  %v16725_v29 = vpop.permute.xlu0 %16724  ;;  %v16737_v37 = vunpack.i.h.bf16 %v18440_v21  ;;  %v16736_v10 = vunpack.i.l.bf16 %v18440_v21 }
  0xe5   : > { %16095 = vmatpush1.bf16.msra.mxu1 %v16094_v34  ;;  %v16726_v13 = vunpack.i.l.bf16 %v16725_v29  ;;  %16083 = vmatpush1.bf16.msra.mxu0 %v16082_v53 }
  0xe6   : > { %1531 = vmatprep.subr.mxu1 %v693_v39  ;;  %1318 = vmatprep.subr.mxu0 %v705_v54  ;;  %v2265_v41 = vsel %vm2206_vm2, %v16736_v10, %v16737_v37 }
  0xe7   : > { %3611 = vrot.lane.b32.xlu1 %v17747_v4, %s17666_s22  ;;  %v18457_v48 = vsel %vm673_vm0, %v16722_v30, %v16726_v13  ;;  %v18463_v63 = vpop.permute.xlu1 %657  ;;  %v707_v4 = vsel %vm673_vm0, %v18202_v40, %v18229_v45  ;;  %1378 = vmatprep.mubr.f32.mxu0 %v25653_v62  ;;  %v16090_v40 = vpack.c.bf16 %v694_v11, %v18322_v22  ;;  %v16727_v45 = vunpack.i.h.bf16 %v16725_v29  ;;  %v25659_v30 = vld [vmem:[#allocation7_spill] sm:$0xff] }
  0xe8   : > { %v18465_v27 = vpop.permute.xlu0 %653  ;;  %v16100_v24 = vpack.c.bf16 %v18457_v48, %v684_v46  ;;  %3625 = vrot.lane.b32.xlu0 %v17778_v12, %s17666_s22  ;;  %v16731_v22 = vunpack.i.l.bf16 %v18417_v42  ;;  %v25657_v42 = vld [vmem:[#allocation4_spill] sm:$0xff]  ;;  %v25660_v46 = vld [vmem:[#allocation10_spill] sm:$0xff] }
  0xe9   : > { %1532 = vmatpush1.msra.mxu1 %v695_v7  ;;  %1319 = vmatpush1.msra.mxu0 %v707_v4  ;;  %v685_v12 = vsel %vm673_vm0, %v18385_v50, %v18465_v27  ;;  %v674_v1 = vsel %vm673_vm0, %v16727_v45, %v18245_v59  ;;  %v683_v7 = vsel %vm673_vm0, %v18465_v27, %v18463_v63 }
  0xea   : > { %15854 = vmatmul.mubr.msk.f32.vlgmr.msra.gmra.mrb[10].mxu1 %vm742_vm1, %v18101_v3  ;;  %15851 = vmatmul.mubr.msk.f32.vlgmr.msra.gmra.mrb[8].mxu0 %vm742_vm1, %v18101_v3  ;;  %v678_v33 = vsel %vm673_vm0, %v18245_v59, %v16731_v22  ;;  %v16104_v43 = vpack.c.bf16 %v674_v1, %v18457_v48 }
  0xeb   : > { %16089 = vmatprep.subr.bf16.mxu0 %v16088_v35  ;;  %16854 = vrot.lane.b32.xlu1 %v18010_v55, %s17666_s22  ;;  %v18496_v52 = vpop.permute.xlu1 %16744  ;;  %v699_v55 = vsel %vm673_vm0, %v18280_v9, %v18335_v2  ;;  %v677_v9 = vsel %vm673_vm0, %v16726_v13, %v16727_v45 }
  0xec   : > { %16091 = vmatpush1.bf16.msra.mxu0 %v16090_v40  ;;  %v646_v31 = vpop.permute.xlu0 %645  ;;  %16101 = vmatprep.subr.bf16.mxu1 %v16100_v24  ;;  %v16747_v17 = vunpack.i.h.bf16 %v18496_v52  ;;  %v16746_v11 = vunpack.i.l.bf16 %v18496_v52  ;;  %v16106_v44 = vpack.c.bf16 %v677_v9, %v18477_v49  ;;  %v25661_v40 = vld [vmem:[#allocation13_spill] sm:$0xff] }
  0xed   : > { %1460 = vmatprep.subr.mxu0 %v697_v25  ;;  %16103 = vmatpush1.bf16.msra.mxu1 %v16102_v6  ;;  %v687_v23 = vsel %vm673_vm0, %v646_v31, %v18385_v50  ;;  %v689_v28 = vsel %vm673_vm0, %v18419_v8, %v646_v31  ;;  %v25662_v6 = vld [vmem:[#allocation16_spill] sm:$0xff] }
  0xee   : > { %1520 = vmatprep.mubr.f32.mxu0 %v25653_v62  ;;  %1673 = vmatprep.subr.mxu1 %v685_v12  ;;  %v2267_v29 = vsel %vm2206_vm2, %v16747_v17, %v16736_v10  ;;  %v2269_v13 = vsel %vm2206_vm2, %v16746_v11, %v16747_v17  ;;  %v25663_v12 = vld [vmem:[#allocation5_spill] sm:$0xff] }
  0xef   : > { %3641 = vrot.lane.b32.xlu1 %v17810_v18, %s17666_s22  ;;  %16849 = vrot.lane.b32.xlu0 %v17800_v16, %s17666_s22  ;;  %v18522_v18 = vpop.permute.xlu1 %2088  ;;  %v675_v16 = vsel %vm673_vm0, %v16731_v22, %v16697_v14  ;;  %v16110_v14 = vpack.c.bf16 %v678_v33, %v677_v9  ;;  %v16112_v49 = vpack.c.bf16 %v2265_v41, %v2269_v13  ;;  %v18726_v13 = vld [vmem:[%s17744_s17 + $0x78] sm:$0xff] }
  0xf0   : > { %1461 = vmatpush1.msra.mxu0 %v699_v55  ;;  %v18524_v2 = vpop.permute.xlu0 %16739  ;;  %1733 = vmatprep.mubr.f32.mxu1 %v25653_v62  ;;  %v16108_v51 = vpack.c.bf16 %v675_v16, %v674_v1 }
  0xf1   : > { %15853 = vmatmul.mubr.msk.f32.vlgmr.msra.gmra.mrb[10].mxu0 %vm742_vm1, %v18101_v3  ;;  %16097 = vmatprep.subr.bf16.mxu0 %v16096_v58  ;;  %v16742_v26 = vunpack.i.h.bf16 %v18524_v2  ;;  %v16741_v50 = vunpack.i.l.bf16 %v18524_v2 }
  0xf2   : > { %1674 = vmatpush1.msra.mxu1 %v687_v23  ;;  %16099 = vmatpush1.bf16.msra.mxu0 %v16098_v38  ;;  %v18660_v38 = vld [vmem:[%s25516_s1 + $0x4] sm:$0xf] }
  0xf3   : > { %15856 = vmatmul.mubr.msk.f32.vlgmr.msra.gmra.mrb[12].mxu1 %vm742_vm1, %v18101_v3  ;;  %16109 = vmatprep.subr.bf16.mxu1 %v16108_v51  ;;  %v18547_v59 = vpop.permute.xlu1 %16754  ;;  %v18559_v57 = vsel %vm2206_vm2, %v16741_v50, %v16742_v26  ;;  %v18578_v47 = vsel %vm2206_vm2, %v16737_v37, %v16741_v50  ;;  %v25665_v51 = vld [vmem:[#allocation9_spill] sm:$0xff] }
  0xf4   : > { %1602 = vmatprep.subr.mxu0 %v689_v28  ;;  %v662_v15 = vpop.permute.xlu0 %661  ;;  %16111 = vmatpush1.bf16.msra.mxu1 %v16110_v14  ;;  %v16118_v48 = vpack.c.bf16 %v18578_v47, %v2267_v29  ;;  %v16756_v27 = vunpack.i.l.bf16 %v18547_v59 }
  0xf5   : > { %16864 = vrot.lane.b32.xlu1 %v18028_v60, %s17666_s22  ;;  %3617 = vrot.lane.b32.xlu0 %v25657_v42, %s17666_s22  ;;  %v691_v60 = vsel %vm673_vm0, %v18333_v0, %v18419_v8  ;;  %v679_v32 = vsel %vm673_vm0, %v662_v15, %v16732_v19  ;;  %v681_v0 = vsel %vm673_vm0, %v18463_v63, %v662_v15  ;;  %v16757_v63 = vunpack.i.h.bf16 %v18547_v59  ;;  %v25664_v19 = vld [vmem:[#allocation8_spill] sm:$0xff]  ;;  %v25667_v15 = vld [vmem:[#allocation15_spill] sm:$0xff] }
  0xf6   : > { %1815 = vmatprep.subr.mxu1 %v676_v5  ;;  %1603 = vmatpush1.msra.mxu0 %v691_v60  ;;  %v16116_v8 = vpack.c.bf16 %v18559_v57, %v2265_v41  ;;  %v2259_v16 = vsel %vm2206_vm2, %v16742_v26, %v16756_v27  ;;  %v25668_v42 = vld [vmem:[#allocation12_spill] sm:$0xff] }
  0xf7   : > { %1662 = vmatprep.mubr.f32.mxu0 %v25653_v62  ;;  %16105 = vmatprep.subr.bf16.mxu0 %v16104_v43  ;;  %v2079_v34 = vpop.permute.xlu1 %2078  ;;  %v2257_v55 = vsel %vm2206_vm2, %v16756_v27, %v16757_v63  ;;  %v16122_v14 = vpack.c.bf16 %v2259_v16, %v18578_v47  ;;  %v18761_v27 = vld [vmem:[%s17744_s17 + $0xb8] sm:$0xff] }
  0xf8   : > { %15855 = vmatmul.mubr.msk.f32.vlgmr.msra.gmra.mrb[12].mxu0 %vm742_vm1, %v18101_v3  ;;  %v18586_v53 = vpop.permute.xlu0 %16749  ;;  %1816 = vmatpush1.msra.mxu1 %v679_v32  ;;  %v16120_v37 = vpack.c.bf16 %v2257_v55, %v18559_v57 }
  0xf9   : > { %3633 = vrot.lane.b32.xlu1 %v25658_v56, %s17666_s22  ;;  %16107 = vmatpush1.bf16.msra.mxu0 %v16106_v44  ;;  %v16752_v20 = vunpack.i.h.bf16 %v18586_v53  ;;  %v18592_v21 = vunpack.i.l.bf16 %v18586_v53  ;;  %v18699_v44 = vld [vmem:[%s17744_s17 + $0x50] sm:$0xff] }
  0xfa   : > { %3637 = vrot.lane.b32.xlu0 %v25659_v30, %s17666_s22  ;;  %1875 = vmatprep.mubr.f32.mxu1 %v25653_v62 }
  0xfb   : > { %1744 = vmatprep.subr.mxu0 %v681_v0  ;;  %v2272_v39 = vsel %vm2206_vm2, %v16752_v20, %v16736_v10  ;;  %v2271_v54 = vsel %vm2206_vm2, %v18592_v21, %v16746_v11  ;;  %15858 = vmatmul.mubr.msk.f32.vlgmr.msra.gmra.mrb[14].mxu1 %vm742_vm1, %v18101_v3  ;;  %v18615_v4 = vpop.permute.xlu1 %16764  ;;  %v25666_v10 = vld [vmem:[#allocation11_spill] sm:$0xff] }
  0xfc   : > { %16117 = vmatprep.subr.bf16.mxu1 %v16116_v8  ;;  %v18617_v35 = vpop.permute.xlu0 %2092  ;;  %v16114_v36 = vpack.c.bf16 %v2272_v39, %v2271_v54  ;;  %1804 = vmatprep.mubr.f32.mxu0 %v25653_v62  ;;  %v25542_v22 = vunpack.i.l.bf16 %v18615_v4  ;;  %v16767_v5 = vunpack.i.h.bf16 %v18615_v4 }
  0xfd   : > { %16119 = vmatpush1.bf16.msra.mxu1 %v16118_v48  ;;  %3657 = vrot.lane.b32.xlu1 %v25660_v46, %s17666_s22  ;;  %v2266_v24 = vsel %vm2206_vm2, %v18522_v18, %v18617_v35  ;;  %v18737_v48 = vld [vmem:[%s17744_s17 + $0x80] sm:$0xff]  ;;  %v18745_v46 = vld [vmem:[%s17744_s17 + $0x90] sm:$0xff] }
  0xfe   : > { %16859 = vrot.lane.b32.xlu0 %v25661_v40, %s17666_s22  ;;  %1745 = vmatpush1.msra.mxu0 %v683_v7  ;;  %v18742_v7 = vld [vmem:[%s17744_s17 + $0x88] sm:$0xff] }
  0xff   : > { %16113 = vmatprep.subr.bf16.mxu0 %v16112_v49  ;;  %15857 = vmatmul.mubr.msk.f32.vlgmr.msra.gmra.mrb[14].mxu0 %vm742_vm1, %v18101_v3  ;;  %v18632_v45 = vpop.permute.xlu1 %2108  ;;  %v18749_v49 = vpack.i.bf16 %v18745_v46, %v18742_v7 }
 0x100   : > { %2354 = vmatprep.subr.mxu1 %v2266_v24  ;;  %v16760_v25 = vpop.permute.xlu0 %16759  ;;  %16115 = vmatpush1.bf16.msra.mxu0 %v16114_v36 }
 0x101   : > { %16874 = vrot.lane.b32.xlu1 %v25662_v6, %s17666_s22  ;;  %v16762_v52 = vunpack.i.h.bf16 %v16760_v25  ;;  %v16761_v31 = vunpack.i.l.bf16 %v16760_v25  ;;  %2414 = vmatprep.mubr.f32.mxu1 %v25653_v62  ;;  %v18764_v25 = vld [vmem:[%s17744_s17 + $0xc0] sm:$0xff] }
 0x102   : > { %3629 = vrot.lane.b32.xlu0 %v25663_v12, %s17666_s22  ;;  %2343 = vmatprep.mubr.f32.mxu0 %v25653_v62  ;;  %v18768_v6 = vpack.i.bf16 %v18764_v25, %v18761_v27 }
 0x103   : > { %v18643_v3 = vsel %vm2206_vm2, %v16761_v31, %v16762_v52  ;;  %v18647_v58 = vpop.permute.xlu1 %16774  ;;  %v18668_v33 = vsel %vm2206_vm2, %v16757_v63, %v16761_v31  ;;  %v2251_v41 = vsel %vm2206_vm2, %v16762_v52, %v16767_v5  ;;  %v18756_v63 = vld [vmem:[%s17744_s17 + $0xa8] sm:$0xff] }
 0x104   : > { %v2085_v23 = vpop.permute.xlu0 %2084  ;;  %v16124_v1 = vpack.c.bf16 %v18643_v3, %v2257_v55  ;;  %v16126_v28 = vpack.c.bf16 %v18668_v33, %v2259_v16  ;;  %v16776_v57 = vunpack.i.l.bf16 %v18647_v58  ;;  %v16130_v40 = vpack.c.bf16 %v2251_v41, %v18668_v33 }
 0x105   : > { %3649 = vrot.lane.b32.xlu1 %v25664_v19, %s17666_s22  ;;  %v2270_v9 = vsel %vm2206_vm2, %v2079_v34, %v2085_v23  ;;  %v2268_v50 = vsel %vm2206_vm2, %v2085_v23, %v18522_v18  ;;  %v2273_v18 = vsel %vm2206_vm2, %v25542_v22, %v2079_v34  ;;  %v16777_v12 = vunpack.i.h.bf16 %v18647_v58 }
 0x106   : > { %3653 = vrot.lane.b32.xlu0 %v25665_v51, %s17666_s22  ;;  %2283 = vmatprep.subr.mxu0 %v2270_v9  ;;  %v18787_v9 = vld [vmem:[%s17744_s17 + $0x70] sm:$0xff] }
 0x107   : > { %2355 = vmatpush1.msra.mxu1 %v2268_v50  ;;  %2284 = vmatpush1.msra.mxu0 %v2273_v18  ;;  %v2101_v2 = vpop.permute.xlu1 %2100  ;;  %v2243_v50 = vsel %vm2206_vm2, %v16776_v57, %v16777_v12 }
 0x108   : > { %15861 = vmatmul.mubr.msk.f32.vlgmr.msra.gmra.mrb[16].mxu1 %vm742_vm1, %v18660_v38  ;;  %16125 = vmatprep.subr.bf16.mxu1 %v16124_v1  ;;  %v2105_v26 = vpop.permute.xlu0 %2104 }
 0x109   : > { %3673 = vrot.lane.b32.xlu1 %v25666_v10, %s17666_s22  ;;  %15860 = vmatmul.mubr.msk.f32.vlgmr.msra.gmra.mrb[16].mxu0 %vm742_vm1, %v18660_v38  ;;  %v2258_v59 = vsel %vm2206_vm2, %v2105_v26, %v18632_v45  ;;  %v2260_v32 = vsel %vm2206_vm2, %v2101_v2, %v2105_v26 }
 0x10a   : > { %16869 = vrot.lane.b32.xlu0 %v25667_v15, %s17666_s22  ;;  %16121 = vmatprep.subr.bf16.mxu0 %v16120_v37  ;;  %v18811_v37 = vld [vmem:[%s17744_s17 + $0x98] sm:$0xff] }
 0x10b   : > { %16127 = vmatpush1.bf16.msra.mxu1 %v16126_v28  ;;  %16123 = vmatpush1.bf16.msra.mxu0 %v16122_v14  ;;  %v18692_v17 = vpop.permute.xlu1 %2124  ;;  %v18821_v14 = vld [vmem:[%s17744_s17 + $0xa0] sm:$0xff] }
 0x10c   : > { %2496 = vmatprep.subr.mxu1 %v2258_v59  ;;  %v16770_v11 = vpop.permute.xlu0 %16769  ;;  %2556 = vmatprep.mubr.f32.mxu1 %v25653_v62  ;;  %v18826_v59 = vld [vmem:[%s17744_s17 + $0xb0] sm:$0xff] }
 0x10d   : > { %16884 = vrot.lane.b32.xlu1 %v25668_v42, %s17666_s22  ;;  %v16772_v60 = vunpack.i.h.bf16 %v16770_v11  ;;  %v16771_v43 = vunpack.i.l.bf16 %v16770_v11  ;;  %2485 = vmatprep.mubr.f32.mxu0 %v25653_v62  ;;  %v18830_v15 = vpack.i.bf16 %v18826_v59, %v18756_v63  ;;  %v18837_v42 = vld [vmem:[%s17744_s17 + $0xc8] sm:$0xff] }
 0x10e   : > { %3645 = vrot.lane.b32.xlu0 %v18699_v44, %s17666_s22 }
 0x10f   : > { %v18709_v47 = vsel %vm2206_vm2, %v16771_v43, %v16772_v60  ;;  %2497 = vmatpush1.msra.mxu1 %v2260_v32  ;;  %v18715_v0 = vsel %vm2206_vm2, %v16772_v60, %v16776_v57  ;;  %v2249_v8 = vsel %vm2206_vm2, %v16767_v5, %v16771_v43  ;;  %v18721_v34 = vpop.permute.xlu1 %16784  ;;  %v18842_v60 = vld [vmem:[%s17744_s17 + $0xd8] sm:$0xff]  ;;  %v18845_v43 = vld [vmem:[%s17744_s17 + $0xe0] sm:$0xff] }
 0x110   : > { %15863 = vmatmul.mubr.msk.f32.vlgmr.msra.gmra.mrb[18].mxu1 %vm742_vm1, %v18660_v38  ;;  %v2097_v56 = vpop.permute.xlu0 %2096  ;;  %v16132_v29 = vpack.c.bf16 %v18715_v0, %v2249_v8  ;;  %v16134_v30 = vpack.c.bf16 %v18709_v47, %v2251_v41  ;;  %v16138_v11 = vpack.c.bf16 %v2243_v50, %v18709_v47  ;;  %v18849_v32 = vpack.i.bf16 %v18845_v43, %v18842_v60 }
 0x111   : > { %3665 = vrot.lane.b32.xlu1 %v18726_v13, %s17666_s22  ;;  %v2262_v39 = vsel %vm2206_vm2, %v2097_v56, %v2101_v2  ;;  %v2264_v54 = vsel %vm2206_vm2, %v18617_v35, %v2097_v56  ;;  %2698 = vmatprep.mubr.f32.mxu1 %v25653_v62  ;;  %v16128_v35 = vpack.c.bf16 %v2249_v8, %v18643_v3  ;;  %v16786_v3 = vunpack.i.l.bf16 %v18721_v34 }
 0x112   : > { %3669 = vrot.lane.b32.xlu0 %v18737_v48, %s17666_s22  ;;  %2425 = vmatprep.subr.mxu0 %v2262_v39 }
 0x113   : > { %16133 = vmatprep.subr.bf16.mxu1 %v16132_v29  ;;  %2426 = vmatpush1.msra.mxu0 %v2264_v54  ;;  %v2117_v36 = vpop.permute.xlu1 %2116 }
 0x114   : > { %16135 = vmatpush1.bf16.msra.mxu1 %v16134_v30  ;;  %v2121_v24 = vpop.permute.xlu0 %2120  ;;  %15862 = vmatmul.mubr.msk.f32.vlgmr.msra.gmra.mrb[18].mxu0 %vm742_vm1, %v18660_v38 }
 0x115   : > { %3689 = vrot.lane.b32.xlu1 %v18756_v63, %s17666_s22  ;;  %16129 = vmatprep.subr.bf16.mxu0 %v16128_v35  ;;  %v2250_v52 = vsel %vm2206_vm2, %v2121_v24, %v18692_v17  ;;  %v2252_v31 = vsel %vm2206_vm2, %v2117_v36, %v2121_v24 }
 0x116   : > { %16879 = vrot.lane.b32.xlu0 %v18749_v49, %s17666_s22  ;;  %16131 = vmatpush1.bf16.msra.mxu0 %v16130_v40 }
 0x117   : > { %2638 = vmatprep.subr.mxu1 %v2250_v52  ;;  %2627 = vmatprep.mubr.f32.mxu0 %v25653_v62  ;;  %v18780_v55 = vpop.permute.xlu1 %2140 }
 0x118   : > { %2639 = vmatpush1.msra.mxu1 %v2252_v31  ;;  %v16780_v23 = vpop.permute.xlu0 %16779 }
 0x119   : > { %16894 = vrot.lane.b32.xlu1 %v18768_v6, %s17666_s22  ;;  %v16782_v1 = vunpack.i.h.bf16 %v16780_v23  ;;  %v16781_v19 = vunpack.i.l.bf16 %v16780_v23  ;;  %15865 = vmatmul.mubr.msk.f32.vlgmr.msra.gmra.mrb[20].mxu1 %vm742_vm1, %v18660_v38  ;;  %v18896_v23 = vld [vmem:[%s17744_s17 + $0xd0] sm:$0xff] }
 0x11a   : > { %3661 = vrot.lane.b32.xlu0 %v18787_v9, %s17666_s22  ;;  %2840 = vmatprep.mubr.f32.mxu1 %v25653_v62 }
 0x11b   : > { %v18798_v16 = vsel %vm2206_vm2, %v16781_v19, %v16782_v1  ;;  %v18802_v33 = vsel %vm2206_vm2, %v16782_v1, %v16786_v3  ;;  %v2241_v51 = vsel %vm2206_vm2, %v16777_v12, %v16781_v19  ;;  %v18806_v18 = vpop.permute.xlu1 %16794  ;;  %v18900_v1 = vpack.i.bf16 %v18896_v23, %v18837_v42 }
 0x11c   : > { %v2113_v2 = vpop.permute.xlu0 %2112  ;;  %v16140_v26 = vpack.c.bf16 %v18802_v33, %v2241_v51  ;;  %v16142_v58 = vpack.c.bf16 %v18798_v16, %v2243_v50  ;;  %v16136_v5 = vpack.c.bf16 %v2241_v51, %v18715_v0  ;;  %v16787_v0 = vunpack.i.h.bf16 %v18721_v34 }
 0x11d   : > { %3681 = vrot.lane.b32.xlu1 %v18811_v37, %s17666_s22  ;;  %v2254_v10 = vsel %vm2206_vm2, %v2113_v2, %v2117_v36  ;;  %v2256_v28 = vsel %vm2206_vm2, %v18632_v45, %v2113_v2  ;;  %v16796_v8 = vunpack.i.l.bf16 %v18806_v18  ;;  %v18907_v2 = vld [vmem:[%s17744_s17 + $0xe8] sm:$0xff] }
 0x11e   : > { %3685 = vrot.lane.b32.xlu0 %v18821_v14, %s17666_s22  ;;  %2567 = vmatprep.subr.mxu0 %v2254_v10  ;;  %v2235_v34 = vsel %vm2206_vm2, %v16786_v3, %v16787_v0 }
 0x11f   : > { %16141 = vmatprep.subr.bf16.mxu1 %v16140_v26  ;;  %2568 = vmatpush1.msra.mxu0 %v2256_v28  ;;  %v2133_v45 = vpop.permute.xlu1 %2132 }
 0x120   : > { %16143 = vmatpush1.bf16.msra.mxu1 %v16142_v58  ;;  %v2137_v57 = vpop.permute.xlu0 %2136  ;;  %15864 = vmatmul.mubr.msk.f32.vlgmr.msra.gmra.mrb[20].mxu0 %vm742_vm1, %v18660_v38 }
 0x121   : > { %3705 = vrot.lane.b32.xlu1 %v18837_v42, %s17666_s22  ;;  %16137 = vmatprep.subr.bf16.mxu0 %v16136_v5  ;;  %v2242_v41 = vsel %vm2206_vm2, %v2137_v57, %v18780_v55  ;;  %v2244_v47 = vsel %vm2206_vm2, %v2133_v45, %v2137_v57  ;;  %v18928_v57 = vld [vmem:[%s17744_s17 + $0x8] sm:$0xff] }
 0x122   : > { %16889 = vrot.lane.b32.xlu0 %v18830_v15, %s17666_s22  ;;  %16139 = vmatpush1.bf16.msra.mxu0 %v16138_v11 }
 0x123   : > { %2780 = vmatprep.subr.mxu1 %v2242_v41  ;;  %2769 = vmatprep.mubr.f32.mxu0 %v25653_v62  ;;  %v18861_v56 = vpop.permute.xlu1 %2156 }
 0x124   : > { %2781 = vmatpush1.msra.mxu1 %v2244_v47  ;;  %v16790_v29 = vpop.permute.xlu0 %16789 }
 0x125   : > { %16904 = vrot.lane.b32.xlu1 %v18849_v32, %s17666_s22  ;;  %v16792_v30 = vunpack.i.h.bf16 %v16790_v29  ;;  %v16791_v39 = vunpack.i.l.bf16 %v16790_v29  ;;  %15867 = vmatmul.mubr.msk.f32.vlgmr.msra.gmra.mrb[22].mxu1 %vm742_vm1, %v18660_v38 }
 0x126   : > { %3677 = vrot.lane.b32.xlu0 %v18745_v46, %s17666_s22  ;;  %2982 = vmatprep.mubr.f32.mxu1 %v25653_v62 }
 0x127   : > { %v18874_v54 = vsel %vm2206_vm2, %v16791_v39, %v16792_v30  ;;  %v18878_v35 = vsel %vm2206_vm2, %v16792_v30, %v16796_v8  ;;  %v2233_v36 = vsel %vm2206_vm2, %v16787_v0, %v16791_v39  ;;  %v18882_v24 = vpop.permute.xlu1 %16804 }
 0x128   : > { %v2129_v40 = vpop.permute.xlu0 %2128  ;;  %v16148_v52 = vpack.c.bf16 %v18878_v35, %v2233_v36  ;;  %v16150_v31 = vpack.c.bf16 %v18874_v54, %v2235_v34  ;;  %v16144_v19 = vpack.c.bf16 %v2233_v36, %v18802_v33  ;;  %v16806_v58 = vunpack.i.l.bf16 %v18882_v24 }
 0x129   : > { %3697 = vrot.lane.b32.xlu1 %v18761_v27, %s17666_s22  ;;  %v2246_v12 = vsel %vm2206_vm2, %v2129_v40, %v2133_v45  ;;  %v2248_v3 = vsel %vm2206_vm2, %v18692_v17, %v2129_v40  ;;  %v16146_v17 = vpack.c.bf16 %v2235_v34, %v18798_v16  ;;  %v16797_v16 = vunpack.i.h.bf16 %v18806_v18  ;;  %v18931_v18 = vld [vmem:[%s17744_s17] sm:$0xff] }
 0x12a   : > { %3701 = vrot.lane.b32.xlu0 %v18764_v25, %s17666_s22  ;;  %2709 = vmatprep.subr.mxu0 %v2246_v12  ;;  %v16913_v11 = vpack.i.bf16 %v18928_v57, %v18931_v18 }
 0x12b   : > { %16149 = vmatprep.subr.bf16.mxu1 %v16148_v52  ;;  %2710 = vmatpush1.msra.mxu0 %v2248_v3  ;;  %v2149_v50 = vpop.permute.xlu1 %2148  ;;  %v2227_v41 = vsel %vm2206_vm2, %v16796_v8, %v16797_v16  ;;  %v18963_v52 = vld [vmem:[%s17744_s17 + $0xf0] sm:$0xff] }
 0x12c   : > { %16151 = vmatpush1.bf16.msra.mxu1 %v16150_v31  ;;  %v2153_v51 = vpop.permute.xlu0 %2152  ;;  %15866 = vmatmul.mubr.msk.f32.vlgmr.msra.gmra.mrb[22].mxu0 %vm742_vm1, %v18660_v38  ;;  %v18967_v31 = vpack.i.bf16 %v25653_v62, %v18963_v52 }
 0x12d   : > { %3721 = vrot.lane.b32.xlu1 %v18907_v2, %s17666_s22  ;;  %16145 = vmatprep.subr.bf16.mxu0 %v16144_v19  ;;  %v2234_v26 = vsel %vm2206_vm2, %v2153_v51, %v18861_v56  ;;  %v2236_v33 = vsel %vm2206_vm2, %v2149_v50, %v2153_v51  ;;  %v16807_v51 = vunpack.i.h.bf16 %v18882_v24  ;;  %v18994_v24 = vld [vmem:[%s17744_s17 + $0x10] sm:$0xff] }
 0x12e   : > { %16899 = vrot.lane.b32.xlu0 %v18900_v1, %s17666_s22  ;;  %16147 = vmatpush1.bf16.msra.mxu0 %v16146_v17 }
 0x12f   : > { %2922 = vmatprep.subr.mxu1 %v2234_v26  ;;  %2911 = vmatprep.mubr.f32.mxu0 %v25653_v62  ;;  %v18921_v10 = vpop.permute.xlu1 %2172 }
 0x130   : > { %2923 = vmatpush1.msra.mxu1 %v2236_v33  ;;  %v16800_v28 = vpop.permute.xlu0 %16799 }
 0x131   : > { %3709 = vrot.lane.b32.xlu1 %v18896_v23, %s17666_s22  ;;  %v16802_v5 = vunpack.i.h.bf16 %v16800_v28  ;;  %v16801_v45 = vunpack.i.l.bf16 %v16800_v28  ;;  %15869 = vmatmul.mubr.msk.f32.vlgmr.msra.gmra.mrb[24].mxu1 %vm742_vm1, %v18660_v38  ;;  %v18997_v28 = vld [vmem:[%s17744_s17 + $0x18] sm:$0xff] }
 0x132   : > { %3693 = vrot.lane.b32.xlu0 %v18826_v59, %s17666_s22  ;;  %3124 = vmatprep.mubr.f32.mxu1 %v25653_v62 }
 0x133   : > { %v18942_v47 = vsel %vm2206_vm2, %v16801_v45, %v16802_v5  ;;  %v18946_v0 = vsel %vm2206_vm2, %v16802_v5, %v16806_v58  ;;  %v2225_v29 = vsel %vm2206_vm2, %v16797_v16, %v16801_v45  ;;  %v18950_v30 = vpop.permute.xlu1 %16814  ;;  %v16918_v5 = vpack.i.bf16 %v18997_v28, %v18994_v24 }
 0x134   : > { %v2145_v39 = vpop.permute.xlu0 %2144  ;;  %v16156_v34 = vpack.c.bf16 %v18946_v0, %v2225_v29  ;;  %v16158_v36 = vpack.c.bf16 %v18942_v47, %v2227_v41  ;;  %v16152_v12 = vpack.c.bf16 %v2225_v29, %v18878_v35  ;;  %v2219_v45 = vsel %vm2206_vm2, %v16806_v58, %v16807_v51  ;;  %v19022_v58 = vld [vmem:[%s17744_s17 + $0x28] sm:$0xff] }
 0x135   : > { %16914 = vrot.lane.b32.xlu1 %v16913_v11, %s17667_s25  ;;  %v2238_v8 = vsel %vm2206_vm2, %v2145_v39, %v2149_v50  ;;  %v2240_v40 = vsel %vm2206_vm2, %v18780_v55, %v2145_v39  ;;  %v16154_v55 = vpack.c.bf16 %v2227_v41, %v18874_v54  ;;  %v16816_v54 = vunpack.i.l.bf16 %v18950_v30 }
 0x136   : > { %3717 = vrot.lane.b32.xlu0 %v18845_v43, %s17666_s22  ;;  %2851 = vmatprep.subr.mxu0 %v2238_v8 }
 0x137   : > { %16157 = vmatprep.subr.bf16.mxu1 %v16156_v34  ;;  %2852 = vmatpush1.msra.mxu0 %v2240_v40  ;;  %v2165_v3 = vpop.permute.xlu1 %2164  ;;  %v19017_v40 = vld [vmem:[%s17744_s17 + $0x20] sm:$0xff] }
 0x138   : > { %16159 = vmatpush1.bf16.msra.mxu1 %v16158_v36  ;;  %v2169_v19 = vpop.permute.xlu0 %2168  ;;  %15868 = vmatmul.mubr.msk.f32.vlgmr.msra.gmra.mrb[24].mxu0 %vm742_vm1, %v18660_v38 }
 0x139   : > { %3725 = vrot.lane.b32.xlu1 %v18963_v52, %s17666_s22  ;;  %16153 = vmatprep.subr.bf16.mxu0 %v16152_v12  ;;  %v2226_v50 = vsel %vm2206_vm2, %v2169_v19, %v18921_v10  ;;  %v2228_v35 = vsel %vm2206_vm2, %v2165_v3, %v2169_v19  ;;  %v19026_v12 = vpack.i.bf16 %v19022_v58, %v19017_v40 }
 0x13a   : > { %16909 = vrot.lane.b32.xlu0 %v18967_v31, %s17666_s22  ;;  %16155 = vmatpush1.bf16.msra.mxu0 %v16154_v55 }
 0x13b   : > { %3064 = vmatprep.subr.mxu1 %v2226_v50  ;;  %3053 = vmatprep.mubr.f32.mxu0 %v25653_v62  ;;  %v18985_v17 = vpop.permute.xlu1 %2188 }
 0x13c   : > { %3065 = vmatpush1.msra.mxu1 %v2228_v35  ;;  %v16810_v26 = vpop.permute.xlu0 %16809 }
 0x13d   : > { %16924 = vrot.lane.b32.xlu1 %v25653_v62, %s17667_s25  ;;  %v16812_v33 = vunpack.i.h.bf16 %v16810_v26  ;;  %v16811_v16 = vunpack.i.l.bf16 %v16810_v26  ;;  %15871 = vmatmul.mubr.msk.f32.vlgmr.msra.gmra.mrb[26].mxu1 %vm742_vm1, %v18660_v38  ;;  %v19046_v26 = vld [vmem:[%s17744_s17 + $0xf8] sm:$0xff] }
 0x13e   : > { %3713 = vrot.lane.b32.xlu0 %v18842_v60, %s17666_s22  ;;  %3266 = vmatprep.mubr.f32.mxu1 %v25653_v62 }
 0x13f   : > { %v19006_v11 = vsel %vm2206_vm2, %v16811_v16, %v16812_v33  ;;  %v19010_v41 = vsel %vm2206_vm2, %v16812_v33, %v16816_v54  ;;  %v2217_v29 = vsel %vm2206_vm2, %v16807_v51, %v16811_v16  ;;  %v2177_v39 = vpop.permute.xlu1 %2176  ;;  %v16817_v33 = vunpack.i.h.bf16 %v18950_v30 }
 0x140   : > { %v2161_v34 = vpop.permute.xlu0 %2160  ;;  %v16164_v36 = vpack.c.bf16 %v19010_v41, %v2217_v29  ;;  %v16166_v8 = vpack.c.bf16 %v19006_v11, %v2219_v45  ;;  %v16160_v50 = vpack.c.bf16 %v2217_v29, %v18946_v0  ;;  %v16928_v0 = vpack.i.bf16 %v19046_v26, %v18907_v2 }
 0x141   : > { %5154 = vrot.lane.b32.xlu1 %v19017_v40, %s17667_s25  ;;  %v2230_v19 = vsel %vm2206_vm2, %v2161_v34, %v2165_v3  ;;  %v2232_v55 = vsel %vm2206_vm2, %v18861_v56, %v2161_v34  ;;  %v16162_v3 = vpack.c.bf16 %v2219_v45, %v18942_v47  ;;  %v19059_v45 = vld [vmem:[%s17744_s17 + $0x40] sm:$0xff]  ;;  %v2207_v30 = vsel %vm2206_vm2, %v16817_v33, %v18592_v21 }
 0x142   : > { %16919 = vrot.lane.b32.xlu0 %v16918_v5, %s17667_s25  ;;  %2993 = vmatprep.subr.mxu0 %v2230_v19  ;;  %v16943_v29 = vpack.i.bf16 %v19059_v45, %v25653_v62 }
 0x143   : > { %16165 = vmatprep.subr.bf16.mxu1 %v16164_v36  ;;  %2994 = vmatpush1.msra.mxu0 %v2232_v55  ;;  %v2210_v55 = vsel %vm2206_vm2, %v16816_v54, %v16817_v33  ;;  %v19089_v54 = vld [vmem:[%s17744_s17 + $0x38] sm:$0xff] }
 0x144   : > { %16167 = vmatpush1.bf16.msra.mxu1 %v16166_v8  ;;  %v19035_v35 = vpop.permute.xlu1 %16824  ;;  %v2185_v51 = vpop.permute.xlu0 %2184  ;;  %15870 = vmatmul.mubr.msk.f32.vlgmr.msra.gmra.mrb[26].mxu0 %vm742_vm1, %v18660_v38  ;;  %25670 = vst [vmem:[#allocation6_spill] sm:$0xff] %v19089_v54 }
 0x145   : > { %16934 = vrot.lane.b32.xlu1 %v19026_v12, %s17667_s25  ;;  %16161 = vmatprep.subr.bf16.mxu0 %v16160_v50  ;;  %v2218_v56 = vsel %vm2206_vm2, %v2185_v51, %v18985_v17 }
 0x146   : > { %3729 = vrot.lane.b32.xlu0 %v19046_v26, %s17666_s22  ;;  %16163 = vmatpush1.bf16.msra.mxu0 %v16162_v3  ;;  %v19086_v3 = vld [vmem:[%s17744_s17 + $0x30] sm:$0xff] }
 0x147   : > { %3206 = vmatprep.subr.mxu1 %v2218_v56  ;;  %3195 = vmatprep.mubr.f32.mxu0 %v25653_v62  ;;  %25669 = vst [vmem:[#allocation4_spill] sm:$0xff] %v19086_v3  ;;  %v19093_v56 = vpack.i.bf16 %v19089_v54, %v19086_v3 }
 0x148   : > { %v19054_v47 = vpop.permute.xlu1 %2192  ;;  %v16820_v16 = vpop.permute.xlu0 %16819 }
 0x149   : > { %5144 = vrot.lane.b32.xlu1 %v18994_v24, %s17667_s25  ;;  %v16821_v5 = vunpack.i.l.bf16 %v16820_v16  ;;  %v16822_v33 = vunpack.i.h.bf16 %v16820_v16  ;;  %v16170_v16 = vpack.c.bf16 %v2210_v55, %v19006_v11  ;;  %v25672_v11 = vunpack.i.l.bf16 %v18615_v4 }
 0x14a   : > { %16929 = vrot.lane.b32.xlu0 %v16928_v0, %s17667_s25  ;;  %v16827_v0 = vunpack.i.h.bf16 %v19035_v35 }
 0x14b   : > { %v2208_v34 = vsel %vm2206_vm2, %v16821_v5, %v16752_v20  ;;  %v2211_v50 = vsel %vm2206_vm2, %v18592_v21, %v16821_v5  ;;  %v2224_v21 = vsel %vm2206_vm2, %v18921_v10, %v2177_v39  ;;  %v19101_v5 = vld [vmem:[%s17744_s17 + $0x58] sm:$0xff] }
 0x14c   : > { %v19071_v36 = vpop.permute.xlu1 %16834  ;;  %v2181_v8 = vpop.permute.xlu0 %2180  ;;  %v16172_v19 = vpack.c.bf16 %v2208_v34, %v2207_v30  ;;  %25671 = vst [vmem:[#allocation7_spill] sm:$0xff] %v19101_v5 }
 0x14d   : > { %16944 = vrot.lane.b32.xlu1 %v16943_v29, %s17667_s25  ;;  %v2222_v53 = vsel %vm2206_vm2, %v2177_v39, %v2181_v8  ;;  %v2220_v20 = vsel %vm2206_vm2, %v2181_v8, %v2185_v51  ;;  %v16826_v51 = vunpack.i.l.bf16 %v19035_v35  ;;  %v19104_v29 = vld [vmem:[%s17744_s17 + $0x60] sm:$0xff]  ;;  %v16168_v39 = vpack.c.bf16 %v2207_v30, %v19010_v41 }
 0x14e   : > { %5158 = vrot.lane.b32.xlu0 %v19022_v58, %s17667_s25  ;;  %3135 = vmatprep.subr.mxu0 %v2222_v53  ;;  %v16953_v34 = vpack.i.bf16 %v19104_v29, %v19101_v5  ;;  %v16174_v35 = vpack.c.bf16 %v2211_v50, %v2210_v55  ;;  %v16837_v8 = vunpack.i.h.bf16 %v19071_v36  ;;  %v16836_v53 = vunpack.i.l.bf16 %v19071_v36 }
 0x14f   : > { %3207 = vmatpush1.msra.mxu1 %v2220_v20  ;;  %3136 = vmatpush1.msra.mxu0 %v2224_v21  ;;  %v19118_v20 = vld [vmem:[%s17744_s17 + $0x48] sm:$0xff]  ;;  %v2209_v41 = vsel %vm2206_vm2, %v16822_v33, %v25672_v11  ;;  %v3798_v36 = vsel %vm3739_vm3, %v16826_v51, %v16827_v0 }
 0x150   : > { %15873 = vmatmul.mubr.msk.f32.vlgmr.msra.gmra.mrb[28].mxu1 %vm742_vm1, %v18660_v38  ;;  %16173 = vmatprep.subr.bf16.mxu1 %v16172_v19  ;;  %v19111_v10 = vpop.permute.xlu0 %16829 }
 0x151   : > { %5174 = vrot.lane.b32.xlu1 %v19118_v20, %s17667_s25  ;;  %v19122_v21 = vpop.permute.xlu1 %3621  ;;  %v16832_v19 = vunpack.i.h.bf16 %v19111_v10  ;;  %v16831_v22 = vunpack.i.l.bf16 %v19111_v10  ;;  %15872 = vmatmul.mubr.msk.f32.vlgmr.msra.gmra.mrb[28].mxu0 %vm742_vm1, %v18660_v38  ;;  %v19246_v10 = vld [vmem:[%s25516_s1 + $0x8] sm:$0xf] }
 0x152   : > { %16939 = vrot.lane.b32.xlu0 %v19093_v56, %s17667_s25  ;;  %16169 = vmatprep.subr.bf16.mxu0 %v16168_v39 }
 0x153   : > { %16175 = vmatpush1.bf16.msra.mxu1 %v16174_v35  ;;  %16171 = vmatpush1.bf16.msra.mxu0 %v16170_v16  ;;  %v19138_v30 = vsel %vm3739_vm3, %v16831_v22, %v16832_v19  ;;  %v3802_v16 = vsel %vm3739_vm3, %v16836_v53, %v16837_v8  ;;  %v19155_v11 = vsel %vm3739_vm3, %v16827_v0, %v16831_v22 }
 0x154   : > { %3348 = vmatprep.subr.mxu1 %v2209_v41  ;;  %v2197_v55 = vpop.permute.xlu0 %2196  ;;  %3408 = vmatprep.mubr.f32.mxu1 %v25653_v62  ;;  %v16180_v50 = vpack.c.bf16 %v19138_v30, %v3798_v36  ;;  %v16176_v22 = vpack.c.bf16 %v3798_v36, %v3802_v16  ;;  %v16948_v36 = vpack.i.bf16 %v18699_v44, %v19118_v20 }
 0x155   : > { %16954 = vrot.lane.b32.xlu1 %v16953_v34, %s17667_s25  ;;  %v16845_v4 = vpop.permute.xlu1 %16844  ;;  %v2214_v39 = vsel %vm2206_vm2, %v19054_v47, %v2197_v55  ;;  %v2212_v35 = vsel %vm2206_vm2, %v2197_v55, %v16822_v33  ;;  %3337 = vmatprep.mubr.f32.mxu0 %v25653_v62  ;;  %v2216_v34 = vsel %vm2206_vm2, %v18985_v17, %v19054_v47 }
 0x156   : > { %5150 = vrot.lane.b32.xlu0 %v18997_v28, %s17667_s25  ;;  %3277 = vmatprep.subr.mxu0 %v2214_v39  ;;  %v3800_v33 = vsel %vm3739_vm3, %v16837_v8, %v16826_v51 }
 0x157   : > { %3349 = vmatpush1.msra.mxu1 %v2212_v35  ;;  %3278 = vmatpush1.msra.mxu0 %v2216_v34  ;;  %v16182_v17 = vpack.c.bf16 %v19155_v11, %v3800_v33  ;;  %v16963_v35 = vpack.i.bf16 %v18737_v48, %v18726_v13 }
 0x158   : > { %15875 = vmatmul.mubr.msk.f32.vlgmr.msra.gmra.mrb[30].mxu1 %vm742_vm1, %v18660_v38  ;;  %16181 = vmatprep.subr.bf16.mxu1 %v16180_v50  ;;  %v19169_v41 = vpop.permute.xlu0 %16839  ;;  %v19192_v50 = vld [vmem:[%s17744_s17 + $0x68] sm:$0xff] }
 0x159   : > { %5166 = vrot.lane.b32.xlu1 %v19089_v54, %s17667_s25  ;;  %v3612_v0 = vpop.permute.xlu1 %3611  ;;  %15874 = vmatmul.mubr.msk.f32.vlgmr.msra.gmra.mrb[30].mxu0 %vm742_vm1, %v18660_v38  ;;  %v25543_v47 = vunpack.i.h.bf16 %v19169_v41  ;;  %v19178_v8 = vunpack.i.l.bf16 %v19169_v41 }
 0x15a   : > { %5170 = vrot.lane.b32.xlu0 %v19059_v45, %s17667_s25  ;;  %16177 = vmatprep.subr.bf16.mxu0 %v16176_v22  ;;  %v16847_v22 = vunpack.i.h.bf16 %v16845_v4 }
 0x15b   : > { %16183 = vmatpush1.bf16.msra.mxu1 %v16182_v17  ;;  %3947 = vmatprep.mubr.f32.mxu1 %v25653_v62  ;;  %v3805_v38 = vsel %vm3739_vm3, %v25543_v47, %v16826_v51  ;;  %v3804_v55 = vsel %vm3739_vm3, %v19178_v8, %v16836_v53  ;;  %v16846_v17 = vunpack.i.l.bf16 %v16845_v4 }
 0x15c   : > { %3876 = vmatprep.mubr.f32.mxu0 %v25653_v62  ;;  %v16178_v16 = vpack.c.bf16 %v3805_v38, %v3804_v55  ;;  %v19201_v51 = vpop.permute.xlu0 %3625 }
 0x15d   : > { %5190 = vrot.lane.b32.xlu1 %v19192_v50, %s17667_s25  ;;  %v19196_v39 = vpop.permute.xlu1 %16854  ;;  %v3799_v53 = vsel %vm3739_vm3, %v19122_v21, %v19201_v51  ;;  %v3790_v4 = vsel %vm3739_vm3, %v16846_v17, %v16847_v22 }
 0x15e   : > { %16949 = vrot.lane.b32.xlu0 %v16948_v36, %s17667_s25  ;;  %16179 = vmatpush1.bf16.msra.mxu0 %v16178_v16 }
 0x15f   : > { %3887 = vmatprep.subr.mxu1 %v3799_v53 }
 0x161   : > { %16964 = vrot.lane.b32.xlu1 %v16963_v35, %s17667_s25  ;;  %v19208_v34 = vpop.permute.xlu1 %3641  ;;  %v16850_v33 = vpop.permute.xlu0 %16849  ;;  %v16958_v35 = vpack.i.bf16 %v18787_v9, %v19192_v50 }
 0x162   : > { %5162 = vrot.lane.b32.xlu0 %v19086_v3, %s17667_s25  ;;  %v16852_v36 = vunpack.i.h.bf16 %v16850_v33  ;;  %v16851_v38 = vunpack.i.l.bf16 %v16850_v33 }
 0x164   : > { %v19216_v55 = vsel %vm3739_vm3, %v16851_v38, %v16852_v36  ;;  %v19234_v16 = vsel %vm3739_vm3, %v16847_v22, %v16851_v38 }
 0x165   : > { %5182 = vrot.lane.b32.xlu1 %v19101_v5, %s17667_s25  ;;  %v16188_v47 = vpack.c.bf16 %v19216_v55, %v3790_v4  ;;  %v3792_v5 = vsel %vm3739_vm3, %v16832_v19, %v16846_v17  ;;  %v25673_v19 = vunpack.i.l.bf16 %v19196_v39  ;;  %v16184_v17 = vpack.c.bf16 %v3790_v4, %v19138_v30 }
 0x166   : > { %5186 = vrot.lane.b32.xlu0 %v19104_v29, %s17667_s25  ;;  %v16857_v30 = vunpack.i.h.bf16 %v19196_v39 }
 0x167   : > { %v19223_v53 = vpop.permute.xlu1 %16864  ;;  %v3618_v33 = vpop.permute.xlu0 %3617 }
 0x168   : > { %v3803_v54 = vsel %vm3739_vm3, %v3612_v0, %v3618_v33  ;;  %v3801_v3 = vsel %vm3739_vm3, %v3618_v33, %v19122_v21  ;;  %v16973_v21 = vpack.i.bf16 %v18821_v14, %v18811_v37 }
 0x169   : > { %5206 = vrot.lane.b32.xlu1 %v18742_v7, %s17667_s25  ;;  %3816 = vmatprep.subr.mxu0 %v3803_v54  ;;  %v3806_v7 = vsel %vm3739_vm3, %v25673_v19, %v3612_v0  ;;  %v16190_v54 = vpack.c.bf16 %v19234_v16, %v3792_v5  ;;  %v16866_v0 = vunpack.i.l.bf16 %v19223_v53  ;;  %v3784_v19 = vsel %vm3739_vm3, %v16852_v36, %v16857_v30 }
 0x16a   : > { %16959 = vrot.lane.b32.xlu0 %v16958_v35, %s17667_s25  ;;  %3888 = vmatpush1.msra.mxu1 %v3801_v3  ;;  %v16186_v35 = vpack.c.bf16 %v3792_v5, %v19155_v11 }
 0x16b   : > { %3817 = vmatpush1.msra.mxu0 %v3806_v7  ;;  %v3634_v22 = vpop.permute.xlu1 %3633  ;;  %15878 = vmatmul.mubr.msk.f32.vlgmr.msra.gmra.mrb[32].mxu1 %vm742_vm1, %v19246_v10 }
 0x16c   : > { %16189 = vmatprep.subr.bf16.mxu1 %v16188_v47  ;;  %v3638_v38 = vpop.permute.xlu0 %3637  ;;  %15877 = vmatmul.mubr.msk.f32.vlgmr.msra.gmra.mrb[32].mxu0 %vm742_vm1, %v19246_v10 }
 0x16d   : > { %16185 = vmatprep.subr.bf16.mxu0 %v16184_v17  ;;  %v3791_v3 = vsel %vm3739_vm3, %v3638_v38, %v19208_v34  ;;  %16191 = vmatpush1.bf16.msra.mxu1 %v16190_v54  ;;  %v3793_v33 = vsel %vm3739_vm3, %v3634_v22, %v3638_v38 }
 0x16e   : > { %16187 = vmatpush1.bf16.msra.mxu0 %v16186_v35  ;;  %16974 = vrot.lane.b32.xlu1 %v16973_v21, %s17667_s25 }
 0x16f   : > { %5178 = vrot.lane.b32.xlu0 %v18699_v44, %s17667_s25  ;;  %v19270_v5 = vpop.permute.xlu1 %3657  ;;  %4029 = vmatprep.subr.mxu1 %v3791_v3 }
 0x170   : > { %v16860_v11 = vpop.permute.xlu0 %16859  ;;  %4089 = vmatprep.mubr.f32.mxu1 %v25653_v62  ;;  %4018 = vmatprep.mubr.f32.mxu0 %v25653_v62 }
 0x171   : > { %v16862_v47 = vunpack.i.h.bf16 %v16860_v11  ;;  %v16861_v4 = vunpack.i.l.bf16 %v16860_v11  ;;  %4030 = vmatpush1.msra.mxu1 %v3793_v33 }
 0x172   : > { %15880 = vmatmul.mubr.msk.f32.vlgmr.msra.gmra.mrb[34].mxu1 %vm742_vm1, %v19246_v10  ;;  %5198 = vrot.lane.b32.xlu1 %v18726_v13, %s17667_s25 }
 0x173   : > { %v19280_v44 = vsel %vm3739_vm3, %v16861_v4, %v16862_v47  ;;  %v19286_v7 = vpop.permute.xlu1 %16874  ;;  %v19292_v17 = vsel %vm3739_vm3, %v16862_v47, %v16866_v0  ;;  %v3782_v36 = vsel %vm3739_vm3, %v16857_v30, %v16861_v4  ;;  %5202 = vrot.lane.b32.xlu0 %v18737_v48, %s17667_s25  ;;  %v19299_v54 = vpop.f32.mrb[0].mxu1  ;;  %4231 = vmatprep.mubr.f32.mxu1 %v25653_v62 }
 0x174   : > { %v3630_v21 = vpop.permute.xlu0 %3629  ;;  %v16196_v38 = vpack.c.bf16 %v19292_v17, %v3782_v36  ;;  %v16198_v13 = vpack.c.bf16 %v19280_v44, %v3784_v19  ;;  %v19308_v30 = vpop.f32.mrb[1].mxu1  ;;  %v16192_v11 = vpack.c.bf16 %v3782_v36, %v19216_v55  ;;  %v16194_v47 = vpack.c.bf16 %v3784_v19, %v19234_v16 }
 0x175   : > { %v3795_v35 = vsel %vm3739_vm3, %v3630_v21, %v3634_v22  ;;  %v3797_v3 = vsel %vm3739_vm3, %v19201_v51, %v3630_v21  ;;  %v16876_v55 = vunpack.i.l.bf16 %v19286_v7  ;;  %v16867_v16 = vunpack.i.h.bf16 %v19223_v53 }
 0x176   : > { %3958 = vmatprep.subr.mxu0 %v3795_v35  ;;  %16197 = vmatprep.subr.bf16.mxu1 %v16196_v38 }
 0x177   : > { %5222 = vrot.lane.b32.xlu1 %v18756_v63, %s17667_s25  ;;  %3959 = vmatpush1.msra.mxu0 %v3797_v3  ;;  %v3650_v48 = vpop.permute.xlu1 %3649 }
 0x178   : > { %16969 = vrot.lane.b32.xlu0 %v18749_v49, %s17667_s25  ;;  %16199 = vmatpush1.bf16.msra.mxu1 %v16198_v13  ;;  %v3654_v22 = vpop.permute.xlu0 %3653  ;;  %v3776_v13 = vsel %vm3739_vm3, %v16866_v0, %v16867_v16 }
 0x179   : > { %15879 = vmatmul.mubr.msk.f32.vlgmr.msra.gmra.mrb[34].mxu0 %vm742_vm1, %v19246_v10  ;;  %16193 = vmatprep.subr.bf16.mxu0 %v16192_v11  ;;  %v3783_v51 = vsel %vm3739_vm3, %v3654_v22, %v19270_v5  ;;  %v3785_v63 = vsel %vm3739_vm3, %v3650_v48, %v3654_v22 }
 0x17a   : > { %16195 = vmatpush1.bf16.msra.mxu0 %v16194_v47  ;;  %4171 = vmatprep.subr.mxu1 %v3783_v51  ;;  %v16202_v47 = vpack.c.bf16 %v3776_v13, %v19280_v44  ;;  %v16877_v44 = vunpack.i.h.bf16 %v19286_v7 }
 0x17b   : > { %16984 = vrot.lane.b32.xlu1 %v18768_v6, %s17667_s25  ;;  %v19326_v49 = vpop.permute.xlu1 %3673  ;;  %4160 = vmatprep.mubr.f32.mxu0 %v25653_v62 }
 0x17c   : > { %5194 = vrot.lane.b32.xlu0 %v18787_v9, %s17667_s25  ;;  %4172 = vmatpush1.msra.mxu1 %v3785_v63  ;;  %v16870_v4 = vpop.permute.xlu0 %16869 }
 0x17d   : > { %v16872_v33 = vunpack.i.h.bf16 %v16870_v4  ;;  %v16871_v19 = vunpack.i.l.bf16 %v16870_v4  ;;  %15882 = vmatmul.mubr.msk.f32.vlgmr.msra.gmra.mrb[36].mxu1 %vm742_vm1, %v19246_v10 }
 0x17e   : > { %4373 = vmatprep.mubr.f32.mxu1 %v25653_v62 }
 0x17f   : > { %v19337_v6 = vsel %vm3739_vm3, %v16871_v19, %v16872_v33  ;;  %5214 = vrot.lane.b32.xlu1 %v18811_v37, %s17667_s25  ;;  %v19341_v36 = vpop.permute.xlu1 %16884  ;;  %v19345_v9 = vsel %vm3739_vm3, %v16872_v33, %v16876_v55  ;;  %v3774_v21 = vsel %vm3739_vm3, %v16867_v16, %v16871_v19  ;;  %v19349_v38 = vpop.f32.mrb[2].mxu1  ;;  %v3768_v19 = vsel %vm3739_vm3, %v16876_v55, %v16877_v44 }
 0x180   : > { %5218 = vrot.lane.b32.xlu0 %v18821_v14, %s17667_s25  ;;  %v3646_v37 = vpop.permute.xlu0 %3645  ;;  %v16204_v35 = vpack.c.bf16 %v19345_v9, %v3774_v21  ;;  %v19358_v3 = vpop.f32.mrb[3].mxu1  ;;  %v16206_v53 = vpack.c.bf16 %v19337_v6, %v3776_v13  ;;  %v16200_v0 = vpack.c.bf16 %v3774_v21, %v19292_v17  ;;  %v16886_v17 = vunpack.i.l.bf16 %v19341_v36 }
 0x181   : > { %v3787_v11 = vsel %vm3739_vm3, %v3646_v37, %v3650_v48  ;;  %v3789_v22 = vsel %vm3739_vm3, %v19208_v34, %v3646_v37 }
 0x182   : > { %4100 = vmatprep.subr.mxu0 %v3787_v11  ;;  %16205 = vmatprep.subr.bf16.mxu1 %v16204_v35 }
 0x183   : > { %5238 = vrot.lane.b32.xlu1 %v18837_v42, %s17667_s25  ;;  %4101 = vmatpush1.msra.mxu0 %v3789_v22  ;;  %v3666_v14 = vpop.permute.xlu1 %3665 }
 0x184   : > { %16979 = vrot.lane.b32.xlu0 %v18830_v15, %s17667_s25  ;;  %16207 = vmatpush1.bf16.msra.mxu1 %v16206_v53  ;;  %v3670_v48 = vpop.permute.xlu0 %3669  ;;  %v16210_v53 = vpack.c.bf16 %v3768_v19, %v19337_v6  ;;  %v16887_v6 = vunpack.i.h.bf16 %v19341_v36 }
 0x185   : > { %15881 = vmatmul.mubr.msk.f32.vlgmr.msra.gmra.mrb[36].mxu0 %vm742_vm1, %v19246_v10  ;;  %16201 = vmatprep.subr.bf16.mxu0 %v16200_v0  ;;  %v3775_v34 = vsel %vm3739_vm3, %v3670_v48, %v19326_v49  ;;  %v3777_v42 = vsel %vm3739_vm3, %v3666_v14, %v3670_v48 }
 0x186   : > { %16203 = vmatpush1.bf16.msra.mxu0 %v16202_v47  ;;  %4313 = vmatprep.subr.mxu1 %v3775_v34 }
 0x187   : > { %16994 = vrot.lane.b32.xlu1 %v18849_v32, %s17667_s25  ;;  %v19382_v15 = vpop.permute.xlu1 %3689  ;;  %4302 = vmatprep.mubr.f32.mxu0 %v25653_v62 }
 0x188   : > { %5210 = vrot.lane.b32.xlu0 %v18745_v46, %s17667_s25  ;;  %4314 = vmatpush1.msra.mxu1 %v3777_v42  ;;  %v16880_v51 = vpop.permute.xlu0 %16879 }
 0x189   : > { %v16882_v63 = vunpack.i.h.bf16 %v16880_v51  ;;  %v16881_v16 = vunpack.i.l.bf16 %v16880_v51  ;;  %15884 = vmatmul.mubr.msk.f32.vlgmr.msra.gmra.mrb[38].mxu1 %vm742_vm1, %v19246_v10 }
 0x18a   : > { %4515 = vmatprep.mubr.f32.mxu1 %v25653_v62 }
 0x18b   : > { %v19393_v32 = vsel %vm3739_vm3, %v16881_v16, %v16882_v63  ;;  %5230 = vrot.lane.b32.xlu1 %v18761_v27, %s17667_s25  ;;  %v19397_v7 = vpop.permute.xlu1 %16894  ;;  %v19401_v46 = vsel %vm3739_vm3, %v16882_v63, %v16886_v17  ;;  %v3766_v4 = vsel %vm3739_vm3, %v16877_v44, %v16881_v16  ;;  %v19405_v33 = vpop.f32.mrb[4].mxu1  ;;  %v3760_v44 = vsel %vm3739_vm3, %v16886_v17, %v16887_v6 }
 0x18c   : > { %5234 = vrot.lane.b32.xlu0 %v18764_v25, %s17667_s25  ;;  %v3662_v21 = vpop.permute.xlu0 %3661  ;;  %v16212_v27 = vpack.c.bf16 %v19401_v46, %v3766_v4  ;;  %v19412_v13 = vpop.f32.mrb[5].mxu1  ;;  %v16214_v11 = vpack.c.bf16 %v19393_v32, %v3768_v19  ;;  %v16208_v55 = vpack.c.bf16 %v3766_v4, %v19345_v9  ;;  %v16896_v9 = vunpack.i.l.bf16 %v19397_v7 }
 0x18d   : > { %v3779_v37 = vsel %vm3739_vm3, %v3662_v21, %v3666_v14  ;;  %v3781_v35 = vsel %vm3739_vm3, %v19270_v5, %v3662_v21  ;;  %v17013_v19 = vpack.i.bf16 %v18997_v28, %v25653_v62 }
 0x18e   : > { %4242 = vmatprep.subr.mxu0 %v3779_v37  ;;  %16213 = vmatprep.subr.bf16.mxu1 %v16212_v27  ;;  %v16897_v37 = vunpack.i.h.bf16 %v19397_v7 }
 0x18f   : > { %5254 = vrot.lane.b32.xlu1 %v18907_v2, %s17667_s25  ;;  %4243 = vmatpush1.msra.mxu0 %v3781_v35  ;;  %v3682_v25 = vpop.permute.xlu1 %3681 }
 0x190   : > { %16989 = vrot.lane.b32.xlu0 %v18900_v1, %s17667_s25  ;;  %16215 = vmatpush1.bf16.msra.mxu1 %v16214_v11  ;;  %v3686_v22 = vpop.permute.xlu0 %3685  ;;  %v3752_v7 = vsel %vm3739_vm3, %v16896_v9, %v16897_v37 }
 0x191   : > { %15883 = vmatmul.mubr.msk.f32.vlgmr.msra.gmra.mrb[38].mxu0 %vm742_vm1, %v19246_v10  ;;  %16209 = vmatprep.subr.bf16.mxu0 %v16208_v55  ;;  %v3767_v5 = vsel %vm3739_vm3, %v3686_v22, %v19382_v15  ;;  %v3769_v2 = vsel %vm3739_vm3, %v3682_v25, %v3686_v22 }
 0x192   : > { %16211 = vmatpush1.bf16.msra.mxu0 %v16210_v53  ;;  %4455 = vmatprep.subr.mxu1 %v3767_v5 }
 0x193   : > { %5242 = vrot.lane.b32.xlu1 %v18896_v23, %s17667_s25  ;;  %v19436_v1 = vpop.permute.xlu1 %3705  ;;  %4444 = vmatprep.mubr.f32.mxu0 %v25653_v62 }
 0x194   : > { %5226 = vrot.lane.b32.xlu0 %v18826_v59, %s17667_s25  ;;  %4456 = vmatpush1.msra.mxu1 %v3769_v2  ;;  %v16890_v14 = vpop.permute.xlu0 %16889  ;;  %v17003_v59 = vpack.i.bf16 %v25653_v62, %v18931_v18  ;;  %v17008_v2 = vpack.i.bf16 %v18994_v24, %v18928_v57 }
 0x195   : > { %v16892_v0 = vunpack.i.h.bf16 %v16890_v14  ;;  %v16891_v48 = vunpack.i.l.bf16 %v16890_v14  ;;  %15886 = vmatmul.mubr.msk.f32.vlgmr.msra.gmra.mrb[40].mxu1 %vm742_vm1, %v19246_v10 }
 0x196   : > { %4657 = vmatprep.mubr.f32.mxu1 %v25653_v62 }
 0x197   : > { %v19447_v23 = vsel %vm3739_vm3, %v16891_v48, %v16892_v0  ;;  %5258 = vrot.lane.b32.xlu1 %v18963_v52, %s17667_s25  ;;  %v19451_v36 = vpop.permute.xlu1 %16904  ;;  %v19457_v47 = vsel %vm3739_vm3, %v16892_v0, %v16896_v9  ;;  %v3758_v34 = vsel %vm3739_vm3, %v16887_v6, %v16891_v48  ;;  %v19461_v42 = vpop.f32.mrb[6].mxu1 }
 0x198   : > { %5250 = vrot.lane.b32.xlu0 %v18845_v43, %s17667_s25  ;;  %v3678_v52 = vpop.permute.xlu0 %3677  ;;  %v16220_v51 = vpack.c.bf16 %v19457_v47, %v3758_v34  ;;  %v19468_v63 = vpop.f32.mrb[7].mxu1  ;;  %v16222_v4 = vpack.c.bf16 %v19447_v23, %v3760_v44  ;;  %v16216_v17 = vpack.c.bf16 %v3758_v34, %v19401_v46  ;;  %v16226_v34 = vpack.c.bf16 %v3752_v7, %v19447_v23 }
 0x199   : > { %v3771_v18 = vsel %vm3739_vm3, %v3678_v52, %v3682_v25  ;;  %v3773_v16 = vsel %vm3739_vm3, %v19326_v49, %v3678_v52  ;;  %v16218_v49 = vpack.c.bf16 %v3760_v44, %v19393_v32  ;;  %v17028_v23 = vpack.i.bf16 %v19118_v20, %v19059_v45 }
 0x19a   : > { %4384 = vmatprep.subr.mxu0 %v3771_v18  ;;  %16221 = vmatprep.subr.bf16.mxu1 %v16220_v51  ;;  %v16907_v52 = vunpack.i.h.bf16 %v19451_v36 }
 0x19b   : > { %17004 = vrot.lane.b32.xlu1 %v17003_v59, %s17668_s28  ;;  %4385 = vmatpush1.msra.mxu0 %v3773_v16  ;;  %v3698_v43 = vpop.permute.xlu1 %3697 }
 0x19c   : > { %16999 = vrot.lane.b32.xlu0 %v18967_v31, %s17667_s25  ;;  %16223 = vmatpush1.bf16.msra.mxu1 %v16222_v4  ;;  %v3702_v21 = vpop.permute.xlu0 %3701  ;;  %v16906_v31 = vunpack.i.l.bf16 %v19451_v36 }
 0x19d   : > { %15885 = vmatmul.mubr.msk.f32.vlgmr.msra.gmra.mrb[40].mxu0 %vm742_vm1, %v19246_v10  ;;  %16217 = vmatprep.subr.bf16.mxu0 %v16216_v17  ;;  %v3759_v27 = vsel %vm3739_vm3, %v3702_v21, %v19436_v1  ;;  %v3761_v46 = vsel %vm3739_vm3, %v3698_v43, %v3702_v21 }
 0x19e   : > { %16219 = vmatpush1.bf16.msra.mxu0 %v16218_v49  ;;  %4597 = vmatprep.subr.mxu1 %v3759_v27 }
 0x19f   : > { %17014 = vrot.lane.b32.xlu1 %v17013_v19, %s17668_s28  ;;  %v19493_v32 = vpop.permute.xlu1 %3721  ;;  %4586 = vmatprep.mubr.f32.mxu0 %v25653_v62 }
 0x1a0   : > { %5246 = vrot.lane.b32.xlu0 %v18842_v60, %s17667_s25  ;;  %4598 = vmatpush1.msra.mxu1 %v3761_v46  ;;  %v16900_v35 = vpop.permute.xlu0 %16899  ;;  %v3743_v46 = vsel %vm3739_vm3, %v16906_v31, %v16907_v52 }
 0x1a1   : > { %v16902_v11 = vunpack.i.h.bf16 %v16900_v35  ;;  %v16901_v25 = vunpack.i.l.bf16 %v16900_v35  ;;  %15888 = vmatmul.mubr.msk.f32.vlgmr.msra.gmra.mrb[42].mxu1 %vm742_vm1, %v19246_v10 }
 0x1a2   : > { %4799 = vmatprep.mubr.f32.mxu1 %v25653_v62 }
 0x1a3   : > { %v19505_v55 = vsel %vm3739_vm3, %v16901_v25, %v16902_v11  ;;  %8016 = vrot.lane.b32.xlu1 %v18997_v28, %s17668_s28  ;;  %v3710_v60 = vpop.permute.xlu1 %3709  ;;  %v19513_v22 = vsel %vm3739_vm3, %v16902_v11, %v16906_v31  ;;  %v3750_v53 = vsel %vm3739_vm3, %v16897_v37, %v16901_v25 }
 0x1a4   : > { %5262 = vrot.lane.b32.xlu0 %v19046_v26, %s17667_s25  ;;  %v3694_v5 = vpop.permute.xlu0 %3693  ;;  %v16228_v9 = vpack.c.bf16 %v19513_v22, %v3750_v53  ;;  %v16230_v28 = vpack.c.bf16 %v19505_v55, %v3752_v7  ;;  %v19523_v6 = vpop.f32.mrb[0].mxu0  ;;  %v16224_v26 = vpack.c.bf16 %v3750_v53, %v19457_v47 }
 0x1a5   : > { %v3763_v14 = vsel %vm3739_vm3, %v3694_v5, %v3698_v43  ;;  %v3765_v0 = vsel %vm3739_vm3, %v19382_v15, %v3694_v5  ;;  %v19530_v48 = vpop.f32.mrb[1].mxu0  ;;  %v16234_v5 = vpack.c.bf16 %v3743_v46, %v19505_v55 }
 0x1a6   : > { %4526 = vmatprep.subr.mxu0 %v3763_v14  ;;  %16229 = vmatprep.subr.bf16.mxu1 %v16228_v9 }
 0x1a7   : > { %17024 = vrot.lane.b32.xlu1 %v19093_v56, %s17668_s28  ;;  %4527 = vmatpush1.msra.mxu0 %v3765_v0  ;;  %v19534_v57 = vpop.permute.xlu1 %16914  ;;  %v25676_v0 = vld [vmem:[#allocation4_spill] sm:$0xff] }
 0x1a8   : > { %17009 = vrot.lane.b32.xlu0 %v17008_v2, %s17668_s28  ;;  %16231 = vmatpush1.bf16.msra.mxu1 %v16230_v28  ;;  %v3718_v59 = vpop.permute.xlu0 %3717  ;;  %v16917_v11 = vunpack.i.h.bf16 %v19534_v57  ;;  %v16916_v31 = vunpack.i.l.bf16 %v19534_v57  ;;  %v17038_v28 = vpack.i.bf16 %v19192_v50, %v19104_v29 }
 0x1a9   : > { %15887 = vmatmul.mubr.msk.f32.vlgmr.msra.gmra.mrb[42].mxu0 %vm742_vm1, %v19246_v10  ;;  %16225 = vmatprep.subr.bf16.mxu0 %v16224_v26  ;;  %v3751_v15 = vsel %vm3739_vm3, %v3718_v59, %v19493_v32 }
 0x1aa   : > { %16227 = vmatpush1.bf16.msra.mxu0 %v16226_v34  ;;  %4739 = vmatprep.subr.mxu1 %v3751_v15  ;;  %v19544_v56 = vpop.f32.mrb[2].mxu0 }
 0x1ab   : > { %8024 = vrot.lane.b32.xlu1 %v19022_v58, %s17668_s28  ;;  %v19548_v47 = vpop.permute.xlu1 %3725  ;;  %v19552_v44 = vpop.f32.mrb[3].mxu0  ;;  %4728 = vmatprep.mubr.f32.mxu0 %v25653_v62  ;;  %v25674_v58 = vunpack.i.h.bf16 %v19169_v41 }
 0x1ac   : > { %17019 = vrot.lane.b32.xlu0 %v19026_v12, %s17668_s28  ;;  %v16910_v51 = vpop.permute.xlu0 %16909  ;;  %v3740_v12 = vsel %vm3739_vm3, %v16907_v52, %v19178_v8  ;;  %v3749_v52 = vsel %vm3739_vm3, %v19493_v32, %v19548_v47  ;;  %v17388_v32 = vld [vmem:[%s17744_s17 + $0x50] sm:$0xff] }
 0x1ad   : > { %v16911_v18 = vunpack.i.l.bf16 %v16910_v51  ;;  %v16912_v37 = vunpack.i.h.bf16 %v16910_v51  ;;  %v16232_v36 = vpack.c.bf16 %v3740_v12, %v19513_v22 }
 0x1af   : > { %17029 = vrot.lane.b32.xlu1 %v17028_v23, %s17668_s28  ;;  %v19559_v16 = vpop.permute.xlu1 %16924  ;;  %v3741_v4 = vsel %vm3739_vm3, %v16911_v18, %v25674_v58  ;;  %v3744_v19 = vsel %vm3739_vm3, %v19178_v8, %v16911_v18  ;;  %v3757_v8 = vsel %vm3739_vm3, %v19436_v1, %v3710_v60 }
 0x1b0   : > { %8020 = vrot.lane.b32.xlu0 %v19017_v40, %s17668_s28  ;;  %v3714_v43 = vpop.permute.xlu0 %3713  ;;  %v19567_v17 = vpop.f32.mrb[8].mxu1  ;;  %v16236_v49 = vpack.c.bf16 %v3741_v4, %v3740_v12  ;;  %v16927_v7 = vunpack.i.h.bf16 %v19559_v16  ;;  %v16926_v53 = vunpack.i.l.bf16 %v19559_v16  ;;  %v25677_v16 = vld [vmem:[#allocation6_spill] sm:$0xff] }
 0x1b1   : > { %v3755_v41 = vsel %vm3739_vm3, %v3710_v60, %v3714_v43  ;;  %v3753_v21 = vsel %vm3739_vm3, %v3714_v43, %v3718_v59  ;;  %v19579_v27 = vpop.f32.mrb[4].mxu0  ;;  %v19581_v40 = vpop.f32.mrb[9].mxu1  ;;  %v5331_v59 = vsel %vm5272_vm4, %v16916_v31, %v16917_v11 }
 0x1b2   : > { %4668 = vmatprep.subr.mxu0 %v3755_v41  ;;  %4740 = vmatpush1.msra.mxu1 %v3753_v21  ;;  %v19590_v35 = vpop.f32.mrb[5].mxu0  ;;  %v5335_v34 = vsel %vm5272_vm4, %v16926_v53, %v16927_v7  ;;  %v5333_v51 = vsel %vm5272_vm4, %v16927_v7, %v16916_v31 }
 0x1b3   : > { %8036 = vrot.lane.b32.xlu1 %v19059_v45, %s17668_s28  ;;  %4669 = vmatpush1.msra.mxu0 %v3757_v8  ;;  %v19595_v25 = vpop.permute.xlu1 %5154  ;;  %v16238_v45 = vpack.c.bf16 %v3744_v19, %v3743_v46  ;;  %v16240_v4 = vpack.c.bf16 %v5331_v59, %v5335_v34  ;;  %v25689_v34 = vlaneseq }
 0x1b4   : > { %8010 = vrot.lane.b32.xlu0 %v18994_v24, %s17668_s28  ;;  %15890 = vmatmul.mubr.msk.f32.vlgmr.msra.gmra.mrb[44].mxu1 %vm742_vm1, %v19246_v10  ;;  %v19605_v1 = vpop.permute.xlu0 %16919  ;;  %v25675_v24 = vunpack.i.l.bf16 %v19196_v39 }
 0x1b5   : > { %16237 = vmatprep.subr.bf16.mxu1 %v16236_v49  ;;  %v16922_v60 = vunpack.i.h.bf16 %v19605_v1  ;;  %v16921_v22 = vunpack.i.l.bf16 %v19605_v1  ;;  %15889 = vmatmul.mubr.msk.f32.vlgmr.msra.gmra.mrb[44].mxu0 %vm742_vm1, %v19246_v10 }
 0x1b6   : > { %16233 = vmatprep.subr.bf16.mxu0 %v16232_v36  ;;  %16239 = vmatpush1.bf16.msra.mxu1 %v16238_v45  ;;  %v3742_v2 = vsel %vm3739_vm3, %v16912_v37, %v25675_v24  ;;  %v17390_v24 = vld [vmem:[%s17744_s17 + $0x88] sm:$0xff] }
 0x1b7   : > { %16235 = vmatpush1.bf16.msra.mxu0 %v16234_v5  ;;  %4881 = vmatprep.subr.mxu1 %v3742_v2  ;;  %v19617_v9 = vpop.permute.xlu1 %16934  ;;  %v19621_v14 = vpop.f32.mrb[6].mxu0  ;;  %v19627_v55 = vsel %vm5272_vm4, %v16921_v22, %v16922_v60  ;;  %v19631_v39 = vsel %vm5272_vm4, %v16917_v11, %v16921_v22  ;;  %v17389_v5 = vld [vmem:[%s17744_s17 + $0x80] sm:$0xff] }
 0x1b8   : > { %8040 = vrot.lane.b32.xlu1 %v19118_v20, %s17668_s28  ;;  %8028 = vrot.lane.b32.xlu0 %v25676_v0, %s17668_s28  ;;  %v3730_v57 = vpop.permute.xlu0 %3729  ;;  %v19637_v26 = vpop.f32.mrb[7].mxu0  ;;  %v16244_v20 = vpack.c.bf16 %v19627_v55, %v5331_v59  ;;  %v16246_v43 = vpack.c.bf16 %v19631_v39, %v5333_v51  ;;  %v16937_v45 = vunpack.i.h.bf16 %v19617_v9  ;;  %v17048_v2 = vpack.i.bf16 %v17390_v24, %v17389_v5  ;;  %v17391_v51 = vld [vmem:[%s17744_s17 + $0x70] sm:$0xff] }
 0x1b9   : > { %v3747_v15 = vsel %vm3739_vm3, %v19548_v47, %v3730_v57  ;;  %v3745_v23 = vsel %vm3739_vm3, %v3730_v57, %v16912_v37  ;;  %4941 = vmatprep.mubr.f32.mxu1 %v25653_v62  ;;  %4870 = vmatprep.mubr.f32.mxu0 %v25653_v62  ;;  %v25679_v47 = vld [vmem:[#allocation7_spill] sm:$0xff] }
 0x1ba   : > { %4810 = vmatprep.subr.mxu0 %v3747_v15  ;;  %4882 = vmatpush1.msra.mxu1 %v3745_v23  ;;  %v17033_v12 = vpack.i.bf16 %v25679_v47, %v17388_v32  ;;  %v19724_v15 = vshrl.u32 %v25689_v34, 7 }
 0x1bb   : > { %4811 = vmatpush1.msra.mxu0 %v3749_v52  ;;  %15892 = vmatmul.mubr.msk.f32.vlgmr.msra.gmra.mrb[46].mxu1 %vm742_vm1, %v19246_v10  ;;  %v19659_v18 = vpop.permute.xlu1 %5144 }
 0x1bc   : > { %17039 = vrot.lane.b32.xlu1 %v17038_v28, %s17668_s28  ;;  %8032 = vrot.lane.b32.xlu0 %v25677_v16, %s17668_s28  ;;  %v19664_v58 = vpop.permute.xlu0 %16929  ;;  %25690 = vst [vmem:[#allocation6_spill] sm:$0xff] %v19724_v15  ;;  %v19735_v16 = vld [vmem:[%s17744_s17 + $0x78] sm:$0xff] }
 0x1bd   : > { %25678 = vst [vmem:[#allocation10_spill] sm:$0xff] %v19664_v58  ;;  %16245 = vmatprep.subr.bf16.mxu1 %v16244_v20  ;;  %v25549_v19 = vunpack.i.h.bf16 %v19664_v58  ;;  %v19671_v41 = vunpack.i.l.bf16 %v19664_v58  ;;  %15891 = vmatmul.mubr.msk.f32.vlgmr.msra.gmra.mrb[46].mxu0 %vm742_vm1, %v19246_v10  ;;  %v19675_v21 = vpop.f32.mrb[10].mxu1  ;;  %v19677_v49 = vpop.f32.mrb[8].mxu0 }
 0x1be   : > { %25681 = vst [vmem:[#allocation16_spill] sm:$0xff] %v19675_v21  ;;  %25682 = vst [vmem:[#allocation5_spill] sm:$0xff] %v19677_v49  ;;  %16241 = vmatprep.subr.bf16.mxu0 %v16240_v4  ;;  %16247 = vmatpush1.bf16.msra.mxu1 %v16246_v43  ;;  %v19679_v46 = vpop.f32.mrb[11].mxu1  ;;  %v19681_v37 = vpop.f32.mrb[9].mxu0  ;;  %v17043_v4 = vpack.i.bf16 %v19735_v16, %v17391_v51  ;;  %v19741_v43 = vld [vmem:[%s25516_s1 + $0xc] sm:$0xf] }
 0x1bf   : > { %25680 = vst [vmem:[#allocation13_spill] sm:$0xff] %v19671_v41  ;;  %25683 = vst [vmem:[#allocation8_spill] sm:$0xff] %v19679_v46  ;;  %v5338_v8 = vsel %vm5272_vm4, %v25549_v19, %v16916_v31  ;;  %v5337_v11 = vsel %vm5272_vm4, %v19671_v41, %v16926_v53  ;;  %v19690_v10 = vpop.permute.xlu1 %16944  ;;  %5480 = vmatprep.mubr.f32.mxu1 %v25653_v62  ;;  %5409 = vmatprep.mubr.f32.mxu0 %v25653_v62  ;;  %v19841_v19 = vld [vmem:[%s25518_s3] sm:$0xff]  ;;  %v19930_v21 = vld [vmem:[%s17744_s17 + $0xc8] sm:$0xff] }
 0x1c0   : > { %25684 = vst [vmem:[#allocation9_spill] sm:$0xff] %v19681_v37  ;;  %25685 = vst [vmem:[#allocation11_spill] sm:$0xff] %v19690_v10  ;;  %8052 = vrot.lane.b32.xlu1 %v19104_v29, %s17668_s28  ;;  %17034 = vrot.lane.b32.xlu0 %v17033_v12, %s17668_s28  ;;  %v19696_v36 = vpop.permute.xlu0 %5158  ;;  %v16242_v7 = vpack.c.bf16 %v5338_v8, %v5337_v11  ;;  %v16936_v29 = vunpack.i.l.bf16 %v19617_v9  ;;  %v25548_v9 = vunpack.i.l.bf16 %v19690_v10  ;;  %v19927_v46 = vld [vmem:[%s17744_s17 + $0xc0] sm:$0xff] }
 0x1c1   : > { %v5332_v31 = vsel %vm5272_vm4, %v19595_v25, %v19696_v36 }
 0x1c2   : > { %5420 = vmatprep.subr.mxu1 %v5332_v31  ;;  %16243 = vmatpush1.bf16.msra.mxu0 %v16242_v7  ;;  %v5325_v7 = vsel %vm5272_vm4, %v16922_v60, %v16936_v29  ;;  %v5339_v31 = vsel %vm5272_vm4, %v25548_v9, %v19659_v18 }
 0x1c3   : > { %v19703_v53 = vpop.permute.xlu1 %5174 }
 0x1c4   : > { %8056 = vrot.lane.b32.xlu1 %v19192_v50, %s17668_s28  ;;  %8044 = vrot.lane.b32.xlu0 %v17388_v32, %s17668_s28  ;;  %v19710_v22 = vpop.permute.xlu0 %16939  ;;  %v19714_v28 = vpop.f32.mrb[10].mxu0  ;;  %v5323_v32 = vsel %vm5272_vm4, %v16936_v29, %v16937_v45  ;;  %v19783_v29 = vld [vmem:[%s25518_s3 + $0x10] sm:$0xff] }
 0x1c5   : > { %25686 = vst [vmem:[#allocation15_spill] sm:$0xff] %v19714_v28  ;;  %v25550_v0 = vunpack.i.h.bf16 %v19710_v22  ;;  %v16941_v57 = vunpack.i.l.bf16 %v19710_v22  ;;  %v19718_v59 = vpop.f32.mrb[11].mxu0  ;;  %v25698_v41 = vunpack.i.h.bf16 %v19710_v22 }
 0x1c6   : > { %25687 = vst [vmem:[#allocation12_spill] sm:$0xff] %v19718_v59  ;;  %v19721_v50 = vpop.f32.mrb[12].mxu1 }
 0x1c7   : > { %25688 = vst [vmem:[#allocation4_spill] sm:$0xff] %v19721_v50  ;;  %v19726_v23 = vpop.permute.xlu1 %16954  ;;  %v19728_v20 = vpop.f32.mrb[13].mxu1  ;;  %v19747_v12 = vsel %vm5272_vm4, %v16937_v45, %v16941_v57  ;;  %v19759_v11 = vsel %vm5272_vm4, %v16941_v57, %v25550_v0  ;;  %v19772_v45 = vsub.s32 0, %v19724_v15  ;;  %v16947_v0 = vunpack.i.h.bf16 %v19690_v10 }
 0x1c8   : > { %25691 = vst [vmem:[#allocation7_spill] sm:$0xff] %v19728_v20  ;;  %17049 = vrot.lane.b32.xlu1 %v17048_v2, %s17668_s28  ;;  %8048 = vrot.lane.b32.xlu0 %v25679_v47, %s17668_s28  ;;  %v5151_v52 = vpop.permute.xlu0 %5150  ;;  %v16248_v2 = vpack.c.bf16 %v5323_v32, %v19627_v55  ;;  %v16254_v57 = vpack.c.bf16 %v19747_v12, %v5325_v7 }
 0x1c9   : > { %v5336_v47 = vsel %vm5272_vm4, %v19659_v18, %v5151_v52  ;;  %v5334_v8 = vsel %vm5272_vm4, %v5151_v52, %v19595_v25  ;;  %v16252_v25 = vpack.c.bf16 %v19759_v11, %v5323_v32  ;;  %v19794_v52 = vld [vmem:[%s25518_s3 + $0x18] sm:$0xff]  ;;  %v16250_v55 = vpack.c.bf16 %v5325_v7, %v19631_v39  ;;  %v19827_v7 = vld [vmem:[%s25518_s3 + $0x70] sm:$0xff] }
 0x1ca   : > { %5349 = vmatprep.subr.mxu0 %v5336_v47  ;;  %5421 = vmatpush1.msra.mxu1 %v5334_v8  ;;  %v19799_v47 = vld [vmem:[%s25518_s3 + $0x30] sm:$0xff]  ;;  %v1893_v32 = vrot.slane %v19783_v29, %v19772_v45  ;;  %v19822_v39 = vld [vmem:[%s25518_s3 + $0x58] sm:$0xff]  ;;  %v5317_v28 = vsel %vm5272_vm4, %v25698_v41, %v16947_v0 }
 0x1cb   : > { %5350 = vmatpush1.msra.mxu0 %v5339_v31  ;;  %15895 = vmatmul.mubr.msk.f32.vlgmr.msra.gmra.mrb[48].mxu1 %vm742_vm1, %v19741_v43  ;;  %v19776_v1 = vpop.permute.xlu1 %5166  ;;  %v19778_v60 = vpop.f32.mrb[12].mxu0  ;;  %v19817_v8 = vld [vmem:[%s25518_s3 + $0x50] sm:$0xff]  ;;  %v17393_v31 = vld [vmem:[%s17744_s17 + $0xa0] sm:$0xff] }
 0x1cc   : > { %25692 = vst [vmem:[#allocation17_spill] sm:$0xff] %v19778_v60  ;;  %8068 = vrot.lane.b32.xlu1 %v17389_v5, %s17668_s28  ;;  %17044 = vrot.lane.b32.xlu0 %v17043_v4, %s17668_s28  ;;  %v5171_v18 = vpop.permute.xlu0 %5170  ;;  %v19789_v34 = vpop.f32.mrb[13].mxu0  ;;  %v19810_v4 = vld [vmem:[%s25518_s3 + $0x38] sm:$0xff] }
 0x1cd   : > { %25693 = vst [vmem:[#allocation18_spill] sm:$0xff] %v19789_v34  ;;  %16253 = vmatprep.subr.bf16.mxu1 %v16252_v25  ;;  %15894 = vmatmul.mubr.msk.f32.vlgmr.msra.gmra.mrb[48].mxu0 %vm742_vm1, %v19741_v43  ;;  %v5324_v5 = vsel %vm5272_vm4, %v5171_v18, %v19703_v53  ;;  %v5326_v50 = vsel %vm5272_vm4, %v19776_v1, %v5171_v18  ;;  %v19872_v18 = vsub.s32 1, %v19724_v15  ;;  %v25697_v15 = vunpack.i.l.bf16 %v19726_v23 }
 0x1ce   : > { %16249 = vmatprep.subr.bf16.mxu0 %v16248_v2  ;;  %16255 = vmatpush1.bf16.msra.mxu1 %v16254_v57  ;;  %v19830_v25 = vpop.f32.mrb[14].mxu1  ;;  %v1897_v57 = vrot.slane %v19794_v52, %v19772_v45 }
 0x1cf   : > { %16251 = vmatpush1.bf16.msra.mxu0 %v16250_v55  ;;  %25694 = vst [vmem:[#allocation19_spill] sm:$0xff] %v19830_v25  ;;  %5562 = vmatprep.subr.mxu1 %v5324_v5  ;;  %v19832_v2 = vpop.permute.xlu1 %5190  ;;  %v19846_v55 = vpop.f32.mrb[15].mxu1  ;;  %v19850_v25 = vld [vmem:[%s17744_s17 + $0xa8] sm:$0xff]  ;;  %v3426_v37 = vrot.slane %v19783_v29, %v19872_v18  ;;  %v16258_v29 = vpack.c.bf16 %v5317_v28, %v19747_v12  ;;  %v19965_v12 = vld [vmem:[%s17744_s17 + $0xb8] sm:$0xff] }
 0x1d0   : > { %8072 = vrot.lane.b32.xlu1 %v17390_v24, %s17668_s28  ;;  %8060 = vrot.lane.b32.xlu0 %v17391_v51, %s17668_s28  ;;  %25695 = vst [vmem:[#allocation20_spill] sm:$0xff] %v19846_v55  ;;  %v16950_v5 = vpop.permute.xlu0 %16949  ;;  %v17058_v34 = vpack.i.bf16 %v19850_v25, %v17393_v31  ;;  %v1885_v24 = vrot.slane %v19841_v19, %v19772_v45  ;;  %v19879_v51 = vld [vmem:[%s25518_s3 + $0x20] sm:$0xff] }
 0x1d1   : > { %v16952_v60 = vunpack.i.h.bf16 %v16950_v5  ;;  %v16951_v20 = vunpack.i.l.bf16 %v16950_v5  ;;  %5622 = vmatprep.mubr.f32.mxu1 %v25653_v62  ;;  %5551 = vmatprep.mubr.f32.mxu0 %v25653_v62  ;;  %v19869_v5 = vld [vmem:[%s25518_s3 + $0x8] sm:$0xff] }
 0x1d2   : > { %5563 = vmatpush1.msra.mxu1 %v5326_v50  ;;  %v19887_v50 = vpop.f32.mrb[14].mxu0  ;;  %v1889_v41 = vrot.slane %v19869_v5, %v19772_v45 }
 0x1d3   : > { %v19883_v55 = vsel %vm5272_vm4, %v16951_v20, %v16952_v60  ;;  %15897 = vmatmul.mubr.msk.f32.vlgmr.msra.gmra.mrb[50].mxu1 %vm742_vm1, %v19741_v43  ;;  %25696 = vst [vmem:[#allocation21_spill] sm:$0xff] %v19887_v50  ;;  %v19889_v9 = vpop.permute.xlu1 %16964  ;;  %v19895_v10 = vsel %vm5272_vm4, %v16952_v60, %v25697_v15  ;;  %v5315_v59 = vsel %vm5272_vm4, %v16947_v0, %v16951_v20  ;;  %v19906_v50 = vpop.f32.mrb[15].mxu0  ;;  %v17395_v15 = vld [vmem:[%s17744_s17 + $0x90] sm:$0xff]  ;;  %v19910_v60 = vld [vmem:[%s17744_s17 + $0x98] sm:$0xff] }
 0x1d4   : > { %17059 = vrot.lane.b32.xlu1 %v17058_v34, %s17668_s28  ;;  %8064 = vrot.lane.b32.xlu0 %v19735_v16, %s17668_s28  ;;  %25699 = vst [vmem:[#allocation22_spill] sm:$0xff] %v19906_v50  ;;  %v5163_v58 = vpop.permute.xlu0 %5162  ;;  %v17053_v20 = vpack.i.bf16 %v19910_v60, %v17395_v15  ;;  %v16260_v22 = vpack.c.bf16 %v19895_v10, %v5315_v59 }
 0x1d5   : > { %v5328_v0 = vsel %vm5272_vm4, %v5163_v58, %v19776_v1  ;;  %v5330_v16 = vsel %vm5272_vm4, %v19696_v36, %v5163_v58  ;;  %v16262_v34 = vpack.c.bf16 %v19883_v55, %v5317_v28  ;;  %5764 = vmatprep.mubr.f32.mxu1 %v25653_v62  ;;  %v17068_v1 = vpack.i.bf16 %v19930_v21, %v19927_v46  ;;  %v19962_v28 = vld [vmem:[%s17744_s17 + $0xb0] sm:$0xff] }
 0x1d6   : > { %5491 = vmatprep.subr.mxu0 %v5328_v0  ;;  %16261 = vmatprep.subr.bf16.mxu1 %v16260_v22  ;;  %v2012_v58 = vmul.f32 %v1893_v32, %v19299_v54  ;;  %v2013_v36 = vmul.f32 %v1897_v57, %v19308_v30  ;;  %v16256_v22 = vpack.c.bf16 %v5315_v59, %v19759_v11  ;;  %v16957_v11 = vunpack.i.h.bf16 %v19726_v23 }
 0x1d7   : > { %5492 = vmatpush1.msra.mxu0 %v5330_v16  ;;  %16263 = vmatpush1.bf16.msra.mxu1 %v16262_v34  ;;  %v19938_v49 = vpop.permute.xlu1 %5182  ;;  %v2010_v0 = vmul.f32 %v1885_v24, %v19523_v6  ;;  %v3418_v54 = vrot.slane %v19841_v19, %v19872_v18  ;;  %v2011_v30 = vmul.f32 %v1889_v41, %v19530_v48 }
 0x1d8   : > { %8084 = vrot.lane.b32.xlu1 %v17393_v31, %s17668_s28  ;;  %17054 = vrot.lane.b32.xlu0 %v17053_v20, %s17668_s28  ;;  %v5187_v50 = vpop.permute.xlu0 %5186  ;;  %v3430_v19 = vrot.slane %v19794_v52, %v19872_v18  ;;  %v3422_v48 = vrot.slane %v19869_v5, %v19872_v18  ;;  %v17063_v32 = vpack.i.bf16 %v19965_v12, %v19962_v28  ;;  %v25700_v31 = vld [vmem:[#allocation14_spill] sm:$0xff] }
 0x1d9   : > { %15896 = vmatmul.mubr.msk.f32.vlgmr.msra.gmra.mrb[50].mxu0 %vm742_vm1, %v19741_v43  ;;  %16257 = vmatprep.subr.bf16.mxu0 %v16256_v22  ;;  %v5316_v6 = vsel %vm5272_vm4, %v5187_v50, %v19832_v2  ;;  %v5318_v59 = vsel %vm5272_vm4, %v19938_v49, %v5187_v50  ;;  %v2044_v57 = vadd.f32 %v2012_v58, %v25700_v31 }
 0x1da   : > { %16259 = vmatpush1.bf16.msra.mxu0 %v16258_v29  ;;  %5704 = vmatprep.subr.mxu1 %v5316_v6  ;;  %v2045_v24 = vadd.f32 %v2013_v36, %v25700_v31  ;;  %v3442_v5 = vrot.slane %v19799_v47, %v19872_v18  ;;  %v25701_v41 = vrot.slane %v19799_v47, %v19772_v45 }
 0x1db   : > { %5705 = vmatpush1.msra.mxu1 %v5318_v59  ;;  %v19972_v20 = vpop.permute.xlu1 %5206  ;;  %v2416_v52 = vpop.f32.mrb[16].mxu1  ;;  %5693 = vmatprep.mubr.f32.mxu0 %v25653_v62  ;;  %v2042_v34 = vadd.f32 %v2010_v0, %v25700_v31  ;;  %v2043_v29 = vadd.f32 %v2011_v30, %v25700_v31  ;;  %v19991_v0 = vld [vmem:[%s25518_s3 + $0x28] sm:$0xff] }
 0x1dc   : > { %v2016_v16 = vmul.f32 %v25701_v41, %v19349_v38  ;;  %8088 = vrot.lane.b32.xlu1 %v19850_v25, %s17668_s28  ;;  %8076 = vrot.lane.b32.xlu0 %v17395_v15, %s17668_s28  ;;  %v16960_v58 = vpop.permute.xlu0 %16959  ;;  %v3545_v36 = vmul.f32 %v3426_v37, %v2416_v52  ;;  %v2345_v22 = vpop.f32.mrb[16].mxu0  ;;  %v25702_v25 = vunpack.i.l.bf16 %v19726_v23  ;;  %v20008_v41 = vld [vmem:[%s25518_s3 + $0x90] sm:$0xff] }
 0x1dd   : > { %v16962_v6 = vunpack.i.h.bf16 %v16960_v58  ;;  %v16961_v59 = vunpack.i.l.bf16 %v16960_v58  ;;  %15899 = vmatmul.mubr.msk.f32.vlgmr.msra.gmra.mrb[52].mxu1 %vm742_vm1, %v19741_v43  ;;  %v3543_v50 = vmul.f32 %v3418_v54, %v2345_v22  ;;  %v2418_v47 = vpop.f32.mrb[17].mxu1  ;;  %v2347_v38 = vpop.f32.mrb[17].mxu0  ;;  %v20003_v54 = vld [vmem:[%s25518_s3 + $0x78] sm:$0xff] }
 0x1de   : > { %v5309_v37 = vsel %vm5272_vm4, %v25702_v25, %v16957_v11  ;;  %v19997_v15 = vadd.f32 %v3545_v36, %v2044_v57  ;;  %v3546_v30 = vmul.f32 %v3430_v19, %v2418_v47  ;;  %v3544_v52 = vmul.f32 %v3422_v48, %v2347_v38  ;;  %5906 = vmatprep.mubr.f32.mxu1 %v25653_v62 }
 0x1df   : > { %v20012_v23 = vsel %vm5272_vm4, %v16961_v59, %v16962_v6  ;;  %v20014_v57 = vadd.f32 %v3543_v50, %v2042_v34  ;;  %v25703_v19 = vunpack.i.l.bf16 %v19889_v9  ;;  %v5307_v58 = vsel %vm5272_vm4, %v16957_v11, %v16961_v59 }
 0x1e0   : > { %17069 = vrot.lane.b32.xlu1 %v17068_v1, %s17668_s28  ;;  %8080 = vrot.lane.b32.xlu0 %v19910_v60, %s17668_s28  ;;  %v20027_v36 = vadd.f32 %v3546_v30, %v2045_v24  ;;  %v20029_v22 = vadd.f32 %v3544_v52, %v2043_v29  ;;  %v25704_v34 = vrot.slane %v19810_v4, %v19772_v45  ;;  %v20038_v11 = vpop.permute.xlu1 %16974 }
 0x1e1   : > { %v20020_v48 = vsel %vm5272_vm4, %v16962_v6, %v25703_v19  ;;  %v1905_v47 = vrot.slane %v19991_v0, %v19772_v45  ;;  %v5179_v1 = vpop.permute.xlu0 %5178  ;;  %v16270_v59 = vpack.c.bf16 %v20012_v23, %v5309_v37  ;;  %v3446_v60 = vrot.slane %v19810_v4, %v19872_v18  ;;  %v20057_v4 = vld [vmem:[%s25518_s3 + $0x40] sm:$0xff] }
 0x1e2   : > { %v16268_v50 = vpack.c.bf16 %v20020_v48, %v5307_v58  ;;  %v2017_v6 = vmul.f32 %v25704_v34, %v19358_v3  ;;  %v5320_v3 = vsel %vm5272_vm4, %v5179_v1, %v19938_v49  ;;  %v5322_v38 = vsel %vm5272_vm4, %v19703_v53, %v5179_v1 }
 0x1e3   : > { %v2048_v25 = vadd.f32 %v2016_v16, %v25700_v31  ;;  %5633 = vmatprep.subr.mxu0 %v5320_v3  ;;  %v2558_v30 = vpop.f32.mrb[18].mxu1  ;;  %v3434_v52 = vrot.slane %v19879_v51, %v19872_v18  ;;  %v3438_v49 = vrot.slane %v19991_v0, %v19872_v18  ;;  %v25705_v53 = vrot.slane %v19879_v51, %v19772_v45 }
 0x1e4   : > { %16269 = vmatprep.subr.bf16.mxu1 %v16268_v50  ;;  %8100 = vrot.lane.b32.xlu1 %v19927_v46, %s17668_s28  ;;  %v3549_v16 = vmul.f32 %v3442_v5, %v2558_v30  ;;  %v16264_v50 = vpack.c.bf16 %v5307_v58, %v19895_v10  ;;  %v2560_v34 = vpop.f32.mrb[19].mxu1  ;;  %v2049_v1 = vadd.f32 %v2017_v6, %v25700_v31  ;;  %v20083_v10 = vld [vmem:[%s17744_s17 + $0xe8] sm:$0xff]  ;;  %v17402_v5 = vld [vmem:[%s17744_s17 + $0xe0] sm:$0xff]  ;;  %v20090_v58 = vld [vmem:[%s25518_s3 + $0x98] sm:$0xff] }
 0x1e5   : > { %16271 = vmatpush1.bf16.msra.mxu1 %v16270_v59  ;;  %v2014_v19 = vmul.f32 %v25705_v53, %v19544_v56  ;;  %17064 = vrot.lane.b32.xlu0 %v17063_v32, %s17668_s28  ;;  %v2015_v0 = vmul.f32 %v1905_v47, %v19552_v44  ;;  %v20073_v59 = vpop.permute.xlu1 %5198  ;;  %v3550_v51 = vmul.f32 %v3446_v60, %v2560_v34  ;;  %v5203_v3 = vpop.permute.xlu0 %5202  ;;  %v16967_v53 = vunpack.i.h.bf16 %v19889_v9 }
 0x1e6   : > { %5634 = vmatpush1.msra.mxu0 %v5322_v38  ;;  %v16266_v56 = vpack.c.bf16 %v5309_v37, %v19883_v55  ;;  %v1917_v46 = vrot.slane %v20057_v4, %v19772_v45  ;;  %v20078_v32 = vadd.f32 %v3549_v16, %v2048_v25  ;;  %v17078_v44 = vpack.i.bf16 %v20083_v10, %v17402_v5  ;;  %v20095_v55 = vld [vmem:[%s25518_s3 + $0x48] sm:$0xff] }
 0x1e7   : > { %15898 = vmatmul.mubr.msk.f32.vlgmr.msra.gmra.mrb[52].mxu0 %vm742_vm1, %v19741_v43  ;;  %16265 = vmatprep.subr.bf16.mxu0 %v16264_v50  ;;  %v20097_v37 = vadd.f32 %v3550_v51, %v2049_v1  ;;  %v5308_v6 = vsel %vm5272_vm4, %v5203_v3, %v19972_v20  ;;  %v5310_v47 = vsel %vm5272_vm4, %v20073_v59, %v5203_v3  ;;  %v2487_v60 = vpop.f32.mrb[18].mxu0  ;;  %v25557_v1 = vunpack.i.l.bf16 %v20038_v11 }
 0x1e8   : > { %16267 = vmatpush1.bf16.msra.mxu0 %v16266_v56  ;;  %5835 = vmatprep.mubr.f32.mxu0 %v25653_v62  ;;  %v25706_v38 = vrot.slane %v19817_v8, %v19772_v45  ;;  %v2046_v30 = vadd.f32 %v2014_v19, %v25700_v31  ;;  %v3547_v16 = vmul.f32 %v3434_v52, %v2487_v60  ;;  %v2489_v50 = vpop.f32.mrb[19].mxu0 }
 0x1e9   : > { %8104 = vrot.lane.b32.xlu1 %v19930_v21, %s17668_s28  ;;  %8092 = vrot.lane.b32.xlu0 %v19962_v28, %s17668_s28  ;;  %v2047_v34 = vadd.f32 %v2015_v0, %v25700_v31  ;;  %v20118_v51 = vpop.permute.xlu1 %5222  ;;  %v3458_v19 = vrot.slane %v19817_v8, %v19872_v18  ;;  %v25707_v21 = vrot.slane %v19822_v39, %v19772_v45  ;;  %v20135_v8 = vld [vmem:[%s25518_s3 + $0x60] sm:$0xff] }
 0x1ea   : > { %v2020_v25 = vmul.f32 %v25706_v38, %v19405_v33  ;;  %5846 = vmatprep.subr.mxu1 %v5308_v6  ;;  %v3548_v33 = vmul.f32 %v3438_v49, %v2489_v50  ;;  %v1921_v52 = vrot.slane %v20095_v55, %v19772_v45  ;;  %v16970_v0 = vpop.permute.xlu0 %16969  ;;  %v20130_v3 = vadd.f32 %v3547_v16, %v2046_v30  ;;  %v20152_v16 = vld [vmem:[%s17744_s17 + $0xd0] sm:$0xff]  ;;  %v20155_v50 = vld [vmem:[%s17744_s17 + $0xd8] sm:$0xff] }
 0x1eb   : > { %v2021_v56 = vmul.f32 %v25707_v21, %v19412_v13  ;;  %5847 = vmatpush1.msra.mxu1 %v5310_v47  ;;  %v16972_v49 = vunpack.i.h.bf16 %v16970_v0  ;;  %v16971_v6 = vunpack.i.l.bf16 %v16970_v0  ;;  %v3462_v60 = vrot.slane %v19822_v39, %v19872_v18 }
 0x1ec   : > { %15901 = vmatmul.mubr.msk.f32.vlgmr.msra.gmra.mrb[54].mxu1 %vm742_vm1, %v19741_v43  ;;  %v20139_v13 = vadd.f32 %v3548_v33, %v2047_v34  ;;  %v2052_v47 = vadd.f32 %v2020_v25, %v25700_v31  ;;  %v25708_v38 = vunpack.i.l.bf16 %v19889_v9  ;;  %v17073_v34 = vpack.i.bf16 %v20155_v50, %v20152_v16  ;;  %v2700_v39 = vpop.f32.mrb[20].mxu1 }
 0x1ed   : > { %17079 = vrot.lane.b32.xlu1 %v17078_v44, %s17668_s28  ;;  %8096 = vrot.lane.b32.xlu0 %v19965_v12, %s17668_s28  ;;  %v20161_v25 = vsel %vm5272_vm4, %v16971_v6, %v16972_v49  ;;  %v20163_v9 = vpop.permute.xlu1 %16984  ;;  %v20169_v44 = vsel %vm5272_vm4, %v16972_v49, %v25557_v1  ;;  %v5299_v12 = vsel %vm5272_vm4, %v16967_v53, %v16971_v6  ;;  %v2702_v21 = vpop.f32.mrb[21].mxu1  ;;  %v20182_v49 = vld [vmem:[%s25518_s3 + $0x68] sm:$0xff]  ;;  %v20204_v1 = vld [vmem:[%s25518_s3 + $0x80] sm:$0xff] }
 0x1ee   : > { %v5301_v30 = vsel %vm5272_vm4, %v25708_v38, %v16967_v53  ;;  %v3553_v33 = vmul.f32 %v3458_v19, %v2700_v39  ;;  %6048 = vmatprep.mubr.f32.mxu1 %v25653_v62  ;;  %v2053_v0 = vadd.f32 %v2021_v56, %v25700_v31  ;;  %v5195_v28 = vpop.permute.xlu0 %5194  ;;  %v16276_v29 = vpack.c.bf16 %v20169_v44, %v5299_v12  ;;  %v20187_v53 = vld [vmem:[%s25518_s3 + $0xb0] sm:$0xff] }
 0x1ef   : > { %v16278_v24 = vpack.c.bf16 %v20161_v25, %v5301_v30  ;;  %v5312_v19 = vsel %vm5272_vm4, %v5195_v28, %v20073_v59  ;;  %v5314_v6 = vsel %vm5272_vm4, %v19832_v2, %v5195_v28  ;;  %v3554_v39 = vmul.f32 %v3462_v60, %v2702_v21 }
 0x1f0   : > { %v20192_v56 = vadd.f32 %v3553_v33, %v2052_v47  ;;  %v2018_v38 = vmul.f32 %v1917_v46, %v19579_v27  ;;  %v3450_v59 = vrot.slane %v20057_v4, %v19872_v18  ;;  %v3454_v2 = vrot.slane %v20095_v55, %v19872_v18  ;;  %5775 = vmatprep.subr.mxu0 %v5312_v19 }
 0x1f1   : > { %8116 = vrot.lane.b32.xlu1 %v17402_v5, %s17668_s28  ;;  %17074 = vrot.lane.b32.xlu0 %v17073_v34, %s17668_s28  ;;  %v2019_v28 = vmul.f32 %v1921_v52, %v19590_v35  ;;  %v20213_v27 = vpop.permute.xlu1 %5214  ;;  %v20215_v46 = vadd.f32 %v3554_v39, %v2053_v0  ;;  %v16272_v60 = vpack.c.bf16 %v5299_v12, %v20020_v48  ;;  %v16977_v34 = vunpack.i.h.bf16 %v20038_v11  ;;  %v20303_v35 = vld [vmem:[%s17744_s17 + $0x18] sm:$0xff] }
 0x1f2   : > { %16277 = vmatprep.subr.bf16.mxu1 %v16276_v29  ;;  %5776 = vmatpush1.msra.mxu0 %v5314_v6  ;;  %v5219_v4 = vpop.permute.xlu0 %5218  ;;  %v16274_v55 = vpack.c.bf16 %v5301_v30, %v20012_v23  ;;  %v25709_v23 = vrot.slane %v19827_v7, %v19772_v45  ;;  %v2050_v30 = vadd.f32 %v2018_v38, %v25700_v31  ;;  %v25558_v0 = vunpack.i.l.bf16 %v20163_v9 }
 0x1f3   : > { %16279 = vmatpush1.bf16.msra.mxu1 %v16278_v24  ;;  %15900 = vmatmul.mubr.msk.f32.vlgmr.msra.gmra.mrb[54].mxu0 %vm742_vm1, %v19741_v43  ;;  %v5300_v48 = vsel %vm5272_vm4, %v5219_v4, %v20118_v51  ;;  %v5302_v29 = vsel %vm5272_vm4, %v20213_v27, %v5219_v4  ;;  %v2629_v52 = vpop.f32.mrb[20].mxu0  ;;  %v2051_v21 = vadd.f32 %v2019_v28, %v25700_v31  ;;  %v20256_v28 = vld [vmem:[%s17744_s17] sm:$0xff] }
 0x1f4   : > { %16273 = vmatprep.subr.bf16.mxu0 %v16272_v60  ;;  %v2024_v24 = vmul.f32 %v25709_v23, %v19461_v42  ;;  %v3551_v12 = vmul.f32 %v3450_v59, %v2629_v52  ;;  %v2631_v33 = vpop.f32.mrb[21].mxu0  ;;  %5988 = vmatprep.subr.mxu1 %v5300_v48  ;;  %v3474_v19 = vrot.slane %v19827_v7, %v19872_v18  ;;  %v25713_v48 = vunpack.i.l.bf16 %v20038_v11  ;;  %v20273_v52 = vld [vmem:[%s17744_s17 + $0xf8] sm:$0xff]  ;;  %v20278_v23 = vld [vmem:[%s17744_s17 + $0xf0] sm:$0xff] }
 0x1f5   : > { %16275 = vmatpush1.bf16.msra.mxu0 %v16274_v55  ;;  %8120 = vrot.lane.b32.xlu1 %v20083_v10, %s17668_s28  ;;  %v20245_v42 = vpop.permute.xlu1 %5238  ;;  %v3552_v38 = vmul.f32 %v3454_v2, %v2631_v33  ;;  %v25710_v10 = vrot.slane %v20003_v54, %v19772_v45  ;;  %v17093_v60 = vpack.i.bf16 %v25653_v62, %v20256_v28 }
 0x1f6   : > { %8108 = vrot.lane.b32.xlu0 %v20152_v16, %s17668_s28  ;;  %v16980_v39 = vpop.permute.xlu0 %16979  ;;  %v20253_v59 = vadd.f32 %v3551_v12, %v2050_v30  ;;  %5977 = vmatprep.mubr.f32.mxu0 %v25653_v62  ;;  %v2056_v55 = vadd.f32 %v2024_v24, %v25700_v31  ;;  %v17083_v30 = vpack.i.bf16 %v20273_v52, %v20278_v23 }
 0x1f7   : > { %v2025_v6 = vmul.f32 %v25710_v10, %v19468_v63  ;;  %5989 = vmatpush1.msra.mxu1 %v5302_v29  ;;  %v16982_v2 = vunpack.i.h.bf16 %v16980_v39  ;;  %v16981_v4 = vunpack.i.l.bf16 %v16980_v39  ;;  %v20263_v7 = vadd.f32 %v3552_v38, %v2051_v21 }
 0x1f8   : > { %25711 = vst [vmem:[#allocation14_spill] sm:$0xff] %v20253_v59  ;;  %15903 = vmatmul.mubr.msk.f32.vlgmr.msra.gmra.mrb[56].mxu1 %vm742_vm1, %v19741_v43  ;;  %v3478_v63 = vrot.slane %v20003_v54, %v19872_v18  ;;  %v5293_v29 = vsel %vm5272_vm4, %v25713_v48, %v16977_v34  ;;  %v2842_v12 = vpop.f32.mrb[22].mxu1  ;;  %v17103_v5 = vpack.i.bf16 %v20303_v35, %v25653_v62 }
 0x1f9   : > { %25712 = vst [vmem:[#allocation23_spill] sm:$0xff] %v20263_v7  ;;  %8128 = vrot.lane.b32.xlu1 %v20273_v52, %s17668_s28  ;;  %6190 = vmatprep.mubr.f32.mxu1 %v25653_v62  ;;  %v20285_v54 = vsel %vm5272_vm4, %v16981_v4, %v16982_v2  ;;  %v20289_v11 = vpop.permute.xlu1 %16994  ;;  %v20295_v24 = vsel %vm5272_vm4, %v16982_v2, %v25558_v0  ;;  %v2844_v38 = vpop.f32.mrb[23].mxu1  ;;  %v20310_v2 = vld [vmem:[%s25518_s3 + $0xb8] sm:$0xff] }
 0x1fa   : > { %8112 = vrot.lane.b32.xlu0 %v20155_v50, %s17668_s28  ;;  %v5291_v33 = vsel %vm5272_vm4, %v16977_v34, %v16981_v4  ;;  %v3557_v21 = vmul.f32 %v3474_v19, %v2842_v12  ;;  %v2057_v10 = vadd.f32 %v2025_v6, %v25700_v31  ;;  %v5211_v39 = vpop.permute.xlu0 %5210  ;;  %v16286_v47 = vpack.c.bf16 %v20285_v54, %v5293_v29  ;;  %v20315_v34 = vld [vmem:[%s25518_s3 + $0x88] sm:$0xff] }
 0x1fb   : > { %v16284_v48 = vpack.c.bf16 %v20295_v24, %v5291_v33  ;;  %v5304_v19 = vsel %vm5272_vm4, %v5211_v39, %v20213_v27  ;;  %v5306_v4 = vsel %vm5272_vm4, %v19972_v20, %v5211_v39  ;;  %v3558_v12 = vmul.f32 %v3478_v63, %v2844_v38 }
 0x1fc   : > { %v20320_v6 = vadd.f32 %v3557_v21, %v2056_v55  ;;  %v25715_v0 = vrot.slane %v20135_v8, %v19772_v45  ;;  %5917 = vmatprep.subr.mxu0 %v5304_v19  ;;  %v3466_v59 = vrot.slane %v20135_v8, %v19872_v18  ;;  %v3470_v27 = vrot.slane %v20182_v49, %v19872_v18 }
 0x1fd   : > { %17094 = vrot.lane.b32.xlu1 %v17093_v60, %s17669_s20  ;;  %v25716_v20 = vrot.slane %v20182_v49, %v19772_v45  ;;  %16285 = vmatprep.subr.bf16.mxu1 %v16284_v48  ;;  %v5231_v55 = vpop.permute.xlu1 %5230  ;;  %v16282_v49 = vpack.c.bf16 %v5293_v29, %v20161_v25  ;;  %v16987_v25 = vunpack.i.h.bf16 %v20163_v9  ;;  %v25559_v48 = vunpack.i.l.bf16 %v20289_v11 }
 0x1fe   : > { %25714 = vst [vmem:[#allocation24_spill] sm:$0xff] %v20320_v6  ;;  %v2022_v7 = vmul.f32 %v25715_v0, %v19621_v14  ;;  %17084 = vrot.lane.b32.xlu0 %v17083_v30, %s17668_s28  ;;  %v20339_v14 = vadd.f32 %v3558_v12, %v2057_v10  ;;  %v16280_v0 = vpack.c.bf16 %v5291_v33, %v20169_v44  ;;  %v5235_v21 = vpop.permute.xlu0 %5234 }
 0x1ff   : > { %v2023_v63 = vmul.f32 %v25716_v20, %v19637_v26  ;;  %5918 = vmatpush1.msra.mxu0 %v5306_v4  ;;  %16287 = vmatpush1.bf16.msra.mxu1 %v16286_v47  ;;  %v5292_v26 = vsel %vm5272_vm4, %v5235_v21, %v20245_v42  ;;  %v5294_v44 = vsel %vm5272_vm4, %v5231_v55, %v5235_v21  ;;  %v2771_v30 = vpop.f32.mrb[22].mxu0 }
 0x200   : > { %25717 = vst [vmem:[#allocation25_spill] sm:$0xff] %v20339_v14  ;;  %15902 = vmatmul.mubr.msk.f32.vlgmr.msra.gmra.mrb[56].mxu0 %vm742_vm1, %v19741_v43  ;;  %16281 = vmatprep.subr.bf16.mxu0 %v16280_v0  ;;  %v25718_v33 = vrot.slane %v20008_v41, %v19772_v45  ;;  %v2054_v38 = vadd.f32 %v2022_v7, %v25700_v31  ;;  %v2773_v10 = vpop.f32.mrb[23].mxu0  ;;  %v20383_v0 = vld [vmem:[%s17744_s17 + $0x30] sm:$0xff] }
 0x201   : > { %16283 = vmatpush1.bf16.msra.mxu0 %v16282_v49  ;;  %17104 = vrot.lane.b32.xlu1 %v17103_v5, %s17669_s20  ;;  %v3555_v29 = vmul.f32 %v3466_v59, %v2771_v30  ;;  %v2055_v39 = vadd.f32 %v2023_v63, %v25700_v31  ;;  %v3556_v7 = vmul.f32 %v3470_v27, %v2773_v10  ;;  %v20401_v30 = vld [vmem:[%s17744_s17 + $0x8] sm:$0xff] }
 0x202   : > { %v2028_v47 = vmul.f32 %v25718_v33, %v19567_v17  ;;  %8124 = vrot.lane.b32.xlu0 %v20278_v23, %s17668_s28  ;;  %6130 = vmatprep.subr.mxu1 %v5292_v26  ;;  %v20365_v17 = vpop.permute.xlu1 %5254  ;;  %v3490_v19 = vrot.slane %v20008_v41, %v19872_v18  ;;  %v25719_v5 = vrot.slane %v20090_v58, %v19772_v45  ;;  %v16990_v4 = vpop.permute.xlu0 %16989  ;;  %v25722_v26 = vunpack.i.l.bf16 %v20163_v9 }
 0x203   : > { %6131 = vmatpush1.msra.mxu1 %v5294_v44  ;;  %v20373_v12 = vadd.f32 %v3555_v29, %v2054_v38  ;;  %6119 = vmatprep.mubr.f32.mxu0 %v25653_v62  ;;  %v3494_v20 = vrot.slane %v20090_v58, %v19872_v18  ;;  %v16992_v27 = vunpack.i.h.bf16 %v16990_v4  ;;  %v16991_v63 = vunpack.i.l.bf16 %v16990_v4  ;;  %v20398_v44 = vld [vmem:[%s17744_s17 + $0x10] sm:$0xff] }
 0x204   : > { %v2029_v59 = vmul.f32 %v25719_v5, %v19581_v40  ;;  %15905 = vmatmul.mubr.msk.f32.vlgmr.msra.gmra.mrb[58].mxu1 %vm742_vm1, %v19741_v43  ;;  %v20380_v41 = vadd.f32 %v3556_v7, %v2055_v39  ;;  %v20386_v40 = vld [vmem:[%s17744_s17 + $0x38] sm:$0xff]  ;;  %v2060_v49 = vadd.f32 %v2028_v47, %v25700_v31  ;;  %v5285_v58 = vsel %vm5272_vm4, %v25722_v26, %v16987_v25  ;;  %v2984_v38 = vpop.f32.mrb[24].mxu1 }
 0x205   : > { %25720 = vst [vmem:[#allocation26_spill] sm:$0xff] %v20373_v12  ;;  %v17113_v21 = vpack.i.bf16 %v20386_v40, %v20383_v0  ;;  %9549 = vrot.lane.b32.xlu1 %v20303_v35, %s17669_s20  ;;  %v17098_v33 = vpack.i.bf16 %v20398_v44, %v20401_v30  ;;  %6332 = vmatprep.mubr.f32.mxu1 %v25653_v62  ;;  %v2986_v7 = vpop.f32.mrb[25].mxu1 }
 0x206   : > { %25721 = vst [vmem:[#allocation27_spill] sm:$0xff] %v20380_v41  ;;  %v20408_v9 = vsel %vm5272_vm4, %v16991_v63, %v16992_v27  ;;  %17089 = vrot.lane.b32.xlu0 %v25653_v62, %s17668_s28  ;;  %v20412_v47 = vpop.permute.xlu1 %5242  ;;  %v20418_v29 = vsel %vm5272_vm4, %v16992_v27, %v25559_v48  ;;  %v5283_v10 = vsel %vm5272_vm4, %v16987_v25, %v16991_v63  ;;  %v5227_v4 = vpop.permute.xlu0 %5226  ;;  %v20433_v25 = vld [vmem:[%s17744_s17 + $0x20] sm:$0xff]  ;;  %v25724_v63 = vld [vmem:[#allocation5_spill] sm:$0xff] }
 0x207   : > { %v3561_v39 = vmul.f32 %v3490_v19, %v2984_v38  ;;  %v2061_v5 = vadd.f32 %v2029_v59, %v25700_v31  ;;  %v16292_v26 = vpack.c.bf16 %v20418_v29, %v5283_v10  ;;  %v16294_v60 = vpack.c.bf16 %v20408_v9, %v5285_v58  ;;  %v20436_v19 = vld [vmem:[%s17744_s17 + $0x28] sm:$0xff] }
 0x208   : > { %v3562_v8 = vmul.f32 %v3494_v20, %v2986_v7  ;;  %v5296_v41 = vsel %vm5272_vm4, %v5227_v4, %v5231_v55  ;;  %v5298_v27 = vsel %vm5272_vm4, %v20118_v51, %v5227_v4  ;;  %v17108_v59 = vpack.i.bf16 %v20436_v19, %v20433_v25 }
 0x209   : > { %v20427_v12 = vadd.f32 %v3561_v39, %v2060_v49  ;;  %v25725_v20 = vrot.slane %v20204_v1, %v19772_v45  ;;  %17114 = vrot.lane.b32.xlu1 %v17113_v21, %s17669_s20  ;;  %6059 = vmatprep.subr.mxu0 %v5296_v41  ;;  %v3482_v51 = vrot.slane %v20204_v1, %v19872_v18  ;;  %v25727_v49 = vld [vmem:[#allocation9_spill] sm:$0xff] }
 0x20a   : > { %v20445_v55 = vadd.f32 %v3562_v8, %v2061_v5  ;;  %v25728_v39 = vrot.slane %v20315_v34, %v19772_v45  ;;  %17099 = vrot.lane.b32.xlu0 %v17098_v33, %s17669_s20  ;;  %16293 = vmatprep.subr.bf16.mxu1 %v16292_v26  ;;  %v20454_v4 = vpop.permute.xlu1 %5258  ;;  %v16288_v21 = vpack.c.bf16 %v5283_v10, %v20295_v24  ;;  %v5251_v41 = vpop.permute.xlu0 %5250  ;;  %v20463_v5 = vld [vmem:[%s25518_s3 + $0xa0] sm:$0xff] }
 0x20b   : > { %25723 = vst [vmem:[#allocation28_spill] sm:$0xff] %v20427_v12  ;;  %v2026_v38 = vmul.f32 %v25725_v20, %v25724_v63  ;;  %v3486_v8 = vrot.slane %v20315_v34, %v19872_v18  ;;  %6060 = vmatpush1.msra.mxu0 %v5298_v27  ;;  %16295 = vmatpush1.bf16.msra.mxu1 %v16294_v60  ;;  %v20471_v33 = vld [vmem:[%s17744_s17 + $0x40] sm:$0xff]  ;;  %v20474_v34 = vld [vmem:[%s17744_s17 + $0x48] sm:$0xff]  ;;  %v2913_v60 = vpop.f32.mrb[24].mxu0 }
 0x20c   : > { %25726 = vst [vmem:[#allocation5_spill] sm:$0xff] %v20445_v55  ;;  %v2027_v7 = vmul.f32 %v25728_v39, %v25727_v49  ;;  %v16290_v1 = vpack.c.bf16 %v5285_v58, %v20285_v54  ;;  %15904 = vmatmul.mubr.msk.f32.vlgmr.msra.gmra.mrb[58].mxu0 %vm742_vm1, %v19741_v43  ;;  %16289 = vmatprep.subr.bf16.mxu0 %v16288_v21  ;;  %v25729_v10 = vld [vmem:[#allocation16_spill] sm:$0xff]  ;;  %v2915_v49 = vpop.f32.mrb[25].mxu0 }
 0x20d   : > { %v5284_v24 = vsel %vm5272_vm4, %v5251_v41, %v20365_v17  ;;  %v17118_v54 = vpack.i.bf16 %v20474_v34, %v20471_v33  ;;  %v3506_v58 = vrot.slane %v20187_v53, %v19872_v18  ;;  %v25730_v26 = vrot.slane %v20187_v53, %v19772_v45  ;;  %9557 = vrot.lane.b32.xlu1 %v20436_v19, %s17669_s20  ;;  %v25731_v39 = vld [vmem:[#allocation8_spill] sm:$0xff] }
 0x20e   : > { %v2058_v63 = vadd.f32 %v2026_v38, %v25700_v31  ;;  %16291 = vmatpush1.bf16.msra.mxu0 %v16290_v1  ;;  %v3559_v20 = vmul.f32 %v3482_v51, %v2913_v60  ;;  %v25732_v21 = vrot.slane %v20310_v2, %v19772_v45  ;;  %v2059_v55 = vadd.f32 %v2027_v7, %v25700_v31  ;;  %v20495_v53 = vld [vmem:[%s25518_s3 + $0xa8] sm:$0xff]  ;;  %v20498_v38 = vpop.permute.xlu1 %17004 }
 0x20f   : > { %v2032_v27 = vmul.f32 %v25730_v26, %v25729_v10  ;;  %17109 = vrot.lane.b32.xlu0 %v17108_v59, %s17669_s20  ;;  %6272 = vmatprep.subr.mxu1 %v5284_v24  ;;  %v3560_v1 = vmul.f32 %v3486_v8, %v2915_v49  ;;  %v1965_v51 = vrot.slane %v20463_v5, %v19772_v45  ;;  %v16997_v60 = vunpack.i.h.bf16 %v20289_v11  ;;  %v20503_v10 = vpop.permute.xlu0 %16999 }
 0x210   : > { %v2033_v48 = vmul.f32 %v25732_v21, %v25731_v39  ;;  %v20505_v26 = vadd.f32 %v3559_v20, %v2058_v63  ;;  %6261 = vmatprep.mubr.f32.mxu0 %v25653_v62  ;;  %v3510_v7 = vrot.slane %v20310_v2, %v19872_v18  ;;  %v17001_v59 = vunpack.i.l.bf16 %v20503_v10  ;;  %v3126_v49 = vpop.f32.mrb[26].mxu1  ;;  %v25735_v21 = vld [vmem:[#allocation10_spill] sm:$0xff] }
 0x211   : > { %v20511_v24 = vadd.f32 %v3560_v1, %v2059_v55  ;;  %v1969_v8 = vrot.slane %v20495_v53, %v19772_v45  ;;  %17119 = vrot.lane.b32.xlu1 %v17118_v54, %s17669_s20  ;;  %v2064_v39 = vadd.f32 %v2032_v27, %v25700_v31  ;;  %v3565_v2 = vmul.f32 %v3506_v58, %v3126_v49  ;;  %v3128_v1 = vpop.f32.mrb[27].mxu1  ;;  %v25738_v54 = vld [vmem:[#allocation13_spill] sm:$0xff] }
 0x212   : > { %25733 = vst [vmem:[#allocation9_spill] sm:$0xff] %v20505_v26  ;;  %v2065_v63 = vadd.f32 %v2033_v48, %v25700_v31  ;;  %v20520_v20 = vpop.permute.xlu1 %17014  ;;  %v25736_v26 = vunpack.i.h.bf16 %v25735_v21  ;;  %v5277_v27 = vsel %vm5272_vm4, %v25738_v54, %v17001_v59  ;;  %v5273_v48 = vsel %vm5272_vm4, %v16997_v60, %v25738_v54 }
 0x213   : > { %25734 = vst [vmem:[#allocation16_spill] sm:$0xff] %v20511_v24  ;;  %9553 = vrot.lane.b32.xlu0 %v20433_v25, %s17669_s20  ;;  %v25737_v24 = vld [vmem:[#allocation15_spill] sm:$0xff]  ;;  %v5247_v14 = vpop.permute.xlu0 %5246  ;;  %v3566_v6 = vmul.f32 %v3510_v7, %v3128_v1  ;;  %v20538_v49 = vadd.f32 %v3565_v2, %v2064_v39  ;;  %v17002_v21 = vunpack.i.h.bf16 %v20503_v10  ;;  %v25742_v39 = vld [vmem:[#allocation12_spill] sm:$0xff] }
 0x214   : > { %v5274_v55 = vsel %vm5272_vm4, %v17001_v59, %v25736_v26  ;;  %v2030_v12 = vmul.f32 %v1965_v51, %v25737_v24  ;;  %v5288_v58 = vsel %vm5272_vm4, %v20412_v47, %v5247_v14  ;;  %v5286_v26 = vsel %vm5272_vm4, %v5247_v14, %v5251_v41  ;;  %v20543_v59 = vld [vmem:[%s25518_s3 + $0xd0] sm:$0xff]  ;;  %v20584_v1 = vld [vmem:[%s25518_s3 + $0xc0] sm:$0xff] }
 0x215   : > { %25739 = vst [vmem:[#allocation8_spill] sm:$0xff] %v20538_v49  ;;  %v16300_v51 = vpack.c.bf16 %v5274_v55, %v5273_v48  ;;  %v25740_v24 = vunpack.i.l.bf16 %v20289_v11  ;;  %9569 = vrot.lane.b32.xlu1 %v20471_v33, %s17669_s20  ;;  %6201 = vmatprep.subr.mxu0 %v5288_v58  ;;  %v20552_v14 = vadd.f32 %v3566_v6, %v2065_v63 }
 0x216   : > { %v3498_v41 = vrot.slane %v20463_v5, %v19872_v18  ;;  %v2031_v2 = vmul.f32 %v1969_v8, %v25742_v39  ;;  %6273 = vmatpush1.msra.mxu1 %v5286_v26  ;;  %v5290_v11 = vsel %vm5272_vm4, %v20245_v42, %v20412_v47  ;;  %v3502_v6 = vrot.slane %v20495_v53, %v19872_v18  ;;  %v20570_v5 = vld [vmem:[%s25518_s3 + $0xd8] sm:$0xff] }
 0x217   : > { %v5276_v7 = vsel %vm5272_vm4, %v25740_v24, %v16997_v60  ;;  %25741 = vst [vmem:[#allocation10_spill] sm:$0xff] %v20552_v14  ;;  %9543 = vrot.lane.b32.xlu0 %v20398_v44, %s17669_s20  ;;  %v20563_v60 = vpop.permute.xlu1 %8016  ;;  %6202 = vmatpush1.msra.mxu0 %v5290_v11  ;;  %v5263_v10 = vpop.permute.xlu0 %5262  ;;  %v16296_v8 = vpack.c.bf16 %v5273_v48, %v20418_v29  ;;  %v25744_v29 = vld [vmem:[#allocation11_spill] sm:$0xff] }
 0x218   : > { %25743 = vst [vmem:[#allocation15_spill] sm:$0xff] %v20563_v60  ;;  %15907 = vmatmul.mubr.msk.f32.vlgmr.msra.gmra.mrb[60].mxu1 %vm742_vm1, %v19741_v43  ;;  %v16302_v63 = vpack.c.bf16 %v5277_v27, %v5276_v7  ;;  %v2062_v42 = vadd.f32 %v2030_v12, %v25700_v31  ;;  %v1989_v47 = vrot.slane %v20543_v59, %v19772_v45  ;;  %v3055_v55 = vpop.f32.mrb[26].mxu0  ;;  %v25745_v54 = vunpack.i.l.bf16 %v25744_v29  ;;  %v20617_v11 = vld [vmem:[%s17744_s17 + $0x60] sm:$0xff] }
 0x219   : > { %16301 = vmatprep.subr.bf16.mxu1 %v16300_v51  ;;  %15906 = vmatmul.mubr.msk.f32.vlgmr.msra.gmra.mrb[60].mxu0 %vm742_vm1, %v19741_v43  ;;  %v16298_v53 = vpack.c.bf16 %v5276_v7, %v20408_v9  ;;  %v5280_v27 = vsel %vm5272_vm4, %v20454_v4, %v5263_v10  ;;  %v3563_v9 = vmul.f32 %v3498_v41, %v3055_v55  ;;  %v3057_v48 = vpop.f32.mrb[27].mxu0  ;;  %v20601_v7 = vld [vmem:[%s25518_s3 + $0xc8] sm:$0xff]  ;;  %v20606_v41 = vld [vmem:[%s25518_s3 + $0xf0] sm:$0xff]  ;;  %v20631_v55 = vld [vmem:[%s25518_s3 + $0xf8] sm:$0xff] }
 0x21a   : > { %16297 = vmatprep.subr.bf16.mxu0 %v16296_v8  ;;  %16303 = vmatpush1.bf16.msra.mxu1 %v16302_v63  ;;  %v5275_v12 = vsel %vm5272_vm4, %v17002_v21, %v25745_v54  ;;  %v2063_v58 = vadd.f32 %v2031_v2, %v25700_v31  ;;  %v1993_v26 = vrot.slane %v20570_v5, %v19772_v45  ;;  %v20636_v29 = vld [vmem:[%s25518_s3 + $0xe0] sm:$0xff]  ;;  %v20641_v54 = vld [vmem:[%s25518_s3 + $0xe8] sm:$0xff] }
 0x21b   : > { %16299 = vmatpush1.bf16.msra.mxu0 %v16298_v53  ;;  %6414 = vmatprep.subr.mxu1 %v5275_v12  ;;  %v20596_v51 = vpop.permute.xlu1 %17024  ;;  %v3564_v24 = vmul.f32 %v3502_v6, %v3057_v48  ;;  %v20612_v39 = vpop.permute.xlu0 %17009  ;;  %v16308_v2 = vpack.c.bf16 %v20303_v35, %v20401_v30  ;;  %v20620_v6 = vld [vmem:[%s17744_s17 + $0x68] sm:$0xff]  ;;  %v20624_v63 = vadd.f32 %v3563_v9, %v2062_v42 }
 0x21c   : > { %9573 = vrot.lane.b32.xlu1 %v20474_v34, %s17669_s20  ;;  %9561 = vrot.lane.b32.xlu0 %v20383_v0, %s17669_s20  ;;  %v17128_v8 = vpack.i.bf16 %v20620_v6, %v20617_v11  ;;  %v1981_v53 = vrot.slane %v20584_v1, %v19772_v45  ;;  %v5278_v42 = vsel %vm5272_vm4, %v5263_v10, %v17002_v21  ;;  %v25750_v10 = vld [vmem:[#allocation7_spill] sm:$0xff] }
 0x21d   : > { %25746 = vst [vmem:[#allocation13_spill] sm:$0xff] %v20624_v63  ;;  %6343 = vmatprep.subr.mxu0 %v5280_v27  ;;  %6474 = vmatprep.mubr.f32.mxu1 %v25653_v62  ;;  %v20646_v12 = vadd.f32 %v3564_v24, %v2063_v58  ;;  %v5282_v9 = vsel %vm5272_vm4, %v20365_v17, %v20454_v4  ;;  %v25749_v58 = vld [vmem:[#allocation4_spill] sm:$0xff]  ;;  %v25751_v63 = vld [vmem:[#allocation17_spill] sm:$0xff] }
 0x21e   : > { %6415 = vmatpush1.msra.mxu1 %v5278_v42  ;;  %6403 = vmatprep.mubr.f32.mxu0 %v25653_v62  ;;  %v16304_v48 = vpack.c.bf16 %v20401_v30, %v25653_v62  ;;  %v16310_v27 = vpack.c.bf16 %v20398_v44, %v20256_v28  ;;  %v1985_v21 = vrot.slane %v20601_v7, %v19772_v45 }
 0x21f   : > { %25747 = vst [vmem:[#allocation12_spill] sm:$0xff] %v20646_v12  ;;  %6344 = vmatpush1.msra.mxu0 %v5282_v9  ;;  %15909 = vmatmul.mubr.msk.f32.vlgmr.msra.gmra.mrb[62].mxu1 %vm742_vm1, %v19741_v43  ;;  %v16306_v17 = vpack.c.bf16 %v20256_v28, %v25653_v62  ;;  %v20665_v4 = vpop.permute.xlu1 %8024  ;;  %v20674_v42 = vpop.permute.xlu0 %17019  ;;  %v17419_v43 = vld [vmem:[%s25516_s1 + $0xc] sm:$0xf]  ;;  %v20683_v28 = vld [vmem:[%s17744_s17 + $0x50] sm:$0xff]  ;;  %v20686_v9 = vld [vmem:[%s17744_s17 + $0x58] sm:$0xff]  ;;  %v16312_v24 = vpack.c.bf16 %v20436_v19, %v20303_v35 }
 0x220   : > { %25748 = vst [vmem:[#allocation11_spill] sm:$0xff] %v20665_v4  ;;  %16309 = vmatprep.subr.bf16.mxu1 %v16308_v2  ;;  %17129 = vrot.lane.b32.xlu1 %v17128_v8, %s17669_s20  ;;  %v17123_v2 = vpack.i.bf16 %v20686_v9, %v20683_v28  ;;  %v16316_v8 = vpack.c.bf16 %v20386_v40, %v20436_v19 }
 0x221   : > { %9565 = vrot.lane.b32.xlu0 %v20386_v40, %s17669_s20  ;;  %15908 = vmatmul.mubr.msk.f32.vlgmr.msra.gmra.mrb[62].mxu0 %vm742_vm1, %v17419_v43  ;;  %v2036_v30 = vmul.f32 %v1989_v47, %v25749_v58  ;;  %v2037_v12 = vmul.f32 %v1993_v26, %v25750_v10  ;;  %v3522_v43 = vrot.slane %v20543_v59, %v19872_v18  ;;  %v25753_v26 = vld [vmem:[#allocation18_spill] sm:$0xff] }
 0x222   : > { %16305 = vmatprep.subr.bf16.mxu0 %v16304_v48  ;;  %16311 = vmatpush1.bf16.msra.mxu1 %v16310_v27  ;;  %v2034_v14 = vmul.f32 %v1981_v53, %v25751_v63  ;;  %v3514_v4 = vrot.slane %v20584_v1, %v19872_v18  ;;  %v3526_v47 = vrot.slane %v20570_v5, %v19872_v18  ;;  %v20728_v53 = vld [vmem:[%s17744_s17 + $0x80] sm:$0xff]  ;;  %v20731_v27 = vld [vmem:[%s17744_s17 + $0x88] sm:$0xff] }
 0x223   : > { %16307 = vmatpush1.bf16.msra.mxu0 %v16306_v17  ;;  %6753 = vmatprep.subr.mxu1 %v20436_v19  ;;  %v20700_v49 = vpop.permute.xlu1 %17029  ;;  %v2035_v48 = vmul.f32 %v1985_v21, %v25753_v26  ;;  %v20713_v19 = vld [vmem:[%s25516_s1 + $0x10] sm:$0xf]  ;;  %v20715_v59 = vpop.permute.xlu0 %8020  ;;  %v16318_v1 = vpack.c.bf16 %v20383_v0, %v20433_v25  ;;  %v3518_v5 = vrot.slane %v20601_v7, %v19872_v18 }
 0x224   : > { %25752 = vst [vmem:[#allocation4_spill] sm:$0xff] %v20700_v49  ;;  %9585 = vrot.lane.b32.xlu1 %v20617_v11, %s17669_s20  ;;  %6682 = vmatprep.subr.mxu0 %v20303_v35  ;;  %25754 = vst [vmem:[#allocation7_spill] sm:$0xff] %v20715_v59  ;;  %v16314_v35 = vpack.c.bf16 %v20433_v25, %v20398_v44  ;;  %v17138_v21 = vpack.i.bf16 %v20731_v27, %v20728_v53  ;;  %v3268_v10 = vpop.f32.mrb[28].mxu1 }
 0x225   : > { %17124 = vrot.lane.b32.xlu0 %v17123_v2, %s17669_s20  ;;  %6813 = vmatprep.mubr.f32.mxu1 %v25653_v62  ;;  %v2068_v7 = vadd.f32 %v2036_v30, %v25700_v31  ;;  %v2069_v17 = vadd.f32 %v2037_v12, %v25700_v31  ;;  %v3569_v58 = vmul.f32 %v3522_v43, %v3268_v10  ;;  %v3197_v2 = vpop.f32.mrb[28].mxu0  ;;  %v3270_v26 = vpop.f32.mrb[29].mxu1 }
 0x226   : > { %6754 = vmatpush1.msra.mxu1 %v20433_v25  ;;  %6742 = vmatprep.mubr.f32.mxu0 %v25653_v62  ;;  %v2066_v63 = vadd.f32 %v2034_v14, %v25700_v31  ;;  %v3567_v60 = vmul.f32 %v3514_v4, %v3197_v2  ;;  %v3570_v30 = vmul.f32 %v3526_v47, %v3270_v26  ;;  %v3199_v59 = vpop.f32.mrb[29].mxu0  ;;  %v25758_v47 = vld [vmem:[#allocation19_spill] sm:$0xff]  ;;  %v25760_v2 = vld [vmem:[#allocation20_spill] sm:$0xff] }
 0x227   : > { %6683 = vmatpush1.msra.mxu0 %v20398_v44  ;;  %15912 = vmatmul.mubr.msk.f32.vlgmr.msra.gmra.mrb[64].mxu1 %vm742_vm1, %v20713_v19  ;;  %v20743_v49 = vpop.permute.xlu1 %8036  ;;  %v2067_v12 = vadd.f32 %v2035_v48, %v25700_v31  ;;  %v20748_v25 = vpop.permute.xlu0 %8010  ;;  %v20750_v43 = vadd.f32 %v3569_v58, %v2068_v7  ;;  %v3568_v14 = vmul.f32 %v3518_v5, %v3199_v59 }
 0x228   : > { %16317 = vmatprep.subr.bf16.mxu1 %v16316_v8  ;;  %15911 = vmatmul.mubr.msk.f32.vlgmr.msra.gmra.mrb[64].mxu0 %vm742_vm1, %v20713_v19  ;;  %v20752_v44 = vadd.f32 %v3567_v60, %v2066_v63  ;;  %v20754_v10 = vadd.f32 %v3570_v30, %v2069_v17  ;;  %v3538_v4 = vrot.slane %v20606_v41, %v19872_v18 }
 0x229   : > { %25755 = vst [vmem:[#allocation17_spill] sm:$0xff] %v20750_v43  ;;  %16313 = vmatprep.subr.bf16.mxu0 %v16312_v24  ;;  %16319 = vmatpush1.bf16.msra.mxu1 %v16318_v1  ;;  %v25759_v8 = vrot.slane %v20606_v41, %v19772_v45  ;;  %v25761_v7 = vrot.slane %v20631_v55, %v19772_v45  ;;  %v25763_v24 = vld [vmem:[#allocation21_spill] sm:$0xff] }
 0x22a   : > { %25756 = vst [vmem:[#allocation18_spill] sm:$0xff] %v20752_v44  ;;  %25757 = vst [vmem:[#allocation29_spill] sm:$0xff] %v20754_v10  ;;  %16315 = vmatpush1.bf16.msra.mxu0 %v16314_v35  ;;  %9589 = vrot.lane.b32.xlu1 %v20620_v6, %s17669_s20  ;;  %v20768_v60 = vadd.f32 %v3568_v14, %v2067_v12  ;;  %v25764_v59 = vrot.slane %v20636_v29, %v19772_v45  ;;  %v25765_v35 = vld [vmem:[#allocation22_spill] sm:$0xff]  ;;  %v25789_v10 = vunpack.i.l.bf16 %v20596_v51 }
 0x22b   : > { %v2040_v48 = vmul.f32 %v25759_v8, %v25758_v47  ;;  %v2041_v58 = vmul.f32 %v25761_v7, %v25760_v2  ;;  %9577 = vrot.lane.b32.xlu0 %v20683_v28, %s17669_s20  ;;  %6895 = vmatprep.subr.mxu1 %v20474_v34  ;;  %v3530_v41 = vrot.slane %v20636_v29, %v19872_v18  ;;  %v20789_v30 = vpop.permute.xlu1 %8040  ;;  %v20791_v12 = vpop.permute.xlu0 %8028  ;;  %v20802_v14 = vld [vmem:[%s17744_s17 + $0x70] sm:$0xff] }
 0x22c   : > { %25762 = vst [vmem:[#allocation19_spill] sm:$0xff] %v20768_v60  ;;  %v2038_v1 = vmul.f32 %v25764_v59, %v25763_v24  ;;  %v3542_v5 = vrot.slane %v20631_v55, %v19872_v18  ;;  %v25766_v63 = vrot.slane %v20641_v54, %v19772_v45  ;;  %6824 = vmatprep.subr.mxu0 %v20386_v40  ;;  %v3410_v8 = vpop.f32.mrb[30].mxu1  ;;  %v3339_v7 = vpop.f32.mrb[30].mxu0  ;;  %v25788_v60 = vld [vmem:[#allocation4_spill] sm:$0xff] }
 0x22d   : > { %6955 = vmatprep.mubr.f32.mxu1 %v25653_v62  ;;  %v16320_v26 = vpack.c.bf16 %v20474_v34, %v20386_v40  ;;  %v3534_v29 = vrot.slane %v20641_v54, %v19872_v18  ;;  %6896 = vmatpush1.msra.mxu1 %v20471_v33  ;;  %v16326_v45 = vpack.c.bf16 %v20683_v28, %v20471_v33  ;;  %v20805_v40 = vld [vmem:[%s17744_s17 + $0x78] sm:$0xff] }
 0x22e   : > { %v2039_v17 = vmul.f32 %v25766_v63, %v25765_v35  ;;  %6884 = vmatprep.mubr.f32.mxu0 %v25653_v62  ;;  %v16322_v55 = vpack.c.bf16 %v20471_v33, %v20383_v0  ;;  %v17133_v47 = vpack.i.bf16 %v20805_v40, %v20802_v14  ;;  %v2072_v18 = vadd.f32 %v2040_v48, %v25700_v31  ;;  %v3412_v33 = vpop.f32.mrb[31].mxu1  ;;  %v3341_v63 = vpop.f32.mrb[31].mxu0 }
 0x22f   : > { %v2073_v54 = vadd.f32 %v2041_v58, %v25700_v31  ;;  %6825 = vmatpush1.msra.mxu0 %v20383_v0  ;;  %15914 = vmatmul.mubr.msk.f32.vlgmr.msra.gmra.mrb[66].mxu1 %vm742_vm1, %v20713_v19  ;;  %v3573_v2 = vmul.f32 %v3538_v4, %v3410_v8  ;;  %v2070_v24 = vadd.f32 %v2038_v1, %v25700_v31  ;;  %v20824_v0 = vpop.permute.xlu1 %17039  ;;  %v20826_v4 = vpop.permute.xlu0 %8032  ;;  %v20879_v8 = vld [vmem:[%s17744_s17 + $0xa8] sm:$0xff] }
 0x230   : > { %v25767_v59 = vpack.c.bf16 %v20686_v9, %v20474_v34  ;;  %17139 = vrot.lane.b32.xlu1 %v17138_v21, %s17669_s20  ;;  %v3571_v35 = vmul.f32 %v3530_v41, %v3339_v7  ;;  %v3574_v48 = vmul.f32 %v3542_v5, %v3412_v33  ;;  %v2071_v58 = vadd.f32 %v2039_v17, %v25700_v31  ;;  %v20893_v33 = vld [vmem:[%s17744_s17 + $0x90] sm:$0xff] }
 0x231   : > { %9581 = vrot.lane.b32.xlu0 %v20686_v9, %s17669_s20  ;;  %15913 = vmatmul.mubr.msk.f32.vlgmr.msra.gmra.mrb[66].mxu0 %vm742_vm1, %v20713_v19  ;;  %v20828_v1 = vadd.f32 %v3573_v2, %v2072_v18  ;;  %v3572_v34 = vmul.f32 %v3534_v29, %v3341_v63  ;;  %v16332_v5 = vpack.c.bf16 %v20805_v40, %v20620_v6 }
 0x232   : > { %16325 = vmatprep.subr.bf16.mxu1 %v25767_v59  ;;  %16321 = vmatprep.subr.bf16.mxu0 %v16320_v26  ;;  %v20830_v21 = vadd.f32 %v3571_v35, %v2070_v24  ;;  %v20832_v41 = vadd.f32 %v3574_v48, %v2073_v54  ;;  %v16328_v17 = vpack.c.bf16 %v20620_v6, %v20686_v9  ;;  %v25772_v54 = vld [vmem:[#allocation6_spill] sm:$0xff] }
 0x233   : > { %25768 = vst [vmem:[#allocation20_spill] sm:$0xff] %v20828_v1  ;;  %16327 = vmatpush1.bf16.msra.mxu1 %v16326_v45  ;;  %16323 = vmatpush1.bf16.msra.mxu0 %v16322_v55  ;;  %v20835_v31 = vadd.f32 %v3572_v34, %v2071_v58  ;;  %v16334_v26 = vpack.c.bf16 %v20802_v14, %v20617_v11  ;;  %v20848_v29 = vpop.permute.xlu1 %8052  ;;  %v20850_v45 = vpop.permute.xlu0 %17034  ;;  %v20884_v2 = vsub.s32 2, %v25772_v54  ;;  %v17432_v34 = vld [vmem:[%s25518_s3 + $0x18] sm:$0xff] }
 0x234   : > { %25769 = vst [vmem:[#allocation21_spill] sm:$0xff] %v20830_v21  ;;  %25770 = vst [vmem:[#allocation22_spill] sm:$0xff] %v20832_v41  ;;  %7037 = vmatprep.subr.mxu1 %v20620_v6  ;;  %9601 = vrot.lane.b32.xlu1 %v20728_v53, %s17669_s20  ;;  %v16330_v55 = vpack.c.bf16 %v20617_v11, %v20683_v28  ;;  %v16336_v7 = vpack.c.bf16 %v20731_v27, %v20805_v40 }
 0x235   : > { %25771 = vst [vmem:[#allocation30_spill] sm:$0xff] %v20835_v31  ;;  %6966 = vmatprep.subr.mxu0 %v20686_v9  ;;  %17134 = vrot.lane.b32.xlu0 %v17133_v47, %s17669_s20  ;;  %v20876_v47 = vld [vmem:[%s17744_s17 + $0xa0] sm:$0xff]  ;;  %v16342_v24 = vpack.c.bf16 %v20893_v33, %v20728_v53  ;;  %v16338_v48 = vpack.c.bf16 %v20728_v53, %v20802_v14 }
 0x236   : > { %7097 = vmatprep.mubr.f32.mxu1 %v25653_v62  ;;  %7026 = vmatprep.mubr.f32.mxu0 %v25653_v62  ;;  %v17148_v18 = vpack.i.bf16 %v20879_v8, %v20876_v47 }
 0x237   : > { %7038 = vmatpush1.msra.mxu1 %v20617_v11  ;;  %6967 = vmatpush1.msra.mxu0 %v20683_v28  ;;  %v20861_v6 = vpop.permute.xlu1 %8056  ;;  %v20863_v9 = vpop.permute.xlu0 %8044  ;;  %v20871_v11 = vld [vmem:[%s17744_s17 + $0x98] sm:$0xff] }
 0x238   : > { %15916 = vmatmul.mubr.msk.f32.vlgmr.msra.gmra.mrb[68].mxu1 %vm742_vm1, %v20713_v19  ;;  %16333 = vmatprep.subr.bf16.mxu1 %v16332_v5  ;;  %v16340_v28 = vpack.c.bf16 %v20871_v11, %v20731_v27  ;;  %v17143_v58 = vpack.i.bf16 %v20871_v11, %v20893_v33  ;;  %v4963_v5 = vrot.slane %v17432_v34, %v20884_v2 }
 0x239   : > { %15915 = vmatmul.mubr.msk.f32.vlgmr.msra.gmra.mrb[68].mxu0 %vm742_vm1, %v20713_v19  ;;  %16329 = vmatprep.subr.bf16.mxu0 %v16328_v17 }
 0x23a   : > { %16335 = vmatpush1.bf16.msra.mxu1 %v16334_v26  ;;  %16331 = vmatpush1.bf16.msra.mxu0 %v16330_v55  ;;  %v17433_v26 = vld [vmem:[%s25518_s3 + $0x8] sm:$0xff] }
 0x23b   : > { %9605 = vrot.lane.b32.xlu1 %v20731_v27, %s17669_s20  ;;  %9593 = vrot.lane.b32.xlu0 %v20802_v14, %s17669_s20  ;;  %v20897_v59 = vpop.permute.xlu1 %17049  ;;  %v20899_v35 = vpop.permute.xlu0 %8048  ;;  %v4955_v55 = vrot.slane %v17433_v26, %v20884_v2 }
 0x23c   : > { %7179 = vmatprep.subr.mxu1 %v20731_v27  ;;  %7108 = vmatprep.subr.mxu0 %v20805_v40  ;;  %v17430_v27 = vld [vmem:[%s25518_s3 + $0x10] sm:$0xff] }
 0x23d   : > { %7239 = vmatprep.mubr.f32.mxu1 %v25653_v62  ;;  %7168 = vmatprep.mubr.f32.mxu0 %v25653_v62  ;;  %v4959_v63 = vrot.slane %v17430_v27, %v20884_v2 }
 0x23e   : > { %7180 = vmatpush1.msra.mxu1 %v20728_v53  ;;  %7109 = vmatpush1.msra.mxu0 %v20802_v14  ;;  %v17431_v53 = vld [vmem:[%s25518_s3] sm:$0xff] }
 0x23f   : > { %15918 = vmatmul.mubr.msk.f32.vlgmr.msra.gmra.mrb[70].mxu1 %vm742_vm1, %v20713_v19  ;;  %16341 = vmatprep.subr.bf16.mxu1 %v16340_v28  ;;  %v4951_v14 = vrot.slane %v17431_v53, %v20884_v2  ;;  %v20927_v17 = vpop.permute.xlu0 %17044  ;;  %v3949_v28 = vpop.f32.mrb[32].mxu1 }
 0x240   : > { %17149 = vrot.lane.b32.xlu1 %v17148_v18, %s17669_s20  ;;  %9597 = vrot.lane.b32.xlu0 %v20805_v40, %s17669_s20  ;;  %v20925_v40 = vpop.permute.xlu1 %8068  ;;  %v20938_v18 = vld [vmem:[%s17744_s17 + $0xb8] sm:$0xff]  ;;  %v5078_v27 = vmul.f32 %v4959_v63, %v3949_v28  ;;  %v3878_v53 = vpop.f32.mrb[32].mxu0  ;;  %v16346_v63 = vpack.c.bf16 %v20876_v47, %v20893_v33 }
 0x241   : > { %15917 = vmatmul.mubr.msk.f32.vlgmr.msra.gmra.mrb[70].mxu0 %vm742_vm1, %v20713_v19  ;;  %16337 = vmatprep.subr.bf16.mxu0 %v16336_v7  ;;  %v16348_v7 = vpack.c.bf16 %v20938_v18, %v20879_v8  ;;  %v3951_v34 = vpop.f32.mrb[33].mxu1  ;;  %v5076_v54 = vmul.f32 %v4951_v14, %v3878_v53  ;;  %v3880_v21 = vpop.f32.mrb[33].mxu0 }
 0x242   : > { %16343 = vmatpush1.bf16.msra.mxu1 %v16342_v24  ;;  %16339 = vmatpush1.bf16.msra.mxu0 %v16338_v48  ;;  %v16344_v24 = vpack.c.bf16 %v20879_v8, %v20871_v11  ;;  %v20947_v48 = vld [vmem:[%s17744_s17 + $0xb0] sm:$0xff]  ;;  %v5079_v31 = vmul.f32 %v4963_v5, %v3951_v34  ;;  %v20956_v28 = vadd.f32 %v5078_v27, %v19997_v15 }
 0x243   : > { %7321 = vmatprep.subr.mxu1 %v20879_v8  ;;  %7250 = vmatprep.subr.mxu0 %v20871_v11  ;;  %v16350_v26 = vpack.c.bf16 %v20947_v48, %v20876_v47  ;;  %v20960_v41 = vpop.permute.xlu0 %8060  ;;  %v5077_v1 = vmul.f32 %v4955_v55, %v3880_v21  ;;  %v20966_v14 = vadd.f32 %v5076_v54, %v20014_v57  ;;  %v17436_v21 = vld [vmem:[%s25518_s3 + $0x30] sm:$0xff]  ;;  %v17437_v57 = vld [vmem:[%s25518_s3 + $0x38] sm:$0xff]  ;;  %v17439_v55 = vld [vmem:[%s17744_s17 + $0xc0] sm:$0xff] }
 0x244   : > { %9617 = vrot.lane.b32.xlu1 %v20876_v47, %s17669_s20  ;;  %17144 = vrot.lane.b32.xlu0 %v17143_v58, %s17669_s20  ;;  %25773 = vst [vmem:[#allocation31_spill] sm:$0xff] %v20956_v28  ;;  %v20958_v58 = vpop.permute.xlu1 %8072  ;;  %v20969_v5 = vadd.f32 %v5079_v31, %v20027_v36  ;;  %v4979_v36 = vrot.slane %v17437_v57, %v20884_v2  ;;  %v20993_v31 = vld [vmem:[%s17744_s17 + $0xc8] sm:$0xff] }
 0x245   : > { %7381 = vmatprep.mubr.f32.mxu1 %v25653_v62  ;;  %7310 = vmatprep.mubr.f32.mxu0 %v25653_v62  ;;  %25774 = vst [vmem:[#allocation32_spill] sm:$0xff] %v20966_v14  ;;  %v20974_v15 = vadd.f32 %v5077_v1, %v20029_v22  ;;  %v16356_v54 = vpack.c.bf16 %v20155_v50, %v20993_v31  ;;  %v17440_v50 = vld [vmem:[%s25518_s3 + $0x20] sm:$0xff]  ;;  %v17441_v57 = vld [vmem:[%s25518_s3 + $0x28] sm:$0xff]  ;;  %v17017_v14 = vunpack.i.h.bf16 %v20520_v20 }
 0x246   : > { %7322 = vmatpush1.msra.mxu1 %v20876_v47  ;;  %7251 = vmatpush1.msra.mxu0 %v20893_v33  ;;  %25775 = vst [vmem:[#allocation33_spill] sm:$0xff] %v20969_v5  ;;  %v4975_v47 = vrot.slane %v17436_v21, %v20884_v2  ;;  %v16358_v53 = vpack.c.bf16 %v20152_v16, %v17439_v55  ;;  %v17021_v5 = vunpack.i.l.bf16 %v20674_v42 }
 0x247   : > { %15920 = vmatmul.mubr.msk.f32.vlgmr.msra.gmra.mrb[72].mxu1 %vm742_vm1, %v20713_v19  ;;  %16349 = vmatprep.subr.bf16.mxu1 %v16348_v7  ;;  %25776 = vst [vmem:[#allocation34_spill] sm:$0xff] %v20974_v15  ;;  %v20988_v1 = vpop.permute.xlu0 %8064  ;;  %v17158_v7 = vpack.i.bf16 %v20993_v31, %v17439_v55 }
 0x248   : > { %15919 = vmatmul.mubr.msk.f32.vlgmr.msra.gmra.mrb[72].mxu0 %vm742_vm1, %v20713_v19  ;;  %16345 = vmatprep.subr.bf16.mxu0 %v16344_v24  ;;  %v20986_v22 = vpop.permute.xlu1 %17059  ;;  %v4091_v24 = vpop.f32.mrb[34].mxu1 }
 0x249   : > { %16351 = vmatpush1.bf16.msra.mxu1 %v16350_v26  ;;  %16347 = vmatpush1.bf16.msra.mxu0 %v16346_v63  ;;  %v5082_v27 = vmul.f32 %v4975_v47, %v4091_v24  ;;  %v4967_v26 = vrot.slane %v17440_v50, %v20884_v2  ;;  %v16354_v63 = vpack.c.bf16 %v17439_v55, %v20947_v48 }
 0x24a   : > { %9621 = vrot.lane.b32.xlu1 %v20879_v8, %s17669_s20  ;;  %9609 = vrot.lane.b32.xlu0 %v20893_v33, %s17669_s20  ;;  %v16352_v8 = vpack.c.bf16 %v20993_v31, %v20938_v18  ;;  %v4093_v33 = vpop.f32.mrb[35].mxu1 }
 0x24b   : > { %7463 = vmatprep.subr.mxu1 %v20993_v31  ;;  %7392 = vmatprep.subr.mxu0 %v20938_v18  ;;  %v5083_v34 = vmul.f32 %v4979_v36, %v4093_v33  ;;  %v21015_v21 = vadd.f32 %v5082_v27, %v20078_v32  ;;  %v21019_v16 = vpop.permute.xlu0 %17054  ;;  %v4971_v36 = vrot.slane %v17441_v57, %v20884_v2  ;;  %v17011_v27 = vunpack.i.l.bf16 %v20612_v39  ;;  %v21046_v32 = vld [vmem:[%s17744_s17 + $0xe8] sm:$0xff] }
 0x24c   : > { %7523 = vmatprep.mubr.f32.mxu1 %v25653_v62  ;;  %7452 = vmatprep.mubr.f32.mxu0 %v25653_v62  ;;  %v21017_v47 = vpop.permute.xlu1 %8084  ;;  %v17153_v33 = vpack.i.bf16 %v20938_v18, %v20947_v48  ;;  %v21043_v57 = vunpack.i.l.bf16 %v20498_v38 }
 0x24d   : > { %7464 = vmatpush1.msra.mxu1 %v17439_v55  ;;  %7393 = vmatpush1.msra.mxu0 %v20947_v48  ;;  %25777 = vst [vmem:[#allocation35_spill] sm:$0xff] %v21015_v21  ;;  %v21027_v24 = vadd.f32 %v5083_v34, %v20097_v37  ;;  %v17442_v34 = vld [vmem:[%s25518_s3 + $0x50] sm:$0xff] }
 0x24e   : > { %15922 = vmatmul.mubr.msk.f32.vlgmr.msra.gmra.mrb[74].mxu1 %vm742_vm1, %v20713_v19  ;;  %16357 = vmatprep.subr.bf16.mxu1 %v16356_v54  ;;  %v4020_v54 = vpop.f32.mrb[34].mxu0  ;;  %v4991_v50 = vrot.slane %v17442_v34, %v20884_v2  ;;  %v8197_v28 = vsel %vm8138_vm5, %v21043_v57, %v17011_v27 }
 0x24f   : > { %17159 = vrot.lane.b32.xlu1 %v17158_v7, %s17669_s20  ;;  %25778 = vst [vmem:[#allocation36_spill] sm:$0xff] %v21027_v24  ;;  %9613 = vrot.lane.b32.xlu0 %v20871_v11, %s17669_s20  ;;  %v5080_v7 = vmul.f32 %v4967_v26, %v4020_v54  ;;  %v4022_v37 = vpop.f32.mrb[35].mxu0  ;;  %v17007_v11 = vunpack.i.h.bf16 %v20498_v38  ;;  %v17444_v54 = vld [vmem:[%s25518_s3 + $0x58] sm:$0xff]  ;;  %v25780_v24 = vunpack.i.h.bf16 %v20612_v39 }
 0x250   : > { %15921 = vmatmul.mubr.msk.f32.vlgmr.msra.gmra.mrb[74].mxu0 %vm742_vm1, %v20713_v19  ;;  %16353 = vmatprep.subr.bf16.mxu0 %v16352_v8  ;;  %v21049_v8 = vpop.permute.xlu1 %8088  ;;  %v5081_v26 = vmul.f32 %v4971_v36, %v4022_v37  ;;  %v4995_v34 = vrot.slane %v17444_v54, %v20884_v2  ;;  %v21060_v38 = vld [vmem:[%s17744_s17 + $0xd8] sm:$0xff]  ;;  %v21073_v54 = vld [vmem:[%s17744_s17 + $0xe0] sm:$0xff] }
 0x251   : > { %16359 = vmatpush1.bf16.msra.mxu1 %v16358_v53  ;;  %16355 = vmatpush1.bf16.msra.mxu0 %v16354_v63  ;;  %v21051_v53 = vpop.permute.xlu0 %8076  ;;  %v16364_v63 = vpack.c.bf16 %v20273_v52, %v21046_v32  ;;  %v16360_v36 = vpack.c.bf16 %v21046_v32, %v21060_v38  ;;  %v21068_v37 = vadd.f32 %v5080_v7, %v20130_v3  ;;  %v4233_v3 = vpop.f32.mrb[36].mxu1 }
 0x252   : > { %7605 = vmatprep.subr.mxu1 %v21046_v32  ;;  %7534 = vmatprep.subr.mxu0 %v21060_v38  ;;  %v21081_v21 = vsel %vm8138_vm5, %v17011_v27, %v25780_v24  ;;  %v21084_v15 = vadd.f32 %v5081_v26, %v20139_v13  ;;  %v8199_v13 = vsel %vm8138_vm5, %v17007_v11, %v21043_v57 }
 0x253   : > { %9633 = vrot.lane.b32.xlu1 %v17439_v55, %s17669_s20  ;;  %25779 = vst [vmem:[#allocation37_spill] sm:$0xff] %v21068_v37  ;;  %17154 = vrot.lane.b32.xlu0 %v17153_v33, %s17669_s20  ;;  %v16366_v55 = vpack.c.bf16 %v20278_v23, %v21073_v54  ;;  %v21089_v33 = vld [vmem:[%s17744_s17 + $0xd0] sm:$0xff]  ;;  %v5086_v23 = vmul.f32 %v4991_v50, %v4233_v3  ;;  %v4235_v37 = vpop.f32.mrb[37].mxu1 }
 0x254   : > { %7665 = vmatprep.mubr.f32.mxu1 %v25653_v62  ;;  %25781 = vst [vmem:[#allocation38_spill] sm:$0xff] %v21084_v15  ;;  %7594 = vmatprep.mubr.f32.mxu0 %v25653_v62  ;;  %v16362_v7 = vpack.c.bf16 %v21073_v54, %v21089_v33  ;;  %v21100_v24 = vpop.permute.xlu1 %17069  ;;  %v5087_v15 = vmul.f32 %v4995_v34, %v4235_v37 }
 0x255   : > { %7606 = vmatpush1.msra.mxu1 %v21073_v54  ;;  %7535 = vmatpush1.msra.mxu0 %v21089_v33  ;;  %v21102_v26 = vpop.permute.xlu0 %8080  ;;  %v16368_v50 = vpack.c.bf16 %v21081_v21, %v8199_v13  ;;  %v21109_v3 = vadd.f32 %v5086_v23, %v20192_v56  ;;  %v17448_v56 = vld [vmem:[%s25518_s3 + $0x40] sm:$0xff]  ;;  %v25784_v23 = vunpack.i.l.bf16 %v20520_v20 }
 0x256   : > { %15924 = vmatmul.mubr.msk.f32.vlgmr.msra.gmra.mrb[76].mxu1 %vm742_vm1, %v20713_v19  ;;  %16365 = vmatprep.subr.bf16.mxu1 %v16364_v63  ;;  %v21116_v34 = vadd.f32 %v5087_v15, %v20215_v46  ;;  %v17168_v63 = vpack.i.bf16 %v21046_v32, %v21073_v54  ;;  %v4983_v37 = vrot.slane %v17448_v56, %v20884_v2  ;;  %v17022_v46 = vunpack.i.h.bf16 %v20674_v42 }
 0x257   : > { %15923 = vmatmul.mubr.msk.f32.vlgmr.msra.gmra.mrb[76].mxu0 %vm742_vm1, %v20713_v19  ;;  %25782 = vst [vmem:[#allocation39_spill] sm:$0xff] %v21109_v3  ;;  %16361 = vmatprep.subr.bf16.mxu0 %v16360_v36  ;;  %v8201_v27 = vsel %vm8138_vm5, %v25784_v23, %v17007_v11 }
 0x258   : > { %16367 = vmatpush1.bf16.msra.mxu1 %v16366_v55  ;;  %25783 = vst [vmem:[#allocation40_spill] sm:$0xff] %v21116_v34  ;;  %16363 = vmatpush1.bf16.msra.mxu0 %v16362_v7  ;;  %v21134_v15 = vpop.permute.xlu1 %8100  ;;  %v17449_v7 = vld [vmem:[%s25518_s3 + $0x48] sm:$0xff]  ;;  %v16370_v42 = vpack.c.bf16 %v8197_v28, %v8201_v27  ;;  %v4162_v56 = vpop.f32.mrb[36].mxu0  ;;  %v25787_v27 = vld [vmem:[#allocation15_spill] sm:$0xff] }
 0x259   : > { %16369 = vmatprep.subr.bf16.mxu1 %v16368_v50  ;;  %9637 = vrot.lane.b32.xlu1 %v20993_v31, %s17669_s20  ;;  %v21136_v55 = vpop.permute.xlu0 %17064  ;;  %v4987_v11 = vrot.slane %v17449_v7, %v20884_v2  ;;  %v8191_v31 = vsel %vm8138_vm5, %v17017_v14, %v17021_v5  ;;  %v17163_v50 = vpack.i.bf16 %v21060_v38, %v21089_v33  ;;  %v4164_v36 = vpop.f32.mrb[37].mxu0  ;;  %v17452_v34 = vld [vmem:[%s25518_s3 + $0x78] sm:$0xff] }
 0x25a   : > { %9625 = vrot.lane.b32.xlu0 %v20947_v48, %s17669_s20  ;;  %7807 = vmatprep.mubr.f32.mxu1 %v25653_v62  ;;  %v25785_v48 = vunpack.i.h.bf16 %v20612_v39  ;;  %v21160_v39 = vld [vmem:[%s17744_s17 + $0xf0] sm:$0xff]  ;;  %v5011_v3 = vrot.slane %v17452_v34, %v20884_v2  ;;  %v17027_v34 = vunpack.i.h.bf16 %v20596_v51 }
 0x25b   : > { %7676 = vmatprep.subr.mxu0 %v20273_v52  ;;  %15926 = vmatmul.mubr.msk.f32.vlgmr.msra.gmra.mrb[78].mxu1 %vm742_vm1, %v20713_v19  ;;  %v17450_v52 = vld [vmem:[%s25518_s3 + $0x70] sm:$0xff]  ;;  %v5085_v43 = vmul.f32 %v4987_v11, %v4164_v36  ;;  %v25794_v11 = vld [vmem:[#allocation11_spill] sm:$0xff] }
 0x25c   : > { %v8193_v13 = vsel %vm8138_vm5, %v25785_v48, %v17017_v14  ;;  %7736 = vmatprep.mubr.f32.mxu0 %v25653_v62  ;;  %v5007_v23 = vrot.slane %v17450_v52, %v20884_v2  ;;  %16371 = vmatpush1.bf16.msra.mxu1 %v16370_v42  ;;  %v25786_v14 = vld [vmem:[#allocation7_spill] sm:$0xff]  ;;  %v5084_v48 = vmul.f32 %v4983_v37, %v4162_v56  ;;  %v21178_v56 = vpop.permute.xlu1 %8104 }
 0x25d   : > { %7677 = vmatpush1.msra.mxu0 %v21160_v39  ;;  %v8200_v7 = vsel %vm8138_vm5, %v25787_v27, %v25786_v14  ;;  %17169 = vrot.lane.b32.xlu1 %v17168_v63, %s17669_s20  ;;  %v16372_v42 = vpack.c.bf16 %v8191_v31, %v21081_v21  ;;  %v8187_v37 = vsel %vm8138_vm5, %v17022_v46, %v25789_v10  ;;  %v21180_v44 = vpop.permute.xlu0 %8092  ;;  %v21192_v10 = vld [vmem:[%s25516_s1 + $0x14] sm:$0xf] }
 0x25e   : > { %8215 = vmatprep.subr.mxu1 %v8200_v7  ;;  %v8189_v7 = vsel %vm8138_vm5, %v17021_v5, %v17022_v46  ;;  %9629 = vrot.lane.b32.xlu0 %v20938_v18, %s17669_s20  ;;  %v16374_v21 = vpack.c.bf16 %v8193_v13, %v8197_v28  ;;  %v25790_v63 = vld [vmem:[#allocation14_spill] sm:$0xff]  ;;  %v8202_v5 = vsel %vm8138_vm5, %v20748_v25, %v25787_v27  ;;  %v25792_v18 = vld [vmem:[#allocation23_spill] sm:$0xff]  ;;  %v4375_v46 = vpop.f32.mrb[38].mxu1 }
 0x25f   : > { %15925 = vmatmul.mubr.msk.f32.vlgmr.msra.gmra.mrb[78].mxu0 %vm742_vm1, %v20713_v19  ;;  %v21195_v52 = vadd.f32 %v5084_v48, %v25790_v63  ;;  %16373 = vmatprep.subr.bf16.mxu0 %v16372_v42  ;;  %v21203_v36 = vadd.f32 %v5085_v43, %v25792_v18  ;;  %v17453_v19 = vld [vmem:[%s17744_s17] sm:$0xff]  ;;  %v8196_v48 = vsel %vm8138_vm5, %v25794_v11, %v20791_v12  ;;  %v4377_v63 = vpop.f32.mrb[39].mxu1  ;;  %v25795_v18 = vunpack.i.l.bf16 %v25788_v60 }
 0x260   : > { %8275 = vmatprep.mubr.f32.mxu1 %v25653_v62  ;;  %v21207_v28 = vpack.i.bf16 %v25653_v62, %v17453_v19  ;;  %16375 = vmatpush1.bf16.msra.mxu0 %v16374_v21  ;;  %v16376_v42 = vpack.c.bf16 %v8187_v37, %v8191_v31  ;;  %v5090_v27 = vmul.f32 %v5007_v23, %v4375_v46  ;;  %v25796_v31 = vunpack.i.l.bf16 %v20596_v51 }
 0x261   : > { %25791 = vst [vmem:[#allocation7_spill] sm:$0xff] %v21195_v52  ;;  %25793 = vst [vmem:[#allocation15_spill] sm:$0xff] %v21203_v36  ;;  %8216 = vmatpush1.msra.mxu1 %v8202_v5  ;;  %8286 = vmatprep.subr.mxu0 %v8196_v48  ;;  %v16378_v43 = vpack.c.bf16 %v8189_v7, %v8193_v13  ;;  %v8183_v21 = vsel %vm8138_vm5, %v17027_v34, %v25795_v18  ;;  %v21220_v5 = vpop.permute.xlu1 %17079  ;;  %v21222_v19 = vpop.permute.xlu0 %8096  ;;  %v17032_v46 = vunpack.i.h.bf16 %v25788_v60  ;;  %v21232_v13 = vld [vmem:[%s17744_s17 + $0xf8] sm:$0xff]  ;;  %v25797_v18 = vld [vmem:[#allocation24_spill] sm:$0xff] }
 0x262   : > { %15928 = vmatmul.mubr.msk.f32.vlgmr.msra.gmra.mrb[80].mxu1 %vm742_vm1, %v21192_v10  ;;  %v5091_v36 = vmul.f32 %v5011_v3, %v4377_v63  ;;  %v8185_v23 = vsel %vm8138_vm5, %v25796_v31, %v17027_v34  ;;  %16377 = vmatprep.subr.bf16.mxu1 %v16376_v42  ;;  %v21237_v52 = vadd.f32 %v5090_v27, %v25797_v18  ;;  %v25564_v3 = vunpack.i.l.bf16 %v20824_v0  ;;  %v25798_v34 = vld [vmem:[#allocation25_spill] sm:$0xff] }
 0x263   : > { %9649 = vrot.lane.b32.xlu1 %v21073_v54, %s17669_s20  ;;  %v17037_v51 = vunpack.i.h.bf16 %v20850_v45  ;;  %17164 = vrot.lane.b32.xlu0 %v17163_v50, %s17669_s20  ;;  %v8198_v54 = vsel %vm8138_vm5, %v25786_v14, %v25794_v11  ;;  %v8192_v27 = vsel %vm8138_vm5, %v20826_v4, %v20743_v49  ;;  %v16380_v63 = vpack.c.bf16 %v8183_v21, %v8187_v37  ;;  %v17455_v50 = vld [vmem:[%s25518_s3 + $0x60] sm:$0xff]  ;;  %v17456_v37 = vld [vmem:[%s25518_s3 + $0x68] sm:$0xff] }
 0x264   : > { %16379 = vmatpush1.bf16.msra.mxu1 %v16378_v43  ;;  %v21247_v42 = vadd.f32 %v5091_v36, %v25798_v34  ;;  %8287 = vmatpush1.msra.mxu0 %v8198_v54  ;;  %v4999_v43 = vrot.slane %v17455_v50, %v20884_v2  ;;  %v16382_v14 = vpack.c.bf16 %v8185_v23, %v8189_v7  ;;  %v25800_v36 = vunpack.i.l.bf16 %v20850_v45 }
 0x265   : > { %8346 = vmatprep.mubr.f32.mxu0 %v25653_v62  ;;  %8357 = vmatprep.subr.mxu1 %v8192_v27  ;;  %v21264_v31 = vpop.permute.xlu1 %8116  ;;  %v21266_v18 = vpop.permute.xlu0 %17074  ;;  %v5003_v54 = vrot.slane %v17456_v37, %v20884_v2  ;;  %v25801_v34 = vunpack.i.l.bf16 %v25788_v60  ;;  %v21279_v27 = vld [vmem:[%s17744_s17 + $0x18] sm:$0xff]  ;;  %v8194_v60 = vsel %vm8138_vm5, %v20791_v12, %v20826_v4  ;;  %v8188_v12 = vsel %vm8138_vm5, %v20789_v30, %v20863_v9 }
 0x266   : > { %25799 = vst [vmem:[#allocation4_spill] sm:$0xff] %v21247_v42  ;;  %15929 = vmatmul.mubr.msk.f32.vlgmr.msra.gmra.mrb[80].mxu0 %vm742_vm1, %v21192_v10  ;;  %v8179_v11 = vsel %vm8138_vm5, %v17032_v46, %v25800_v36  ;;  %16381 = vmatprep.subr.bf16.mxu0 %v16380_v63  ;;  %v21283_v50 = vpack.i.bf16 %v21279_v27, %v25653_v62  ;;  %v17458_v63 = vld [vmem:[%s25518_s3 + $0x90] sm:$0xff] }
 0x267   : > { %v8181_v7 = vsel %vm8138_vm5, %v25801_v34, %v17032_v46  ;;  %9653 = vrot.lane.b32.xlu1 %v21046_v32, %s17669_s20  ;;  %16383 = vmatpush1.bf16.msra.mxu0 %v16382_v14  ;;  %v21295_v32 = vsel %vm8138_vm5, %v17037_v51, %v25564_v3  ;;  %v4304_v46 = vpop.f32.mrb[38].mxu0  ;;  %v5023_v14 = vrot.slane %v17458_v63, %v20884_v2  ;;  %v17042_v34 = vunpack.i.h.bf16 %v20824_v0  ;;  %v17459_v3 = vld [vmem:[%s25518_s3 + $0x98] sm:$0xff] }
 0x268   : > { %9641 = vrot.lane.b32.xlu0 %v21089_v33, %s17669_s20  ;;  %v17046_v33 = vunpack.i.l.bf16 %v20927_v17  ;;  %8358 = vmatpush1.msra.mxu1 %v8194_v60  ;;  %v16384_v4 = vpack.c.bf16 %v8179_v11, %v8183_v21  ;;  %v5088_v36 = vmul.f32 %v4999_v43, %v4304_v46  ;;  %v4306_v37 = vpop.f32.mrb[39].mxu0  ;;  %v16386_v63 = vpack.c.bf16 %v8181_v7, %v8185_v23 }
 0x269   : > { %8417 = vmatprep.mubr.f32.mxu1 %v25653_v62  ;;  %8428 = vmatprep.subr.mxu0 %v8188_v12  ;;  %v21310_v48 = vpop.permute.xlu1 %8120  ;;  %v5089_v60 = vmul.f32 %v5003_v54, %v4306_v37  ;;  %v5027_v42 = vrot.slane %v17459_v3, %v20884_v2  ;;  %v25802_v21 = vunpack.i.l.bf16 %v20850_v45  ;;  %v8190_v23 = vsel %vm8138_vm5, %v20743_v49, %v20789_v30  ;;  %v25803_v54 = vld [vmem:[#allocation26_spill] sm:$0xff]  ;;  %v21328_v12 = vpop.permute.xlu0 %8108 }
 0x26a   : > { %15930 = vmatmul.mubr.msk.f32.vlgmr.msra.gmra.mrb[82].mxu1 %vm742_vm1, %v21192_v10  ;;  %16385 = vmatprep.subr.bf16.mxu1 %v16384_v4  ;;  %v21326_v46 = vadd.f32 %v5088_v36, %v25803_v54  ;;  %v8184_v45 = vsel %vm8138_vm5, %v20899_v35, %v20848_v29  ;;  %v16388_v3 = vpack.c.bf16 %v21295_v32, %v8179_v11  ;;  %v4517_v49 = vpop.f32.mrb[40].mxu1  ;;  %v25565_v30 = vunpack.i.l.bf16 %v20897_v59 }
 0x26b   : > { %v8177_v43 = vsel %vm8138_vm5, %v25802_v21, %v17037_v51  ;;  %8488 = vmatprep.mubr.f32.mxu0 %v25653_v62  ;;  %16387 = vmatpush1.bf16.msra.mxu1 %v16386_v63  ;;  %v25804_v51 = vld [vmem:[#allocation27_spill] sm:$0xff]  ;;  %v17047_v36 = vunpack.i.h.bf16 %v20927_v17  ;;  %v21344_v37 = vsel %vm8138_vm5, %v17042_v34, %v17046_v33  ;;  %v5094_v63 = vmul.f32 %v5023_v14, %v4517_v49  ;;  %v4519_v21 = vpop.f32.mrb[41].mxu1  ;;  %v25807_v14 = vld [vmem:[#allocation28_spill] sm:$0xff] }
 0x26c   : > { %8429 = vmatpush1.msra.mxu0 %v8190_v23  ;;  %v21336_v4 = vadd.f32 %v5089_v60, %v25804_v51  ;;  %8499 = vmatprep.subr.mxu1 %v8184_v45  ;;  %v25806_v11 = vunpack.i.l.bf16 %v20824_v0  ;;  %v16390_v17 = vpack.c.bf16 %v8177_v43, %v8181_v7  ;;  %v5095_v54 = vmul.f32 %v5027_v42, %v4519_v21  ;;  %v25809_v42 = vld [vmem:[#allocation5_spill] sm:$0xff] }
 0x26d   : > { %9661 = vrot.lane.b32.xlu1 %v21232_v13, %s17669_s20  ;;  %9645 = vrot.lane.b32.xlu0 %v21060_v38, %s17669_s20  ;;  %v21356_v23 = vpop.permute.xlu1 %8128  ;;  %v8186_v0 = vsel %vm8138_vm5, %v20863_v9, %v20899_v35  ;;  %v21366_v45 = vpop.permute.xlu0 %8112  ;;  %v17460_v38 = vld [vmem:[%s25518_s3 + $0x80] sm:$0xff]  ;;  %v8180_v9 = vsel %vm8138_vm5, %v20861_v6, %v20960_v41  ;;  %v16392_v35 = vpack.c.bf16 %v21344_v37, %v21295_v32  ;;  %v25566_v49 = vunpack.i.l.bf16 %v21019_v16 }
 0x26e   : > { %25805 = vst [vmem:[#allocation14_spill] sm:$0xff] %v21336_v4  ;;  %v21350_v60 = vsel %vm8138_vm5, %v25806_v11, %v17042_v34  ;;  %15931 = vmatmul.mubr.msk.f32.vlgmr.msra.gmra.mrb[82].mxu0 %vm742_vm1, %v21192_v10  ;;  %16389 = vmatprep.subr.bf16.mxu0 %v16388_v3  ;;  %v21364_v34 = vadd.f32 %v5094_v63, %v25807_v14  ;;  %v17052_v21 = vunpack.i.h.bf16 %v20897_v59  ;;  %v21402_v11 = vld [vmem:[%s17744_s17 + $0x38] sm:$0xff] }
 0x26f   : > { %8559 = vmatprep.mubr.f32.mxu1 %v25653_v62  ;;  %v5015_v7 = vrot.slane %v17460_v38, %v20884_v2  ;;  %16391 = vmatpush1.bf16.msra.mxu0 %v16390_v17  ;;  %v21379_v3 = vadd.f32 %v5095_v54, %v25809_v42  ;;  %v21383_v51 = vsel %vm8138_vm5, %v17046_v33, %v17047_v36  ;;  %v21399_v33 = vld [vmem:[%s17744_s17 + $0x30] sm:$0xff]  ;;  %v21432_v42 = vld [vmem:[%s17744_s17 + $0x28] sm:$0xff]  ;;  %v17061_v54 = vunpack.i.l.bf16 %v20986_v22  ;;  %v17469_v4 = vld [vmem:[%s25518_s3 + $0xb8] sm:$0xff] }
 0x270   : > { %25808 = vst [vmem:[#allocation23_spill] sm:$0xff] %v21364_v34  ;;  %8500 = vmatpush1.msra.mxu1 %v8186_v0  ;;  %8570 = vmatprep.subr.mxu0 %v8180_v9  ;;  %v16394_v63 = vpack.c.bf16 %v21350_v60, %v8177_v43  ;;  %v21393_v32 = vsel %vm8138_vm5, %v17047_v36, %v25565_v30  ;;  %v21407_v17 = vld [vmem:[%s17744_s17 + $0x10] sm:$0xff]  ;;  %v21410_v36 = vld [vmem:[%s17744_s17 + $0x8] sm:$0xff]  ;;  %v17057_v30 = vunpack.i.h.bf16 %v21019_v16 }
 0x271   : > { %25810 = vst [vmem:[#allocation11_spill] sm:$0xff] %v21379_v3  ;;  %15932 = vmatmul.mubr.msk.f32.vlgmr.msra.gmra.mrb[84].mxu1 %vm742_vm1, %v21192_v10  ;;  %16393 = vmatprep.subr.bf16.mxu1 %v16392_v35  ;;  %v21414_v0 = vpop.permute.xlu1 %17094  ;;  %v25811_v38 = vpack.i.bf16 %v21232_v13, %v21160_v39  ;;  %v8182_v9 = vsel %vm8138_vm5, %v20848_v29, %v20861_v6  ;;  %v21429_v35 = vld [vmem:[%s17744_s17 + $0x20] sm:$0xff]  ;;  %v21436_v43 = vpop.permute.xlu0 %17084  ;;  %v17468_v13 = vld [vmem:[%s25518_s3 + $0xb0] sm:$0xff] }
 0x272   : > { %17184 = vrot.lane.b32.xlu1 %v21207_v28, %s17670_s10  ;;  %v17465_v28 = vld [vmem:[%s25518_s3 + $0x88] sm:$0xff]  ;;  %16395 = vmatpush1.bf16.msra.mxu1 %v16394_v63  ;;  %v5039_v63 = vrot.slane %v17468_v13, %v20884_v2  ;;  %v8176_v29 = vsel %vm8138_vm5, %v20988_v1, %v20925_v40  ;;  %v16396_v6 = vpack.c.bf16 %v21393_v32, %v21344_v37 }
 0x273   : > { %v5019_v14 = vrot.slane %v17465_v28, %v20884_v2  ;;  %17174 = vrot.lane.b32.xlu0 %v25811_v38, %s17669_s20  ;;  %8571 = vmatpush1.msra.mxu0 %v8182_v9  ;;  %v16398_v28 = vpack.c.bf16 %v21383_v51, %v21350_v60  ;;  %v4446_v38 = vpop.f32.mrb[40].mxu0  ;;  %v8163_v9 = vsel %vm8138_vm5, %v17052_v21, %v25566_v49  ;;  %v25812_v60 = vunpack.i.l.bf16 %v20897_v59 }
 0x274   : > { %8630 = vmatprep.mubr.f32.mxu0 %v25653_v62  ;;  %8641 = vmatprep.subr.mxu1 %v8176_v29  ;;  %v5092_v37 = vmul.f32 %v5015_v7, %v4446_v38  ;;  %v4448_v13 = vpop.f32.mrb[41].mxu0  ;;  %v5043_v49 = vrot.slane %v17469_v4, %v20884_v2  ;;  %v8178_v59 = vsel %vm8138_vm5, %v20960_v41, %v20988_v1  ;;  %v21478_v7 = vld [vmem:[%s17744_s17 + $0x40] sm:$0xff] }
 0x275   : > { %15933 = vmatmul.mubr.msk.f32.vlgmr.msra.gmra.mrb[84].mxu0 %vm742_vm1, %v21192_v10  ;;  %v8165_v3 = vsel %vm8138_vm5, %v25812_v60, %v17052_v21  ;;  %16397 = vmatprep.subr.bf16.mxu0 %v16396_v6  ;;  %v21465_v29 = vpop.permute.xlu1 %17104  ;;  %v5093_v34 = vmul.f32 %v5019_v14, %v4448_v13  ;;  %v25813_v14 = vld [vmem:[#allocation9_spill] sm:$0xff]  ;;  %v21488_v4 = vpop.permute.xlu0 %8124  ;;  %v8172_v41 = vsel %vm8138_vm5, %v20958_v58, %v21051_v53 }
 0x276   : > { %17194 = vrot.lane.b32.xlu1 %v21283_v50, %s17670_s10  ;;  %16399 = vmatpush1.bf16.msra.mxu0 %v16398_v28  ;;  %v21481_v50 = vld [vmem:[%s17744_s17 + $0x48] sm:$0xff]  ;;  %v21486_v6 = vadd.f32 %v5092_v37, %v25813_v14  ;;  %v16400_v1 = vpack.c.bf16 %v8163_v9, %v21393_v32  ;;  %v4659_v13 = vpop.f32.mrb[42].mxu1  ;;  %v17062_v37 = vunpack.i.h.bf16 %v20986_v22  ;;  %v16402_v60 = vpack.c.bf16 %v8165_v3, %v21383_v51 }
 0x277   : > { %9657 = vrot.lane.b32.xlu0 %v21160_v39, %s17669_s20  ;;  %8642 = vmatpush1.msra.mxu1 %v8178_v59  ;;  %v25814_v39 = vld [vmem:[#allocation16_spill] sm:$0xff]  ;;  %v8159_v59 = vsel %vm8138_vm5, %v17057_v30, %v17061_v54  ;;  %v5098_v14 = vmul.f32 %v5039_v63, %v4659_v13  ;;  %v4661_v21 = vpop.f32.mrb[43].mxu1  ;;  %v25815_v28 = vunpack.i.l.bf16 %v21019_v16  ;;  %v8174_v22 = vsel %vm8138_vm5, %v20925_v40, %v20958_v58 }
 0x278   : > { %8701 = vmatprep.mubr.f32.mxu1 %v25653_v62  ;;  %v21498_v38 = vadd.f32 %v5093_v34, %v25814_v39  ;;  %8712 = vmatprep.subr.mxu0 %v8172_v41  ;;  %v5099_v51 = vmul.f32 %v5043_v49, %v4661_v21  ;;  %v25567_v41 = vunpack.i.l.bf16 %v21100_v24  ;;  %v17067_v63 = vunpack.i.h.bf16 %v21136_v55 }
 0x279   : > { %15934 = vmatmul.mubr.msk.f32.vlgmr.msra.gmra.mrb[86].mxu1 %vm742_vm1, %v21192_v10  ;;  %v8161_v34 = vsel %vm8138_vm5, %v25815_v28, %v17057_v30  ;;  %16401 = vmatprep.subr.bf16.mxu1 %v16400_v1  ;;  %v21515_v32 = vpop.permute.xlu1 %9549  ;;  %v8168_v16 = vsel %vm8138_vm5, %v21102_v26, %v21017_v47  ;;  %v25816_v30 = vld [vmem:[#allocation8_spill] sm:$0xff]  ;;  %v21526_v40 = vpop.permute.xlu0 %17089  ;;  %v16404_v58 = vpack.c.bf16 %v8159_v59, %v8163_v9  ;;  %v25818_v49 = vunpack.i.l.bf16 %v21136_v55  ;;  %v25819_v1 = vld [vmem:[#allocation10_spill] sm:$0xff] }
 0x27a   : > { %8772 = vmatprep.mubr.f32.mxu0 %v25653_v62  ;;  %16403 = vmatpush1.bf16.msra.mxu1 %v16402_v60  ;;  %v21524_v28 = vadd.f32 %v5098_v14, %v25816_v30  ;;  %v21535_v39 = vadd.f32 %v5099_v51, %v25819_v1  ;;  %v21539_v13 = vsel %vm8138_vm5, %v17061_v54, %v17062_v37  ;;  %v17472_v9 = vld [vmem:[%s25518_s3 + $0xa0] sm:$0xff]  ;;  %v17475_v51 = vld [vmem:[%s25518_s3 + $0xa8] sm:$0xff] }
 0x27b   : > { %8713 = vmatpush1.msra.mxu0 %v8174_v22  ;;  %8783 = vmatprep.subr.mxu1 %v8168_v16  ;;  %v8155_v21 = vsel %vm8138_vm5, %v17062_v37, %v25818_v49  ;;  %v5031_v60 = vrot.slane %v17472_v9, %v20884_v2  ;;  %v8170_v54 = vsel %vm8138_vm5, %v21051_v53, %v21102_v26  ;;  %v21557_v14 = vld [vmem:[%s17744_s17 + $0x60] sm:$0xff]  ;;  %v21560_v22 = vld [vmem:[%s17744_s17 + $0x68] sm:$0xff]  ;;  %v17076_v49 = vunpack.i.l.bf16 %v21266_v18 }
 0x27c   : > { %25817 = vst [vmem:[#allocation24_spill] sm:$0xff] %v21524_v28  ;;  %11082 = vrot.lane.b32.xlu1 %v21279_v27, %s17670_s10  ;;  %25820 = vst [vmem:[#allocation25_spill] sm:$0xff] %v21535_v39  ;;  %17179 = vrot.lane.b32.xlu0 %v25653_v62, %s17669_s20  ;;  %v16406_v27 = vpack.c.bf16 %v8161_v34, %v8165_v3  ;;  %v5035_v16 = vrot.slane %v17475_v51, %v20884_v2  ;;  %v21610_v28 = vld [vmem:[%s25518_s3 + $0xd8] sm:$0xff] }
 0x27d   : > { %15935 = vmatmul.mubr.msk.f32.vlgmr.msra.gmra.mrb[86].mxu0 %vm742_vm1, %v21192_v10  ;;  %16405 = vmatprep.subr.bf16.mxu0 %v16404_v58  ;;  %v21554_v37 = vpop.permute.xlu1 %17114  ;;  %v8164_v53 = vsel %vm8138_vm5, %v21049_v8, %v21180_v44  ;;  %v16408_v26 = vpack.c.bf16 %v8155_v21, %v8159_v59  ;;  %v21576_v30 = vsel %vm8138_vm5, %v17067_v63, %v25567_v41  ;;  %v21578_v58 = vpop.permute.xlu0 %17099  ;;  %v21587_v59 = vld [vmem:[%s25518_s3 + $0xd0] sm:$0xff] }
 0x27e   : > { %8843 = vmatprep.mubr.f32.mxu1 %v25653_v62  ;;  %16407 = vmatpush1.bf16.msra.mxu0 %v16406_v27  ;;  %v16410_v1 = vpack.c.bf16 %v21539_v13, %v8161_v34  ;;  %v4588_v27 = vpop.f32.mrb[42].mxu0  ;;  %v25821_v34 = vunpack.i.l.bf16 %v21136_v55  ;;  %v25822_v9 = vpack.i.bf16 %v21402_v11, %v21399_v33  ;;  %v25823_v55 = vpack.i.bf16 %v21407_v17, %v21410_v36 }
 0x27f   : > { %8784 = vmatpush1.msra.mxu1 %v8170_v54  ;;  %8854 = vmatprep.subr.mxu0 %v8164_v53  ;;  %v21594_v54 = vld [vmem:[%s25518_s3 + $0xc0] sm:$0xff]  ;;  %v17072_v53 = vunpack.i.h.bf16 %v21100_v24  ;;  %v5096_v41 = vmul.f32 %v5031_v60, %v4588_v27  ;;  %v4590_v39 = vpop.f32.mrb[43].mxu0  ;;  %v16412_v60 = vpack.c.bf16 %v21576_v30, %v8155_v21  ;;  %v8160_v36 = vsel %vm8138_vm5, %v21222_v19, %v21134_v15 }
 0x280   : > { %15936 = vmatmul.mubr.msk.f32.vlgmr.msra.gmra.mrb[88].mxu1 %vm742_vm1, %v21192_v10  ;;  %v8153_v3 = vsel %vm8138_vm5, %v25821_v34, %v17067_v63  ;;  %16409 = vmatprep.subr.bf16.mxu1 %v16408_v26  ;;  %v8166_v63 = vsel %vm8138_vm5, %v21017_v47, %v21049_v8  ;;  %v5097_v27 = vmul.f32 %v5035_v16, %v4590_v39  ;;  %v17077_v34 = vunpack.i.h.bf16 %v21266_v18  ;;  %v25825_v21 = vld [vmem:[#allocation12_spill] sm:$0xff] }
 0x281   : > { %17204 = vrot.lane.b32.xlu1 %v25822_v9, %s17670_s10  ;;  %17189 = vrot.lane.b32.xlu0 %v25823_v55, %s17670_s10  ;;  %v21623_v26 = vpop.permute.xlu1 %9557  ;;  %v17081_v9 = vunpack.i.l.bf16 %v21220_v5  ;;  %v21635_v47 = vpop.permute.xlu0 %17109  ;;  %v16414_v8 = vpack.c.bf16 %v8153_v3, %v21539_v13  ;;  %v8147_v18 = vsel %vm8138_vm5, %v17072_v53, %v17076_v49  ;;  %v25827_v16 = vunpack.i.l.bf16 %v21100_v24  ;;  %v21657_v13 = vld [vmem:[%s25518_s3 + $0xc8] sm:$0xff]  ;;  %v21664_v24 = vld [vmem:[%s25518_s3 + $0xf0] sm:$0xff] }
 0x282   : > { %16411 = vmatpush1.bf16.msra.mxu1 %v16410_v1  ;;  %8855 = vmatpush1.msra.mxu0 %v8166_v63  ;;  %v25824_v1 = vld [vmem:[#allocation13_spill] sm:$0xff]  ;;  %v21643_v39 = vadd.f32 %v5097_v27, %v25825_v21  ;;  %v17086_v63 = vunpack.i.l.bf16 %v21436_v43  ;;  %v25832_v51 = vrot.slane %v21594_v54, %v20884_v2  ;;  %v17101_v54 = vunpack.i.l.bf16 %v21578_v58 }
 0x283   : > { %8914 = vmatprep.mubr.f32.mxu0 %v25653_v62  ;;  %v21633_v55 = vadd.f32 %v5096_v41, %v25824_v1  ;;  %8925 = vmatprep.subr.mxu1 %v8160_v36  ;;  %v21649_v41 = vsel %vm8138_vm5, %v25827_v16, %v17072_v53  ;;  %v25828_v36 = vpack.i.bf16 %v21432_v42, %v21429_v35  ;;  %v21682_v16 = vld [vmem:[%s25518_s3 + $0xe0] sm:$0xff] }
 0x284   : > { %15937 = vmatmul.mubr.msk.f32.vlgmr.msra.gmra.mrb[88].mxu0 %vm742_vm1, %v21192_v10  ;;  %25826 = vst [vmem:[#allocation26_spill] sm:$0xff] %v21643_v39  ;;  %16413 = vmatprep.subr.bf16.mxu0 %v16412_v60  ;;  %v17082_v60 = vunpack.i.h.bf16 %v21220_v5  ;;  %v8162_v1 = vsel %vm8138_vm5, %v21180_v44, %v21222_v19  ;;  %v8156_v44 = vsel %vm8138_vm5, %v21178_v56, %v21328_v12 }
 0x285   : > { %11090 = vrot.lane.b32.xlu1 %v21432_v42, %s17670_s10  ;;  %16415 = vmatpush1.bf16.msra.mxu0 %v16414_v8  ;;  %v21677_v21 = vpop.permute.xlu1 %17119  ;;  %v21689_v42 = vld [vmem:[%s25518_s3 + $0xf8] sm:$0xff]  ;;  %v16416_v19 = vpack.c.bf16 %v8147_v18, %v21576_v30  ;;  %v21702_v5 = vsel %vm8138_vm5, %v17077_v34, %v17081_v9  ;;  %v21704_v53 = vpop.permute.xlu0 %9553  ;;  %v16418_v8 = vpack.c.bf16 %v21649_v41, %v8153_v3  ;;  %v21759_v30 = vunpack.i.l.bf16 %v21414_v0 }
 0x286   : > { %17199 = vrot.lane.b32.xlu0 %v25828_v36, %s17670_s10  ;;  %8926 = vmatpush1.msra.mxu1 %v8162_v1  ;;  %v17087_v36 = vunpack.i.h.bf16 %v21436_v43  ;;  %v21708_v1 = vsel %vm8138_vm5, %v17076_v49, %v17077_v34  ;;  %v21716_v43 = vld [vmem:[%s25518_s3 + $0xe8] sm:$0xff]  ;;  %v21722_v27 = vsel %vm8138_vm5, %v17081_v9, %v17082_v60  ;;  %v8158_v49 = vsel %vm8138_vm5, %v21134_v15, %v21178_v56 }
 0x287   : > { %8985 = vmatprep.mubr.f32.mxu1 %v25653_v62  ;;  %8996 = vmatprep.subr.mxu0 %v8156_v44  ;;  %v8143_v3 = vsel %vm8138_vm5, %v17082_v60, %v17086_v63  ;;  %v8152_v34 = vsel %vm8138_vm5, %v21366_v45, %v21264_v31  ;;  %v16420_v9 = vpack.c.bf16 %v21702_v5, %v8147_v18  ;;  %v25829_v44 = vunpack.i.l.bf16 %v20520_v20 }
 0x288   : > { %15938 = vmatmul.mubr.msk.f32.vlgmr.msra.gmra.mrb[90].mxu1 %vm742_vm1, %v21192_v10  ;;  %16417 = vmatprep.subr.bf16.mxu1 %v16416_v19  ;;  %v17097_v19 = vunpack.i.h.bf16 %v21414_v0  ;;  %v16422_v18 = vpack.c.bf16 %v21708_v1, %v21649_v41  ;;  %v8154_v20 = vsel %vm8138_vm5, %v21328_v12, %v21366_v45  ;;  %v8148_v41 = vsel %vm8138_vm5, %v21310_v48, %v21488_v4 }
 0x289   : > { %9056 = vmatprep.mubr.f32.mxu0 %v25653_v62  ;;  %16419 = vmatpush1.bf16.msra.mxu1 %v16418_v8  ;;  %v8203_v15 = vsel %vm8138_vm5, %v17082_v60, %v25829_v44  ;;  %v21741_v56 = vpop.permute.xlu1 %9569  ;;  %v8140_v8 = vsel %vm8138_vm5, %v17086_v63, %v17087_v36  ;;  %v21756_v60 = vpop.permute.xlu0 %9543  ;;  %v16424_v63 = vpack.c.bf16 %v8143_v3, %v21702_v5 }
 0x28a   : > { %8997 = vmatpush1.msra.mxu0 %v8158_v49  ;;  %9067 = vmatprep.subr.mxu1 %v8152_v34  ;;  %v25830_v49 = vpack.i.bf16 %v21481_v50, %v21478_v7  ;;  %v4801_v44 = vpop.f32.mrb[44].mxu1  ;;  %v25831_v12 = vrot.slane %v21587_v59, %v20884_v2  ;;  %v4730_v34 = vpop.f32.mrb[44].mxu0  ;;  %v25833_v5 = vrot.slane %v21610_v28, %v20884_v2  ;;  %v17102_v28 = vunpack.i.h.bf16 %v21578_v58 }
 0x28b   : > { %11086 = vrot.lane.b32.xlu0 %v21429_v35, %s17670_s10  ;;  %15939 = vmatmul.mubr.msk.f32.vlgmr.msra.gmra.mrb[90].mxu0 %vm742_vm1, %v21192_v10  ;;  %v4803_v0 = vpop.f32.mrb[45].mxu1  ;;  %v8204_v35 = vsel %vm8138_vm5, %v17087_v36, %v21043_v57  ;;  %v5100_v39 = vmul.f32 %v25832_v51, %v4730_v34  ;;  %v4732_v3 = vpop.f32.mrb[45].mxu0  ;;  %v25835_v57 = vrot.slane %v21657_v13, %v20884_v2  ;;  %v25836_v51 = vld [vmem:[#allocation18_spill] sm:$0xff]  ;;  %v17111_v58 = vunpack.i.l.bf16 %v21635_v47  ;;  %v25838_v34 = vld [vmem:[#allocation19_spill] sm:$0xff] }
 0x28c   : > { %17209 = vrot.lane.b32.xlu1 %v25830_v49, %s17670_s10  ;;  %v5102_v45 = vmul.f32 %v25831_v12, %v4801_v44  ;;  %16421 = vmatprep.subr.bf16.mxu0 %v16420_v9  ;;  %v5103_v59 = vmul.f32 %v25833_v5, %v4803_v0  ;;  %v17092_v9 = vunpack.i.h.bf16 %v21526_v40  ;;  %v17091_v44 = vunpack.i.l.bf16 %v21526_v40  ;;  %v25834_v12 = vld [vmem:[#allocation17_spill] sm:$0xff] }
 0x28d   : > { %9127 = vmatprep.mubr.f32.mxu1 %v25653_v62  ;;  %16423 = vmatpush1.bf16.msra.mxu0 %v16422_v18  ;;  %v5101_v36 = vmul.f32 %v25835_v57, %v4732_v3  ;;  %v21799_v18 = vadd.f32 %v5100_v39, %v25836_v51  ;;  %v25837_v40 = vld [vmem:[#allocation29_spill] sm:$0xff]  ;;  %v8150_v13 = vsel %vm8138_vm5, %v21264_v31, %v21310_v48 }
 0x28e   : > { %9068 = vmatpush1.msra.mxu1 %v8154_v20  ;;  %v21787_v49 = vadd.f32 %v5102_v45, %v25834_v12  ;;  %v21802_v20 = vadd.f32 %v5103_v59, %v25837_v40  ;;  %9138 = vmatprep.subr.mxu0 %v8148_v41  ;;  %v21813_v45 = vpop.permute.xlu1 %9573  ;;  %v21815_v39 = vpop.permute.xlu0 %9561  ;;  %v16428_v48 = vpack.c.bf16 %v8204_v35, %v8203_v15 }
 0x28f   : > { %15940 = vmatmul.mubr.msk.f32.vlgmr.msra.gmra.mrb[92].mxu1 %vm742_vm1, %v21192_v10  ;;  %11076 = vrot.lane.b32.xlu0 %v21407_v17, %s17670_s10  ;;  %v21818_v0 = vadd.f32 %v5101_v36, %v25838_v34  ;;  %v25839_v17 = vunpack.i.l.bf16 %v21465_v29  ;;  %v9732_v31 = vsel %vm9671_vm6, %v17097_v19, %v21759_v30  ;;  %v16430_v5 = vpack.c.bf16 %v8140_v8, %v21722_v27  ;;  %v4943_v3 = vpop.f32.mrb[46].mxu1 }
 0x290   : > { %11102 = vrot.lane.b32.xlu1 %v21478_v7, %s17670_s10  ;;  %v16426_v7 = vpack.c.bf16 %v21722_v27, %v21708_v1  ;;  %16425 = vmatprep.subr.bf16.mxu1 %v16424_v63  ;;  %v17107_v1 = vunpack.i.h.bf16 %v21465_v29  ;;  %v8144_v59 = vsel %vm8138_vm5, %v21356_v23, %v17091_v44  ;;  %v8205_v63 = vsel %vm8138_vm5, %v17092_v9, %v20748_v25  ;;  %v4945_v35 = vpop.f32.mrb[47].mxu1 }
 0x291   : > { %v9734_v41 = vsel %vm9671_vm6, %v25839_v17, %v17097_v19  ;;  %9198 = vmatprep.mubr.f32.mxu0 %v25653_v62  ;;  %9139 = vmatpush1.msra.mxu0 %v8150_v13  ;;  %v9730_v15 = vsel %vm9671_vm6, %v21759_v30, %v17101_v54  ;;  %v9728_v27 = vsel %vm9671_vm6, %v17101_v54, %v17102_v28 }
 0x292   : > { %16427 = vmatpush1.bf16.msra.mxu1 %v16426_v7  ;;  %15941 = vmatmul.mubr.msk.f32.vlgmr.msra.gmra.mrb[92].mxu0 %vm742_vm1, %v21192_v10  ;;  %v25840_v19 = vrot.slane %v21664_v24, %v20884_v2  ;;  %v8146_v25 = vsel %vm8138_vm5, %v21488_v4, %v21356_v23  ;;  %v21856_v12 = vsel %vm9671_vm6, %v17107_v1, %v17111_v58  ;;  %v21858_v57 = vpop.permute.xlu1 %17129  ;;  %v4872_v24 = vpop.f32.mrb[46].mxu0  ;;  %v25842_v4 = vld [vmem:[#allocation20_spill] sm:$0xff] }
 0x293   : > { %16429 = vmatprep.subr.bf16.mxu0 %v16428_v48  ;;  %v25841_v36 = vrot.slane %v21689_v42, %v20884_v2  ;;  %11094 = vrot.lane.b32.xlu0 %v21399_v33, %s17670_s10  ;;  %v8141_v23 = vsel %vm8138_vm5, %v17091_v44, %v17092_v9  ;;  %v25843_v40 = vrot.slane %v21682_v16, %v20884_v2  ;;  %v4874_v7 = vpop.f32.mrb[47].mxu0  ;;  %v25844_v33 = vld [vmem:[#allocation22_spill] sm:$0xff]  ;;  %v25845_v44 = vld [vmem:[#allocation21_spill] sm:$0xff] }
 0x294   : > { %v5106_v8 = vmul.f32 %v25840_v19, %v4943_v3  ;;  %16431 = vmatpush1.bf16.msra.mxu0 %v16430_v5  ;;  %11106 = vrot.lane.b32.xlu1 %v21481_v50, %s17670_s10  ;;  %v21867_v50 = vpop.permute.xlu0 %9565  ;;  %v16432_v42 = vpack.c.bf16 %v9728_v27, %v9732_v31  ;;  %v16434_v34 = vpack.c.bf16 %v9730_v15, %v9734_v41  ;;  %v17116_v31 = vunpack.i.l.bf16 %v21554_v37  ;;  %v25848_v19 = vld [vmem:[#allocation30_spill] sm:$0xff] }
 0x295   : > { %v5107_v54 = vmul.f32 %v25841_v36, %v4945_v35  ;;  %9209 = vmatprep.subr.mxu1 %v8144_v59  ;;  %v5104_v13 = vmul.f32 %v25843_v40, %v4872_v24  ;;  %9280 = vmatprep.subr.mxu0 %v8205_v63  ;;  %v16436_v9 = vpack.c.bf16 %v21856_v12, %v9728_v27  ;;  %v17112_v63 = vunpack.i.h.bf16 %v21635_v47  ;;  %v25849_v36 = vld [vmem:[#allocation6_spill] sm:$0xff] }
 0x296   : > { %v21870_v51 = vadd.f32 %v5106_v8, %v25842_v4  ;;  %9210 = vmatpush1.msra.mxu1 %v8146_v25  ;;  %9269 = vmatprep.mubr.f32.mxu1 %v25653_v62  ;;  %v25846_v16 = vrot.slane %v21716_v43, %v20884_v2  ;;  %v9726_v41 = vsel %vm9671_vm6, %v17102_v28, %v17107_v1  ;;  %v21895_v3 = vpop.permute.xlu1 %9585  ;;  %v21902_v2 = vld [vmem:[%s17744_s17 + $0x50] sm:$0xff]  ;;  %v21905_v43 = vld [vmem:[%s17744_s17 + $0x58] sm:$0xff]  ;;  %v17121_v8 = vunpack.i.l.bf16 %v21677_v21  ;;  %v21955_v4 = vld [vmem:[%s17744_s17 + $0x88] sm:$0xff] }
 0x297   : > { %v21876_v17 = vadd.f32 %v5107_v54, %v25844_v33  ;;  %9340 = vmatprep.mubr.f32.mxu0 %v25653_v62  ;;  %v21882_v48 = vadd.f32 %v5104_v13, %v25845_v44  ;;  %v25847_v59 = vpack.i.bf16 %v21560_v22, %v21557_v14  ;;  %11098 = vrot.lane.b32.xlu0 %v21402_v11, %s17670_s10  ;;  %v17117_v35 = vunpack.i.h.bf16 %v21554_v37  ;;  %v21966_v40 = vld [vmem:[%s17744_s17 + $0x78] sm:$0xff] }
 0x298   : > { %v5105_v5 = vmul.f32 %v25846_v16, %v4874_v7  ;;  %9281 = vmatpush1.msra.mxu0 %v8141_v23  ;;  %15942 = vmatmul.mubr.msk.f32.vlgmr.msra.gmra.mrb[94].mxu1 %vm742_vm1, %v21192_v10  ;;  %v21909_v28 = vpack.i.bf16 %v21905_v43, %v21902_v2  ;;  %v9733_v1 = vsel %vm9671_vm6, %v21515_v32, %v21704_v53  ;;  %v21915_v27 = vpop.permute.xlu0 %17124  ;;  %v21929_v54 = vsub.s32 3, %v25849_v36  ;;  %v21992_v16 = vld [vmem:[%s25518_s3 + $0x10] sm:$0xff] }
 0x299   : > { %17219 = vrot.lane.b32.xlu1 %v25847_v59, %s17670_s10  ;;  %15943 = vmatmul.mubr.msk.f32.vlgmr.msra.gmra.mrb[94].mxu0 %vm742_vm1, %v21192_v10  ;;  %v16438_v25 = vpack.c.bf16 %v9726_v41, %v9730_v15  ;;  %v9729_v24 = vsel %vm9671_vm6, %v21623_v26, %v21815_v39  ;;  %v9735_v10 = vsel %vm9671_vm6, %v21756_v60, %v21515_v32  ;;  %v25568_v23 = vunpack.i.l.bf16 %v21915_v27  ;;  %v21952_v32 = vld [vmem:[%s17744_s17 + $0x80] sm:$0xff] }
 0x29a   : > { %v21918_v11 = vadd.f32 %v5105_v5, %v25848_v19  ;;  %16433 = vmatprep.subr.bf16.mxu1 %v16432_v42  ;;  %16437 = vmatprep.subr.bf16.mxu0 %v16436_v9  ;;  %v9720_v37 = vsel %vm9671_vm6, %v17112_v63, %v17116_v31  ;;  %v9722_v15 = vsel %vm9671_vm6, %v17111_v58, %v17112_v63  ;;  %v21963_v58 = vld [vmem:[%s17744_s17 + $0x70] sm:$0xff]  ;;  %v17122_v33 = vunpack.i.h.bf16 %v21677_v21  ;;  %v22010_v63 = vld [vmem:[%s25518_s3 + $0x18] sm:$0xff] }
 0x29b   : > { %16435 = vmatpush1.bf16.msra.mxu1 %v16434_v34  ;;  %17214 = vrot.lane.b32.xlu0 %v21909_v28, %s17670_s10  ;;  %v21959_v47 = vpack.i.bf16 %v21955_v4, %v21952_v32  ;;  %v21970_v13 = vpack.i.bf16 %v21966_v40, %v21963_v58  ;;  %v21976_v7 = vsel %vm9671_vm6, %v17117_v35, %v17121_v8  ;;  %v25853_v21 = vunpack.i.l.bf16 %v21858_v57 }
 0x29c   : > { %9748 = vmatprep.subr.mxu1 %v9733_v1  ;;  %16439 = vmatpush1.bf16.msra.mxu0 %v16438_v25  ;;  %v21978_v42 = vpop.permute.xlu1 %9589  ;;  %v21982_v34 = vsel %vm9671_vm6, %v17116_v31, %v17117_v35  ;;  %v16440_v9 = vpack.c.bf16 %v9720_v37, %v21856_v12  ;;  %v6492_v5 = vrot.slane %v21992_v16, %v21929_v54  ;;  %v22003_v12 = vld [vmem:[%s25518_s3] sm:$0xff] }
 0x29d   : > { %11118 = vrot.lane.b32.xlu1 %v21557_v14, %s17670_s10  ;;  %v21948_v14 = vld [vmem:[%s25516_s1 + $0x18] sm:$0xf]  ;;  %25850 = vst [vmem:[#allocation27_spill] sm:$0xff] %v21959_v47  ;;  %9808 = vmatprep.mubr.f32.mxu1 %v25653_v62  ;;  %25851 = vst [vmem:[#allocation28_spill] sm:$0xff] %v21970_v13  ;;  %v21987_v44 = vpop.permute.xlu0 %9577  ;;  %v16442_v31 = vpack.c.bf16 %v9722_v15, %v9726_v41  ;;  %v6484_v59 = vrot.slane %v22003_v12, %v21929_v54 }
 0x29e   : > { %9819 = vmatprep.subr.mxu0 %v9729_v24  ;;  %9879 = vmatprep.mubr.f32.mxu0 %v25653_v62  ;;  %v9731_v41 = vsel %vm9671_vm6, %v21704_v53, %v21623_v26  ;;  %v16444_v1 = vpack.c.bf16 %v21976_v7, %v9720_v37  ;;  %v9712_v19 = vsel %vm9671_vm6, %v17122_v33, %v25568_v23  ;;  %v17127_v26 = vunpack.i.h.bf16 %v21915_v27  ;;  %v5482_v53 = vpop.f32.mrb[48].mxu1 }
 0x29f   : > { %9749 = vmatpush1.msra.mxu1 %v9735_v10  ;;  %11110 = vrot.lane.b32.xlu0 %v21902_v2, %s17670_s10  ;;  %v16446_v25 = vpack.c.bf16 %v21982_v34, %v9722_v15  ;;  %v9725_v24 = vsel %vm9671_vm6, %v21867_v50, %v21741_v56  ;;  %v9727_v10 = vsel %vm9671_vm6, %v21815_v39, %v21867_v50 }
 0x2a0   : > { %15945 = vmatmul.mubr.msk.f32.vlgmr.msra.gmra.mrb[96].mxu1 %vm742_vm1, %v21948_v14  ;;  %16441 = vmatprep.subr.bf16.mxu1 %v16440_v9  ;;  %v6611_v15 = vmul.f32 %v6492_v5, %v5482_v53  ;;  %v5484_v9 = vpop.f32.mrb[49].mxu1  ;;  %v9721_v39 = vsel %vm9671_vm6, %v21813_v45, %v21987_v44  ;;  %v16448_v50 = vpack.c.bf16 %v9712_v19, %v21976_v7  ;;  %v22066_v7 = vld [vmem:[%s25518_s3 + $0x30] sm:$0xff] }
 0x2a1   : > { %11122 = vrot.lane.b32.xlu1 %v21560_v22, %s17670_s10  ;;  %v6496_v22 = vrot.slane %v22010_v63, %v21929_v54  ;;  %16443 = vmatpush1.bf16.msra.mxu1 %v16442_v31  ;;  %v22043_v31 = vld [vmem:[%s25518_s3 + $0x8] sm:$0xff]  ;;  %v9714_v23 = vsel %vm9671_vm6, %v17121_v8, %v17122_v33 }
 0x2a2   : > { %9820 = vmatpush1.msra.mxu0 %v9731_v41  ;;  %v22038_v37 = vpop.permute.xlu1 %17139  ;;  %v6488_v41 = vrot.slane %v22043_v31, %v21929_v54  ;;  %9890 = vmatprep.subr.mxu1 %v9725_v24  ;;  %v25854_v33 = vld [vmem:[#allocation33_spill] sm:$0xff] }
 0x2a3   : > { %15946 = vmatmul.mubr.msk.f32.vlgmr.msra.gmra.mrb[96].mxu0 %vm742_vm1, %v21948_v14  ;;  %16445 = vmatprep.subr.bf16.mxu0 %v16444_v1  ;;  %v9582_v5 = vpop.permute.xlu0 %9581  ;;  %v5411_v1 = vpop.f32.mrb[48].mxu0  ;;  %v6612_v53 = vmul.f32 %v6496_v22, %v5484_v9  ;;  %v6508_v22 = vrot.slane %v22066_v7, %v21929_v54 }
 0x2a4   : > { %16447 = vmatpush1.bf16.msra.mxu0 %v16446_v25  ;;  %11114 = vrot.lane.b32.xlu0 %v21905_v43, %s17670_s10  ;;  %v25852_v25 = vld [vmem:[#allocation31_spill] sm:$0xff]  ;;  %v9708_v43 = vsel %vm9671_vm6, %v17127_v26, %v25853_v21  ;;  %v6609_v8 = vmul.f32 %v6484_v59, %v5411_v1 }
 0x2a5   : > { %17229 = vrot.lane.b32.xlu1 %v21959_v47, %s17670_s10  ;;  %v22061_v35 = vadd.f32 %v6611_v15, %v25852_v25  ;;  %v5413_v47 = vpop.f32.mrb[49].mxu0  ;;  %9891 = vmatpush1.msra.mxu1 %v9727_v10  ;;  %v22076_v24 = vadd.f32 %v6612_v53, %v25854_v33  ;;  %v25855_v15 = vunpack.i.l.bf16 %v21915_v27  ;;  %v22091_v59 = vld [vmem:[%s25518_s3 + $0x38] sm:$0xff]  ;;  %v9723_v27 = vsel %vm9671_vm6, %v21741_v56, %v21813_v45 }
 0x2a6   : > { %9950 = vmatprep.mubr.f32.mxu1 %v25653_v62  ;;  %9961 = vmatprep.subr.mxu0 %v9721_v39  ;;  %v22086_v10 = vpop.permute.xlu1 %9601  ;;  %v6610_v25 = vmul.f32 %v6488_v41, %v5413_v47  ;;  %v6512_v1 = vrot.slane %v22091_v59, %v21929_v54  ;;  %v25856_v41 = vld [vmem:[#allocation32_spill] sm:$0xff]  ;;  %v17132_v53 = vunpack.i.h.bf16 %v21858_v57  ;;  %v16452_v21 = vpack.c.bf16 %v9708_v43, %v9712_v19 }
 0x2a7   : > { %v22082_v9 = vsel %vm9671_vm6, %v25855_v15, %v17127_v26  ;;  %15947 = vmatmul.mubr.msk.f32.vlgmr.msra.gmra.mrb[98].mxu1 %vm742_vm1, %v21948_v14  ;;  %16449 = vmatprep.subr.bf16.mxu1 %v16448_v50  ;;  %v16450_v26 = vpack.c.bf16 %v9714_v23, %v21982_v34  ;;  %v17135_v47 = vpop.permute.xlu0 %17134  ;;  %v22103_v39 = vadd.f32 %v6609_v8, %v25856_v41  ;;  %v25857_v50 = vld [vmem:[#allocation34_spill] sm:$0xff]  ;;  %v25570_v56 = vunpack.i.l.bf16 %v22038_v37  ;;  %v5624_v15 = vpop.f32.mrb[50].mxu1 }
 0x2a8   : > { %17224 = vrot.lane.b32.xlu0 %v21970_v13, %s17670_s10  ;;  %9962 = vmatpush1.msra.mxu0 %v9723_v27  ;;  %v22109_v33 = vadd.f32 %v6610_v25, %v25857_v50  ;;  %v16454_v45 = vpack.c.bf16 %v22082_v9, %v9714_v23  ;;  %v9717_v34 = vsel %vm9671_vm6, %v9582_v5, %v21895_v3  ;;  %v17137_v8 = vunpack.i.h.bf16 %v17135_v47  ;;  %v22127_v23 = vld [vmem:[%s17744_s17 + $0xa0] sm:$0xff] }
 0x2a9   : > { %11134 = vrot.lane.b32.xlu1 %v21952_v32, %s17670_s10  ;;  %v17136_v32 = vunpack.i.l.bf16 %v17135_v47  ;;  %10021 = vmatprep.mubr.f32.mxu0 %v25653_v62  ;;  %v9719_v19 = vsel %vm9671_vm6, %v21987_v44, %v9582_v5  ;;  %v6615_v27 = vmul.f32 %v6508_v22, %v5624_v15  ;;  %25858 = vst [vmem:[#allocation5_spill] sm:$0xff] %v22127_v23  ;;  %v22130_v47 = vld [vmem:[%s17744_s17 + $0xa8] sm:$0xff]  ;;  %v25860_v44 = vunpack.i.l.bf16 %v21858_v57  ;;  %v25861_v22 = vld [vmem:[#allocation35_spill] sm:$0xff] }
 0x2aa   : > { %16451 = vmatpush1.bf16.msra.mxu1 %v16450_v26  ;;  %15948 = vmatmul.mubr.msk.f32.vlgmr.msra.gmra.mrb[98].mxu0 %vm742_vm1, %v21948_v14  ;;  %v5626_v26 = vpop.f32.mrb[51].mxu1  ;;  %v22134_v41 = vpack.i.bf16 %v22130_v47, %v22127_v23 }
 0x2ab   : > { %16453 = vmatprep.subr.bf16.mxu0 %v16452_v21  ;;  %v9704_v25 = vsel %vm9671_vm6, %v17132_v53, %v17136_v32  ;;  %v6616_v50 = vmul.f32 %v6512_v1, %v5626_v26  ;;  %v9706_v5 = vsel %vm9671_vm6, %v25860_v44, %v17132_v53  ;;  %10032 = vmatprep.subr.mxu1 %v9717_v34  ;;  %v25862_v53 = vld [vmem:[#allocation36_spill] sm:$0xff]  ;;  %v22186_v44 = vld [vmem:[%s17744_s17 + $0x98] sm:$0xff] }
 0x2ac   : > { %25859 = vst [vmem:[#allocation9_spill] sm:$0xff] %v22134_v41  ;;  %16455 = vmatpush1.bf16.msra.mxu0 %v16454_v45  ;;  %v16456_v21 = vpack.c.bf16 %v9704_v25, %v9708_v43  ;;  %11126 = vrot.lane.b32.xlu0 %v21963_v58, %s17670_s10  ;;  %v22145_v15 = vadd.f32 %v6615_v27, %v25861_v22  ;;  %v22150_v43 = vld [vmem:[%s25518_s3 + $0x20] sm:$0xff]  ;;  %v22167_v34 = vld [vmem:[%s25518_s3 + $0x28] sm:$0xff] }
 0x2ad   : > { %11138 = vrot.lane.b32.xlu1 %v21955_v4, %s17670_s10  ;;  %v22142_v4 = vpop.permute.xlu1 %9605  ;;  %v6500_v57 = vrot.slane %v22150_v43, %v21929_v54  ;;  %10092 = vmatprep.mubr.f32.mxu1 %v25653_v62  ;;  %v9594_v58 = vpop.permute.xlu0 %9593  ;;  %v22159_v1 = vsel %vm9671_vm6, %v17137_v8, %v25570_v56  ;;  %v22162_v45 = vadd.f32 %v6616_v50, %v25862_v53  ;;  %v22183_v50 = vld [vmem:[%s17744_s17 + $0x90] sm:$0xff] }
 0x2ae   : > { %10033 = vmatpush1.msra.mxu1 %v9719_v19  ;;  %v6504_v19 = vrot.slane %v22167_v34, %v21929_v54  ;;  %v22173_v27 = vsel %vm9671_vm6, %v17136_v32, %v17137_v8  ;;  %v9713_v26 = vsel %vm9671_vm6, %v21978_v42, %v9594_v58  ;;  %25863 = vst [vmem:[#allocation16_spill] sm:$0xff] %v22183_v50 }
 0x2af   : > { %15949 = vmatmul.mubr.msk.f32.vlgmr.msra.gmra.mrb[100].mxu1 %vm742_vm1, %v21948_v14  ;;  %16457 = vmatprep.subr.bf16.mxu1 %v16456_v21  ;;  %v22190_v22 = vpack.i.bf16 %v22186_v44, %v22183_v50  ;;  %v9715_v32 = vsel %vm9671_vm6, %v21895_v3, %v21978_v42  ;;  %v16458_v8 = vpack.c.bf16 %v9706_v5, %v22082_v9  ;;  %v5553_v21 = vpop.f32.mrb[50].mxu0  ;;  %v22214_v9 = vld [vmem:[%s25518_s3 + $0x58] sm:$0xff] }
 0x2b0   : > { %10103 = vmatprep.subr.mxu0 %v9713_v26  ;;  %11130 = vrot.lane.b32.xlu0 %v21966_v40, %s17670_s10  ;;  %v16460_v53 = vpack.c.bf16 %v22159_v1, %v9704_v25  ;;  %v6613_v56 = vmul.f32 %v6500_v57, %v5553_v21  ;;  %v22203_v26 = vld [vmem:[%s25518_s3 + $0x50] sm:$0xff]  ;;  %v16462_v40 = vpack.c.bf16 %v22173_v27, %v9706_v5 }
 0x2b1   : > { %17239 = vrot.lane.b32.xlu1 %v22134_v41, %s17670_s10  ;;  %25864 = vst [vmem:[#allocation8_spill] sm:$0xff] %v22190_v22  ;;  %10104 = vmatpush1.msra.mxu0 %v9715_v32  ;;  %v5555_v41 = vpop.f32.mrb[51].mxu0  ;;  %25865 = vst [vmem:[#allocation10_spill] sm:$0xff] %v22203_v26  ;;  %v6524_v13 = vrot.slane %v22203_v26, %v21929_v54  ;;  %v6528_v25 = vrot.slane %v22214_v9, %v21929_v54  ;;  %v25867_v32 = vld [vmem:[#allocation37_spill] sm:$0xff] }
 0x2b2   : > { %10163 = vmatprep.mubr.f32.mxu0 %v25653_v62  ;;  %16459 = vmatpush1.bf16.msra.mxu1 %v16458_v8  ;;  %v22208_v3 = vpop.permute.xlu1 %17149  ;;  %v6614_v42 = vmul.f32 %v6504_v19, %v5555_v41  ;;  %25866 = vst [vmem:[#allocation13_spill] sm:$0xff] %v22214_v9  ;;  %v9598_v57 = vpop.permute.xlu0 %9597  ;;  %v22221_v8 = vadd.f32 %v6613_v56, %v25867_v32  ;;  %v25869_v19 = vld [vmem:[#allocation38_spill] sm:$0xff]  ;;  %v17142_v56 = vunpack.i.h.bf16 %v22038_v37 }
 0x2b3   : > { %15950 = vmatmul.mubr.msk.f32.vlgmr.msra.gmra.mrb[100].mxu0 %vm742_vm1, %v21948_v14  ;;  %16461 = vmatprep.subr.bf16.mxu0 %v16460_v53  ;;  %v9709_v41 = vsel %vm9671_vm6, %v9598_v57, %v22086_v10  ;;  %v9711_v5 = vsel %vm9671_vm6, %v9594_v58, %v9598_v57  ;;  %v5766_v9 = vpop.f32.mrb[52].mxu1  ;;  %v22313_v26 = vld [vmem:[%s25518_s3 + $0x70] sm:$0xff] }
 0x2b4   : > { %25868 = vst [vmem:[#allocation12_spill] sm:$0xff] %v22221_v8  ;;  %16463 = vmatpush1.bf16.msra.mxu0 %v16462_v40  ;;  %v22231_v21 = vadd.f32 %v6614_v42, %v25869_v19  ;;  %17234 = vrot.lane.b32.xlu0 %v22190_v22, %s17670_s10  ;;  %v6619_v53 = vmul.f32 %v6524_v13, %v5766_v9  ;;  %v5768_v40 = vpop.f32.mrb[53].mxu1  ;;  %v25871_v42 = vld [vmem:[#allocation39_spill] sm:$0xff]  ;;  %v17505_v9 = vld [vmem:[%s17744_s17 + $0xc8] sm:$0xff]  ;;  %25882 = vst [vmem:[#allocation31_spill] sm:$0xff] %v22313_v26 }
 0x2b5   : > { %11150 = vrot.lane.b32.xlu1 %v22127_v23, %s17670_s10  ;;  %10174 = vmatprep.subr.mxu1 %v9709_v41  ;;  %v6620_v58 = vmul.f32 %v6528_v25, %v5768_v40  ;;  %v22248_v13 = vld [vmem:[%s17744_s17 + $0xc0] sm:$0xff] }
 0x2b6   : > { %25870 = vst [vmem:[#allocation17_spill] sm:$0xff] %v22231_v21  ;;  %10175 = vmatpush1.msra.mxu1 %v9711_v5  ;;  %10234 = vmatprep.mubr.f32.mxu1 %v25653_v62  ;;  %v22237_v32 = vpop.permute.xlu1 %9617  ;;  %v17145_v57 = vpop.permute.xlu0 %17144  ;;  %v22242_v19 = vadd.f32 %v6619_v53, %v25871_v42  ;;  %25873 = vst [vmem:[#allocation29_spill] sm:$0xff] %v22248_v13  ;;  %v22252_v41 = vpack.i.bf16 %v17505_v9, %v22248_v13  ;;  %v25875_v25 = vld [vmem:[#allocation40_spill] sm:$0xff]  ;;  %v25877_v53 = vunpack.i.l.bf16 %v22038_v37 }
 0x2b7   : > { %15951 = vmatmul.mubr.msk.f32.vlgmr.msra.gmra.mrb[102].mxu1 %vm742_vm1, %v21948_v14  ;;  %10305 = vmatprep.mubr.f32.mxu0 %v25653_v62  ;;  %v17146_v5 = vunpack.i.l.bf16 %v17145_v57  ;;  %v22255_v40 = vadd.f32 %v6620_v58, %v25875_v25  ;;  %v17147_v22 = vunpack.i.h.bf16 %v17145_v57  ;;  %v22270_v58 = vld [vmem:[%s25518_s3 + $0x40] sm:$0xff]  ;;  %v25881_v21 = vunpack.i.l.bf16 %v22208_v3 }
 0x2b8   : > { %25872 = vst [vmem:[#allocation18_spill] sm:$0xff] %v22242_v19  ;;  %25874 = vst [vmem:[#allocation19_spill] sm:$0xff] %v22252_v41  ;;  %10376 = vmatprep.mubr.f32.mxu1 %v25653_v62  ;;  %v9698_v42 = vsel %vm9671_vm6, %v25877_v53, %v17142_v56  ;;  %11142 = vrot.lane.b32.xlu0 %v22183_v50, %s17670_s10  ;;  %v6516_v37 = vrot.slane %v22270_v58, %v21929_v54  ;;  %v22278_v53 = vld [vmem:[%s25518_s3 + $0x48] sm:$0xff]  ;;  %v17508_v50 = vld [vmem:[%s17744_s17 + $0xb0] sm:$0xff] }
 0x2b9   : > { %11154 = vrot.lane.b32.xlu1 %v22130_v47, %s17670_s10  ;;  %25876 = vst [vmem:[#allocation20_spill] sm:$0xff] %v22255_v40  ;;  %v9696_v23 = vsel %vm9671_vm6, %v17142_v56, %v17146_v5  ;;  %25878 = vst [vmem:[#allocation22_spill] sm:$0xff] %v22270_v58  ;;  %v6520_v57 = vrot.slane %v22278_v53, %v21929_v54  ;;  %v16466_v47 = vpack.c.bf16 %v9698_v42, %v22173_v27 }
 0x2ba   : > { %v16464_v25 = vpack.c.bf16 %v9696_v23, %v22159_v1  ;;  %25879 = vst [vmem:[#allocation21_spill] sm:$0xff] %v22278_v53  ;;  %v17509_v1 = vld [vmem:[%s17744_s17 + $0xb8] sm:$0xff]  ;;  %v22297_v53 = vsel %vm9671_vm6, %v17147_v22, %v25881_v21  ;;  %v22301_v58 = vsel %vm9671_vm6, %v17146_v5, %v17147_v22  ;;  %v6540_v22 = vrot.slane %v22313_v26, %v21929_v54 }
 0x2bb   : > { %v22291_v40 = vpack.i.bf16 %v17509_v1, %v17508_v50  ;;  %v25883_v5 = vld [vmem:[#allocation7_spill] sm:$0xff] }
 0x2bc   : > { %v22284_v56 = vpop.permute.xlu1 %9621  ;;  %11146 = vrot.lane.b32.xlu0 %v22186_v44, %s17670_s10  ;;  %v9610_v19 = vpop.permute.xlu0 %9609  ;;  %16465 = vmatprep.subr.bf16.mxu1 %v16464_v25  ;;  %v9707_v25 = vsel %vm9671_vm6, %v22086_v10, %v22142_v4  ;;  %v22326_v10 = vld [vmem:[%s25518_s3 + $0x78] sm:$0xff] }
 0x2bd   : > { %17249 = vrot.lane.b32.xlu1 %v22252_v41, %s17670_s10  ;;  %25880 = vst [vmem:[#allocation30_spill] sm:$0xff] %v22291_v40  ;;  %v5695_v41 = vpop.f32.mrb[52].mxu0  ;;  %v9705_v27 = vsel %vm9671_vm6, %v22142_v4, %v9610_v19  ;;  %16467 = vmatpush1.bf16.msra.mxu1 %v16466_v47  ;;  %25884 = vst [vmem:[#allocation33_spill] sm:$0xff] %v22326_v10  ;;  %v6544_v4 = vrot.slane %v22326_v10, %v21929_v54 }
 0x2be   : > { %v6617_v44 = vmul.f32 %v6516_v37, %v5695_v41  ;;  %v5697_v8 = vpop.f32.mrb[53].mxu0  ;;  %10245 = vmatprep.subr.mxu0 %v9705_v27  ;;  %v16468_v41 = vpack.c.bf16 %v22297_v53, %v9696_v23  ;;  %v16470_v23 = vpack.c.bf16 %v22301_v58, %v9698_v42  ;;  %v25885_v37 = vld [vmem:[#allocation15_spill] sm:$0xff]  ;;  %v17152_v42 = vunpack.i.h.bf16 %v22208_v3 }
 0x2bf   : > { %v6618_v21 = vmul.f32 %v6520_v57, %v5697_v8  ;;  %10246 = vmatpush1.msra.mxu0 %v9707_v25 }
 0x2c0   : > { %v22321_v47 = vadd.f32 %v6617_v44, %v25883_v5  ;;  %17244 = vrot.lane.b32.xlu0 %v22291_v40, %s17670_s10  ;;  %15952 = vmatmul.mubr.msk.f32.vlgmr.msra.gmra.mrb[102].mxu0 %vm742_vm1, %v21948_v14  ;;  %v5908_v44 = vpop.f32.mrb[54].mxu1 }
 0x2c1   : > { %11166 = vrot.lane.b32.xlu1 %v22248_v13, %s17670_s10  ;;  %v22332_v8 = vpop.permute.xlu1 %17159  ;;  %v22338_v57 = vadd.f32 %v6618_v21, %v25885_v37  ;;  %v9614_v27 = vpop.permute.xlu0 %9613  ;;  %16469 = vmatprep.subr.bf16.mxu0 %v16468_v41  ;;  %v6623_v40 = vmul.f32 %v6540_v22, %v5908_v44  ;;  %v17512_v21 = vld [vmem:[%s17744_s17 + $0xe8] sm:$0xff]  ;;  %v17513_v37 = vld [vmem:[%s17744_s17 + $0xe0] sm:$0xff] }
 0x2c2   : > { %10447 = vmatprep.mubr.f32.mxu0 %v25653_v62  ;;  %16471 = vmatpush1.bf16.msra.mxu0 %v16470_v23  ;;  %v9701_v25 = vsel %vm9671_vm6, %v9614_v27, %v22237_v32  ;;  %v9703_v5 = vsel %vm9671_vm6, %v9610_v19, %v9614_v27  ;;  %v5910_v13 = vpop.f32.mrb[55].mxu1  ;;  %v22350_v41 = vpack.i.bf16 %v17512_v21, %v17513_v37 }
 0x2c3   : > { %25886 = vst [vmem:[#allocation32_spill] sm:$0xff] %v22338_v57  ;;  %10316 = vmatprep.subr.mxu1 %v9701_v25  ;;  %v6624_v57 = vmul.f32 %v6544_v4, %v5910_v13  ;;  %v22354_v23 = vadd.f32 %v6623_v40, %v21237_v52  ;;  %v25892_v13 = vunpack.i.l.bf16 %v22208_v3  ;;  %v22381_v25 = vld [vmem:[%s25518_s3 + $0x68] sm:$0xff]  ;;  %v17516_v3 = vld [vmem:[%s17744_s17 + $0xd0] sm:$0xff] }
 0x2c4   : > { %25887 = vst [vmem:[#allocation34_spill] sm:$0xff] %v22350_v41  ;;  %11158 = vrot.lane.b32.xlu0 %v17508_v50, %s17670_s10  ;;  %10317 = vmatpush1.msra.mxu1 %v9703_v5  ;;  %v22367_v50 = vld [vmem:[%s25518_s3 + $0x60] sm:$0xff]  ;;  %25893 = vst [vmem:[#allocation38_spill] sm:$0xff] %v22381_v25  ;;  %v6536_v5 = vrot.slane %v22381_v25, %v21929_v54  ;;  %v22397_v25 = vld [vmem:[%s25518_s3 + $0x90] sm:$0xff] }
 0x2c5   : > { %11170 = vrot.lane.b32.xlu1 %v17505_v9, %s17670_s10  ;;  %25888 = vst [vmem:[#allocation35_spill] sm:$0xff] %v22354_v23  ;;  %v22356_v19 = vpop.permute.xlu1 %9633  ;;  %v17155_v22 = vpop.permute.xlu0 %17154  ;;  %15953 = vmatmul.mubr.msk.f32.vlgmr.msra.gmra.mrb[104].mxu1 %vm742_vm1, %v21948_v14  ;;  %v25889_v9 = vld [vmem:[#allocation4_spill] sm:$0xff]  ;;  %25891 = vst [vmem:[#allocation37_spill] sm:$0xff] %v22367_v50  ;;  %v6532_v52 = vrot.slane %v22367_v50, %v21929_v54  ;;  %v9690_v40 = vsel %vm9671_vm6, %v25892_v13, %v17152_v42 }
 0x2c6   : > { %v22361_v27 = vadd.f32 %v6624_v57, %v25889_v9  ;;  %v17156_v44 = vunpack.i.l.bf16 %v17155_v22  ;;  %10518 = vmatprep.mubr.f32.mxu1 %v25653_v62  ;;  %v17157_v57 = vunpack.i.h.bf16 %v17155_v22  ;;  %v17517_v9 = vld [vmem:[%s17744_s17 + $0xd8] sm:$0xff]  ;;  %v5837_v22 = vpop.f32.mrb[54].mxu0  ;;  %25895 = vst [vmem:[#allocation40_spill] sm:$0xff] %v22397_v25 }
 0x2c7   : > { %v6621_v23 = vmul.f32 %v6532_v52, %v5837_v22  ;;  %v5839_v50 = vpop.f32.mrb[55].mxu0  ;;  %v22413_v22 = vld [vmem:[%s25518_s3 + $0x98] sm:$0xff] }
 0x2c8   : > { %25890 = vst [vmem:[#allocation36_spill] sm:$0xff] %v22361_v27  ;;  %11162 = vrot.lane.b32.xlu0 %v17509_v1, %s17670_s10  ;;  %v22388_v27 = vpack.i.bf16 %v17517_v9, %v17516_v3  ;;  %v9688_v13 = vsel %vm9671_vm6, %v17152_v42, %v17156_v44  ;;  %v6556_v1 = vrot.slane %v22397_v25, %v21929_v54  ;;  %25897 = vst [vmem:[#allocation7_spill] sm:$0xff] %v22413_v22 }
 0x2c9   : > { %17259 = vrot.lane.b32.xlu1 %v22350_v41, %s17670_s10  ;;  %v16472_v4 = vpack.c.bf16 %v9688_v13, %v22297_v53  ;;  %v16474_v41 = vpack.c.bf16 %v9690_v40, %v22301_v58  ;;  %v25896_v53 = vunpack.i.l.bf16 %v22332_v8  ;;  %v6622_v52 = vmul.f32 %v6536_v5, %v5839_v50 }
 0x2ca   : > { %25894 = vst [vmem:[#allocation39_spill] sm:$0xff] %v22388_v27  ;;  %v6560_v25 = vrot.slane %v22413_v22, %v21929_v54  ;;  %v22427_v50 = vadd.f32 %v6621_v23, %v21326_v46  ;;  %v9699_v5 = vsel %vm9671_vm6, %v22237_v32, %v22284_v56  ;;  %v25900_v23 = vld [vmem:[#allocation23_spill] sm:$0xff] }
 0x2cb   : > { %v22402_v10 = vpop.permute.xlu1 %9637  ;;  %16473 = vmatprep.subr.bf16.mxu1 %v16472_v4  ;;  %v22408_v58 = vsel %vm9671_vm6, %v17157_v57, %v25896_v53  ;;  %v25898_v53 = vld [vmem:[#allocation14_spill] sm:$0xff]  ;;  %v6050_v22 = vpop.f32.mrb[56].mxu1 }
 0x2cc   : > { %v9626_v42 = vpop.permute.xlu0 %9625  ;;  %17254 = vrot.lane.b32.xlu0 %v22388_v27, %s17670_s10  ;;  %16475 = vmatpush1.bf16.msra.mxu1 %v16474_v41  ;;  %v22434_v27 = vadd.f32 %v6622_v52, %v25898_v53  ;;  %v6052_v26 = vpop.f32.mrb[57].mxu1  ;;  %v22464_v52 = vld [vmem:[%s17744_s17 + $0xf8] sm:$0xff]  ;;  %v17162_v53 = vunpack.i.h.bf16 %v22332_v8 }
 0x2cd   : > { %11182 = vrot.lane.b32.xlu1 %v17513_v37, %s17670_s10  ;;  %v22421_v37 = vsel %vm9671_vm6, %v17156_v44, %v17157_v57  ;;  %v9697_v4 = vsel %vm9671_vm6, %v22284_v56, %v9626_v42  ;;  %v16476_v44 = vpack.c.bf16 %v22408_v58, %v9688_v13  ;;  %v6627_v57 = vmul.f32 %v6556_v1, %v6050_v22 }
 0x2ce   : > { %10387 = vmatprep.subr.mxu0 %v9697_v4  ;;  %25899 = vst [vmem:[#allocation15_spill] sm:$0xff] %v22434_v27  ;;  %v16478_v46 = vpack.c.bf16 %v22421_v37, %v9690_v40  ;;  %v6628_v32 = vmul.f32 %v6560_v25, %v6052_v26  ;;  %v25902_v40 = vld [vmem:[#allocation11_spill] sm:$0xff]  ;;  %v22473_v4 = vld [vmem:[%s25518_s3 + $0x88] sm:$0xff] }
 0x2cf   : > { %10388 = vmatpush1.msra.mxu0 %v9699_v5  ;;  %v22438_v41 = vpop.permute.xlu1 %17169  ;;  %v22445_v13 = vadd.f32 %v6627_v57, %v25900_v23  ;;  %v22459_v25 = vld [vmem:[%s25518_s3 + $0x80] sm:$0xff]  ;;  %25905 = vst [vmem:[#allocation11_spill] sm:$0xff] %v22464_v52  ;;  %25906 = vst [vmem:[#allocation41_spill] sm:$0xff] %v22473_v4  ;;  %v6552_v5 = vrot.slane %v22473_v4, %v21929_v54 }
 0x2d0   : > { %15954 = vmatmul.mubr.msk.f32.vlgmr.msra.gmra.mrb[104].mxu0 %vm742_vm1, %v21948_v14  ;;  %11174 = vrot.lane.b32.xlu0 %v17516_v3, %s17670_s10  ;;  %v9630_v56 = vpop.permute.xlu0 %9629  ;;  %v22454_v26 = vadd.f32 %v6628_v32, %v25902_v40  ;;  %25904 = vst [vmem:[#allocation23_spill] sm:$0xff] %v22459_v25  ;;  %v6548_v3 = vrot.slane %v22459_v25, %v21929_v54  ;;  %v17526_v32 = vld [vmem:[%s17744_s17 + $0x18] sm:$0xff] }
 0x2d1   : > { %11186 = vrot.lane.b32.xlu1 %v17512_v21, %s17670_s10  ;;  %16477 = vmatprep.subr.bf16.mxu0 %v16476_v44  ;;  %25901 = vst [vmem:[#allocation4_spill] sm:$0xff] %v22445_v13  ;;  %v9693_v21 = vsel %vm9671_vm6, %v9630_v56, %v22356_v19  ;;  %v9695_v1 = vsel %vm9671_vm6, %v9626_v42, %v9630_v56  ;;  %v17522_v42 = vld [vmem:[%s17744_s17] sm:$0xff]  ;;  %v17524_v44 = vld [vmem:[%s17744_s17 + $0xf0] sm:$0xff] }
 0x2d2   : > { %16479 = vmatpush1.bf16.msra.mxu0 %v16478_v46  ;;  %10589 = vmatprep.mubr.f32.mxu0 %v25653_v62  ;;  %25903 = vst [vmem:[#allocation14_spill] sm:$0xff] %v22454_v26  ;;  %v17273_v22 = vpack.i.bf16 %v25653_v62, %v17522_v42  ;;  %v17263_v57 = vpack.i.bf16 %v22464_v52, %v17524_v44 }
 0x2d3   : > { %10458 = vmatprep.subr.mxu1 %v9693_v21  ;;  %v5979_v23 = vpop.f32.mrb[56].mxu0  ;;  %v17283_v26 = vpack.i.bf16 %v17526_v32, %v25653_v62 }
 0x2d4   : > { %10459 = vmatpush1.msra.mxu1 %v9695_v1  ;;  %11178 = vrot.lane.b32.xlu0 %v17517_v9, %s17670_s10  ;;  %v6625_v40 = vmul.f32 %v6548_v3, %v5979_v23  ;;  %v5981_v42 = vpop.f32.mrb[57].mxu0  ;;  %v22490_v9 = vld [vmem:[%s25518_s3 + $0xb0] sm:$0xff]  ;;  %v22500_v3 = vld [vmem:[%s25518_s3 + $0xb8] sm:$0xff]  ;;  %v25909_v23 = vunpack.i.l.bf16 %v22332_v8 }
 0x2d5   : > { %11194 = vrot.lane.b32.xlu1 %v22464_v52, %s17670_s10  ;;  %v22481_v46 = vpop.permute.xlu1 %9649  ;;  %15955 = vmatmul.mubr.msk.f32.vlgmr.msra.gmra.mrb[106].mxu1 %vm742_vm1, %v21948_v14  ;;  %v17165_v56 = vpop.permute.xlu0 %17164  ;;  %25907 = vst [vmem:[#allocation42_spill] sm:$0xff] %v22490_v9  ;;  %v6572_v52 = vrot.slane %v22490_v9, %v21929_v54  ;;  %v6626_v13 = vmul.f32 %v6552_v5, %v5981_v42  ;;  %25908 = vst [vmem:[#allocation43_spill] sm:$0xff] %v22500_v3 }
 0x2d6   : > { %10660 = vmatprep.mubr.f32.mxu1 %v25653_v62  ;;  %v17167_v21 = vunpack.i.h.bf16 %v17165_v56  ;;  %v17166_v1 = vunpack.i.l.bf16 %v17165_v56  ;;  %v6576_v56 = vrot.slane %v22500_v3, %v21929_v54  ;;  %v9682_v9 = vsel %vm9671_vm6, %v25909_v23, %v17162_v53 }
 0x2d7   : > { %v22514_v42 = vadd.f32 %v6625_v40, %v21486_v6  ;;  %v25910_v3 = vunpack.i.l.bf16 %v22438_v41  ;;  %v22524_v23 = vadd.f32 %v6626_v13, %v21498_v38  ;;  %v16482_v40 = vpack.c.bf16 %v9682_v9, %v22421_v37 }
 0x2d8   : > { %17264 = vrot.lane.b32.xlu0 %v17263_v57, %s17670_s10  ;;  %v9680_v5 = vsel %vm9671_vm6, %v17162_v53, %v17166_v1  ;;  %v6192_v57 = vpop.f32.mrb[58].mxu1  ;;  %v22528_v25 = vsel %vm9671_vm6, %v17166_v1, %v17167_v21  ;;  %v9691_v38 = vsel %vm9671_vm6, %v22356_v19, %v22402_v10 }
 0x2d9   : > { %17274 = vrot.lane.b32.xlu1 %v17273_v22, %s17671_s29  ;;  %v22509_v22 = vpop.permute.xlu1 %9653  ;;  %v16480_v27 = vpack.c.bf16 %v9680_v5, %v22408_v58  ;;  %v22521_v8 = vsel %vm9671_vm6, %v17167_v21, %v25910_v3  ;;  %v6631_v53 = vmul.f32 %v6572_v52, %v6192_v57  ;;  %v6194_v58 = vpop.f32.mrb[59].mxu1  ;;  %v25911_v21 = vld [vmem:[#allocation24_spill] sm:$0xff]  ;;  %v16486_v37 = vpack.c.bf16 %v22528_v25, %v9682_v9 }
 0x2da   : > { %v9642_v4 = vpop.permute.xlu0 %9641  ;;  %v6632_v3 = vmul.f32 %v6576_v56, %v6194_v58  ;;  %v16484_v13 = vpack.c.bf16 %v22521_v8, %v9680_v5  ;;  %v22563_v9 = vld [vmem:[%s25518_s3 + $0xa8] sm:$0xff]  ;;  %v17530_v5 = vld [vmem:[%s17744_s17 + $0x10] sm:$0xff] }
 0x2db   : > { %v9689_v6 = vsel %vm9671_vm6, %v22402_v10, %v9642_v4  ;;  %16481 = vmatprep.subr.bf16.mxu1 %v16480_v27  ;;  %v22542_v1 = vadd.f32 %v6631_v53, %v25911_v21  ;;  %v22555_v10 = vld [vmem:[%s25518_s3 + $0xa0] sm:$0xff]  ;;  %v6568_v56 = vrot.slane %v22563_v9, %v21929_v54  ;;  %v17531_v57 = vld [vmem:[%s17744_s17 + $0x8] sm:$0xff] }
 0x2dc   : > { %10529 = vmatprep.subr.mxu0 %v9689_v6  ;;  %11190 = vrot.lane.b32.xlu0 %v17524_v44, %s17670_s10  ;;  %v6564_v19 = vrot.slane %v22555_v10, %v21929_v54  ;;  %v17278_v6 = vpack.i.bf16 %v17530_v5, %v17531_v57  ;;  %v17533_v21 = vld [vmem:[%s17744_s17 + $0x28] sm:$0xff] }
 0x2dd   : > { %17284 = vrot.lane.b32.xlu1 %v17283_v26, %s17671_s29  ;;  %10530 = vmatpush1.msra.mxu0 %v9691_v38  ;;  %v25912_v26 = vld [vmem:[#allocation25_spill] sm:$0xff] }
 0x2de   : > { %16483 = vmatpush1.bf16.msra.mxu1 %v16482_v40  ;;  %v22546_v52 = vadd.f32 %v6632_v3, %v25912_v26  ;;  %15956 = vmatmul.mubr.msk.f32.vlgmr.msra.gmra.mrb[106].mxu0 %vm742_vm1, %v21948_v14 }
 0x2df   : > { %v22548_v27 = vpop.permute.xlu1 %9661  ;;  %16485 = vmatprep.subr.bf16.mxu0 %v16484_v13  ;;  %v9646_v44 = vpop.permute.xlu0 %9645  ;;  %10731 = vmatprep.mubr.f32.mxu0 %v25653_v62 }
 0x2e0   : > { %25913 = vst [vmem:[#allocation24_spill] sm:$0xff] %v22546_v52  ;;  %16487 = vmatpush1.bf16.msra.mxu0 %v16486_v37  ;;  %17269 = vrot.lane.b32.xlu0 %v25653_v62, %s17670_s10  ;;  %v9687_v53 = vsel %vm9671_vm6, %v9642_v4, %v9646_v44  ;;  %v6121_v58 = vpop.f32.mrb[58].mxu0  ;;  %v17532_v4 = vld [vmem:[%s17744_s17 + $0x20] sm:$0xff]  ;;  %s16047_s10 = sshll.u32 %s26173_s12, 7 }
 0x2e1   : > { %12615 = vrot.lane.b32.xlu1 %v17526_v32, %s17671_s29  ;;  %v9685_v32 = vsel %vm9671_vm6, %v9646_v44, %v22481_v46  ;;  %v6629_v40 = vmul.f32 %v6564_v19, %v6121_v58  ;;  %v6123_v3 = vpop.f32.mrb[59].mxu0  ;;  %v17288_v37 = vpack.i.bf16 %v17533_v21, %v17532_v4  ;;  %v17172_v44 = vunpack.i.h.bf16 %v22438_v41  ;;  %v17534_v58 = vld [vmem:[%s17744_s17 + $0x40] sm:$0xff]  ;;  %s25490_s19 = scalar_lea.vmem %s25524_s9, %s16047_s10 }
 0x2e2   : > { %10600 = vmatprep.subr.mxu1 %v9685_v32  ;;  %v6630_v13 = vmul.f32 %v6568_v56, %v6123_v3  ;;  %v25915_v32 = vld [vmem:[#allocation26_spill] sm:$0xff]  ;;  %v25917_v56 = vunpack.i.l.bf16 %v22438_v41  ;;  %v22600_v3 = vld [vmem:[%s17744_s17 + $0x48] sm:$0xff] }
 0x2e3   : > { %10601 = vmatpush1.msra.mxu1 %v9687_v53  ;;  %v22587_v19 = vadd.f32 %v6629_v40, %v21633_v55  ;;  %v17298_v55 = vpack.i.bf16 %v22600_v3, %v17534_v58 }
 0x2e4   : > { %v22578_v38 = vpop.permute.xlu1 %17184  ;;  %15957 = vmatmul.mubr.msk.f32.vlgmr.msra.gmra.mrb[108].mxu1 %vm742_vm1, %v21948_v14  ;;  %17279 = vrot.lane.b32.xlu0 %v17278_v6, %s17671_s29  ;;  %v22591_v53 = vadd.f32 %v6630_v13, %v25915_v32  ;;  %v9672_v6 = vsel %vm9671_vm6, %v25917_v56, %v17172_v44 }
 0x2e5   : > { %12609 = vrot.lane.b32.xlu1 %v17530_v5, %s17671_s29  ;;  %v17175_v26 = vpop.permute.xlu0 %17174  ;;  %10802 = vmatprep.mubr.f32.mxu1 %v25653_v62  ;;  %25914 = vst [vmem:[#allocation25_spill] sm:$0xff] %v22587_v19 }
 0x2e6   : > { %v17177_v5 = vunpack.i.h.bf16 %v17175_v26  ;;  %v17176_v57 = vunpack.i.l.bf16 %v17175_v26  ;;  %25916 = vst [vmem:[#allocation26_spill] sm:$0xff] %v22591_v53  ;;  %v25921_v53 = vunpack.i.l.bf16 %v21465_v29 }
 0x2e8   : > { %v22603_v40 = vpop.permute.xlu1 %17194  ;;  %v9676_v26 = vsel %vm9671_vm6, %v17172_v44, %v17176_v57  ;;  %17289 = vrot.lane.b32.xlu0 %v17288_v37, %s17671_s29  ;;  %v9673_v32 = vsel %vm9671_vm6, %v17176_v57, %v17177_v5  ;;  %v22623_v37 = vld [vmem:[%s25518_s3 + $0xd0] sm:$0xff]  ;;  %v9683_v57 = vsel %vm9671_vm6, %v22481_v46, %v22509_v22  ;;  %v9736_v19 = vsel %vm9671_vm6, %v17172_v44, %v25921_v53  ;;  %v22654_v46 = vld [vmem:[%s17744_s17 + $0x38] sm:$0xff] }
 0x2e9   : > { %12623 = vrot.lane.b32.xlu1 %v17533_v21, %s17671_s29  ;;  %25918 = vst [vmem:[#allocation44_spill] sm:$0xff] %v22603_v40  ;;  %v22608_v13 = vpop.permute.xlu0 %9657  ;;  %v16488_v41 = vpack.c.bf16 %v9676_v26, %v22521_v8  ;;  %v9737_v21 = vsel %vm9671_vm6, %v17177_v5, %v21759_v30  ;;  %25919 = vst [vmem:[#allocation45_spill] sm:$0xff] %v22623_v37  ;;  %v6588_v8 = vrot.slane %v22623_v37, %v21929_v54  ;;  %v22630_v30 = vld [vmem:[%s25518_s3 + $0xc0] sm:$0xff] }
 0x2ea   : > { %v9681_v56 = vsel %vm9671_vm6, %v22509_v22, %v22608_v13  ;;  %25920 = vst [vmem:[#allocation46_spill] sm:$0xff] %v22630_v30  ;;  %v6580_v5 = vrot.slane %v22630_v30, %v21929_v54  ;;  %v16490_v26 = vpack.c.bf16 %v9672_v6, %v22528_v25  ;;  %v16492_v37 = vpack.c.bf16 %v9737_v21, %v9736_v19  ;;  %v17539_v25 = vld [vmem:[%s17744_s17 + $0x30] sm:$0xff]  ;;  %v22660_v19 = vld [vmem:[%s25518_s3 + $0xc8] sm:$0xff] }
 0x2eb   : > { %10671 = vmatprep.subr.mxu0 %v9681_v56  ;;  %16489 = vmatprep.subr.bf16.mxu1 %v16488_v41  ;;  %v22647_v41 = vld [vmem:[%s25518_s3 + $0xd8] sm:$0xff]  ;;  %v17293_v29 = vpack.i.bf16 %v22654_v46, %v17539_v25  ;;  %v16494_v22 = vpack.c.bf16 %v9673_v32, %v9672_v6  ;;  %v6334_v44 = vpop.f32.mrb[60].mxu1  ;;  %25923 = vst [vmem:[#allocation48_spill] sm:$0xff] %v22660_v19  ;;  %v17187_v30 = vunpack.i.h.bf16 %v22578_v38 }
 0x2ec   : > { %10672 = vmatpush1.msra.mxu0 %v9683_v57  ;;  %25922 = vst [vmem:[#allocation47_spill] sm:$0xff] %v22647_v41  ;;  %v6592_v56 = vrot.slane %v22647_v41, %v21929_v54  ;;  %12619 = vrot.lane.b32.xlu0 %v17532_v4, %s17671_s29  ;;  %v6584_v53 = vrot.slane %v22660_v19, %v21929_v54  ;;  %v6263_v21 = vpop.f32.mrb[60].mxu0  ;;  %v6336_v32 = vpop.f32.mrb[61].mxu1 }
 0x2ed   : > { %17299 = vrot.lane.b32.xlu1 %v17298_v55, %s17671_s29  ;;  %16491 = vmatpush1.bf16.msra.mxu1 %v16490_v26  ;;  %v6635_v4 = vmul.f32 %v6588_v8, %v6334_v44  ;;  %v6633_v6 = vmul.f32 %v6580_v5, %v6263_v21  ;;  %v22672_v26 = vld [vmem:[%s25518_s3 + $0xf0] sm:$0xff]  ;;  %v6265_v41 = vpop.f32.mrb[61].mxu0 }
 0x2ee   : > { %v22664_v55 = vpop.permute.xlu1 %11082  ;;  %15958 = vmatmul.mubr.msk.f32.vlgmr.msra.gmra.mrb[108].mxu0 %vm742_vm1, %v21948_v14  ;;  %16493 = vmatprep.subr.bf16.mxu0 %v16492_v37  ;;  %v17180_v57 = vpop.permute.xlu0 %17179  ;;  %25924 = vst [vmem:[#allocation49_spill] sm:$0xff] %v22672_v26  ;;  %v6604_v19 = vrot.slane %v22672_v26, %v21929_v54  ;;  %v22679_v37 = vld [vmem:[%s25518_s3 + $0xf8] sm:$0xff]  ;;  %v6636_v21 = vmul.f32 %v6592_v56, %v6336_v32  ;;  %v22689_v26 = vunpack.i.l.bf16 %v22578_v38  ;;  %v22727_v32 = vld [vmem:[%s25518_s3 + $0xe0] sm:$0xff] }
 0x2ef   : > { %16495 = vmatpush1.bf16.msra.mxu0 %v16494_v22  ;;  %10873 = vmatprep.mubr.f32.mxu0 %v25653_v62  ;;  %25925 = vst [vmem:[#allocation50_spill] sm:$0xff] %v22679_v37  ;;  %v6608_v8 = vrot.slane %v22679_v37, %v21929_v54  ;;  %v17182_v5 = vunpack.i.h.bf16 %v17180_v57  ;;  %v17181_v22 = vunpack.i.l.bf16 %v17180_v57  ;;  %v22685_v44 = vadd.f32 %v6635_v4, %v21787_v49  ;;  %v22721_v4 = vld [vmem:[%s17744_s17 + $0x68] sm:$0xff] }
 0x2f0   : > { %25926 = vst [vmem:[#allocation51_spill] sm:$0xff] %v22689_v26  ;;  %17294 = vrot.lane.b32.xlu0 %v17293_v29, %s17671_s29  ;;  %v22693_v52 = vadd.f32 %v6633_v6, %v21799_v18  ;;  %v6634_v37 = vmul.f32 %v6584_v53, %v6265_v41  ;;  %v22704_v56 = vadd.f32 %v6636_v21, %v21802_v20  ;;  %v25602_v18 = vunpack.i.l.bf16 %v22603_v40  ;;  %v17544_v53 = vld [vmem:[%s17744_s17 + $0x60] sm:$0xff] }
 0x2f1   : > { %12635 = vrot.lane.b32.xlu1 %v17534_v58, %s17671_s29  ;;  %v9677_v49 = vsel %vm9671_vm6, %v22548_v27, %v17181_v22  ;;  %v9738_v58 = vsel %vm9671_vm6, %v17182_v5, %v21756_v60  ;;  %v9674_v38 = vsel %vm9671_vm6, %v17181_v22, %v17182_v5  ;;  %v9679_v29 = vsel %vm9671_vm6, %v22608_v13, %v22548_v27 }
 0x2f2   : > { %10742 = vmatprep.subr.mxu1 %v9677_v49  ;;  %10813 = vmatprep.subr.mxu0 %v9738_v58  ;;  %v22715_v60 = vadd.f32 %v6634_v37, %v21818_v0  ;;  %v17308_v57 = vpack.i.bf16 %v22721_v4, %v17544_v53  ;;  %v6476_v6 = vpop.f32.mrb[62].mxu1  ;;  %v6596_v0 = vrot.slane %v22727_v32, %v21929_v54  ;;  %v22733_v5 = vsub.s32 4, %v25849_v36 }
 0x2f3   : > { %v22708_v41 = vpop.permute.xlu1 %17204  ;;  %v17190_v20 = vpop.permute.xlu0 %17189  ;;  %10743 = vmatpush1.msra.mxu1 %v9679_v29  ;;  %10814 = vmatpush1.msra.mxu0 %v9674_v38  ;;  %v6639_v13 = vmul.f32 %v6604_v19, %v6476_v6  ;;  %v17197_v22 = vunpack.i.h.bf16 %v22603_v40  ;;  %v22746_v19 = vld [vmem:[%s25518_s3 + $0xe8] sm:$0xff]  ;;  %v11267_v38 = vsel %vm11204_vm7, %v25602_v18, %v17187_v30 }
 0x2f4   : > { %12627 = vrot.lane.b32.xlu0 %v17539_v25, %s17671_s29  ;;  %v17192_v27 = vunpack.i.h.bf16 %v17190_v20  ;;  %v6478_v37 = vpop.f32.mrb[63].mxu1  ;;  %15959 = vmatmul.mubr.msk.f32.vlgmr.msra.gmra.mrb[110].mxu1 %vm742_vm1, %v21948_v14  ;;  %v11265_v25 = vsel %vm11204_vm7, %v17187_v30, %v22689_v26  ;;  %v6405_v21 = vpop.f32.mrb[62].mxu0  ;;  %v6600_v58 = vrot.slane %v22746_v19, %v21929_v54 }
 0x2f5   : > { %12639 = vrot.lane.b32.xlu1 %v22600_v3, %s17671_s29  ;;  %v17191_v3 = vunpack.i.l.bf16 %v17190_v20  ;;  %15960 = vmatmul.mubr.msk.f32.vlgmr.msra.gmra.mrb[110].mxu0 %vm742_vm1, %v21948_v14  ;;  %v6640_v49 = vmul.f32 %v6608_v8, %v6478_v37  ;;  %v6407_v20 = vpop.f32.mrb[63].mxu0  ;;  %v22765_v30 = vadd.f32 %v6639_v13, %v21870_v51  ;;  %v6637_v40 = vmul.f32 %v6596_v0, %v6405_v21 }
 0x2f6   : > { %11341 = vmatprep.mubr.f32.mxu1 %v25653_v62  ;;  %11412 = vmatprep.mubr.f32.mxu0 %v25653_v62  ;;  %v7817_v51 = vrot.slane %v22003_v12, %v22733_v5  ;;  %v7821_v21 = vrot.slane %v22043_v31, %v22733_v5 }
 0x2f7   : > { %v11263_v14 = vsel %vm11204_vm7, %v22689_v26, %v17191_v3  ;;  %v22757_v29 = vpop.permute.xlu1 %11090  ;;  %v11261_v8 = vsel %vm11204_vm7, %v17191_v3, %v17192_v27  ;;  %v22770_v3 = vadd.f32 %v6640_v49, %v21876_v17  ;;  %v7825_v26 = vrot.slane %v21992_v16, %v22733_v5 }
 0x2f8   : > { %v17200_v54 = vpop.permute.xlu0 %17199  ;;  %v16496_v6 = vpack.c.bf16 %v11261_v8, %v11265_v25  ;;  %v16498_v37 = vpack.c.bf16 %v11263_v14, %v11267_v38  ;;  %12631 = vrot.lane.b32.xlu0 %v22654_v46, %s17671_s29  ;;  %v6638_v25 = vmul.f32 %v6600_v58, %v6407_v20  ;;  %v22783_v0 = vadd.f32 %v6637_v40, %v21882_v48 }
 0x2f9   : > { %17309 = vrot.lane.b32.xlu1 %v17308_v57, %s17671_s29  ;;  %v17201_v18 = vunpack.i.l.bf16 %v17200_v54  ;;  %v22776_v57 = vsel %vm11204_vm7, %v17192_v27, %v17197_v22  ;;  %v7829_v17 = vrot.slane %v22010_v63, %v22733_v5  ;;  %v17206_v16 = vunpack.i.l.bf16 %v22708_v41 }
 0x2fa   : > { %16497 = vmatprep.subr.bf16.mxu1 %v16496_v6  ;;  %v6815_v13 = vpop.f32.mrb[64].mxu1  ;;  %v17202_v12 = vunpack.i.h.bf16 %v17200_v54  ;;  %v16502_v48 = vpack.c.bf16 %v22776_v57, %v11263_v14  ;;  %v22797_v40 = vadd.f32 %v6638_v25, %v21918_v11  ;;  %v17207_v25 = vunpack.i.h.bf16 %v22708_v41  ;;  %v17548_v41 = vld [vmem:[%s17744_s17 + $0x58] sm:$0xff] }
 0x2fb   : > { %16499 = vmatpush1.bf16.msra.mxu1 %v16498_v37  ;;  %v11257_v46 = vsel %vm11204_vm7, %v17197_v22, %v17201_v18  ;;  %v7944_v63 = vmul.f32 %v7825_v26, %v6815_v13  ;;  %v6744_v49 = vpop.f32.mrb[64].mxu0  ;;  %v6817_v38 = vpop.f32.mrb[65].mxu1  ;;  %v7841_v26 = vrot.slane %v22066_v7, %v22733_v5 }
 0x2fc   : > { %v16500_v27 = vpack.c.bf16 %v11257_v46, %v11261_v8  ;;  %17304 = vrot.lane.b32.xlu0 %v21909_v28, %s17671_s29  ;;  %v7945_v8 = vmul.f32 %v7829_v17, %v6817_v38  ;;  %v6746_v20 = vpop.f32.mrb[65].mxu0  ;;  %v7837_v17 = vrot.slane %v22167_v34, %v22733_v5 }
 0x2fd   : > { %12651 = vrot.lane.b32.xlu1 %v17544_v53, %s17671_s29  ;;  %v11087_v58 = vpop.permute.xlu0 %11086  ;;  %v7942_v53 = vmul.f32 %v7817_v51, %v6744_v49  ;;  %v22803_v28 = vadd.f32 %v7944_v63, %v22061_v35  ;;  %v11253_v35 = vsel %vm11204_vm7, %v17202_v12, %v17206_v16  ;;  %v7943_v6 = vmul.f32 %v7821_v21, %v6746_v20 }
 0x2fe   : > { %v22793_v22 = vpop.permute.xlu1 %17209  ;;  %16501 = vmatprep.subr.bf16.mxu0 %v16500_v27  ;;  %v11266_v31 = vsel %vm11204_vm7, %v22664_v55, %v11087_v58  ;;  %v22819_v54 = vadd.f32 %v7945_v8, %v22076_v24  ;;  %v7833_v24 = vrot.slane %v22150_v43, %v22733_v5  ;;  %v25927_v27 = vld [vmem:[#allocation27_spill] sm:$0xff]  ;;  %v16504_v13 = vpack.c.bf16 %v11253_v35, %v11257_v46  ;;  %v25928_v8 = vld [vmem:[#allocation10_spill] sm:$0xff] }
 0x2ff   : > { %16503 = vmatpush1.bf16.msra.mxu0 %v16502_v48  ;;  %11281 = vmatprep.subr.mxu1 %v11266_v31  ;;  %v22808_v11 = vadd.f32 %v7942_v53, %v22103_v39  ;;  %v11255_v39 = vsel %vm11204_vm7, %v17201_v18, %v17202_v12  ;;  %v17211_v7 = vunpack.i.l.bf16 %v22793_v22  ;;  %v22841_v18 = vadd.f32 %v7943_v6, %v22109_v33  ;;  %v25929_v6 = vld [vmem:[#allocation12_spill] sm:$0xff] }
 0x300   : > { %12643 = vrot.lane.b32.xlu0 %v21902_v2, %s17671_s29  ;;  %v22831_v2 = vld [vmem:[%s25516_s1 + $0x1c] sm:$0xf]  ;;  %v16506_v33 = vpack.c.bf16 %v11255_v39, %v22776_v57  ;;  %v22866_v57 = vsel %vm11204_vm7, %v17206_v16, %v17207_v25  ;;  %v7857_v20 = vrot.slane %v25928_v8, %v22733_v5  ;;  %v25930_v16 = vld [vmem:[#allocation22_spill] sm:$0xff] }
 0x301   : > { %12655 = vrot.lane.b32.xlu1 %v22721_v4, %s17671_s29  ;;  %v7845_v4 = vrot.slane %v22091_v59, %v22733_v5  ;;  %v22826_v37 = vpop.permute.xlu0 %11076  ;;  %v22858_v46 = vsel %vm11204_vm7, %v17207_v25, %v17211_v7  ;;  %v17551_v8 = vld [vmem:[%s17744_s17 + $0x70] sm:$0xff] }
 0x302   : > { %v22814_v14 = vpop.permute.xlu1 %11102  ;;  %v11268_v59 = vsel %vm11204_vm7, %v22826_v37, %v22664_v55  ;;  %v6957_v51 = vpop.f32.mrb[66].mxu1 }
 0x303   : > { %11282 = vmatpush1.msra.mxu1 %v11268_v59  ;;  %v7948_v43 = vmul.f32 %v7841_v26, %v6957_v51  ;;  %v6959_v21 = vpop.f32.mrb[67].mxu1  ;;  %v17549_v26 = vld [vmem:[%s17744_s17 + $0x80] sm:$0xff]  ;;  %v11264_v51 = vsel %vm11204_vm7, %v11087_v58, %v22757_v29  ;;  %v17212_v58 = vunpack.i.h.bf16 %v22793_v22 }
 0x304   : > { %12647 = vrot.lane.b32.xlu0 %v17548_v41, %s17671_s29  ;;  %15962 = vmatmul.mubr.msk.f32.vlgmr.msra.gmra.mrb[112].mxu1 %vm742_vm1, %v22831_v2  ;;  %v6886_v55 = vpop.f32.mrb[66].mxu0  ;;  %v7949_v12 = vmul.f32 %v7845_v4, %v6959_v21  ;;  %v25932_v59 = vld [vmem:[#allocation28_spill] sm:$0xff]  ;;  %v16510_v21 = vpack.c.bf16 %v22866_v57, %v11255_v39  ;;  %v25934_v41 = vld [vmem:[#allocation21_spill] sm:$0xff] }
 0x305   : > { %17319 = vrot.lane.b32.xlu1 %v25927_v27, %s17671_s29  ;;  %16505 = vmatprep.subr.bf16.mxu1 %v16504_v13  ;;  %v22862_v48 = vadd.f32 %v7948_v43, %v22145_v15  ;;  %v7946_v63 = vmul.f32 %v7833_v24, %v6886_v55  ;;  %v6888_v49 = vpop.f32.mrb[67].mxu0  ;;  %v11095_v53 = vpop.permute.xlu0 %11094  ;;  %v7849_v24 = vrot.slane %v25930_v16, %v22733_v5  ;;  %v25933_v27 = vld [vmem:[#allocation17_spill] sm:$0xff] }
 0x306   : > { %v22852_v34 = vpop.permute.xlu1 %11106  ;;  %11483 = vmatprep.mubr.f32.mxu1 %v25653_v62  ;;  %16507 = vmatpush1.bf16.msra.mxu1 %v16506_v33  ;;  %v22869_v38 = vadd.f32 %v7949_v12, %v22162_v45  ;;  %v7947_v31 = vmul.f32 %v7837_v17, %v6888_v49  ;;  %v11262_v15 = vsel %vm11204_vm7, %v22757_v29, %v11095_v53  ;;  %v25931_v45 = vld [vmem:[#allocation13_spill] sm:$0xff] }
 0x307   : > { %v22879_v4 = vadd.f32 %v7946_v63, %v25929_v6  ;;  %v7861_v25 = vrot.slane %v25931_v45, %v22733_v5  ;;  %11352 = vmatprep.subr.mxu0 %v11262_v15  ;;  %v16508_v17 = vpack.c.bf16 %v22858_v46, %v11253_v35  ;;  %v7853_v33 = vrot.slane %v25934_v41, %v22733_v5  ;;  %v17550_v12 = vld [vmem:[%s17744_s17 + $0x88] sm:$0xff]  ;;  %v25935_v45 = vld [vmem:[#allocation18_spill] sm:$0xff] }
 0x308   : > { %17314 = vrot.lane.b32.xlu0 %v25932_v59, %s17671_s29  ;;  %v22892_v13 = vadd.f32 %v7947_v31, %v25933_v27  ;;  %11353 = vmatpush1.msra.mxu0 %v11264_v51  ;;  %v25937_v27 = vld [vmem:[#allocation31_spill] sm:$0xff]  ;;  %v25938_v41 = vld [vmem:[#allocation33_spill] sm:$0xff] }
 0x309   : > { %12667 = vrot.lane.b32.xlu1 %v17549_v26, %s17671_s29  ;;  %v11099_v55 = vpop.permute.xlu0 %11098  ;;  %15963 = vmatmul.mubr.msk.f32.vlgmr.msra.gmra.mrb[112].mxu0 %vm742_vm1, %v22831_v2 }
 0x30a   : > { %16509 = vmatprep.subr.bf16.mxu0 %v16508_v17  ;;  %v11260_v35 = vsel %vm11204_vm7, %v11095_v53, %v11099_v55  ;;  %v11258_v39 = vsel %vm11204_vm7, %v11099_v55, %v22814_v14  ;;  %11554 = vmatprep.mubr.f32.mxu0 %v25653_v62  ;;  %v7877_v55 = vrot.slane %v25938_v41, %v22733_v5 }
 0x30b   : > { %v22894_v43 = vpop.permute.xlu1 %17219  ;;  %v7099_v29 = vpop.f32.mrb[68].mxu1  ;;  %16511 = vmatpush1.bf16.msra.mxu0 %v16510_v21  ;;  %11423 = vmatprep.subr.mxu1 %v11258_v39  ;;  %v7873_v21 = vrot.slane %v25937_v27, %v22733_v5  ;;  %v25943_v27 = vld [vmem:[#allocation40_spill] sm:$0xff] }
 0x30c   : > { %v7952_v63 = vmul.f32 %v7857_v20, %v7099_v29  ;;  %v7028_v49 = vpop.f32.mrb[68].mxu0  ;;  %v7101_v31 = vpop.f32.mrb[69].mxu1  ;;  %12659 = vrot.lane.b32.xlu0 %v17551_v8, %s17671_s29  ;;  %v17221_v53 = vunpack.i.l.bf16 %v22894_v43  ;;  %11424 = vmatpush1.msra.mxu1 %v11260_v35  ;;  %v7889_v41 = vrot.slane %v25943_v27, %v22733_v5 }
 0x30d   : > { %12671 = vrot.lane.b32.xlu1 %v17550_v12, %s17671_s29  ;;  %v7950_v26 = vmul.f32 %v7849_v24, %v7028_v49  ;;  %v7953_v15 = vmul.f32 %v7861_v25, %v7101_v31  ;;  %v7030_v6 = vpop.f32.mrb[69].mxu0  ;;  %v17215_v51 = vpop.permute.xlu0 %17214  ;;  %15964 = vmatmul.mubr.msk.f32.vlgmr.msra.gmra.mrb[114].mxu1 %vm742_vm1, %v22831_v2  ;;  %v25936_v25 = vld [vmem:[#allocation20_spill] sm:$0xff]  ;;  %v25939_v12 = vld [vmem:[#allocation9_spill] sm:$0xff] }
 0x30e   : > { %v22916_v59 = vadd.f32 %v7952_v63, %v25935_v45  ;;  %v7951_v20 = vmul.f32 %v7853_v33, %v7030_v6  ;;  %v11247_v33 = vsel %vm11204_vm7, %v17211_v7, %v17212_v58  ;;  %v17217_v29 = vunpack.i.h.bf16 %v17215_v51  ;;  %11625 = vmatprep.mubr.f32.mxu1 %v25653_v62  ;;  %v17552_v63 = vld [vmem:[%s17744_s17 + $0x78] sm:$0xff]  ;;  %v25941_v49 = vld [vmem:[#allocation37_spill] sm:$0xff] }
 0x30f   : > { %v22912_v16 = vpop.permute.xlu1 %11118  ;;  %v22921_v24 = vadd.f32 %v7950_v26, %v22321_v47  ;;  %v22924_v17 = vadd.f32 %v7953_v15, %v25936_v25  ;;  %v17216_v35 = vunpack.i.l.bf16 %v17215_v51  ;;  %v25940_v47 = vld [vmem:[#allocation32_spill] sm:$0xff]  ;;  %v7865_v31 = vrot.slane %v25941_v49, %v22733_v5  ;;  %v25942_v15 = vld [vmem:[#allocation38_spill] sm:$0xff] }
 0x310   : > { %v22938_v39 = vadd.f32 %v7951_v20, %v25940_v47  ;;  %12663 = vrot.lane.b32.xlu0 %v17552_v63, %s17671_s29  ;;  %v22952_v8 = vsel %vm11204_vm7, %v17217_v29, %v17221_v53  ;;  %v7869_v6 = vrot.slane %v25942_v15, %v22733_v5  ;;  %v16514_v45 = vpack.c.bf16 %v11247_v33, %v22866_v57  ;;  %v25945_v15 = vld [vmem:[#allocation8_spill] sm:$0xff] }
 0x311   : > { %17329 = vrot.lane.b32.xlu1 %v25939_v12, %s17671_s29  ;;  %v11245_v7 = vsel %vm11204_vm7, %v17212_v58, %v17216_v35  ;;  %v11111_v20 = vpop.permute.xlu0 %11110  ;;  %v22962_v58 = vsel %vm11204_vm7, %v17216_v35, %v17217_v29  ;;  %v25944_v12 = vld [vmem:[#allocation5_spill] sm:$0xff] }
 0x312   : > { %v7241_v26 = vpop.f32.mrb[70].mxu1  ;;  %v16512_v51 = vpack.c.bf16 %v11245_v7, %v22858_v46  ;;  %v11254_v47 = vsel %vm11204_vm7, %v22852_v34, %v11111_v20  ;;  %v11256_v46 = vsel %vm11204_vm7, %v22814_v14, %v22852_v34  ;;  %v16516_v29 = vpack.c.bf16 %v22952_v8, %v11245_v7  ;;  %v25948_v7 = vld [vmem:[#allocation23_spill] sm:$0xff] }
 0x313   : > { %v22944_v22 = vpop.permute.xlu1 %11122  ;;  %v7243_v25 = vpop.f32.mrb[71].mxu1  ;;  %v7956_v63 = vmul.f32 %v7873_v21, %v7241_v26  ;;  %11494 = vmatprep.subr.mxu0 %v11254_v47  ;;  %v25946_v21 = vld [vmem:[#allocation35_spill] sm:$0xff]  ;;  %v25947_v26 = vld [vmem:[#allocation36_spill] sm:$0xff]  ;;  %v16518_v34 = vpack.c.bf16 %v22962_v58, %v11247_v33 }
 0x314   : > { %v7170_v57 = vpop.f32.mrb[70].mxu0  ;;  %v7957_v49 = vmul.f32 %v7877_v55, %v7243_v25  ;;  %17324 = vrot.lane.b32.xlu0 %v25945_v15, %s17671_s29  ;;  %16513 = vmatprep.subr.bf16.mxu1 %v16512_v51  ;;  %v7881_v51 = vrot.slane %v25948_v7, %v22733_v5 }
 0x315   : > { %12683 = vrot.lane.b32.xlu1 %v25944_v12, %s17671_s29  ;;  %v7954_v35 = vmul.f32 %v7865_v31, %v7170_v57  ;;  %v7172_v27 = vpop.f32.mrb[71].mxu0  ;;  %11495 = vmatpush1.msra.mxu0 %v11256_v46  ;;  %v22979_v55 = vadd.f32 %v7956_v63, %v25946_v21  ;;  %v17553_v57 = vld [vmem:[%s17744_s17 + $0xa8] sm:$0xff] }
 0x316   : > { %v22982_v25 = vadd.f32 %v7957_v49, %v25947_v26  ;;  %v7955_v14 = vmul.f32 %v7869_v6, %v7172_v27  ;;  %16515 = vmatpush1.bf16.msra.mxu1 %v16514_v45  ;;  %v11115_v47 = vpop.permute.xlu0 %11114  ;;  %15965 = vmatmul.mubr.msk.f32.vlgmr.msra.gmra.mrb[114].mxu0 %vm742_vm1, %v22831_v2  ;;  %v25949_v6 = vld [vmem:[#allocation15_spill] sm:$0xff] }
 0x317   : > { %v22976_v12 = vpop.permute.xlu1 %17229  ;;  %v22988_v31 = vadd.f32 %v7954_v35, %v22427_v50  ;;  %v11252_v63 = vsel %vm11204_vm7, %v11111_v20, %v11115_v47  ;;  %16517 = vmatprep.subr.bf16.mxu0 %v16516_v29  ;;  %v11250_v33 = vsel %vm11204_vm7, %v11115_v47, %v22912_v16  ;;  %v25950_v50 = vld [vmem:[#allocation16_spill] sm:$0xff]  ;;  %v25951_v49 = vld [vmem:[#allocation7_spill] sm:$0xff]  ;;  %v25952_v20 = vld [vmem:[#allocation41_spill] sm:$0xff]  ;;  %v17222_v29 = vunpack.i.h.bf16 %v22894_v43  ;;  %11696 = vmatprep.mubr.f32.mxu0 %v25653_v62 }
 0x318   : > { %v23000_v45 = vadd.f32 %v7955_v14, %v25949_v6  ;;  %16519 = vmatpush1.bf16.msra.mxu0 %v16518_v34  ;;  %12675 = vrot.lane.b32.xlu0 %v25950_v50, %s17671_s29  ;;  %v7893_v46 = vrot.slane %v25951_v49, %v22733_v5  ;;  %v7885_v15 = vrot.slane %v25952_v20, %v22733_v5  ;;  %v17554_v49 = vld [vmem:[%s17744_s17 + $0x98] sm:$0xff] }
 0x319   : > { %12687 = vrot.lane.b32.xlu1 %v17553_v57, %s17671_s29  ;;  %11565 = vmatprep.subr.mxu1 %v11250_v33  ;;  %v25953_v57 = vld [vmem:[#allocation19_spill] sm:$0xff] }
 0x31a   : > { %v7383_v27 = vpop.f32.mrb[72].mxu1  ;;  %11566 = vmatpush1.msra.mxu1 %v11252_v63  ;;  %v17225_v26 = vpop.permute.xlu0 %17224  ;;  %v25954_v63 = vld [vmem:[#allocation4_spill] sm:$0xff] }
 0x31b   : > { %v23009_v35 = vpop.permute.xlu1 %11134  ;;  %v7960_v14 = vmul.f32 %v7889_v41, %v7383_v27  ;;  %v7312_v34 = vpop.f32.mrb[72].mxu0  ;;  %v17227_v47 = vunpack.i.h.bf16 %v17225_v26  ;;  %v17226_v7 = vunpack.i.l.bf16 %v17225_v26  ;;  %15966 = vmatmul.mubr.msk.f32.vlgmr.msra.gmra.mrb[116].mxu1 %vm742_vm1, %v22831_v2  ;;  %v11239_v26 = vsel %vm11204_vm7, %v17221_v53, %v17222_v29  ;;  %v25957_v53 = vld [vmem:[#allocation43_spill] sm:$0xff] }
 0x31c   : > { %v7958_v33 = vmul.f32 %v7881_v51, %v7312_v34  ;;  %v7385_v6 = vpop.f32.mrb[73].mxu1  ;;  %v7314_v50 = vpop.f32.mrb[73].mxu0  ;;  %12679 = vrot.lane.b32.xlu0 %v17554_v49, %s17671_s29  ;;  %11767 = vmatprep.mubr.f32.mxu1 %v25653_v62 }
 0x31d   : > { %17339 = vrot.lane.b32.xlu1 %v25953_v57, %s17671_s29  ;;  %v23021_v20 = vadd.f32 %v7960_v14, %v25954_v63  ;;  %v7961_v41 = vmul.f32 %v7893_v46, %v7385_v6  ;;  %v7959_v27 = vmul.f32 %v7885_v15, %v7314_v50  ;;  %v11237_v51 = vsel %vm11204_vm7, %v17222_v29, %v17226_v7  ;;  %v25955_v57 = vld [vmem:[#allocation42_spill] sm:$0xff] }
 0x31e   : > { %v23032_v34 = vadd.f32 %v7958_v33, %v22514_v42  ;;  %v7905_v49 = vrot.slane %v25955_v57, %v22733_v5  ;;  %v11127_v14 = vpop.permute.xlu0 %11126  ;;  %v16520_v46 = vpack.c.bf16 %v11237_v51, %v22952_v8  ;;  %v25956_v15 = vunpack.i.l.bf16 %v22976_v12  ;;  %v25958_v42 = vld [vmem:[#allocation29_spill] sm:$0xff]  ;;  %v25959_v33 = vld [vmem:[#allocation14_spill] sm:$0xff] }
 0x31f   : > { %v23027_v21 = vpop.permute.xlu1 %11138  ;;  %v7909_v6 = vrot.slane %v25957_v53, %v22733_v5  ;;  %v23047_v29 = vsel %vm11204_vm7, %v17226_v7, %v17227_v47  ;;  %v11246_v8 = vsel %vm11204_vm7, %v22944_v22, %v11127_v14  ;;  %v23055_v50 = vadd.f32 %v7961_v41, %v25959_v33  ;;  %v25961_v7 = vld [vmem:[#allocation30_spill] sm:$0xff] }
 0x320   : > { %v23041_v43 = vsel %vm11204_vm7, %v17227_v47, %v25956_v15  ;;  %v23058_v63 = vadd.f32 %v7959_v27, %v22524_v23  ;;  %v16522_v57 = vpack.c.bf16 %v11239_v26, %v22962_v58  ;;  %v11248_v47 = vsel %vm11204_vm7, %v22912_v16, %v22944_v22  ;;  %17334 = vrot.lane.b32.xlu0 %v25961_v7, %s17671_s29 }
 0x321   : > { %12699 = vrot.lane.b32.xlu1 %v25958_v42, %s17671_s29  ;;  %25960 = vst [vmem:[#allocation27_spill] sm:$0xff] %v23055_v50  ;;  %11636 = vmatprep.subr.mxu0 %v11246_v8  ;;  %v7525_v15 = vpop.f32.mrb[74].mxu1  ;;  %v7897_v53 = vrot.slane %v22555_v10, %v22733_v5  ;;  %v16524_v58 = vpack.c.bf16 %v23041_v43, %v11237_v51  ;;  %v17232_v8 = vunpack.i.h.bf16 %v22976_v12 }
 0x322   : > { %16521 = vmatprep.subr.bf16.mxu1 %v16520_v46  ;;  %11637 = vmatpush1.msra.mxu0 %v11248_v47  ;;  %v7964_v41 = vmul.f32 %v7905_v49, %v7525_v15  ;;  %v7527_v27 = vpop.f32.mrb[75].mxu1  ;;  %v7901_v16 = vrot.slane %v22563_v9, %v22733_v5  ;;  %v16526_v22 = vpack.c.bf16 %v23047_v29, %v11239_v26  ;;  %v11131_v42 = vpop.permute.xlu0 %11130  ;;  %v17555_v49 = vld [vmem:[%s17744_s17 + $0xc8] sm:$0xff] }
 0x323   : > { %v23069_v23 = vpop.permute.xlu1 %17239  ;;  %16523 = vmatpush1.bf16.msra.mxu1 %v16522_v57  ;;  %15967 = vmatmul.mubr.msk.f32.vlgmr.msra.gmra.mrb[116].mxu0 %vm742_vm1, %v22831_v2  ;;  %v7454_v10 = vpop.f32.mrb[74].mxu0  ;;  %v7965_v46 = vmul.f32 %v7909_v6, %v7527_v27  ;;  %v11244_v51 = vsel %vm11204_vm7, %v11127_v14, %v11131_v42  ;;  %v11242_v9 = vsel %vm11204_vm7, %v11131_v42, %v23009_v35  ;;  %v17556_v57 = vld [vmem:[%s17744_s17 + $0xb0] sm:$0xff]  ;;  %v25963_v47 = vld [vmem:[#allocation24_spill] sm:$0xff] }
 0x324   : > { %16525 = vmatprep.subr.bf16.mxu0 %v16524_v58  ;;  %v23086_v26 = vadd.f32 %v7964_v41, %v22542_v1  ;;  %v7456_v33 = vpop.f32.mrb[75].mxu0  ;;  %12691 = vrot.lane.b32.xlu0 %v17556_v57, %s17671_s29  ;;  %v7962_v6 = vmul.f32 %v7897_v53, %v7454_v10  ;;  %v25965_v58 = vld [vmem:[#allocation45_spill] sm:$0xff]  ;;  %v25968_v53 = vld [vmem:[#allocation46_spill] sm:$0xff] }
 0x325   : > { %12703 = vrot.lane.b32.xlu1 %v17555_v49, %s17671_s29  ;;  %16527 = vmatpush1.bf16.msra.mxu0 %v16526_v22  ;;  %v23091_v7 = vadd.f32 %v7965_v46, %v25963_v47  ;;  %v7963_v15 = vmul.f32 %v7901_v16, %v7456_v33  ;;  %v7921_v1 = vrot.slane %v25965_v58, %v22733_v5  ;;  %v25966_v22 = vld [vmem:[#allocation25_spill] sm:$0xff]  ;;  %v25969_v46 = vunpack.i.l.bf16 %v22976_v12  ;;  %v25970_v33 = vld [vmem:[#allocation34_spill] sm:$0xff]  ;;  %v25973_v47 = vld [vmem:[#allocation47_spill] sm:$0xff] }
 0x326   : > { %25962 = vst [vmem:[#allocation10_spill] sm:$0xff] %v23086_v26  ;;  %11707 = vmatprep.subr.mxu1 %v11242_v9  ;;  %11838 = vmatprep.mubr.f32.mxu0 %v25653_v62  ;;  %v17235_v27 = vpop.permute.xlu0 %17234  ;;  %v23100_v42 = vadd.f32 %v7962_v6, %v25966_v22  ;;  %v7913_v10 = vrot.slane %v25968_v53, %v22733_v5  ;;  %v17557_v6 = vld [vmem:[%s17744_s17 + $0xb8] sm:$0xff] }
 0x327   : > { %25964 = vst [vmem:[#allocation12_spill] sm:$0xff] %v23091_v7  ;;  %v23093_v14 = vpop.permute.xlu1 %11150  ;;  %11708 = vmatpush1.msra.mxu1 %v11244_v51  ;;  %v11231_v49 = vsel %vm11204_vm7, %v25969_v46, %v17232_v8  ;;  %v17237_v9 = vunpack.i.h.bf16 %v17235_v27  ;;  %v17236_v16 = vunpack.i.l.bf16 %v17235_v27  ;;  %v25971_v51 = vld [vmem:[#allocation26_spill] sm:$0xff]  ;;  %v7925_v58 = vrot.slane %v25973_v47, %v22733_v5  ;;  %v25974_v27 = vld [vmem:[#allocation48_spill] sm:$0xff] }
 0x328   : > { %25967 = vst [vmem:[#allocation22_spill] sm:$0xff] %v23100_v42  ;;  %15968 = vmatmul.mubr.msk.f32.vlgmr.msra.gmra.mrb[118].mxu1 %vm742_vm1, %v22831_v2  ;;  %v23113_v57 = vadd.f32 %v7963_v15, %v25971_v51  ;;  %12695 = vrot.lane.b32.xlu0 %v17557_v6, %s17671_s29  ;;  %v7917_v22 = vrot.slane %v25974_v27, %v22733_v5  ;;  %v25975_v51 = vld [vmem:[#allocation49_spill] sm:$0xff]  ;;  %v25976_v41 = vld [vmem:[#allocation50_spill] sm:$0xff]  ;;  %v25977_v27 = vunpack.i.l.bf16 %v23069_v23 }
 0x329   : > { %17349 = vrot.lane.b32.xlu1 %v25970_v33, %s17671_s29  ;;  %11909 = vmatprep.mubr.f32.mxu1 %v25653_v62  ;;  %v7667_v12 = vpop.f32.mrb[76].mxu1  ;;  %v11229_v46 = vsel %vm11204_vm7, %v17232_v8, %v17236_v16  ;;  %v7937_v6 = vrot.slane %v25975_v51, %v22733_v5  ;;  %v7941_v7 = vrot.slane %v25976_v41, %v22733_v5  ;;  %v17558_v41 = vld [vmem:[%s17744_s17 + $0xe0] sm:$0xff] }
 0x32a   : > { %25972 = vst [vmem:[#allocation13_spill] sm:$0xff] %v23113_v57  ;;  %v7968_v15 = vmul.f32 %v7921_v1, %v7667_v12  ;;  %v7596_v33 = vpop.f32.mrb[76].mxu0  ;;  %v16530_v26 = vpack.c.bf16 %v11231_v49, %v23047_v29  ;;  %v11143_v57 = vpop.permute.xlu0 %11142  ;;  %v16528_v47 = vpack.c.bf16 %v11229_v46, %v23041_v43  ;;  %v23136_v42 = vsel %vm11204_vm7, %v17237_v9, %v25977_v27 }
 0x32b   : > { %v23122_v53 = vpop.permute.xlu1 %11154  ;;  %v7669_v8 = vpop.f32.mrb[77].mxu1  ;;  %v7929_v1 = vrot.slane %v22727_v32, %v22733_v5  ;;  %v23142_v12 = vsel %vm11204_vm7, %v17236_v16, %v17237_v9  ;;  %v11238_v43 = vsel %vm11204_vm7, %v23027_v21, %v11143_v57  ;;  %v7966_v51 = vmul.f32 %v7913_v10, %v7596_v33  ;;  %v25978_v9 = vld [vmem:[#allocation39_spill] sm:$0xff] }
 0x32c   : > { %v23150_v29 = vadd.f32 %v7968_v15, %v22685_v44  ;;  %v7598_v27 = vpop.f32.mrb[77].mxu0  ;;  %v11240_v32 = vsel %vm11204_vm7, %v23009_v35, %v23027_v21  ;;  %17344 = vrot.lane.b32.xlu0 %v25978_v9, %s17671_s29  ;;  %11778 = vmatprep.subr.mxu0 %v11238_v43  ;;  %v7969_v16 = vmul.f32 %v7925_v58, %v7669_v8  ;;  %v23201_v9 = vld [vmem:[%s25518_s3] sm:$0xff] }
 0x32d   : > { %12715 = vrot.lane.b32.xlu1 %v17558_v41, %s17671_s29  ;;  %v7967_v41 = vmul.f32 %v7917_v22, %v7598_v27  ;;  %16529 = vmatprep.subr.bf16.mxu1 %v16528_v47  ;;  %v16532_v44 = vpack.c.bf16 %v23136_v42, %v11229_v46  ;;  %v23162_v10 = vadd.f32 %v7966_v51, %v22693_v52  ;;  %v23176_v52 = vsub.s32 5, %v25849_v36 }
 0x32e   : > { %11779 = vmatpush1.msra.mxu0 %v11240_v32  ;;  %v7933_v15 = vrot.slane %v22746_v19, %v22733_v5  ;;  %v16534_v35 = vpack.c.bf16 %v23142_v12, %v11231_v49  ;;  %16531 = vmatpush1.bf16.msra.mxu1 %v16530_v26  ;;  %v11147_v21 = vpop.permute.xlu0 %11146  ;;  %v23170_v58 = vadd.f32 %v7969_v16, %v22704_v56  ;;  %v7809_v46 = vpop.f32.mrb[78].mxu1  ;;  %v17559_v19 = vld [vmem:[%s17744_s17 + $0xe8] sm:$0xff]  ;;  %v17242_v47 = vunpack.i.h.bf16 %v23069_v23 }
 0x32f   : > { %v23158_v50 = vpop.permute.xlu1 %17249  ;;  %15969 = vmatmul.mubr.msk.f32.vlgmr.msra.gmra.mrb[118].mxu0 %vm742_vm1, %v22831_v2  ;;  %v23173_v22 = vadd.f32 %v7967_v41, %v22715_v60  ;;  %v11236_v5 = vsel %vm11204_vm7, %v11143_v57, %v11147_v21  ;;  %16533 = vmatprep.subr.bf16.mxu0 %v16532_v44  ;;  %v11234_v26 = vsel %vm11204_vm7, %v11147_v21, %v23093_v14  ;;  %v7811_v49 = vpop.f32.mrb[79].mxu1  ;;  %v17560_v60 = vld [vmem:[%s17744_s17 + $0xd0] sm:$0xff]  ;;  %v25979_v44 = vld [vmem:[#allocation11_spill] sm:$0xff] }
 0x330   : > { %v7972_v56 = vmul.f32 %v7937_v6, %v7809_v46  ;;  %16535 = vmatpush1.bf16.msra.mxu0 %v16534_v35  ;;  %12707 = vrot.lane.b32.xlu0 %v17560_v60, %s17671_s29  ;;  %v7973_v33 = vmul.f32 %v7941_v7, %v7811_v49  ;;  %v25605_v8 = vunpack.i.l.bf16 %v23158_v50  ;;  %v17563_v21 = vld [vmem:[%s17744_s17 + $0xd8] sm:$0xff] }
 0x331   : > { %12719 = vrot.lane.b32.xlu1 %v17559_v19, %s17671_s29  ;;  %11849 = vmatprep.subr.mxu1 %v11234_v26  ;;  %v25980_v26 = vunpack.i.l.bf16 %v23069_v23 }
 0x332   : > { %v23192_v43 = vadd.f32 %v7972_v56, %v22765_v30  ;;  %11980 = vmatprep.mubr.f32.mxu0 %v25653_v62  ;;  %v7738_v6 = vpop.f32.mrb[78].mxu0  ;;  %11850 = vmatpush1.msra.mxu1 %v11236_v5  ;;  %v17245_v51 = vpop.permute.xlu0 %17244  ;;  %v23196_v27 = vadd.f32 %v7973_v33, %v22770_v3  ;;  %v9350_v30 = vrot.slane %v23201_v9, %v23176_v52 }
 0x333   : > { %v23189_v57 = vpop.permute.xlu1 %11166  ;;  %v7970_v7 = vmul.f32 %v7929_v1, %v7738_v6  ;;  %v7740_v32 = vpop.f32.mrb[79].mxu0  ;;  %v17247_v16 = vunpack.i.h.bf16 %v17245_v51  ;;  %v17246_v41 = vunpack.i.l.bf16 %v17245_v51  ;;  %15970 = vmatmul.mubr.msk.f32.vlgmr.msra.gmra.mrb[120].mxu1 %vm742_vm1, %v22831_v2  ;;  %v23212_v1 = vld [vmem:[%s25518_s3 + $0x8] sm:$0xff]  ;;  %v11223_v56 = vsel %vm11204_vm7, %v25980_v26, %v17242_v47 }
 0x334   : > { %v7971_v3 = vmul.f32 %v7933_v15, %v7740_v32  ;;  %v9354_v35 = vrot.slane %v23212_v1, %v23176_v52  ;;  %12711 = vrot.lane.b32.xlu0 %v17563_v21, %s17671_s29  ;;  %12051 = vmatprep.mubr.f32.mxu1 %v25653_v62  ;;  %v23225_v15 = vld [vmem:[%s25518_s3 + $0x10] sm:$0xff]  ;;  %v23257_v32 = vld [vmem:[%s25518_s3 + $0x20] sm:$0xff]  ;;  %v16538_v26 = vpack.c.bf16 %v11223_v56, %v23142_v12 }
 0x335   : > { %12733 = vrot.lane.b32.xlu1 %v25979_v44, %s17671_s29  ;;  %v23219_v46 = vadd.f32 %v7970_v7, %v22783_v0  ;;  %v8277_v5 = vpop.f32.mrb[80].mxu1  ;;  %v9358_v19 = vrot.slane %v23225_v15, %v23176_v52  ;;  %v11221_v0 = vsel %vm11204_vm7, %v17242_v47, %v17246_v41  ;;  %v23241_v60 = vsel %vm11204_vm7, %v17247_v16, %v25605_v8  ;;  %v23250_v7 = vld [vmem:[%s25518_s3 + $0x18] sm:$0xff] }
 0x336   : > { %v23244_v33 = vadd.f32 %v7971_v3, %v22797_v40  ;;  %v8279_v6 = vpop.f32.mrb[81].mxu1  ;;  %v11159_v23 = vpop.permute.xlu0 %11158  ;;  %v16536_v51 = vpack.c.bf16 %v11221_v0, %v23136_v42  ;;  %v9362_v47 = vrot.slane %v23250_v7, %v23176_v52  ;;  %25981 = vst [vmem:[#allocation28_spill] sm:$0xff] %v23257_v32  ;;  %v9366_v40 = vrot.slane %v23257_v32, %v23176_v52  ;;  %v17567_v32 = vld [vmem:[%s17744_s17 + $0xf0] sm:$0xff] }
 0x337   : > { %v23233_v49 = vpop.permute.xlu1 %11170  ;;  %v23263_v44 = vsel %vm11204_vm7, %v17246_v41, %v17247_v16  ;;  %v11230_v42 = vsel %vm11204_vm7, %v23122_v53, %v11159_v23  ;;  %v9475_v3 = vmul.f32 %v9350_v30, %v8277_v5  ;;  %v9476_v21 = vmul.f32 %v9354_v35, %v8279_v6 }
 0x338   : > { %v11232_v8 = vsel %vm11204_vm7, %v23093_v14, %v23122_v53  ;;  %12729 = vrot.lane.b32.xlu0 %v17567_v32, %s17671_s29  ;;  %11920 = vmatprep.subr.mxu0 %v11230_v42  ;;  %v16540_v16 = vpack.c.bf16 %v23241_v60, %v11221_v0  ;;  %v16542_v14 = vpack.c.bf16 %v23263_v44, %v11223_v56  ;;  %v17252_v42 = vunpack.i.h.bf16 %v23158_v50 }
 0x339   : > { %12731 = vrot.lane.b32.xlu1 %v25653_v62, %s17671_s29  ;;  %v8348_v41 = vpop.f32.mrb[80].mxu0  ;;  %16537 = vmatprep.subr.bf16.mxu1 %v16536_v51  ;;  %v23281_v35 = vadd.f32 %v9475_v3, %v22808_v11  ;;  %v23284_v12 = vadd.f32 %v9476_v21, %v22841_v18 }
 0x33a   : > { %11921 = vmatpush1.msra.mxu0 %v11232_v8  ;;  %v9477_v5 = vmul.f32 %v9358_v19, %v8348_v41  ;;  %v8350_v6 = vpop.f32.mrb[81].mxu0  ;;  %16539 = vmatpush1.bf16.msra.mxu1 %v16538_v26  ;;  %v11163_v53 = vpop.permute.xlu0 %11162  ;;  %v23292_v8 = vld [vmem:[%s25518_s3 + $0x28] sm:$0xff] }
 0x33b   : > { %v23278_v30 = vpop.permute.xlu1 %17259  ;;  %15971 = vmatmul.mubr.msk.f32.vlgmr.msra.gmra.mrb[120].mxu0 %vm742_vm1, %v22831_v2  ;;  %v9478_v0 = vmul.f32 %v9362_v47, %v8350_v6  ;;  %v9370_v11 = vrot.slane %v23292_v8, %v23176_v52  ;;  %v11228_v18 = vsel %vm11204_vm7, %v11159_v23, %v11163_v53  ;;  %16541 = vmatprep.subr.bf16.mxu0 %v16540_v16  ;;  %v23328_v6 = vld [vmem:[%s25518_s3 + $0x38] sm:$0xff] }
 0x33c   : > { %v11226_v19 = vsel %vm11204_vm7, %v11163_v53, %v23189_v57  ;;  %v23302_v56 = vadd.f32 %v9477_v5, %v22803_v28  ;;  %12122 = vmatprep.mubr.f32.mxu0 %v25653_v62  ;;  %16543 = vmatpush1.bf16.msra.mxu0 %v16542_v14  ;;  %v23315_v28 = vld [vmem:[%s25518_s3 + $0x30] sm:$0xff]  ;;  %25984 = vst [vmem:[#allocation18_spill] sm:$0xff] %v23328_v6  ;;  %v17571_v53 = vld [vmem:[%s17744_s17 + $0xf8] sm:$0xff] }
 0x33d   : > { %12723 = vrot.lane.b32.xlu0 %v17567_v32, %s17671_s29  ;;  %v23307_v51 = vadd.f32 %v9478_v0, %v22819_v54  ;;  %v8419_v47 = vpop.f32.mrb[82].mxu1  ;;  %11991 = vmatprep.subr.mxu1 %v11226_v19  ;;  %25982 = vst [vmem:[#allocation17_spill] sm:$0xff] %v23315_v28  ;;  %v9374_v32 = vrot.slane %v23315_v28, %v23176_v52  ;;  %v25987_v19 = vunpack.i.l.bf16 %v23158_v50 }
 0x33e   : > { %v9479_v3 = vmul.f32 %v9366_v40, %v8419_v47  ;;  %v8421_v21 = vpop.f32.mrb[83].mxu1  ;;  %11992 = vmatpush1.msra.mxu1 %v11228_v18  ;;  %v17255_v26 = vpop.permute.xlu0 %17254  ;;  %v9378_v14 = vrot.slane %v23328_v6, %v23176_v52 }
 0x33f   : > { %v23310_v23 = vpop.permute.xlu1 %11182  ;;  %v9480_v16 = vmul.f32 %v9370_v11, %v8421_v21  ;;  %v17257_v41 = vunpack.i.h.bf16 %v17255_v26  ;;  %v17256_v5 = vunpack.i.l.bf16 %v17255_v26  ;;  %15972 = vmatmul.mubr.msk.f32.vlgmr.msra.gmra.mrb[122].mxu1 %vm742_vm1, %v22831_v2  ;;  %v11215_v47 = vsel %vm11204_vm7, %v25987_v19, %v17252_v42 }
 0x340   : > { %v23323_v40 = vadd.f32 %v9479_v3, %v22879_v4  ;;  %12193 = vmatprep.mubr.f32.mxu1 %v25653_v62  ;;  %v23341_v4 = vld [vmem:[%s25518_s3 + $0x40] sm:$0xff]  ;;  %v25989_v19 = vunpack.i.l.bf16 %v23278_v30  ;;  %v16546_v6 = vpack.c.bf16 %v11215_v47, %v23263_v44 }
 0x341   : > { %12727 = vrot.lane.b32.xlu0 %v17571_v53, %s17671_s29  ;;  %v23335_v0 = vadd.f32 %v9480_v16, %v22892_v13  ;;  %v8490_v11 = vpop.f32.mrb[82].mxu0  ;;  %25986 = vst [vmem:[#allocation31_spill] sm:$0xff] %v23341_v4  ;;  %v9382_v18 = vrot.slane %v23341_v4, %v23176_v52  ;;  %v11213_v13 = vsel %vm11204_vm7, %v17252_v42, %v17256_v5  ;;  %v23356_v16 = vld [vmem:[%s25518_s3 + $0x48] sm:$0xff]  ;;  %v23370_v42 = vld [vmem:[%s25518_s3 + $0x50] sm:$0xff] }
 0x342   : > { %25983 = vst [vmem:[#allocation21_spill] sm:$0xff] %v23323_v40  ;;  %v9481_v21 = vmul.f32 %v9374_v32, %v8490_v11  ;;  %v8492_v26 = vpop.f32.mrb[83].mxu0  ;;  %25988 = vst [vmem:[#allocation33_spill] sm:$0xff] %v23356_v16  ;;  %v9386_v53 = vrot.slane %v23356_v16, %v23176_v52  ;;  %v11175_v54 = vpop.permute.xlu0 %11174  ;;  %v16544_v50 = vpack.c.bf16 %v11213_v13, %v23241_v60  ;;  %v23377_v11 = vld [vmem:[%s25518_s3 + $0x58] sm:$0xff] }
 0x343   : > { %25985 = vst [vmem:[#allocation20_spill] sm:$0xff] %v23335_v0  ;;  %v23349_v3 = vpop.permute.xlu1 %11186  ;;  %v23365_v4 = vsel %vm11204_vm7, %v17257_v41, %v25989_v19  ;;  %25990 = vst [vmem:[#allocation9_spill] sm:$0xff] %v23370_v42  ;;  %v9390_v32 = vrot.slane %v23370_v42, %v23176_v52  ;;  %v9394_v60 = vrot.slane %v23377_v11, %v23176_v52 }
 0x344   : > { %25991 = vst [vmem:[#allocation32_spill] sm:$0xff] %v23377_v11  ;;  %v23383_v19 = vsel %vm11204_vm7, %v17256_v5, %v17257_v41  ;;  %v11222_v16 = vsel %vm11204_vm7, %v23233_v49, %v11175_v54  ;;  %v23389_v0 = vadd.f32 %v9481_v21, %v22862_v48  ;;  %v9482_v42 = vmul.f32 %v9378_v14, %v8492_v26  ;;  %v8561_v40 = vpop.f32.mrb[84].mxu1 }
 0x345   : > { %v11224_v11 = vsel %vm11204_vm7, %v23189_v57, %v23233_v49  ;;  %12735 = vrot.lane.b32.xlu0 %v25653_v62, %s17671_s29  ;;  %12062 = vmatprep.subr.mxu0 %v11222_v16  ;;  %v9483_v41 = vmul.f32 %v9382_v18, %v8561_v40  ;;  %v8563_v5 = vpop.f32.mrb[85].mxu1  ;;  %v16548_v48 = vpack.c.bf16 %v23365_v4, %v11213_v13 }
 0x346   : > { %16545 = vmatprep.subr.bf16.mxu1 %v16544_v50  ;;  %12063 = vmatpush1.msra.mxu0 %v11224_v11  ;;  %v23402_v14 = vadd.f32 %v9482_v42, %v22869_v38  ;;  %v9484_v44 = vmul.f32 %v9386_v53, %v8563_v5  ;;  %v16550_v21 = vpack.c.bf16 %v23383_v19, %v11215_v47  ;;  %v11179_v57 = vpop.permute.xlu0 %11178 }
 0x347   : > { %v23398_v28 = vpop.permute.xlu1 %11194  ;;  %16547 = vmatpush1.bf16.msra.mxu1 %v16546_v6  ;;  %15973 = vmatmul.mubr.msk.f32.vlgmr.msra.gmra.mrb[122].mxu0 %vm742_vm1, %v22831_v2  ;;  %v23408_v49 = vadd.f32 %v9483_v41, %v22921_v24  ;;  %v11220_v40 = vsel %vm11204_vm7, %v11175_v54, %v11179_v57  ;;  %v11218_v38 = vsel %vm11204_vm7, %v11179_v57, %v23310_v23  ;;  %v23422_v24 = vld [vmem:[%s25518_s3 + $0x60] sm:$0xff]  ;;  %v25995_v57 = vunpack.i.l.bf16 %v23278_v30 }
 0x348   : > { %16549 = vmatprep.subr.bf16.mxu0 %v16548_v48  ;;  %v23416_v18 = vadd.f32 %v9484_v44, %v22938_v39  ;;  %v8632_v47 = vpop.f32.mrb[84].mxu0  ;;  %12264 = vmatprep.mubr.f32.mxu0 %v25653_v62  ;;  %v9398_v54 = vrot.slane %v23422_v24, %v23176_v52  ;;  %v23431_v39 = vld [vmem:[%s25518_s3 + $0x68] sm:$0xff] }
 0x349   : > { %16551 = vmatpush1.bf16.msra.mxu0 %v16550_v21  ;;  %12133 = vmatprep.subr.mxu1 %v11218_v38  ;;  %v9485_v6 = vmul.f32 %v9390_v32, %v8632_v47  ;;  %v8634_v13 = vpop.f32.mrb[85].mxu0  ;;  %v9402_v53 = vrot.slane %v23431_v39, %v23176_v52  ;;  %v17262_v32 = vunpack.i.h.bf16 %v23278_v30  ;;  %v23447_v21 = vld [vmem:[%s25518_s3 + $0x70] sm:$0xff] }
 0x34a   : > { %v9486_v16 = vmul.f32 %v9394_v60, %v8634_v13  ;;  %v17265_v50 = vpop.permute.xlu0 %17264  ;;  %25994 = vst [vmem:[#allocation40_spill] sm:$0xff] %v23447_v21 }
 0x34b   : > { %v23426_v26 = vpop.permute.xlu1 %17274  ;;  %12134 = vmatpush1.msra.mxu1 %v11220_v40  ;;  %v23436_v42 = vadd.f32 %v9485_v6, %v22916_v59  ;;  %v17267_v11 = vunpack.i.h.bf16 %v17265_v50  ;;  %v17266_v41 = vunpack.i.l.bf16 %v17265_v50  ;;  %v9406_v59 = vrot.slane %v23447_v21, %v23176_v52  ;;  %v23463_v6 = vld [vmem:[%s25518_s3 + $0x78] sm:$0xff] }
 0x34c   : > { %15974 = vmatmul.mubr.msk.f32.vlgmr.msra.gmra.mrb[124].mxu1 %vm742_vm1, %v22831_v2  ;;  %v23442_v60 = vadd.f32 %v9486_v16, %v22924_v17  ;;  %v8703_v5 = vpop.f32.mrb[86].mxu1  ;;  %v11205_v40 = vsel %vm11204_vm7, %v25995_v57, %v17262_v32  ;;  %25997 = vst [vmem:[#allocation8_spill] sm:$0xff] %v23463_v6  ;;  %v9410_v13 = vrot.slane %v23463_v6, %v23176_v52  ;;  %v25999_v16 = vld [vmem:[#allocation51_spill] sm:$0xff] }
 0x34d   : > { %25992 = vst [vmem:[#allocation37_spill] sm:$0xff] %v23436_v42  ;;  %v9487_v48 = vmul.f32 %v9398_v54, %v8703_v5  ;;  %v8705_v44 = vpop.f32.mrb[87].mxu1  ;;  %12335 = vmatprep.mubr.f32.mxu1 %v25653_v62  ;;  %v11209_v38 = vsel %vm11204_vm7, %v17262_v32, %v17266_v41  ;;  %v11270_v50 = vsel %vm11204_vm7, %v17267_v11, %v25999_v16 }
 0x34e   : > { %25993 = vst [vmem:[#allocation38_spill] sm:$0xff] %v23442_v60  ;;  %v9488_v47 = vmul.f32 %v9402_v53, %v8705_v44  ;;  %v11191_v54 = vpop.permute.xlu0 %11190  ;;  %v23476_v53 = vld [vmem:[%s25518_s3 + $0x80] sm:$0xff]  ;;  %v23483_v44 = vld [vmem:[%s25518_s3 + $0x88] sm:$0xff]  ;;  %v16552_v16 = vpack.c.bf16 %v11209_v38, %v23365_v4  ;;  %v16554_v21 = vpack.c.bf16 %v11205_v40, %v23383_v19  ;;  %v23510_v19 = vld [vmem:[%s25518_s3 + $0x90] sm:$0xff] }
 0x34f   : > { %v23456_v17 = vpop.permute.xlu1 %17284  ;;  %v23468_v30 = vadd.f32 %v9487_v48, %v22988_v31  ;;  %26000 = vst [vmem:[#allocation36_spill] sm:$0xff] %v23476_v53  ;;  %v9414_v5 = vrot.slane %v23476_v53, %v23176_v52  ;;  %26001 = vst [vmem:[#allocation23_spill] sm:$0xff] %v23483_v44  ;;  %v9418_v31 = vrot.slane %v23483_v44, %v23176_v52 }
 0x350   : > { %25996 = vst [vmem:[#allocation5_spill] sm:$0xff] %v23456_v17  ;;  %v11206_v48 = vsel %vm11204_vm7, %v17266_v41, %v17267_v11  ;;  %v11214_v57 = vsel %vm11204_vm7, %v23349_v3, %v11191_v54  ;;  %v23494_v6 = vadd.f32 %v9488_v47, %v23000_v45  ;;  %v8774_v53 = vpop.f32.mrb[86].mxu0  ;;  %v11216_v44 = vsel %vm11204_vm7, %v23310_v23, %v23349_v3  ;;  %v23523_v47 = vld [vmem:[%s25518_s3 + $0x98] sm:$0xff] }
 0x351   : > { %25998 = vst [vmem:[#allocation35_spill] sm:$0xff] %v23468_v30  ;;  %12204 = vmatprep.subr.mxu0 %v11214_v57  ;;  %v26002_v30 = vld [vmem:[#allocation44_spill] sm:$0xff]  ;;  %v9489_v60 = vmul.f32 %v9406_v59, %v8774_v53  ;;  %v8776_v42 = vpop.f32.mrb[87].mxu0  ;;  %16553 = vmatprep.subr.bf16.mxu1 %v16552_v16  ;;  %v9422_v23 = vrot.slane %v23510_v19, %v23176_v52 }
 0x352   : > { %v26003_v11 = vunpack.i.l.bf16 %v26002_v30  ;;  %12205 = vmatpush1.msra.mxu0 %v11216_v44  ;;  %v9490_v38 = vmul.f32 %v9410_v13, %v8776_v42  ;;  %v16558_v3 = vpack.c.bf16 %v11206_v48, %v11205_v40  ;;  %16555 = vmatpush1.bf16.msra.mxu1 %v16554_v21  ;;  %v9426_v13 = vrot.slane %v23523_v47, %v23176_v52 }
 0x353   : > { %v23505_v45 = vpop.permute.xlu1 %12615  ;;  %15975 = vmatmul.mubr.msk.f32.vlgmr.msra.gmra.mrb[124].mxu0 %vm742_vm1, %v22831_v2  ;;  %v23518_v59 = vadd.f32 %v9489_v60, %v22979_v55  ;;  %v8845_v42 = vpop.f32.mrb[88].mxu1  ;;  %v17277_v55 = vunpack.i.h.bf16 %v23426_v26  ;;  %v23533_v60 = vunpack.i.l.bf16 %v23426_v26  ;;  %v25617_v44 = vunpack.i.l.bf16 %v23456_v17 }
 0x354   : > { %v11269_v41 = vsel %vm11204_vm7, %v17262_v32, %v26003_v11  ;;  %v17270_v32 = vpop.permute.xlu0 %17269  ;;  %v23528_v21 = vadd.f32 %v9490_v38, %v22982_v25  ;;  %v8847_v53 = vpop.f32.mrb[89].mxu1  ;;  %12406 = vmatprep.mubr.f32.mxu0 %v25653_v62 }
 0x355   : > { %v16556_v4 = vpack.c.bf16 %v11270_v50, %v11269_v41  ;;  %v17272_v40 = vunpack.i.h.bf16 %v17270_v32  ;;  %v17271_v30 = vunpack.i.l.bf16 %v17270_v32  ;;  %v9491_v50 = vmul.f32 %v9414_v5, %v8845_v42  ;;  %26004 = vst [vmem:[#allocation15_spill] sm:$0xff] %v23533_v60  ;;  %v23571_v42 = vld [vmem:[%s25518_s3 + $0xa8] sm:$0xff] }
 0x356   : > { %v9492_v48 = vmul.f32 %v9418_v31, %v8847_v53  ;;  %v11212_v31 = vsel %vm11204_vm7, %v11191_v54, %v23398_v28  ;;  %v17287_v54 = vunpack.i.h.bf16 %v23456_v17  ;;  %26005 = vst [vmem:[#allocation16_spill] sm:$0xff] %v23571_v42 }
 0x357   : > { %16557 = vmatprep.subr.bf16.mxu0 %v16556_v4  ;;  %v23536_v57 = vpop.permute.xlu1 %12609  ;;  %v23539_v16 = vadd.f32 %v9491_v50, %v23032_v34  ;;  %v11210_v25 = vsel %vm11204_vm7, %v23398_v28, %v17271_v30  ;;  %v11271_v5 = vsel %vm11204_vm7, %v17272_v40, %v22826_v37  ;;  %v11207_v26 = vsel %vm11204_vm7, %v17271_v30, %v17272_v40  ;;  %v8916_v41 = vpop.f32.mrb[88].mxu0  ;;  %v23558_v37 = vld [vmem:[%s25518_s3 + $0xa0] sm:$0xff] }
 0x358   : > { %16559 = vmatpush1.bf16.msra.mxu0 %v16558_v3  ;;  %v17280_v11 = vpop.permute.xlu0 %17279  ;;  %12275 = vmatprep.subr.mxu1 %v11210_v25  ;;  %v23553_v34 = vadd.f32 %v9492_v48, %v23058_v63  ;;  %v9493_v3 = vmul.f32 %v9422_v23, %v8916_v41  ;;  %v8918_v32 = vpop.f32.mrb[89].mxu0  ;;  %v9430_v28 = vrot.slane %v23558_v37, %v23176_v52 }
 0x359   : > { %12346 = vmatprep.subr.mxu0 %v11271_v5  ;;  %v17282_v4 = vunpack.i.h.bf16 %v17280_v11  ;;  %v17281_v38 = vunpack.i.l.bf16 %v17280_v11  ;;  %12276 = vmatpush1.msra.mxu1 %v11212_v31  ;;  %v9494_v63 = vmul.f32 %v9426_v13, %v8918_v32  ;;  %v12798_v23 = vsel %vm12737_vm8, %v17277_v55, %v23533_v60 }
 0x35a   : > { %15976 = vmatmul.mubr.msk.f32.vlgmr.msra.gmra.mrb[126].mxu1 %vm742_vm1, %v22831_v2  ;;  %v9434_v40 = vrot.slane %v23571_v42, %v23176_v52  ;;  %v12800_v30 = vsel %vm12737_vm8, %v25617_v44, %v17277_v55  ;;  %v23585_v50 = vadd.f32 %v9493_v3, %v23021_v20  ;;  %v23601_v3 = vld [vmem:[%s25518_s3 + $0xb0] sm:$0xff]  ;;  %v26018_v42 = vld [vmem:[#allocation12_spill] sm:$0xff] }
 0x35b   : > { %v12796_v13 = vsel %vm12737_vm8, %v23533_v60, %v17281_v38  ;;  %v23587_v53 = vpop.permute.xlu1 %12623  ;;  %v12794_v48 = vsel %vm12737_vm8, %v17281_v38, %v17282_v4  ;;  %v8987_v31 = vpop.f32.mrb[90].mxu1  ;;  %12874 = vmatprep.mubr.f32.mxu1 %v25653_v62  ;;  %26009 = vst [vmem:[#allocation19_spill] sm:$0xff] %v23601_v3  ;;  %v9438_v38 = vrot.slane %v23601_v3, %v23176_v52  ;;  %v26017_v60 = vld [vmem:[#allocation10_spill] sm:$0xff] }
 0x35c   : > { %12347 = vmatpush1.msra.mxu0 %v11207_v26  ;;  %26006 = vst [vmem:[#allocation7_spill] sm:$0xff] %v23585_v50  ;;  %v16562_v25 = vpack.c.bf16 %v12796_v13, %v12800_v30  ;;  %v23591_v5 = vpop.permute.xlu0 %17289  ;;  %v26007_v26 = vld [vmem:[#allocation27_spill] sm:$0xff]  ;;  %v16560_v11 = vpack.c.bf16 %v12794_v48, %v12798_v23  ;;  %v9495_v41 = vmul.f32 %v9430_v28, %v8987_v31  ;;  %v8989_v20 = vpop.f32.mrb[91].mxu1  ;;  %v26011_v30 = vld [vmem:[#allocation22_spill] sm:$0xff] }
 0x35d   : > { %15977 = vmatmul.mubr.msk.f32.vlgmr.msra.gmra.mrb[126].mxu0 %vm742_vm1, %v22831_v2  ;;  %v23594_v55 = vadd.f32 %v9494_v63, %v26007_v26  ;;  %v17291_v2 = vunpack.i.l.bf16 %v23591_v5  ;;  %v9496_v32 = vmul.f32 %v9434_v40, %v8989_v20  ;;  %v23609_v63 = vld [vmem:[%s25518_s3 + $0xb8] sm:$0xff]  ;;  %v23615_v23 = vsel %vm12737_vm8, %v17282_v4, %v17287_v54 }
 0x35e   : > { %12945 = vmatprep.mubr.f32.mxu0 %v25653_v62  ;;  %16561 = vmatprep.subr.bf16.mxu1 %v16560_v11  ;;  %26010 = vst [vmem:[#allocation4_spill] sm:$0xff] %v23609_v63  ;;  %v9442_v28 = vrot.slane %v23609_v63, %v23176_v52  ;;  %v23618_v26 = vadd.f32 %v9495_v41, %v26011_v30  ;;  %v26013_v11 = vld [vmem:[#allocation13_spill] sm:$0xff]  ;;  %v9058_v17 = vpop.f32.mrb[90].mxu0  ;;  %v23630_v63 = vld [vmem:[%s25518_s3 + $0xc0] sm:$0xff]  ;;  %v17292_v3 = vunpack.i.h.bf16 %v23591_v5 }
 0x35f   : > { %26008 = vst [vmem:[#allocation41_spill] sm:$0xff] %v23594_v55  ;;  %16563 = vmatpush1.bf16.msra.mxu1 %v16562_v25  ;;  %v23620_v31 = vpop.permute.xlu1 %17299  ;;  %v12790_v40 = vsel %vm12737_vm8, %v17287_v54, %v17291_v2  ;;  %v23625_v20 = vadd.f32 %v9496_v32, %v26013_v11  ;;  %26015 = vst [vmem:[#allocation29_spill] sm:$0xff] %v23630_v63  ;;  %v9446_v4 = vrot.slane %v23630_v63, %v23176_v52  ;;  %v9060_v25 = vpop.f32.mrb[91].mxu0  ;;  %v23640_v32 = vld [vmem:[%s25516_s1 + $0x20] sm:$0xf]  ;;  %v23645_v11 = vld [vmem:[%s25518_s3 + $0xc8] sm:$0xff] }
 0x360   : > { %26012 = vst [vmem:[#allocation42_spill] sm:$0xff] %v23618_v26  ;;  %v12620_v44 = vpop.permute.xlu0 %12619  ;;  %v9497_v41 = vmul.f32 %v9438_v38, %v9058_v17  ;;  %v16564_v54 = vpack.c.bf16 %v12790_v40, %v12794_v48  ;;  %26016 = vst [vmem:[#allocation14_spill] sm:$0xff] %v23645_v11  ;;  %v9450_v63 = vrot.slane %v23645_v11, %v23176_v52 }
 0x361   : > { %26014 = vst [vmem:[#allocation43_spill] sm:$0xff] %v23625_v20  ;;  %v12799_v30 = vsel %vm12737_vm8, %v23505_v45, %v12620_v44  ;;  %v12801_v17 = vsel %vm12737_vm8, %v23536_v57, %v23505_v45  ;;  %v16566_v48 = vpack.c.bf16 %v23615_v23, %v12796_v13  ;;  %v9498_v38 = vmul.f32 %v9442_v28, %v9060_v25 }
 0x362   : > { %12814 = vmatprep.subr.mxu1 %v12799_v30  ;;  %v23656_v20 = vadd.f32 %v9497_v41, %v26017_v60  ;;  %16565 = vmatprep.subr.bf16.mxu0 %v16564_v54  ;;  %v9129_v55 = vpop.f32.mrb[92].mxu1  ;;  %v23669_v60 = vld [vmem:[%s25518_s3 + $0xd0] sm:$0xff]  ;;  %v12788_v54 = vsel %vm12737_vm8, %v17291_v2, %v17292_v3 }
 0x363   : > { %12815 = vmatpush1.msra.mxu1 %v12801_v17  ;;  %v23658_v26 = vpop.permute.xlu1 %12635  ;;  %v23662_v50 = vadd.f32 %v9498_v38, %v26018_v42  ;;  %16567 = vmatpush1.bf16.msra.mxu0 %v16566_v48  ;;  %v9499_v13 = vmul.f32 %v9446_v4, %v9129_v55  ;;  %v9131_v5 = vpop.f32.mrb[93].mxu1  ;;  %26019 = vst [vmem:[#allocation30_spill] sm:$0xff] %v23669_v60  ;;  %v23676_v42 = vld [vmem:[%s25518_s3 + $0xd8] sm:$0xff] }
 0x364   : > { %v17295_v45 = vpop.permute.xlu0 %17294  ;;  %15979 = vmatmul.mubr.msk.f32.vlgmr.msra.gmra.mrb[128].mxu1 %vm742_vm1, %v23640_v32  ;;  %v9454_v28 = vrot.slane %v23669_v60, %v23176_v52  ;;  %v9500_v30 = vmul.f32 %v9450_v63, %v9131_v5  ;;  %26020 = vst [vmem:[#allocation24_spill] sm:$0xff] %v23676_v42  ;;  %v9458_v55 = vrot.slane %v23676_v42, %v23176_v52  ;;  %v26021_v42 = vunpack.i.l.bf16 %v23620_v31 }
 0x365   : > { %v17297_v41 = vunpack.i.h.bf16 %v17295_v45  ;;  %v17296_v25 = vunpack.i.l.bf16 %v17295_v45  ;;  %13016 = vmatprep.mubr.f32.mxu1 %v25653_v62  ;;  %v23682_v4 = vadd.f32 %v9499_v13, %v23162_v10  ;;  %v9200_v63 = vpop.f32.mrb[92].mxu0 }
 0x366   : > { %v23687_v17 = vadd.f32 %v9500_v30, %v23173_v22  ;;  %v9501_v45 = vmul.f32 %v9454_v28, %v9200_v63  ;;  %v9202_v11 = vpop.f32.mrb[93].mxu0  ;;  %v23702_v22 = vld [vmem:[%s25518_s3 + $0xe0] sm:$0xff]  ;;  %v12797_v63 = vsel %vm12737_vm8, %v12620_v44, %v23587_v53 }
 0x367   : > { %v23689_v48 = vpop.permute.xlu1 %12639  ;;  %v12786_v38 = vsel %vm12737_vm8, %v17292_v3, %v17296_v25  ;;  %v23697_v10 = vsel %vm12737_vm8, %v17297_v41, %v26021_v42  ;;  %26022 = vst [vmem:[#allocation45_spill] sm:$0xff] %v23702_v22  ;;  %v9462_v2 = vrot.slane %v23702_v22, %v23176_v52  ;;  %v23708_v3 = vsel %vm12737_vm8, %v17296_v25, %v17297_v41  ;;  %v23723_v41 = vld [vmem:[%s25518_s3 + $0xf0] sm:$0xff] }
 0x368   : > { %v12628_v5 = vpop.permute.xlu0 %12627  ;;  %v9502_v13 = vmul.f32 %v9458_v55, %v9202_v11  ;;  %v16568_v30 = vpack.c.bf16 %v12786_v38, %v12790_v40  ;;  %v16570_v42 = vpack.c.bf16 %v12788_v54, %v23615_v23  ;;  %v23718_v60 = vadd.f32 %v9501_v45, %v23150_v29  ;;  %26023 = vst [vmem:[#allocation25_spill] sm:$0xff] %v23723_v41  ;;  %v23736_v29 = vld [vmem:[%s25518_s3 + $0xe8] sm:$0xff] }
 0x369   : > { %v12795_v28 = vsel %vm12737_vm8, %v23587_v53, %v12628_v5  ;;  %v9470_v11 = vrot.slane %v23723_v41, %v23176_v52  ;;  %v16572_v44 = vpack.c.bf16 %v23697_v10, %v12786_v38  ;;  %26024 = vst [vmem:[#allocation46_spill] sm:$0xff] %v23736_v29  ;;  %v9466_v53 = vrot.slane %v23736_v29, %v23176_v52 }
 0x36a   : > { %12885 = vmatprep.subr.mxu0 %v12795_v28  ;;  %v23728_v40 = vadd.f32 %v9502_v13, %v23170_v58  ;;  %16569 = vmatprep.subr.bf16.mxu1 %v16568_v30  ;;  %v16574_v25 = vpack.c.bf16 %v23708_v3, %v12788_v54  ;;  %v23746_v58 = vld [vmem:[%s25518_s3 + $0xf8] sm:$0xff]  ;;  %v23751_v45 = vsub.s32 6, %v25849_v36  ;;  %v17302_v30 = vunpack.i.h.bf16 %v23620_v31 }
 0x36b   : > { %12886 = vmatpush1.msra.mxu0 %v12797_v63  ;;  %v23730_v23 = vpop.permute.xlu1 %17309  ;;  %16571 = vmatpush1.bf16.msra.mxu1 %v16570_v42  ;;  %26025 = vst [vmem:[#allocation34_spill] sm:$0xff] %v23746_v58  ;;  %v9474_v38 = vrot.slane %v23746_v58, %v23176_v52  ;;  %v9271_v54 = vpop.f32.mrb[94].mxu1 }
 0x36c   : > { %v12632_v55 = vpop.permute.xlu0 %12631  ;;  %15980 = vmatmul.mubr.msk.f32.vlgmr.msra.gmra.mrb[128].mxu0 %vm742_vm1, %v23640_v32  ;;  %16573 = vmatprep.subr.bf16.mxu0 %v16572_v44  ;;  %v9503_v42 = vmul.f32 %v9462_v2, %v9271_v54  ;;  %v9342_v63 = vpop.f32.mrb[94].mxu0  ;;  %v17311_v36 = vunpack.i.l.bf16 %v23730_v23  ;;  %v10883_v2 = vrot.slane %v23201_v9, %v23751_v45 }
 0x36d   : > { %v12793_v13 = vsel %vm12737_vm8, %v12628_v5, %v12632_v55  ;;  %v12791_v28 = vsel %vm12737_vm8, %v12632_v55, %v23658_v26  ;;  %13087 = vmatprep.mubr.f32.mxu0 %v25653_v62  ;;  %16575 = vmatpush1.bf16.msra.mxu0 %v16574_v25  ;;  %v9273_v52 = vpop.f32.mrb[95].mxu1  ;;  %v9505_v58 = vmul.f32 %v9470_v11, %v9342_v63  ;;  %v9344_v5 = vpop.f32.mrb[95].mxu0 }
 0x36e   : > { %12956 = vmatprep.subr.mxu1 %v12791_v28  ;;  %v9504_v29 = vmul.f32 %v9466_v53, %v9273_v52  ;;  %v23764_v41 = vadd.f32 %v9503_v42, %v23219_v46  ;;  %v9506_v55 = vmul.f32 %v9474_v38, %v9344_v5  ;;  %v26026_v46 = vunpack.i.l.bf16 %v23620_v31 }
 0x36f   : > { %v23761_v44 = vpop.permute.xlu1 %12651  ;;  %12957 = vmatpush1.msra.mxu1 %v12793_v13  ;;  %v23769_v25 = vadd.f32 %v9505_v58, %v23192_v43  ;;  %v10887_v43 = vrot.slane %v23212_v1, %v23751_v45  ;;  %v10891_v58 = vrot.slane %v23225_v15, %v23751_v45  ;;  %v10895_v52 = vrot.slane %v23250_v7, %v23751_v45 }
 0x370   : > { %v17305_v22 = vpop.permute.xlu0 %17304  ;;  %v23772_v54 = vadd.f32 %v9504_v29, %v23244_v33  ;;  %15981 = vmatmul.mubr.msk.f32.vlgmr.msra.gmra.mrb[130].mxu1 %vm742_vm1, %v23640_v32  ;;  %v12780_v38 = vsel %vm12737_vm8, %v26026_v46, %v17302_v30  ;;  %v23781_v13 = vadd.f32 %v9506_v55, %v23196_v27 }
 0x371   : > { %v17307_v11 = vunpack.i.h.bf16 %v17305_v22  ;;  %v17306_v53 = vunpack.i.l.bf16 %v17305_v22  ;;  %13158 = vmatprep.mubr.f32.mxu1 %v25653_v62  ;;  %v16578_v28 = vpack.c.bf16 %v12780_v38, %v23708_v3 }
 0x373   : > { %v23786_v9 = vpop.permute.xlu1 %12655  ;;  %v12778_v33 = vsel %vm12737_vm8, %v17302_v30, %v17306_v53  ;;  %v23794_v31 = vsel %vm12737_vm8, %v17307_v11, %v17311_v36  ;;  %v23798_v27 = vsel %vm12737_vm8, %v17306_v53, %v17307_v11  ;;  %v9810_v29 = vpop.f32.mrb[96].mxu1  ;;  %v26027_v11 = vld [vmem:[#allocation28_spill] sm:$0xff] }
 0x374   : > { %v12644_v22 = vpop.permute.xlu0 %12643  ;;  %v16576_v1 = vpack.c.bf16 %v12778_v33, %v23697_v10  ;;  %v11008_v42 = vmul.f32 %v10883_v2, %v9810_v29  ;;  %v9812_v63 = vpop.f32.mrb[97].mxu1  ;;  %v12789_v10 = vsel %vm12737_vm8, %v23658_v26, %v23689_v48  ;;  %v16580_v15 = vpack.c.bf16 %v23794_v31, %v12778_v33 }
 0x375   : > { %v12787_v30 = vsel %vm12737_vm8, %v23689_v48, %v12644_v22  ;;  %v11009_v5 = vmul.f32 %v10887_v43, %v9812_v63  ;;  %v16582_v3 = vpack.c.bf16 %v23798_v27, %v12780_v38  ;;  %v10899_v53 = vrot.slane %v26027_v11, %v23751_v45  ;;  %v26030_v11 = vld [vmem:[#allocation21_spill] sm:$0xff] }
 0x376   : > { %13027 = vmatprep.subr.mxu0 %v12787_v30  ;;  %16577 = vmatprep.subr.bf16.mxu1 %v16576_v1  ;;  %v23818_v2 = vadd.f32 %v11008_v42, %v23281_v35  ;;  %v9881_v7 = vpop.f32.mrb[96].mxu0  ;;  %v10903_v43 = vrot.slane %v23292_v8, %v23751_v45  ;;  %v17312_v29 = vunpack.i.h.bf16 %v23730_v23 }
 0x377   : > { %13028 = vmatpush1.msra.mxu0 %v12789_v10  ;;  %16579 = vmatpush1.bf16.msra.mxu1 %v16578_v28  ;;  %v23815_v55 = vpop.permute.xlu1 %17319  ;;  %v23825_v26 = vadd.f32 %v11009_v5, %v23284_v12  ;;  %v11010_v48 = vmul.f32 %v10891_v58, %v9881_v7  ;;  %v9883_v38 = vpop.f32.mrb[97].mxu0 }
 0x378   : > { %v12648_v46 = vpop.permute.xlu0 %12647  ;;  %15982 = vmatmul.mubr.msk.f32.vlgmr.msra.gmra.mrb[130].mxu0 %vm742_vm1, %v23640_v32  ;;  %16581 = vmatprep.subr.bf16.mxu0 %v16580_v15  ;;  %v11011_v1 = vmul.f32 %v10895_v52, %v9883_v38  ;;  %v17321_v58 = vunpack.i.l.bf16 %v23815_v55  ;;  %v26028_v52 = vld [vmem:[#allocation17_spill] sm:$0xff]  ;;  %v26031_v38 = vld [vmem:[#allocation20_spill] sm:$0xff] }
 0x379   : > { %v12785_v35 = vsel %vm12737_vm8, %v12644_v22, %v12648_v46  ;;  %16583 = vmatpush1.bf16.msra.mxu0 %v16582_v3  ;;  %v12783_v33 = vsel %vm12737_vm8, %v12648_v46, %v23761_v44  ;;  %13229 = vmatprep.mubr.f32.mxu0 %v25653_v62  ;;  %v23837_v12 = vadd.f32 %v11010_v48, %v23302_v56  ;;  %v26029_v3 = vld [vmem:[#allocation18_spill] sm:$0xff] }
 0x37a   : > { %13098 = vmatprep.subr.mxu1 %v12783_v33  ;;  %v23843_v22 = vadd.f32 %v11011_v1, %v23307_v51  ;;  %v9952_v28 = vpop.f32.mrb[98].mxu1  ;;  %v10907_v10 = vrot.slane %v26028_v52, %v23751_v45  ;;  %v10911_v7 = vrot.slane %v26029_v3, %v23751_v45  ;;  %v12772_v51 = vsel %vm12737_vm8, %v17311_v36, %v17312_v29 }
 0x37b   : > { %13099 = vmatpush1.msra.mxu1 %v12785_v35  ;;  %v23840_v8 = vpop.permute.xlu1 %12667  ;;  %v11012_v42 = vmul.f32 %v10899_v53, %v9952_v28  ;;  %v9954_v63 = vpop.f32.mrb[99].mxu1  ;;  %v16586_v52 = vpack.c.bf16 %v12772_v51, %v23798_v27 }
 0x37c   : > { %v17315_v30 = vpop.permute.xlu0 %17314  ;;  %15983 = vmatmul.mubr.msk.f32.vlgmr.msra.gmra.mrb[132].mxu1 %vm742_vm1, %v23640_v32  ;;  %v11013_v5 = vmul.f32 %v10903_v43, %v9954_v63 }
 0x37d   : > { %v17317_v56 = vunpack.i.h.bf16 %v17315_v30  ;;  %v17316_v15 = vunpack.i.l.bf16 %v17315_v30  ;;  %13300 = vmatprep.mubr.f32.mxu1 %v25653_v62  ;;  %v23857_v46 = vadd.f32 %v11012_v42, %v26030_v11  ;;  %v10023_v23 = vpop.f32.mrb[98].mxu0  ;;  %v26033_v42 = vld [vmem:[#allocation33_spill] sm:$0xff] }
 0x37e   : > { %v23864_v43 = vadd.f32 %v11013_v5, %v26031_v38  ;;  %v10025_v28 = vpop.f32.mrb[99].mxu0  ;;  %v10919_v63 = vrot.slane %v26033_v42, %v23751_v45  ;;  %v11014_v3 = vmul.f32 %v10907_v10, %v10023_v23 }
 0x37f   : > { %v23859_v53 = vpop.permute.xlu1 %12671  ;;  %v12770_v48 = vsel %vm12737_vm8, %v17312_v29, %v17316_v15  ;;  %v23870_v35 = vsel %vm12737_vm8, %v17317_v56, %v17321_v58  ;;  %v23874_v36 = vsel %vm12737_vm8, %v17316_v15, %v17317_v56  ;;  %v26032_v29 = vld [vmem:[#allocation31_spill] sm:$0xff]  ;;  %v11015_v11 = vmul.f32 %v10911_v7, %v10025_v28 }
 0x380   : > { %v12660_v33 = vpop.permute.xlu0 %12659  ;;  %v16584_v1 = vpack.c.bf16 %v12770_v48, %v23794_v31  ;;  %v10915_v30 = vrot.slane %v26032_v29, %v23751_v45  ;;  %v12781_v31 = vsel %vm12737_vm8, %v23761_v44, %v23786_v9  ;;  %v16588_v56 = vpack.c.bf16 %v23870_v35, %v12770_v48 }
 0x381   : > { %v12779_v5 = vsel %vm12737_vm8, %v23786_v9, %v12660_v33  ;;  %v16590_v15 = vpack.c.bf16 %v23874_v36, %v12772_v51  ;;  %v23894_v38 = vadd.f32 %v11014_v3, %v23389_v0  ;;  %v23897_v10 = vadd.f32 %v11015_v11, %v23402_v14  ;;  %v26034_v51 = vld [vmem:[#allocation9_spill] sm:$0xff] }
 0x382   : > { %13169 = vmatprep.subr.mxu0 %v12779_v5  ;;  %16585 = vmatprep.subr.bf16.mxu1 %v16584_v1  ;;  %v10094_v7 = vpop.f32.mrb[100].mxu1  ;;  %v10923_v48 = vrot.slane %v26034_v51, %v23751_v45  ;;  %v26035_v1 = vld [vmem:[#allocation32_spill] sm:$0xff] }
 0x383   : > { %13170 = vmatpush1.msra.mxu0 %v12781_v31  ;;  %16587 = vmatpush1.bf16.msra.mxu1 %v16586_v52  ;;  %v23891_v27 = vpop.permute.xlu1 %17329  ;;  %v11016_v44 = vmul.f32 %v10915_v30, %v10094_v7  ;;  %v10096_v9 = vpop.f32.mrb[101].mxu1  ;;  %v10927_v28 = vrot.slane %v26035_v1, %v23751_v45  ;;  %v17322_v30 = vunpack.i.h.bf16 %v23815_v55  ;;  %v26037_v1 = vld [vmem:[#allocation38_spill] sm:$0xff] }
 0x384   : > { %v12664_v23 = vpop.permute.xlu0 %12663  ;;  %15984 = vmatmul.mubr.msk.f32.vlgmr.msra.gmra.mrb[132].mxu0 %vm742_vm1, %v23640_v32  ;;  %16589 = vmatprep.subr.bf16.mxu0 %v16588_v56  ;;  %v11017_v29 = vmul.f32 %v10919_v63, %v10096_v9  ;;  %v17331_v52 = vunpack.i.l.bf16 %v23891_v27  ;;  %v10931_v56 = vrot.slane %v23422_v24, %v23751_v45 }
 0x385   : > { %v12777_v0 = vsel %vm12737_vm8, %v12660_v33, %v12664_v23  ;;  %16591 = vmatpush1.bf16.msra.mxu0 %v16590_v15  ;;  %v12775_v14 = vsel %vm12737_vm8, %v12664_v23, %v23840_v8  ;;  %13371 = vmatprep.mubr.f32.mxu0 %v25653_v62  ;;  %v23913_v42 = vadd.f32 %v11016_v44, %v23408_v49  ;;  %v26036_v44 = vld [vmem:[#allocation37_spill] sm:$0xff] }
 0x386   : > { %13240 = vmatprep.subr.mxu1 %v12775_v14  ;;  %v23919_v33 = vadd.f32 %v11017_v29, %v23416_v18  ;;  %v10165_v3 = vpop.f32.mrb[100].mxu0  ;;  %v10935_v23 = vrot.slane %v23431_v39, %v23751_v45  ;;  %v12764_v18 = vsel %vm12737_vm8, %v17321_v58, %v17322_v30 }
 0x387   : > { %13241 = vmatpush1.msra.mxu1 %v12777_v0  ;;  %v23916_v5 = vpop.permute.xlu1 %12683  ;;  %v11018_v63 = vmul.f32 %v10923_v48, %v10165_v3  ;;  %v10167_v31 = vpop.f32.mrb[101].mxu0  ;;  %v16594_v29 = vpack.c.bf16 %v12764_v18, %v23874_v36  ;;  %v26038_v36 = vld [vmem:[#allocation35_spill] sm:$0xff] }
 0x388   : > { %v17325_v11 = vpop.permute.xlu0 %17324  ;;  %15985 = vmatmul.mubr.msk.f32.vlgmr.msra.gmra.mrb[134].mxu1 %vm742_vm1, %v23640_v32  ;;  %v11019_v7 = vmul.f32 %v10927_v28, %v10167_v31 }
 0x389   : > { %v17327_v49 = vunpack.i.h.bf16 %v17325_v11  ;;  %v17326_v15 = vunpack.i.l.bf16 %v17325_v11  ;;  %13442 = vmatprep.mubr.f32.mxu1 %v25653_v62  ;;  %v23933_v9 = vadd.f32 %v11018_v63, %v26036_v44  ;;  %v12773_v63 = vsel %vm12737_vm8, %v23840_v8, %v23859_v53 }
 0x38a   : > { %v23940_v28 = vadd.f32 %v11019_v7, %v26037_v1  ;;  %v10236_v0 = vpop.f32.mrb[102].mxu1  ;;  %v26040_v1 = vld [vmem:[#allocation8_spill] sm:$0xff] }
 0x38b   : > { %v12688_v51 = vpop.permute.xlu1 %12687  ;;  %v12762_v24 = vsel %vm12737_vm8, %v17322_v30, %v17326_v15  ;;  %v12758_v48 = vsel %vm12737_vm8, %v17327_v49, %v17331_v52  ;;  %v12760_v39 = vsel %vm12737_vm8, %v17326_v15, %v17327_v49  ;;  %v10238_v14 = vpop.f32.mrb[103].mxu1  ;;  %v11020_v3 = vmul.f32 %v10931_v56, %v10236_v0 }
 0x38c   : > { %v12676_v55 = vpop.permute.xlu0 %12675  ;;  %v16592_v58 = vpack.c.bf16 %v12762_v24, %v23870_v35  ;;  %v11021_v11 = vmul.f32 %v10935_v23, %v10238_v14  ;;  %v16596_v31 = vpack.c.bf16 %v12758_v48, %v12762_v24  ;;  %v16598_v49 = vpack.c.bf16 %v12760_v39, %v12764_v18 }
 0x38d   : > { %v12771_v30 = vsel %vm12737_vm8, %v23859_v53, %v12676_v55  ;;  %v23956_v15 = vadd.f32 %v11020_v3, %v26038_v36  ;;  %v17332_v23 = vunpack.i.h.bf16 %v23891_v27  ;;  %v10943_v0 = vrot.slane %v26040_v1, %v23751_v45  ;;  %v26041_v36 = vld [vmem:[#allocation36_spill] sm:$0xff] }
 0x38e   : > { %13311 = vmatprep.subr.mxu0 %v12771_v30  ;;  %16593 = vmatprep.subr.bf16.mxu1 %v16592_v58  ;;  %v23959_v7 = vadd.f32 %v11021_v11, %v23494_v6  ;;  %v26039_v6 = vld [vmem:[#allocation40_spill] sm:$0xff] }
 0x38f   : > { %13312 = vmatpush1.msra.mxu0 %v12773_v63  ;;  %16595 = vmatpush1.bf16.msra.mxu1 %v16594_v29  ;;  %v23953_v35 = vpop.permute.xlu1 %17339  ;;  %v10939_v18 = vrot.slane %v26039_v6, %v23751_v45  ;;  %v12756_v29 = vsel %vm12737_vm8, %v17331_v52, %v17332_v23  ;;  %v26042_v52 = vld [vmem:[#allocation23_spill] sm:$0xff] }
 0x390   : > { %v12680_v56 = vpop.permute.xlu0 %12679  ;;  %15986 = vmatmul.mubr.msk.f32.vlgmr.msra.gmra.mrb[134].mxu0 %vm742_vm1, %v23640_v32  ;;  %16597 = vmatprep.subr.bf16.mxu0 %v16596_v31  ;;  %v17341_v44 = vunpack.i.l.bf16 %v23953_v35  ;;  %v16602_v1 = vpack.c.bf16 %v12756_v29, %v12760_v39 }
 0x391   : > { %v12769_v8 = vsel %vm12737_vm8, %v12676_v55, %v12680_v56  ;;  %16599 = vmatpush1.bf16.msra.mxu0 %v16598_v49  ;;  %v12767_v53 = vsel %vm12737_vm8, %v12680_v56, %v23916_v5  ;;  %13513 = vmatprep.mubr.f32.mxu0 %v25653_v62  ;;  %v10947_v56 = vrot.slane %v26041_v36, %v23751_v45 }
 0x392   : > { %13382 = vmatprep.subr.mxu1 %v12767_v53 }
 0x393   : > { %13383 = vmatpush1.msra.mxu1 %v12769_v8  ;;  %v23973_v24 = vpop.permute.xlu1 %12699  ;;  %v10307_v27 = vpop.f32.mrb[102].mxu0 }
 0x394   : > { %v17335_v55 = vpop.permute.xlu0 %17334  ;;  %15987 = vmatmul.mubr.msk.f32.vlgmr.msra.gmra.mrb[136].mxu1 %vm742_vm1, %v23640_v32  ;;  %v11022_v30 = vmul.f32 %v10939_v18, %v10307_v27  ;;  %v10309_v3 = vpop.f32.mrb[103].mxu0  ;;  %v10951_v18 = vrot.slane %v26042_v52, %v23751_v45  ;;  %v12765_v27 = vsel %vm12737_vm8, %v23916_v5, %v12688_v51  ;;  %v10959_v52 = vrot.slane %v23523_v47, %v23751_v45 }
 0x395   : > { %v17337_v58 = vunpack.i.h.bf16 %v17335_v55  ;;  %v17336_v14 = vunpack.i.l.bf16 %v17335_v55  ;;  %13584 = vmatprep.mubr.f32.mxu1 %v25653_v62  ;;  %v11023_v49 = vmul.f32 %v10943_v0, %v10309_v3  ;;  %v10963_v47 = vrot.slane %v23558_v37, %v23751_v45  ;;  %v26045_v37 = vld [vmem:[#allocation41_spill] sm:$0xff] }
 0x397   : > { %v12704_v11 = vpop.permute.xlu1 %12703  ;;  %v12754_v63 = vsel %vm12737_vm8, %v17332_v23, %v17336_v14  ;;  %v12750_v31 = vsel %vm12737_vm8, %v17337_v58, %v17341_v44  ;;  %v12752_v8 = vsel %vm12737_vm8, %v17336_v14, %v17337_v58  ;;  %v23995_v23 = vadd.f32 %v11022_v30, %v23518_v59 }
 0x398   : > { %v12692_v53 = vpop.permute.xlu0 %12691  ;;  %v16600_v6 = vpack.c.bf16 %v12754_v63, %v12758_v48  ;;  %v23998_v0 = vadd.f32 %v11023_v49, %v23528_v21  ;;  %v16604_v48 = vpack.c.bf16 %v12750_v31, %v12754_v63  ;;  %v10378_v58 = vpop.f32.mrb[104].mxu1  ;;  %v16606_v14 = vpack.c.bf16 %v12752_v8, %v12756_v29 }
 0x399   : > { %v12763_v55 = vsel %vm12737_vm8, %v12688_v51, %v12692_v53  ;;  %v11024_v3 = vmul.f32 %v10947_v56, %v10378_v58  ;;  %v10380_v36 = vpop.f32.mrb[105].mxu1  ;;  %v17342_v30 = vunpack.i.h.bf16 %v23953_v35  ;;  %v10955_v35 = vrot.slane %v23510_v19, %v23751_v45 }
 0x39a   : > { %13453 = vmatprep.subr.mxu0 %v12763_v55  ;;  %16601 = vmatprep.subr.bf16.mxu1 %v16600_v6  ;;  %v11025_v21 = vmul.f32 %v10951_v18, %v10380_v36  ;;  %v12757_v36 = vsel %vm12737_vm8, %v23973_v24, %v12704_v11 }
 0x39b   : > { %13454 = vmatpush1.msra.mxu0 %v12765_v27  ;;  %16603 = vmatpush1.bf16.msra.mxu1 %v16602_v1  ;;  %v24003_v39 = vpop.permute.xlu1 %17349  ;;  %v24013_v29 = vadd.f32 %v11024_v3, %v23539_v16 }
 0x39c   : > { %v12696_v59 = vpop.permute.xlu0 %12695  ;;  %15988 = vmatmul.mubr.msk.f32.vlgmr.msra.gmra.mrb[136].mxu0 %vm742_vm1, %v23640_v32  ;;  %16605 = vmatprep.subr.bf16.mxu0 %v16604_v48  ;;  %v24018_v63 = vadd.f32 %v11025_v21, %v23553_v34  ;;  %v17351_v49 = vunpack.i.l.bf16 %v24003_v39  ;;  %v12748_v34 = vsel %vm12737_vm8, %v17341_v44, %v17342_v30 }
 0x39d   : > { %v12761_v5 = vsel %vm12737_vm8, %v12692_v53, %v12696_v59  ;;  %16607 = vmatpush1.bf16.msra.mxu0 %v16606_v14  ;;  %v12759_v51 = vsel %vm12737_vm8, %v12696_v59, %v23973_v24  ;;  %13655 = vmatprep.mubr.f32.mxu0 %v25653_v62  ;;  %v16610_v14 = vpack.c.bf16 %v12748_v34, %v12752_v8  ;;  %v26043_v8 = vld [vmem:[#allocation7_spill] sm:$0xff] }
 0x39e   : > { %13524 = vmatprep.subr.mxu1 %v12759_v51 }
 0x39f   : > { %13525 = vmatpush1.msra.mxu1 %v12761_v5  ;;  %v24021_v56 = vpop.permute.xlu1 %12715 }
 0x3a0   : > { %v17345_v53 = vpop.permute.xlu0 %17344  ;;  %15989 = vmatmul.mubr.msk.f32.vlgmr.msra.gmra.mrb[138].mxu1 %vm742_vm1, %v23640_v32 }
 0x3a1   : > { %v17347_v6 = vunpack.i.h.bf16 %v17345_v53  ;;  %v17346_v16 = vunpack.i.l.bf16 %v17345_v53  ;;  %13726 = vmatprep.mubr.f32.mxu1 %v25653_v62 }
 0x3a3   : > { %v12746_v18 = vsel %vm12737_vm8, %v17342_v30, %v17346_v16  ;;  %v12741_v1 = vsel %vm12737_vm8, %v17347_v6, %v17351_v49  ;;  %v12744_v55 = vsel %vm12737_vm8, %v17346_v16, %v17347_v6  ;;  %v10449_v58 = vpop.f32.mrb[104].mxu0  ;;  %v12720_v59 = vpop.permute.xlu1 %12719  ;;  %v26044_v30 = vld [vmem:[#allocation16_spill] sm:$0xff] }
 0x3a4   : > { %v12708_v27 = vpop.permute.xlu0 %12707  ;;  %v16608_v48 = vpack.c.bf16 %v12746_v18, %v12750_v31  ;;  %v11026_v44 = vmul.f32 %v10955_v35, %v10449_v58  ;;  %v10451_v3 = vpop.f32.mrb[105].mxu0  ;;  %v16612_v21 = vpack.c.bf16 %v12741_v1, %v12746_v18  ;;  %v16614_v31 = vpack.c.bf16 %v12744_v55, %v12748_v34 }
 0x3a5   : > { %v12755_v19 = vsel %vm12737_vm8, %v12704_v11, %v12708_v27  ;;  %v11027_v5 = vmul.f32 %v10959_v52, %v10451_v3  ;;  %v10967_v53 = vrot.slane %v26044_v30, %v23751_v45  ;;  %v17352_v34 = vunpack.i.h.bf16 %v24003_v39  ;;  %v26047_v39 = vld [vmem:[#allocation43_spill] sm:$0xff] }
 0x3a6   : > { %13595 = vmatprep.subr.mxu0 %v12755_v19  ;;  %16609 = vmatprep.subr.bf16.mxu1 %v16608_v48  ;;  %v24046_v51 = vadd.f32 %v11026_v44, %v26043_v8  ;;  %v26046_v19 = vld [vmem:[#allocation42_spill] sm:$0xff]  ;;  %v26049_v30 = vld [vmem:[#allocation19_spill] sm:$0xff] }
 0x3a7   : > { %13596 = vmatpush1.msra.mxu0 %v12757_v36  ;;  %16611 = vmatpush1.bf16.msra.mxu1 %v16610_v14  ;;  %v24053_v24 = vadd.f32 %v11027_v5, %v26045_v37  ;;  %v12734_v58 = vpop.permute.xlu1 %12733  ;;  %v12738_v14 = vsel %vm12737_vm8, %v17351_v49, %v17352_v34 }
 0x3a8   : > { %v12712_v6 = vpop.permute.xlu0 %12711  ;;  %15990 = vmatmul.mubr.msk.f32.vlgmr.msra.gmra.mrb[138].mxu0 %vm742_vm1, %v23640_v32  ;;  %16613 = vmatprep.subr.bf16.mxu0 %v16612_v21  ;;  %v10520_v35 = vpop.f32.mrb[106].mxu1  ;;  %v26048_v21 = vld [vmem:[#allocation15_spill] sm:$0xff]  ;;  %v16618_v5 = vpack.c.bf16 %v12738_v14, %v12744_v55 }
 0x3a9   : > { %v12753_v11 = vsel %vm12737_vm8, %v12708_v27, %v12712_v6  ;;  %16615 = vmatpush1.bf16.msra.mxu0 %v16614_v31  ;;  %v12751_v16 = vsel %vm12737_vm8, %v12712_v6, %v24021_v56  ;;  %13797 = vmatprep.mubr.f32.mxu0 %v25653_v62  ;;  %v11028_v52 = vmul.f32 %v10963_v47, %v10520_v35  ;;  %v10522_v18 = vpop.f32.mrb[107].mxu1  ;;  %v26050_v6 = vld [vmem:[#allocation5_spill] sm:$0xff] }
 0x3aa   : > { %13666 = vmatprep.subr.mxu1 %v12751_v16  ;;  %v11029_v48 = vmul.f32 %v10967_v53, %v10522_v18  ;;  %v12803_v49 = vsel %vm12737_vm8, %v12734_v58, %v26048_v21  ;;  %v10971_v53 = vrot.slane %v26049_v30, %v23751_v45  ;;  %v26051_v37 = vunpack.i.l.bf16 %v26050_v6  ;;  %v26052_v16 = vld [vmem:[#allocation4_spill] sm:$0xff]  ;;  %v26054_v21 = vld [vmem:[#allocation14_spill] sm:$0xff] }
 0x3ab   : > { %13667 = vmatpush1.msra.mxu1 %v12753_v11  ;;  %v24067_v44 = vadd.f32 %v11028_v52, %v26046_v19  ;;  %v10975_v55 = vrot.slane %v26052_v16, %v23751_v45  ;;  %v12749_v35 = vsel %vm12737_vm8, %v24021_v56, %v12720_v59  ;;  %v12732_v18 = vpop.permute.xlu1 %12731  ;;  %v17596_v30 = vld [vmem:[%s17744_s17 + $0x8] sm:$0xff] }
 0x3ac   : > { %v12730_v27 = vpop.permute.xlu0 %12729  ;;  %15991 = vmatmul.mubr.msk.f32.vlgmr.msra.gmra.mrb[140].mxu1 %vm742_vm1, %v23640_v32  ;;  %v24072_v36 = vadd.f32 %v11029_v48, %v26047_v39  ;;  %v12802_v11 = vsel %vm12737_vm8, %v17352_v34, %v26051_v37 }
 0x3ad   : > { %v12742_v3 = vsel %vm12737_vm8, %v17352_v34, %v12730_v27  ;;  %13868 = vmatprep.mubr.f32.mxu1 %v25653_v62  ;;  %v12739_v31 = vsel %vm12737_vm8, %v12730_v27, %v12734_v58  ;;  %v16620_v52 = vpack.c.bf16 %v12803_v49, %v12802_v11  ;;  %v10983_v49 = vrot.slane %v26054_v21, %v23751_v45 }
 0x3ae   : > { %v16616_v47 = vpack.c.bf16 %v12742_v3, %v12741_v1  ;;  %v16622_v48 = vpack.c.bf16 %v12739_v31, %v12738_v14  ;;  %v26053_v3 = vld [vmem:[#allocation29_spill] sm:$0xff] }
 0x3af   : > { %v10979_v39 = vrot.slane %v26053_v3, %v23751_v45  ;;  %v26057_v3 = vld [vmem:[#allocation45_spill] sm:$0xff] }
 0x3b0   : > { %v12724_v8 = vpop.permute.xlu0 %12723  ;;  %16617 = vmatprep.subr.bf16.mxu1 %v16616_v47 }
 0x3b1   : > { %16619 = vmatpush1.bf16.msra.mxu1 %v16618_v5  ;;  %v12747_v1 = vsel %vm12737_vm8, %v12720_v59, %v12724_v8  ;;  %v10591_v58 = vpop.f32.mrb[106].mxu0 }
 0x3b2   : > { %13737 = vmatprep.subr.mxu0 %v12747_v1  ;;  %v11030_v34 = vmul.f32 %v10971_v53, %v10591_v58  ;;  %v10593_v19 = vpop.f32.mrb[107].mxu0  ;;  %v17598_v1 = vld [vmem:[%s17744_s17 + $0x28] sm:$0xff] }
 0x3b3   : > { %13738 = vmatpush1.msra.mxu0 %v12749_v35  ;;  %v11031_v14 = vmul.f32 %v10975_v55, %v10593_v19  ;;  %v17600_v55 = vld [vmem:[%s17744_s17 + $0x10] sm:$0xff]  ;;  %v17601_v35 = vld [vmem:[%s17744_s17 + $0x38] sm:$0xff] }
 0x3b4   : > { %v12728_v27 = vpop.permute.xlu0 %12727  ;;  %15992 = vmatmul.mubr.msk.f32.vlgmr.msra.gmra.mrb[140].mxu0 %vm742_vm1, %v23640_v32  ;;  %16621 = vmatprep.subr.bf16.mxu0 %v16620_v52  ;;  %v24103_v47 = vadd.f32 %v11030_v34, %v23656_v20  ;;  %v26055_v52 = vld [vmem:[#allocation30_spill] sm:$0xff] }
 0x3b5   : > { %v12745_v56 = vsel %vm12737_vm8, %v12724_v8, %v12728_v27  ;;  %16623 = vmatpush1.bf16.msra.mxu0 %v16622_v48  ;;  %v12743_v59 = vsel %vm12737_vm8, %v12728_v27, %v12732_v18  ;;  %13939 = vmatprep.mubr.f32.mxu0 %v25653_v62  ;;  %v24108_v5 = vadd.f32 %v11031_v14, %v23662_v50  ;;  %v17597_v50 = vld [vmem:[%s17744_s17] sm:$0xff]  ;;  %v26059_v14 = vld [vmem:[#allocation46_spill] sm:$0xff] }
 0x3b6   : > { %13808 = vmatprep.subr.mxu1 %v12743_v59  ;;  %v10999_v21 = vrot.slane %v26059_v14, %v23751_v45 }
 0x3b7   : > { %13809 = vmatpush1.msra.mxu1 %v12745_v56  ;;  %v10662_v8 = vpop.f32.mrb[108].mxu1  ;;  %v26058_v56 = vld [vmem:[#allocation25_spill] sm:$0xff] }
 0x3b8   : > { %v12736_v31 = vpop.permute.xlu0 %12735  ;;  %15993 = vmatmul.mubr.msk.f32.vlgmr.msra.gmra.mrb[142].mxu1 %vm742_vm1, %v23640_v32  ;;  %14531 = vmatprep.subr.mxu1 %v17596_v30  ;;  %v11032_v6 = vmul.f32 %v10979_v39, %v10662_v8  ;;  %v10664_v37 = vpop.f32.mrb[109].mxu1  ;;  %v10995_v39 = vrot.slane %v26057_v3, %v23751_v45  ;;  %v11003_v59 = vrot.slane %v26058_v56, %v23751_v45 }
 0x3b9   : > { %v12740_v20 = vsel %vm12737_vm8, %v12732_v18, %v12736_v31  ;;  %v12804_v53 = vsel %vm12737_vm8, %v12736_v31, %v23536_v57  ;;  %14532 = vmatpush1.msra.mxu1 %v17597_v50  ;;  %14595 = vmatprep.mubr.f32.mxu1 %v25653_v62  ;;  %v11033_v11 = vmul.f32 %v10983_v49, %v10664_v37  ;;  %v17599_v57 = vld [vmem:[%s17744_s17 + $0x18] sm:$0xff] }
 0x3ba   : > { %13879 = vmatprep.subr.mxu0 %v12804_v53  ;;  %14673 = vmatprep.subr.mxu1 %v17598_v1  ;;  %v24122_v16 = vadd.f32 %v11032_v6, %v23682_v4  ;;  %v10987_v18 = vrot.slane %v26055_v52, %v23751_v45  ;;  %v26056_v4 = vld [vmem:[#allocation24_spill] sm:$0xff]  ;;  %v26060_v49 = vld [vmem:[#allocation34_spill] sm:$0xff] }
 0x3bb   : > { %13880 = vmatpush1.msra.mxu0 %v12740_v20  ;;  %v24127_v61 = vadd.f32 %v11033_v11, %v23687_v17  ;;  %v10991_v48 = vrot.slane %v26056_v4, %v23751_v45  ;;  %v11007_v31 = vrot.slane %v26060_v49, %v23751_v45  ;;  %v26061_v45 = vld [vmem:[#allocation6_spill] sm:$0xff] }
 0x3bc   : > { %15994 = vmatmul.mubr.msk.f32.vlgmr.msra.gmra.mrb[142].mxu0 %vm742_vm1, %v23640_v32  ;;  %14602 = vmatprep.subr.mxu0 %v17599_v57 }
 0x3bd   : > { %14603 = vmatpush1.msra.mxu0 %v17600_v55  ;;  %14666 = vmatprep.mubr.f32.mxu0 %v25653_v62  ;;  %v24164_v55 = vsub.s32 7, %v26061_v45 }
 0x3be   : > { %14744 = vmatprep.subr.mxu0 %v17601_v35  ;;  %v17602_v35 = vld [vmem:[%s25518_s3] sm:$0xff] }
 0x3c1   : > { %v10733_v58 = vpop.f32.mrb[108].mxu0 }
 0x3c2   : > { %v11034_v27 = vmul.f32 %v10987_v18, %v10733_v58  ;;  %v10735_v32 = vpop.f32.mrb[109].mxu0  ;;  %v12416_v18 = vrot.slane %v17602_v35, %v24164_v55 }
 0x3c3   : > { %v11035_v34 = vmul.f32 %v10991_v48, %v10735_v32  ;;  %v17604_v32 = vld [vmem:[%s25518_s3 + $0x10] sm:$0xff] }
 0x3c4   : > { %v24138_v17 = vadd.f32 %v11034_v27, %v23718_v60 }
 0x3c5   : > { %v24141_v19 = vadd.f32 %v11035_v34, %v23728_v40  ;;  %v12424_v34 = vrot.slane %v17604_v32, %v24164_v55 }
 0x3c7   : > { %v10804_v8 = vpop.f32.mrb[110].mxu1 }
 0x3c8   : > { %v10875_v30 = vpop.f32.mrb[110].mxu0  ;;  %v11036_v20 = vmul.f32 %v10995_v39, %v10804_v8  ;;  %v10806_v53 = vpop.f32.mrb[111].mxu1 }
 0x3c9   : > { %v11038_v60 = vmul.f32 %v11003_v59, %v10875_v30  ;;  %v10877_v6 = vpop.f32.mrb[111].mxu0  ;;  %v11037_v40 = vmul.f32 %v10999_v21, %v10806_v53  ;;  %v17605_v59 = vld [vmem:[%s25518_s3 + $0x18] sm:$0xff] }
 0x3ca   : > { %v11039_v37 = vmul.f32 %v11007_v31, %v10877_v6  ;;  %v24152_v50 = vadd.f32 %v11036_v20, %v23764_v41  ;;  %v17603_v41 = vld [vmem:[%s25518_s3 + $0x8] sm:$0xff]  ;;  %v12428_v21 = vrot.slane %v17605_v59, %v24164_v55 }
 0x3cb   : > { %v24155_v11 = vadd.f32 %v11038_v60, %v23769_v25  ;;  %v24158_v1 = vadd.f32 %v11037_v40, %v23772_v54  ;;  %v12420_v25 = vrot.slane %v17603_v41, %v24164_v55 }
 0x3cc   : > { %v24161_v57 = vadd.f32 %v11039_v37, %v23781_v13 }
 0x3d7   : > { %v11343_v54 = vpop.f32.mrb[112].mxu1 }
 0x3d8   : > { %v12541_v48 = vmul.f32 %v12416_v18, %v11343_v54  ;;  %v11345_v58 = vpop.f32.mrb[113].mxu1  ;;  %v17608_v54 = vld [vmem:[%s25518_s3 + $0x30] sm:$0xff] }
 0x3d9   : > { %v12542_v13 = vmul.f32 %v12420_v25, %v11345_v58 }
 0x3da   : > { %v24175_v27 = vadd.f32 %v12541_v48, %v23818_v2  ;;  %v17606_v2 = vld [vmem:[%s25518_s3 + $0x20] sm:$0xff] }
 0x3db   : > { %v24182_v39 = vadd.f32 %v12542_v13, %v23825_v26  ;;  %v12432_v20 = vrot.slane %v17606_v2, %v24164_v55  ;;  %v17607_v26 = vld [vmem:[%s25518_s3 + $0x28] sm:$0xff] }
 0x3dc   : > { %v11414_v31 = vpop.f32.mrb[112].mxu0  ;;  %v12436_v53 = vrot.slane %v17607_v26, %v24164_v55 }
 0x3dd   : > { %v12543_v8 = vmul.f32 %v12424_v34, %v11414_v31  ;;  %v11416_v30 = vpop.f32.mrb[113].mxu0 }
 0x3de   : > { %v12544_v60 = vmul.f32 %v12428_v21, %v11416_v30  ;;  %v17611_v21 = vld [vmem:[%s25518_s3 + $0x48] sm:$0xff] }
 0x3df   : > { %v24197_v6 = vadd.f32 %v12543_v8, %v23837_v12  ;;  %v12440_v12 = vrot.slane %v17608_v54, %v24164_v55  ;;  %v12452_v31 = vrot.slane %v17611_v21, %v24164_v55 }
 0x3e0   : > { %v24200_v40 = vadd.f32 %v12544_v60, %v23843_v22  ;;  %v11485_v37 = vpop.f32.mrb[114].mxu1  ;;  %v17609_v22 = vld [vmem:[%s25518_s3 + $0x38] sm:$0xff] }
 0x3e1   : > { %v12545_v45 = vmul.f32 %v12432_v20, %v11485_v37  ;;  %v11487_v35 = vpop.f32.mrb[115].mxu1  ;;  %v12444_v48 = vrot.slane %v17609_v22, %v24164_v55 }
 0x3e2   : > { %v12546_v18 = vmul.f32 %v12436_v53, %v11487_v35 }
 0x3e3   : > { %v24203_v41 = vadd.f32 %v12545_v45, %v23857_v46 }
 0x3e4   : > { %v24206_v25 = vadd.f32 %v12546_v18, %v23864_v43  ;;  %v17610_v43 = vld [vmem:[%s25518_s3 + $0x40] sm:$0xff] }
 0x3e5   : > { %v12448_v34 = vrot.slane %v17610_v43, %v24164_v55 }
 0x3e9   : > { %v11556_v58 = vpop.f32.mrb[114].mxu0 }
 0x3ea   : > { %v12547_v13 = vmul.f32 %v12440_v12, %v11556_v58  ;;  %v11558_v32 = vpop.f32.mrb[115].mxu0 }
 0x3eb   : > { %v12548_v46 = vmul.f32 %v12444_v48, %v11558_v32  ;;  %v17615_v48 = vld [vmem:[%s25518_s3 + $0x68] sm:$0xff] }
 0x3ec   : > { %v24221_v59 = vadd.f32 %v12547_v13, %v23894_v38  ;;  %v17612_v38 = vld [vmem:[%s25518_s3 + $0x50] sm:$0xff]  ;;  %v12468_v58 = vrot.slane %v17615_v48, %v24164_v55 }
 0x3ed   : > { %v24228_v8 = vadd.f32 %v12548_v46, %v23897_v10  ;;  %v12456_v37 = vrot.slane %v17612_v38, %v24164_v55  ;;  %v17613_v10 = vld [vmem:[%s25518_s3 + $0x58] sm:$0xff] }
 0x3ee   : > { %v11627_v30 = vpop.f32.mrb[116].mxu1  ;;  %v12460_v45 = vrot.slane %v17613_v10, %v24164_v55 }
 0x3ef   : > { %v12549_v2 = vmul.f32 %v12448_v34, %v11627_v30  ;;  %v11629_v20 = vpop.f32.mrb[117].mxu1 }
 0x3f0   : > { %v12550_v60 = vmul.f32 %v12452_v31, %v11629_v20 }
 0x3f1   : > { %v24231_v26 = vadd.f32 %v12549_v2, %v23913_v42 }
 0x3f2   : > { %v24234_v53 = vadd.f32 %v12550_v60, %v23919_v33  ;;  %v17614_v33 = vld [vmem:[%s25518_s3 + $0x60] sm:$0xff] }
 0x3f3   : > { %v12464_v12 = vrot.slane %v17614_v33, %v24164_v55 }
 0x3f6   : > { %v11698_v35 = vpop.f32.mrb[116].mxu0 }
 0x3f7   : > { %v12551_v18 = vmul.f32 %v12456_v37, %v11698_v35  ;;  %v11700_v54 = vpop.f32.mrb[117].mxu0 }
 0x3f8   : > { %v12552_v42 = vmul.f32 %v12460_v45, %v11700_v54  ;;  %v17619_v45 = vld [vmem:[%s25518_s3 + $0x88] sm:$0xff] }
 0x3f9   : > { %v24249_v22 = vadd.f32 %v12551_v18, %v23933_v9  ;;  %v17616_v9 = vld [vmem:[%s25518_s3 + $0x70] sm:$0xff]  ;;  %v12484_v35 = vrot.slane %v17619_v45, %v24164_v55 }
 0x3fa   : > { %v24256_v13 = vadd.f32 %v12552_v42, %v23940_v28  ;;  %v12472_v30 = vrot.slane %v17616_v9, %v24164_v55  ;;  %v17617_v28 = vld [vmem:[%s25518_s3 + $0x78] sm:$0xff] }
 0x3fb   : > { %v11769_v32 = vpop.f32.mrb[118].mxu1  ;;  %v12476_v2 = vrot.slane %v17617_v28, %v24164_v55 }
 0x3fc   : > { %v12553_v46 = vmul.f32 %v12464_v12, %v11769_v32  ;;  %v11771_v43 = vpop.f32.mrb[119].mxu1 }
 0x3fd   : > { %v12554_v34 = vmul.f32 %v12468_v58, %v11771_v43 }
 0x3fe   : > { %v24259_v21 = vadd.f32 %v12553_v46, %v23956_v15 }
 0x3ff   : > { %v24262_v31 = vadd.f32 %v12554_v34, %v23959_v7  ;;  %v17618_v7 = vld [vmem:[%s25518_s3 + $0x80] sm:$0xff] }
 0x400   : > { %v12480_v37 = vrot.slane %v17618_v7, %v24164_v55 }
 0x402   : > { %v11840_v20 = vpop.f32.mrb[118].mxu0 }
 0x403   : > { %v12555_v60 = vmul.f32 %v12472_v30, %v11840_v20  ;;  %v11842_v38 = vpop.f32.mrb[119].mxu0 }
 0x404   : > { %v12556_v15 = vmul.f32 %v12476_v2, %v11842_v38  ;;  %v17623_v2 = vld [vmem:[%s25518_s3 + $0xa8] sm:$0xff] }
 0x405   : > { %v24277_v10 = vadd.f32 %v12555_v60, %v23995_v23  ;;  %v17620_v23 = vld [vmem:[%s25518_s3 + $0x90] sm:$0xff]  ;;  %v12500_v20 = vrot.slane %v17623_v2, %v24164_v55 }
 0x406   : > { %v24284_v18 = vadd.f32 %v12556_v15, %v23998_v0  ;;  %v11911_v54 = vpop.f32.mrb[120].mxu1  ;;  %v12488_v32 = vrot.slane %v17620_v23, %v24164_v55  ;;  %v17621_v0 = vld [vmem:[%s25518_s3 + $0x98] sm:$0xff] }
 0x407   : > { %v12557_v42 = vmul.f32 %v12480_v37, %v11911_v54  ;;  %v11913_v33 = vpop.f32.mrb[121].mxu1  ;;  %v12492_v46 = vrot.slane %v17621_v0, %v24164_v55 }
 0x408   : > { %v12558_v12 = vmul.f32 %v12484_v35, %v11913_v33 }
 0x409   : > { %v24287_v48 = vadd.f32 %v12557_v42, %v24013_v29 }
 0x40a   : > { %v24290_v58 = vadd.f32 %v12558_v12, %v24018_v63  ;;  %v17622_v63 = vld [vmem:[%s25518_s3 + $0xa0] sm:$0xff] }
 0x40b   : > { %v12496_v30 = vrot.slane %v17622_v63, %v24164_v55 }
 0x40e   : > { %v11982_v43 = vpop.f32.mrb[120].mxu0 }
 0x40f   : > { %v12559_v34 = vmul.f32 %v12488_v32, %v11982_v43  ;;  %v11984_v9 = vpop.f32.mrb[121].mxu0 }
 0x410   : > { %v12560_v29 = vmul.f32 %v12492_v46, %v11984_v9  ;;  %v17627_v46 = vld [vmem:[%s25518_s3 + $0xc8] sm:$0xff] }
 0x411   : > { %v24305_v28 = vadd.f32 %v12559_v34, %v24046_v51  ;;  %v17624_v51 = vld [vmem:[%s25518_s3 + $0xb0] sm:$0xff]  ;;  %v12516_v43 = vrot.slane %v17627_v46, %v24164_v55 }
 0x412   : > { %v24312_v60 = vadd.f32 %v12560_v29, %v24053_v24  ;;  %v12053_v38 = vpop.f32.mrb[122].mxu1  ;;  %v12504_v54 = vrot.slane %v17624_v51, %v24164_v55  ;;  %v17625_v24 = vld [vmem:[%s25518_s3 + $0xb8] sm:$0xff] }
 0x413   : > { %v12561_v15 = vmul.f32 %v12496_v30, %v12053_v38  ;;  %v12055_v7 = vpop.f32.mrb[123].mxu1  ;;  %v12508_v42 = vrot.slane %v17625_v24, %v24164_v55  ;;  %v12524_v38 = vrot.slane %v26056_v4, %v24164_v55  ;;  %v12540_v4 = vrot.slane %v26060_v49, %v24164_v55  ;;  %v15995_v49 = vld [vmem:[%s25518_s3 + $0x100] ss:$0 sm:$0xff] }
 0x414   : > { %v12562_v37 = vmul.f32 %v12500_v20, %v12055_v7 }
 0x415   : > { %v24315_v45 = vadd.f32 %v12561_v15, %v24067_v44 }
 0x416   : > { %v24318_v35 = vadd.f32 %v12562_v37, %v24072_v36  ;;  %v17626_v36 = vld [vmem:[%s25518_s3 + $0xc0] sm:$0xff] }
 0x417   : > { %v12512_v32 = vrot.slane %v17626_v36, %v24164_v55 }
 0x41a   : > { %v12124_v33 = vpop.f32.mrb[122].mxu0 }
 0x41b   : > { %v12563_v12 = vmul.f32 %v12504_v54, %v12124_v33  ;;  %v12126_v23 = vpop.f32.mrb[123].mxu0 }
 0x41c   : > { %v12564_v44 = vmul.f32 %v12508_v42, %v12126_v23 }
 0x41d   : > { %v24333_v0 = vadd.f32 %v12563_v12, %v24103_v47  ;;  %v12520_v47 = vrot.slane %v26055_v52, %v24164_v55  ;;  %v12532_v52 = vrot.slane %v26059_v14, %v24164_v55 }
 0x41e   : > { %v24340_v34 = vadd.f32 %v12564_v44, %v24108_v5 }
 0x41f   : > { %v12195_v9 = vpop.f32.mrb[124].mxu1 }
 0x420   : > { %v12565_v29 = vmul.f32 %v12512_v32, %v12195_v9  ;;  %v12197_v63 = vpop.f32.mrb[125].mxu1  ;;  %v15998_v9 = vld [vmem:[%s25518_s3 + $0x118] ss:$0 sm:$0xff] }
 0x421   : > { %v12566_v30 = vmul.f32 %v12516_v43, %v12197_v63 }
 0x422   : > { %v24343_v2 = vadd.f32 %v12565_v29, %v24122_v16  ;;  %v12528_v16 = vrot.slane %v26057_v3, %v24164_v55 }
 0x423   : > { %v24346_v20 = vadd.f32 %v12566_v30, %v24127_v61  ;;  %v12536_v61 = vrot.slane %v26058_v56, %v24164_v55  ;;  %v15996_v55 = vld [vmem:[%s25518_s3 + $0x108] ss:$0 sm:$0xff] }
 0x426   : > { %v12266_v15 = vpop.f32.mrb[124].mxu0 }
 0x427   : > { %v12567_v7 = vmul.f32 %v12520_v47, %v12266_v15  ;;  %v12268_v5 = vpop.f32.mrb[125].mxu0  ;;  %v15999_v15 = vld [vmem:[%s25518_s3 + $0x120] ss:$0 sm:$0xff] }
 0x428   : > { %v12568_v37 = vmul.f32 %v12524_v38, %v12268_v5 }
 0x429   : > { %v24353_v51 = vadd.f32 %v12567_v7, %v24138_v17 }
 0x42a   : > { %v24358_v54 = vadd.f32 %v12568_v37, %v24141_v19  ;;  %v16000_v37 = vld [vmem:[%s25518_s3 + $0x128] ss:$0 sm:$0xff] }
 0x42d   : > { %v12337_v24 = vpop.f32.mrb[126].mxu1 }
 0x42e   : > { %v12569_v42 = vmul.f32 %v12528_v16, %v12337_v24  ;;  %v12339_v17 = vpop.f32.mrb[127].mxu1 }
 0x42f   : > { %v12570_v23 = vmul.f32 %v12532_v52, %v12339_v17 }
 0x430   : > { %v12408_v33 = vpop.f32.mrb[126].mxu0  ;;  %v24367_v3 = vadd.f32 %v12569_v42, %v24152_v50 }
 0x431   : > { %v12571_v12 = vmul.f32 %v12536_v61, %v12408_v33  ;;  %v12410_v44 = vpop.f32.mrb[127].mxu0  ;;  %v24373_v56 = vadd.f32 %v12570_v23, %v24158_v1  ;;  %v16001_v23 = vld [vmem:[%s25518_s3 + $0x130] ss:$0 sm:$0xff] }
 0x432   : > { %v12572_v19 = vmul.f32 %v12540_v4, %v12410_v44  ;;  %v16002_v44 = vld [vmem:[%s25518_s3 + $0x138] ss:$0 sm:$0xff] }
 0x433   : > { %v24370_v36 = vadd.f32 %v12571_v12, %v24155_v11 }
 0x434   : > { %v24376_v14 = vadd.f32 %v12572_v19, %v24161_v57  ;;  %v15997_v57 = vld [vmem:[%s25518_s3 + $0x110] ss:$0 sm:$0xff] }
 0x437   : > { %v12876_v50 = vpop.f32.mrb[128].mxu1 }
 0x438   : > { %v14074_v32 = vmul.f32 %v15995_v49, %v12876_v50  ;;  %v12878_v46 = vpop.f32.mrb[129].mxu1 }
 0x439   : > { %v14075_v43 = vmul.f32 %v15996_v55, %v12878_v46 }
 0x43a   : > { %v24385_v11 = vadd.f32 %v14074_v32, %v24175_v27  ;;  %v16003_v32 = vld [vmem:[%s25518_s3 + $0x140] ss:$0 sm:$0xff] }
 0x43b   : > { %v24388_v1 = vadd.f32 %v14075_v43, %v24182_v39  ;;  %v16004_v43 = vld [vmem:[%s25518_s3 + $0x148] ss:$0 sm:$0xff] }
 0x43c   : > { %v14139_v63 = vsel %vm14138_vm9, %v24385_v11, 0.0 }
 0x43d   : > { %v14140_v27 = vsel %vm14138_vm9, %v24388_v1, 0.0 }
 0x43e   : > { %v14141_v7 = vadd.f32 %v14140_v27, %v14139_v63 }
 0x43f   : > { %v12947_v29 = vpop.f32.mrb[128].mxu0 }
 0x440   : > { %v14076_v30 = vmul.f32 %v15997_v57, %v12947_v29  ;;  %v12949_v47 = vpop.f32.mrb[129].mxu0 }
 0x441   : > { %v14077_v39 = vmul.f32 %v15998_v9, %v12949_v47 }
 0x442   : > { %v24401_v38 = vadd.f32 %v14076_v30, %v24197_v6 }
 0x443   : > { %v24407_v5 = vadd.f32 %v14077_v39, %v24200_v40  ;;  %v13018_v61 = vpop.f32.mrb[130].mxu1 }
 0x444   : > { %v14142_v16 = vsel %vm14138_vm9, %v24401_v38, 0.0  ;;  %v14078_v4 = vmul.f32 %v15999_v15, %v13018_v61  ;;  %v13020_v24 = vpop.f32.mrb[131].mxu1  ;;  %v16006_v61 = vld [vmem:[%s25518_s3 + $0x158] ss:$0 sm:$0xff] }
 0x445   : > { %v14143_v52 = vadd.f32 %v14142_v16, %v14141_v7  ;;  %v14144_v6 = vsel %vm14138_vm9, %v24407_v5, 0.0  ;;  %v14079_v42 = vmul.f32 %v16000_v37, %v13020_v24  ;;  %v16005_v16 = vld [vmem:[%s25518_s3 + $0x150] ss:$0 sm:$0xff] }
 0x446   : > { %v24417_v17 = vadd.f32 %v14078_v4, %v24203_v41 }
 0x447   : > { %v14145_v33 = vadd.f32 %v14144_v6, %v14143_v52  ;;  %v24420_v40 = vadd.f32 %v14079_v42, %v24206_v25  ;;  %v16007_v42 = vld [vmem:[%s25518_s3 + $0x160] ss:$0 sm:$0xff] }
 0x448   : > { %v14146_v12 = vsel %vm14138_vm9, %v24417_v17, 0.0 }
 0x449   : > { %v14147_v19 = vadd.f32 %v14146_v12, %v14145_v33  ;;  %v14148_v41 = vsel %vm14138_vm9, %v24420_v40, 0.0  ;;  %v16008_v12 = vld [vmem:[%s25518_s3 + $0x168] ss:$0 sm:$0xff] }
 0x44b   : > { %v13089_v49 = vpop.f32.mrb[130].mxu0  ;;  %v14149_v57 = vadd.f32 %v14148_v41, %v14147_v19 }
 0x44c   : > { %v14080_v55 = vmul.f32 %v16001_v23, %v13089_v49  ;;  %v13091_v50 = vpop.f32.mrb[131].mxu0 }
 0x44d   : > { %v14081_v25 = vmul.f32 %v16002_v44, %v13091_v50 }
 0x44e   : > { %v24436_v46 = vadd.f32 %v14080_v55, %v24221_v59 }
 0x44f   : > { %v24442_v9 = vadd.f32 %v14081_v25, %v24228_v8  ;;  %v13160_v29 = vpop.f32.mrb[132].mxu1 }
 0x450   : > { %v14150_v63 = vsel %vm14138_vm9, %v24436_v46, 0.0  ;;  %v14082_v27 = vmul.f32 %v16003_v32, %v13160_v29  ;;  %v13162_v30 = vpop.f32.mrb[133].mxu1  ;;  %v16009_v29 = vld [vmem:[%s25518_s3 + $0x170] ss:$0 sm:$0xff] }
 0x451   : > { %v14151_v47 = vadd.f32 %v14150_v63, %v14149_v57  ;;  %v14152_v39 = vsel %vm14138_vm9, %v24442_v9, 0.0  ;;  %v14083_v59 = vmul.f32 %v16004_v43, %v13162_v30  ;;  %v16010_v63 = vld [vmem:[%s25518_s3 + $0x178] ss:$0 sm:$0xff] }
 0x452   : > { %v24449_v15 = vadd.f32 %v14082_v27, %v24231_v26 }
 0x453   : > { %v14153_v7 = vadd.f32 %v14152_v39, %v14151_v47  ;;  %v24452_v37 = vadd.f32 %v14083_v59, %v24234_v53  ;;  %v16011_v59 = vld [vmem:[%s25518_s3 + $0x180] ss:$0 sm:$0xff] }
 0x454   : > { %v14154_v8 = vsel %vm14138_vm9, %v24449_v15, 0.0 }
 0x455   : > { %v14155_v52 = vadd.f32 %v14154_v8, %v14153_v7  ;;  %v14156_v26 = vsel %vm14138_vm9, %v24452_v37, 0.0  ;;  %v16012_v8 = vld [vmem:[%s25518_s3 + $0x188] ss:$0 sm:$0xff] }
 0x457   : > { %v13231_v6 = vpop.f32.mrb[132].mxu0  ;;  %v14157_v23 = vadd.f32 %v14156_v26, %v14155_v52 }
 0x458   : > { %v14084_v4 = vmul.f32 %v16005_v16, %v13231_v6  ;;  %v13233_v24 = vpop.f32.mrb[133].mxu0 }
 0x459   : > { %v14085_v53 = vmul.f32 %v16006_v61, %v13233_v24 }
 0x45a   : > { %v24468_v33 = vadd.f32 %v14084_v4, %v24249_v22 }
 0x45b   : > { %v24474_v44 = vadd.f32 %v14085_v53, %v24256_v13  ;;  %v13302_v19 = vpop.f32.mrb[134].mxu1 }
 0x45c   : > { %v14158_v49 = vsel %vm14138_vm9, %v24468_v33, 0.0  ;;  %v14086_v41 = vmul.f32 %v16007_v42, %v13302_v19  ;;  %v13304_v55 = vpop.f32.mrb[135].mxu1  ;;  %v16013_v19 = vld [vmem:[%s25518_s3 + $0x190] ss:$0 sm:$0xff] }
 0x45d   : > { %v14159_v50 = vadd.f32 %v14158_v49, %v14157_v23  ;;  %v14160_v25 = vsel %vm14138_vm9, %v24474_v44, 0.0  ;;  %v14087_v22 = vmul.f32 %v16008_v12, %v13304_v55  ;;  %v16014_v49 = vld [vmem:[%s25518_s3 + $0x198] ss:$0 sm:$0xff] }
 0x45e   : > { %v24481_v32 = vadd.f32 %v14086_v41, %v24259_v21 }
 0x45f   : > { %v14161_v43 = vadd.f32 %v14160_v25, %v14159_v50  ;;  %v24484_v57 = vadd.f32 %v14087_v22, %v24262_v31  ;;  %v16015_v22 = vld [vmem:[%s25518_s3 + $0x1a0] ss:$0 sm:$0xff] }
 0x460   : > { %v14162_v13 = vsel %vm14138_vm9, %v24481_v32, 0.0 }
 0x461   : > { %v14163_v27 = vadd.f32 %v14162_v13, %v14161_v43  ;;  %v14164_v21 = vsel %vm14138_vm9, %v24484_v57, 0.0  ;;  %v16016_v13 = vld [vmem:[%s25518_s3 + $0x1a8] ss:$0 sm:$0xff] }
 0x463   : > { %v13373_v30 = vpop.f32.mrb[134].mxu0  ;;  %v14165_v16 = vadd.f32 %v14164_v21, %v14163_v27 }
 0x464   : > { %v14088_v47 = vmul.f32 %v16009_v29, %v13373_v30  ;;  %v13375_v39 = vpop.f32.mrb[135].mxu0 }
 0x465   : > { %v14089_v31 = vmul.f32 %v16010_v63, %v13375_v39 }
 0x466   : > { %v24500_v7 = vadd.f32 %v14088_v47, %v24277_v10 }
 0x467   : > { %v24506_v61 = vadd.f32 %v14089_v31, %v24284_v18  ;;  %v13444_v52 = vpop.f32.mrb[136].mxu1 }
 0x468   : > { %v14166_v6 = vsel %vm14138_vm9, %v24500_v7, 0.0  ;;  %v14090_v26 = vmul.f32 %v16011_v59, %v13444_v52  ;;  %v13446_v4 = vpop.f32.mrb[137].mxu1  ;;  %v16017_v52 = vld [vmem:[%s25518_s3 + $0x1b0] ss:$0 sm:$0xff] }
 0x469   : > { %v14167_v24 = vadd.f32 %v14166_v6, %v14165_v16  ;;  %v14168_v53 = vsel %vm14138_vm9, %v24506_v61, 0.0  ;;  %v14091_v10 = vmul.f32 %v16012_v8, %v13446_v4  ;;  %v16018_v6 = vld [vmem:[%s25518_s3 + $0x1b8] ss:$0 sm:$0xff] }
 0x46a   : > { %v24513_v42 = vadd.f32 %v14090_v26, %v24287_v48 }
 0x46b   : > { %v14169_v12 = vadd.f32 %v14168_v53, %v14167_v24  ;;  %v24516_v23 = vadd.f32 %v14091_v10, %v24290_v58  ;;  %v16019_v10 = vld [vmem:[%s25518_s3 + $0x1c0] ss:$0 sm:$0xff] }
 0x46c   : > { %v14170_v18 = vsel %vm14138_vm9, %v24513_v42, 0.0 }
 0x46d   : > { %v14171_v41 = vadd.f32 %v14170_v18, %v14169_v12  ;;  %v14172_v48 = vsel %vm14138_vm9, %v24516_v23, 0.0  ;;  %v16020_v18 = vld [vmem:[%s25518_s3 + $0x1c8] ss:$0 sm:$0xff] }
 0x46f   : > { %v13515_v55 = vpop.f32.mrb[136].mxu0  ;;  %v14173_v29 = vadd.f32 %v14172_v48, %v14171_v41 }
 0x470   : > { %v14092_v50 = vmul.f32 %v16013_v19, %v13515_v55  ;;  %v13517_v25 = vpop.f32.mrb[137].mxu0 }
 0x471   : > { %v14093_v58 = vmul.f32 %v16014_v49, %v13517_v25 }
 0x472   : > { %v24532_v43 = vadd.f32 %v14092_v50, %v24305_v28 }
 0x473   : > { %v24538_v63 = vadd.f32 %v14093_v58, %v24312_v60  ;;  %v13586_v27 = vpop.f32.mrb[138].mxu1 }
 0x474   : > { %v14174_v30 = vsel %vm14138_vm9, %v24532_v43, 0.0  ;;  %v14094_v21 = vmul.f32 %v16015_v22, %v13586_v27  ;;  %v13588_v47 = vpop.f32.mrb[139].mxu1  ;;  %v16021_v27 = vld [vmem:[%s25518_s3 + $0x1d0] ss:$0 sm:$0xff] }
 0x475   : > { %v14175_v39 = vadd.f32 %v14174_v30, %v14173_v29  ;;  %v14176_v31 = vsel %vm14138_vm9, %v24538_v63, 0.0  ;;  %v14095_v28 = vmul.f32 %v16016_v13, %v13588_v47  ;;  %v16022_v30 = vld [vmem:[%s25518_s3 + $0x1d8] ss:$0 sm:$0xff] }
 0x476   : > { %v24545_v59 = vadd.f32 %v14094_v21, %v24315_v45 }
 0x477   : > { %v14177_v8 = vadd.f32 %v14176_v31, %v14175_v39  ;;  %v24548_v16 = vadd.f32 %v14095_v28, %v24318_v35  ;;  %v16023_v28 = vld [vmem:[%s25518_s3 + $0x1e0] ss:$0 sm:$0xff] }
 0x478   : > { %v14178_v60 = vsel %vm14138_vm9, %v24545_v59, 0.0 }
 0x479   : > { %v14179_v26 = vadd.f32 %v14178_v60, %v14177_v8  ;;  %v14180_v45 = vsel %vm14138_vm9, %v24548_v16, 0.0  ;;  %v16024_v60 = vld [vmem:[%s25518_s3 + $0x1e8] ss:$0 sm:$0xff] }
 0x47b   : > { %v13657_v4 = vpop.f32.mrb[138].mxu0  ;;  %v14181_v19 = vadd.f32 %v14180_v45, %v14179_v26 }
 0x47c   : > { %v14096_v24 = vmul.f32 %v16017_v52, %v13657_v4  ;;  %v13659_v53 = vpop.f32.mrb[139].mxu0 }
 0x47d   : > { %v14097_v35 = vmul.f32 %v16018_v6, %v13659_v53 }
 0x47e   : > { %v24564_v12 = vadd.f32 %v14096_v24, %v24333_v0 }
 0x47f   : > { %v24570_v49 = vadd.f32 %v14097_v35, %v24340_v34  ;;  %v13728_v41 = vpop.f32.mrb[140].mxu1 }
 0x480   : > { %v14182_v55 = vsel %vm14138_vm9, %v24564_v12, 0.0  ;;  %v14098_v48 = vmul.f32 %v16019_v10, %v13728_v41  ;;  %v13730_v50 = vpop.f32.mrb[141].mxu1  ;;  %v16025_v10 = vld [vmem:[%s25518_s3 + $0x1f0] ss:$0 sm:$0xff] }
 0x481   : > { %v14183_v25 = vadd.f32 %v14182_v55, %v14181_v19  ;;  %v14184_v58 = vsel %vm14138_vm9, %v24570_v49, 0.0  ;;  %v14099_v0 = vmul.f32 %v16020_v18, %v13730_v50 }
 0x482   : > { %v24577_v22 = vadd.f32 %v14098_v48, %v24343_v2 }
 0x483   : > { %v14185_v13 = vadd.f32 %v14184_v58, %v14183_v25  ;;  %v24580_v29 = vadd.f32 %v14099_v0, %v24346_v20 }
 0x484   : > { %v14186_v34 = vsel %vm14138_vm9, %v24577_v22, 0.0 }
 0x485   : > { %v14187_v21 = vadd.f32 %v14186_v34, %v14185_v13  ;;  %v14188_v2 = vsel %vm14138_vm9, %v24580_v29, 0.0 }
 0x487   : > { %v13799_v47 = vpop.f32.mrb[140].mxu0  ;;  %v14189_v52 = vadd.f32 %v14188_v2, %v14187_v21  ;;  %v17629_v2 = vld [vmem:[%s17744_s17 + $0x30] sm:$0xff] }
 0x488   : > { %v14100_v39 = vmul.f32 %v16021_v27, %v13799_v47  ;;  %v13801_v31 = vpop.f32.mrb[141].mxu0 }
 0x489   : > { %v14101_v20 = vmul.f32 %v16022_v30, %v13801_v31  ;;  %v17631_v31 = vld [vmem:[%s17744_s17 + $0x58] sm:$0xff] }
 0x48a   : > { %v24596_v8 = vadd.f32 %v14100_v39, %v24353_v51  ;;  %v17630_v39 = vld [vmem:[%s17744_s17 + $0x48] sm:$0xff] }
 0x48b   : > { %v24602_v6 = vadd.f32 %v14101_v20, %v24358_v54  ;;  %v13870_v26 = vpop.f32.mrb[142].mxu1  ;;  %v16026_v54 = vld [vmem:[%s25518_s3 + $0x1f8] ss:$0 sm:$0xff]  ;;  %v17632_v20 = vld [vmem:[%s17744_s17 + $0x40] sm:$0xff] }
 0x48c   : > { %v14190_v4 = vsel %vm14138_vm9, %v24596_v8, 0.0  ;;  %v14102_v45 = vmul.f32 %v16023_v28, %v13870_v26  ;;  %v13872_v24 = vpop.f32.mrb[143].mxu1  ;;  %v17633_v28 = vld [vmem:[%s17744_s17 + $0x50] sm:$0xff]  ;;  %v17636_v26 = vld [vmem:[%s17744_s17 + $0x60] sm:$0xff] }
 0x48d   : > { %v14191_v53 = vadd.f32 %v14190_v4, %v14189_v52  ;;  %v14192_v35 = vsel %vm14138_vm9, %v24602_v6, 0.0  ;;  %v14103_v51 = vmul.f32 %v16024_v60, %v13872_v24  ;;  %v17634_v60 = vld [vmem:[%s17744_s17 + $0x68] sm:$0xff]  ;;  %v17635_v52 = vld [vmem:[%s17744_s17 + $0x78] sm:$0xff]  ;;  %v17637_v4 = vld [vmem:[%s17744_s17 + $0x70] sm:$0xff] }
 0x48e   : > { %v24612_v18 = vadd.f32 %v14102_v45, %v24367_v3  ;;  %v17638_v45 = vld [vmem:[%s17744_s17 + $0x88] sm:$0xff]  ;;  %v17639_v24 = vld [vmem:[%s17744_s17 + $0x98] sm:$0xff] }
 0x48f   : > { %v14193_v19 = vadd.f32 %v14192_v35, %v14191_v53  ;;  %v24618_v41 = vadd.f32 %v14103_v51, %v24373_v56  ;;  %v13941_v55 = vpop.f32.mrb[142].mxu0  ;;  %v17640_v53 = vld [vmem:[%s17744_s17 + $0x80] sm:$0xff]  ;;  %v17641_v35 = vld [vmem:[%s17744_s17 + $0x90] sm:$0xff]  ;;  %v17642_v51 = vld [vmem:[%s17744_s17 + $0xa8] sm:$0xff] }
 0x490   : > { %v14194_v48 = vsel %vm14138_vm9, %v24612_v18, 0.0  ;;  %v14104_v50 = vmul.f32 %v16025_v10, %v13941_v55  ;;  %v13943_v25 = vpop.f32.mrb[143].mxu0  ;;  %v17643_v10 = vld [vmem:[%s17744_s17 + $0xb8] sm:$0xff]  ;;  %v17646_v55 = vld [vmem:[%s17744_s17 + $0xc8] sm:$0xff] }
 0x491   : > { %v14195_v58 = vadd.f32 %v14194_v48, %v14193_v19  ;;  %v14196_v3 = vsel %vm14138_vm9, %v24618_v41, 0.0  ;;  %v14105_v0 = vmul.f32 %v16026_v54, %v13943_v25  ;;  %v17644_v54 = vld [vmem:[%s17744_s17 + $0xa0] sm:$0xff]  ;;  %v17645_v19 = vld [vmem:[%s17744_s17 + $0xb0] sm:$0xff]  ;;  %v17647_v48 = vld [vmem:[%s17744_s17 + $0xd8] sm:$0xff] }
 0x492   : > { %v24625_v13 = vadd.f32 %v14104_v50, %v24370_v36  ;;  %v24637_v36 = vld [vmem:[%s25522_s7] sm:$0xf]  ;;  %v17649_v25 = vld [vmem:[%s17744_s17 + $0xd0] sm:$0xff] }
 0x493   : > { %v14197_v34 = vadd.f32 %v14196_v3, %v14195_v58  ;;  %v24628_v56 = vadd.f32 %v14105_v0, %v24376_v14  ;;  %16028 = vmatmul.mubr.msk.f32.vlgmr.msra.gmra.mrb[144].mxu1 %vm14527_vm10, %v24637_v36  ;;  %16029 = vmatmul.mubr.msk.f32.vlgmr.msra.gmra.mrb[144].mxu0 %vm14527_vm10, %v24637_v36  ;;  %v17628_v14 = vld [vmem:[%s17744_s17 + $0x20] sm:$0xff]  ;;  %v17650_v58 = vld [vmem:[%s17744_s17 + $0xe8] sm:$0xff]  ;;  %v17651_v3 = vld [vmem:[%s17744_s17 + $0xf8] sm:$0xff] }
 0x494   : > { %v14198_v27 = vsel %vm14138_vm9, %v24625_v13, 0.0  ;;  %14674 = vmatpush1.msra.mxu1 %v17628_v14  ;;  %14745 = vmatpush1.msra.mxu0 %v17629_v2  ;;  %v17648_v50 = vld [vmem:[%s17744_s17 + $0xc0] sm:$0xff] }
 0x495   : > { %v14199_v30 = vadd.f32 %v14198_v27, %v14197_v34  ;;  %v14200_v21 = vsel %vm14138_vm9, %v24628_v56, 0.0  ;;  %14737 = vmatprep.mubr.f32.mxu1 %v25653_v62  ;;  %14808 = vmatprep.mubr.f32.mxu0 %v25653_v62  ;;  %v17652_v0 = vld [vmem:[%s17744_s17 + $0xe0] sm:$0xff]  ;;  %v17653_v34 = vld [vmem:[%s17744_s17 + $0xf0] sm:$0xff] }
 0x496   : > { %14815 = vmatprep.subr.mxu1 %v17630_v39  ;;  %14886 = vmatprep.subr.mxu0 %v17631_v31 }
 0x497   : > { %v14201_v47 = vadd.f32 %v14200_v21, %v14199_v30  ;;  %16030 = vmatmul.mubr.msk.f32.vlgmr.msra.gmra.mrb[146].mxu1 %vm14527_vm10, %v24637_v36  ;;  %16031 = vmatmul.mubr.msk.f32.vlgmr.msra.gmra.mrb[146].mxu0 %vm14527_vm10, %v24637_v36 }
 0x498   : > { %14816 = vmatpush1.msra.mxu1 %v17632_v20  ;;  %14887 = vmatpush1.msra.mxu0 %v17633_v28 }
 0x499   : > { %14202 = vadd.xlane.f32.xlu1 %v14201_v47  ;;  %14879 = vmatprep.mubr.f32.mxu1 %v25653_v62 }
 0x49a   : > { %14950 = vmatprep.mubr.f32.mxu0 %v25653_v62  ;;  %14957 = vmatprep.subr.mxu1 %v17634_v60 }
 0x49b   : > { %15028 = vmatprep.subr.mxu0 %v17635_v52  ;;  %16032 = vmatmul.mubr.msk.f32.vlgmr.msra.gmra.mrb[148].mxu1 %vm14527_vm10, %v24637_v36 }
 0x49c   : > { %16033 = vmatmul.mubr.msk.f32.vlgmr.msra.gmra.mrb[148].mxu0 %vm14527_vm10, %v24637_v36  ;;  %14958 = vmatpush1.msra.mxu1 %v17636_v26 }
 0x49d   : > { %15029 = vmatpush1.msra.mxu0 %v17637_v4  ;;  %15021 = vmatprep.mubr.f32.mxu1 %v25653_v62 }
 0x49e   : > { %15092 = vmatprep.mubr.f32.mxu0 %v25653_v62  ;;  %15099 = vmatprep.subr.mxu1 %v17638_v45 }
 0x49f   : > { %15170 = vmatprep.subr.mxu0 %v17639_v24  ;;  %16034 = vmatmul.mubr.msk.f32.vlgmr.msra.gmra.mrb[150].mxu1 %vm14527_vm10, %v24637_v36 }
 0x4a0   : > { %16035 = vmatmul.mubr.msk.f32.vlgmr.msra.gmra.mrb[150].mxu0 %vm14527_vm10, %v24637_v36  ;;  %15100 = vmatpush1.msra.mxu1 %v17640_v53 }
 0x4a1   : > { %15171 = vmatpush1.msra.mxu0 %v17641_v35  ;;  %15163 = vmatprep.mubr.f32.mxu1 %v25653_v62 }
 0x4a2   : > { %15234 = vmatprep.mubr.f32.mxu0 %v25653_v62  ;;  %15241 = vmatprep.subr.mxu1 %v17642_v51 }
 0x4a3   : > { %15312 = vmatprep.subr.mxu0 %v17643_v10  ;;  %16036 = vmatmul.mubr.msk.f32.vlgmr.msra.gmra.mrb[152].mxu1 %vm14527_vm10, %v24637_v36 }
 0x4a4   : > { %16037 = vmatmul.mubr.msk.f32.vlgmr.msra.gmra.mrb[152].mxu0 %vm14527_vm10, %v24637_v36  ;;  %15242 = vmatpush1.msra.mxu1 %v17644_v54 }
 0x4a5   : > { %15313 = vmatpush1.msra.mxu0 %v17645_v19  ;;  %15305 = vmatprep.mubr.f32.mxu1 %v25653_v62 }
 0x4a6   : > { %15376 = vmatprep.mubr.f32.mxu0 %v25653_v62  ;;  %15383 = vmatprep.subr.mxu1 %v17646_v55 }
 0x4a7   : > { %15454 = vmatprep.subr.mxu0 %v17647_v48  ;;  %16038 = vmatmul.mubr.msk.f32.vlgmr.msra.gmra.mrb[154].mxu1 %vm14527_vm10, %v24637_v36 }
 0x4a8   : > { %16039 = vmatmul.mubr.msk.f32.vlgmr.msra.gmra.mrb[154].mxu0 %vm14527_vm10, %v24637_v36  ;;  %15384 = vmatpush1.msra.mxu1 %v17648_v50 }
 0x4a9   : > { %15455 = vmatpush1.msra.mxu0 %v17649_v25  ;;  %15447 = vmatprep.mubr.f32.mxu1 %v25653_v62 }
 0x4aa   : > { %15518 = vmatprep.mubr.f32.mxu0 %v25653_v62  ;;  %15525 = vmatprep.subr.mxu1 %v17650_v58 }
 0x4ab   : > { %15596 = vmatprep.subr.mxu0 %v17651_v3  ;;  %16040 = vmatmul.mubr.msk.f32.vlgmr.msra.gmra.mrb[156].mxu1 %vm14527_vm10, %v24637_v36 }
 0x4ac   : > { %16041 = vmatmul.mubr.msk.f32.vlgmr.msra.gmra.mrb[156].mxu0 %vm14527_vm10, %v24637_v36  ;;  %15526 = vmatpush1.msra.mxu1 %v17652_v0 }
 0x4ad   : > { %15597 = vmatpush1.msra.mxu0 %v17653_v34  ;;  %15589 = vmatprep.mubr.f32.mxu1 %v25653_v62 }
 0x4ae   : > { %15660 = vmatprep.mubr.f32.mxu0 %v25653_v62 }
 0x4af   : > { %16042 = vmatmul.mubr.msk.f32.vlgmr.msra.gmra.mrb[158].mxu1 %vm14527_vm10, %v24637_v36 }
 0x4b0   : > { %16043 = vmatmul.mubr.msk.f32.vlgmr.msra.gmra.mrb[158].mxu0 %vm14527_vm10, %v24637_v36 }
 0x526   : > { %v14203_v27 = vpop.xlane.xlu1 %14202 }
 0x527   : > { %v24711_v30 = vmul.f32 0.00024414063, %v14203_v27 }
 0x529   : > { %v24715_v21 = vsub.f32 %v24385_v11, %v24711_v30  ;;  %v24719_v47 = vsub.f32 %v24388_v1, %v24711_v30  ;;  %v24723_v62 = vsub.f32 %v24401_v38, %v24711_v30  ;;  %v24727_v14 = vsub.f32 %v24407_v5, %v24711_v30 }
 0x52a   : > { %v24735_v11 = vsub.f32 %v24417_v17, %v24711_v30  ;;  %v24741_v38 = vsub.f32 %v24420_v40, %v24711_v30  ;;  %v24749_v28 = vsub.f32 %v24436_v46, %v24711_v30  ;;  %v24756_v40 = vsub.f32 %v24442_v9, %v24711_v30 }
 0x52b   : > { %v14237_v36 = vmul.f32 %v24715_v21, %v24715_v21  ;;  %v14238_v2 = vmul.f32 %v24719_v47, %v24719_v47  ;;  %v14239_v1 = vmul.f32 %v24723_v62, %v24723_v62  ;;  %v14240_v5 = vmul.f32 %v24727_v14, %v24727_v14 }
 0x52c   : > { %v14241_v17 = vmul.f32 %v24735_v11, %v24735_v11  ;;  %v14242_v26 = vmul.f32 %v24741_v38, %v24741_v38  ;;  %v24763_v46 = vsub.f32 %v24449_v15, %v24711_v30  ;;  %v14243_v24 = vmul.f32 %v24749_v28, %v24749_v28 }
 0x52d   : > { %v14269_v39 = vsel %vm14138_vm9, %v14237_v36, 0.0  ;;  %v14270_v31 = vsel %vm14138_vm9, %v14238_v2, 0.0  ;;  %v14272_v60 = vsel %vm14138_vm9, %v14239_v1, 0.0  ;;  %v14274_v4 = vsel %vm14138_vm9, %v14240_v5, 0.0 }
 0x52e   : > { %v14271_v20 = vadd.f32 %v14270_v31, %v14269_v39  ;;  %v14276_v53 = vsel %vm14138_vm9, %v14241_v17, 0.0  ;;  %v24770_v9 = vsub.f32 %v24452_v37, %v24711_v30  ;;  %v14244_v51 = vmul.f32 %v24756_v40, %v24756_v40 }
 0x52f   : > { %v14278_v10 = vsel %vm14138_vm9, %v14242_v26, 0.0  ;;  %v24777_v15 = vsub.f32 %v24468_v33, %v24711_v30  ;;  %v14245_v19 = vmul.f32 %v24763_v46, %v24763_v46  ;;  %v14280_v55 = vsel %vm14138_vm9, %v14243_v24, 0.0 }
 0x530   : > { %v14273_v52 = vadd.f32 %v14272_v60, %v14271_v20  ;;  %v24784_v37 = vsub.f32 %v24474_v44, %v24711_v30  ;;  %v14246_v50 = vmul.f32 %v24770_v9, %v24770_v9  ;;  %v14282_v25 = vsel %vm14138_vm9, %v14244_v51, 0.0 }
 0x531   : > { %v24791_v33 = vsub.f32 %v24481_v32, %v24711_v30  ;;  %v14247_v3 = vmul.f32 %v24777_v15, %v24777_v15  ;;  %v14284_v0 = vsel %vm14138_vm9, %v14245_v19, 0.0  ;;  %v24798_v44 = vsub.f32 %v24484_v57, %v24711_v30 }
 0x532   : > { %v14275_v45 = vadd.f32 %v14274_v4, %v14273_v52  ;;  %v14248_v27 = vmul.f32 %v24784_v37, %v24784_v37  ;;  %v14286_v36 = vsel %vm14138_vm9, %v14246_v50, 0.0  ;;  %v24805_v32 = vsub.f32 %v24500_v7, %v24711_v30 }
 0x533   : > { %v14249_v1 = vmul.f32 %v24791_v33, %v24791_v33  ;;  %v14288_v5 = vsel %vm14138_vm9, %v14247_v3, 0.0  ;;  %v24812_v57 = vsub.f32 %v24506_v61, %v24711_v30  ;;  %v14250_v31 = vmul.f32 %v24798_v44, %v24798_v44 }
 0x534   : > { %v14277_v35 = vadd.f32 %v14276_v53, %v14275_v45  ;;  %v14290_v20 = vsel %vm14138_vm9, %v14248_v27, 0.0  ;;  %v24819_v7 = vsub.f32 %v24513_v42, %v24711_v30  ;;  %v14251_v60 = vmul.f32 %v24805_v32, %v24805_v32 }
 0x535   : > { %v14292_v52 = vsel %vm14138_vm9, %v14249_v1, 0.0  ;;  %v24826_v61 = vsub.f32 %v24516_v23, %v24711_v30  ;;  %v14252_v4 = vmul.f32 %v24812_v57, %v24812_v57  ;;  %v14294_v45 = vsel %vm14138_vm9, %v14250_v31, 0.0 }
 0x536   : > { %v14279_v54 = vadd.f32 %v14278_v10, %v14277_v35  ;;  %v24833_v42 = vsub.f32 %v24532_v43, %v24711_v30  ;;  %v14253_v53 = vmul.f32 %v24819_v7, %v24819_v7  ;;  %v14296_v35 = vsel %vm14138_vm9, %v14251_v60, 0.0 }
 0x537   : > { %v24840_v23 = vsub.f32 %v24538_v63, %v24711_v30  ;;  %v14254_v10 = vmul.f32 %v24826_v61, %v24826_v61  ;;  %v24847_v43 = vsub.f32 %v24545_v59, %v24711_v30  ;;  %v24854_v63 = vsub.f32 %v24548_v16, %v24711_v30 }
 0x538   : > { %v14281_v48 = vadd.f32 %v14280_v55, %v14279_v54  ;;  %v14298_v54 = vsel %vm14138_vm9, %v14252_v4, 0.0  ;;  %v14255_v55 = vmul.f32 %v24833_v42, %v24833_v42  ;;  %v24861_v59 = vsub.f32 %v24564_v12, %v24711_v30 }
 0x539   : > { %v24868_v16 = vsub.f32 %v24570_v49, %v24711_v30  ;;  %v24875_v12 = vsub.f32 %v24577_v22, %v24711_v30  ;;  %v24882_v49 = vsub.f32 %v24580_v29, %v24711_v30  ;;  %v24889_v22 = vsub.f32 %v24596_v8, %v24711_v30 }
 0x53a   : > { %v14283_v58 = vadd.f32 %v14282_v25, %v14281_v48  ;;  %v14300_v48 = vsel %vm14138_vm9, %v14253_v53, 0.0  ;;  %v14256_v25 = vmul.f32 %v24840_v23, %v24840_v23  ;;  %v24896_v29 = vsub.f32 %v24602_v6, %v24711_v30 }
 0x53b   : > { %v24903_v8 = vsub.f32 %v24612_v18, %v24711_v30  ;;  %v24910_v6 = vsub.f32 %v24618_v41, %v24711_v30  ;;  %v24917_v18 = vsub.f32 %v24625_v13, %v24711_v30  ;;  %v24924_v41 = vsub.f32 %v24628_v56, %v24711_v30 }
 0x53c   : > { %v14285_v34 = vadd.f32 %v14284_v0, %v14283_v58  ;;  %v14302_v58 = vsel %vm14138_vm9, %v14254_v10, 0.0  ;;  %v14257_v0 = vmul.f32 %v24847_v43, %v24847_v43 }
 0x53d   : > { %v14267_v13 = vmul.f32 %v24917_v18, %v24917_v18 }
 0x53e   : > { %v14287_v2 = vadd.f32 %v14286_v36, %v14285_v34  ;;  %v14304_v34 = vsel %vm14138_vm9, %v14255_v55, 0.0  ;;  %v14258_v36 = vmul.f32 %v24854_v63, %v24854_v63 }
 0x53f   : > { %v14328_v56 = vsel %vm14138_vm9, %v14267_v13, 0.0 }
 0x540   : > { %v14289_v39 = vadd.f32 %v14288_v5, %v14287_v2  ;;  %v14306_v2 = vsel %vm14138_vm9, %v14256_v25, 0.0  ;;  %v14259_v5 = vmul.f32 %v24861_v59, %v24861_v59 }
 0x542   : > { %v14291_v17 = vadd.f32 %v14290_v20, %v14289_v39  ;;  %v14308_v39 = vsel %vm14138_vm9, %v14257_v0, 0.0  ;;  %v14260_v20 = vmul.f32 %v24868_v16, %v24868_v16 }
 0x544   : > { %v14293_v26 = vadd.f32 %v14292_v52, %v14291_v17  ;;  %v14310_v17 = vsel %vm14138_vm9, %v14258_v36, 0.0  ;;  %v14261_v52 = vmul.f32 %v24875_v12, %v24875_v12  ;;  %v14268_v36 = vmul.f32 %v24924_v41, %v24924_v41 }
 0x546   : > { %v14295_v24 = vadd.f32 %v14294_v45, %v14293_v26  ;;  %v14312_v26 = vsel %vm14138_vm9, %v14259_v5, 0.0  ;;  %v14262_v45 = vmul.f32 %v24882_v49, %v24882_v49  ;;  %v14330_v5 = vsel %vm14138_vm9, %v14268_v36, 0.0 }
 0x548   : > { %v14297_v51 = vadd.f32 %v14296_v35, %v14295_v24  ;;  %v14314_v24 = vsel %vm14138_vm9, %v14260_v20, 0.0  ;;  %v14263_v35 = vmul.f32 %v24889_v22, %v24889_v22  ;;  %v16027_v20 = vld [vmem:[#allocation3] ss:$0 sm:$0xff] }
 0x54a   : > { %v14299_v19 = vadd.f32 %v14298_v54, %v14297_v51  ;;  %v14316_v51 = vsel %vm14138_vm9, %v14261_v52, 0.0  ;;  %v14264_v54 = vmul.f32 %v24896_v29, %v24896_v29 }
 0x54c   : > { %v14301_v50 = vadd.f32 %v14300_v48, %v14299_v19  ;;  %v14318_v19 = vsel %vm14138_vm9, %v14262_v45, 0.0  ;;  %v14265_v48 = vmul.f32 %v24903_v8, %v24903_v8 }
 0x54e   : > { %v14303_v3 = vadd.f32 %v14302_v58, %v14301_v50  ;;  %v14320_v50 = vsel %vm14138_vm9, %v14263_v35, 0.0  ;;  %v14266_v58 = vmul.f32 %v24910_v6, %v24910_v6 }
 0x550   : > { %v14305_v27 = vadd.f32 %v14304_v34, %v14303_v3  ;;  %v14322_v3 = vsel %vm14138_vm9, %v14264_v54, 0.0  ;;  %v14324_v34 = vsel %vm14138_vm9, %v14265_v48, 0.0 }
 0x552   : > { %v14307_v1 = vadd.f32 %v14306_v2, %v14305_v27  ;;  %v14326_v2 = vsel %vm14138_vm9, %v14266_v58, 0.0 }
 0x554   : > { %v14309_v31 = vadd.f32 %v14308_v39, %v14307_v1 }
 0x556   : > { %v14311_v60 = vadd.f32 %v14310_v17, %v14309_v31  ;;  %v14376_v31 = vld [vmem:[%s25520_s5] sm:$0xf] }
 0x557   : > { %14379 = vperm.xlu1 %17353, %v14376_v31  }
 0x558   : > { %v14313_v4 = vadd.f32 %v14312_v26, %v14311_v60 }
 0x55a   : > { %v14315_v53 = vadd.f32 %v14314_v24, %v14313_v4 }
 0x55b   : > { %14453 = vperm.xlu1 %17353, %v16027_v20  }
 0x55c   : > { %v14317_v10 = vadd.f32 %v14316_v51, %v14315_v53 }
 0x55e   : > { %v14319_v55 = vadd.f32 %v14318_v19, %v14317_v10 }
 0x560   : > { %v14321_v25 = vadd.f32 %v14320_v50, %v14319_v55 }
 0x562   : > { %v14323_v0 = vadd.f32 %v14322_v3, %v14321_v25 }
 0x564   : > { %v14325_v27 = vadd.f32 %v14324_v34, %v14323_v0 }
 0x566   : > { %v14327_v1 = vadd.f32 %v14326_v2, %v14325_v27  ;;  %v24940_v17 = vpop.f32.mrb[144].mxu1  ;;  %v24942_v60 = vpop.f32.mrb[144].mxu0 }
 0x567   : > { %26062 = vst [vmem:[#allocation26_spill] sm:$0xff] %v24940_v17  ;;  %26063 = vst [vmem:[#allocation47_spill] sm:$0xff] %v24942_v60  ;;  %v24944_v52 = vpop.f32.mrb[145].mxu1  ;;  %v24946_v26 = vpop.f32.mrb[145].mxu0 }
 0x568   : > { %v14329_v30 = vadd.f32 %v14328_v56, %v14327_v1  ;;  %26064 = vst [vmem:[#allocation48_spill] sm:$0xff] %v24944_v52  ;;  %26065 = vst [vmem:[#allocation49_spill] sm:$0xff] %v24946_v26 }
 0x56a   : > { %v14331_v39 = vadd.f32 %v14330_v5, %v14329_v30  ;;  %v24948_v4 = vpop.f32.mrb[146].mxu1  ;;  %v24950_v45 = vpop.f32.mrb[146].mxu0 }
 0x56b   : > { %26066 = vst [vmem:[#allocation50_spill] sm:$0xff] %v24948_v4  ;;  %26067 = vst [vmem:[#allocation39_spill] sm:$0xff] %v24950_v45  ;;  %v24952_v24 = vpop.f32.mrb[147].mxu1  ;;  %v24954_v53 = vpop.f32.mrb[147].mxu0 }
 0x56c   : > { %14332 = vadd.xlane.f32.xlu0 %v14331_v39  ;;  %26068 = vst [vmem:[#allocation11_spill] sm:$0xff] %v24952_v24  ;;  %26069 = vst [vmem:[#allocation51_spill] sm:$0xff] %v24954_v53  ;;  %v14335_v39 = vld [vmem:[%s25519_s4] sm:$0xf] }
 0x56e   : > { %v24956_v35 = vpop.f32.mrb[148].mxu1 }
 0x56f   : > { %26070 = vst [vmem:[#allocation44_spill] sm:$0xff] %v24956_v35  ;;  %v24958_v51 = vpop.f32.mrb[148].mxu0  ;;  %v24960_v10 = vpop.f32.mrb[149].mxu1 }
 0x570   : > { %26071 = vst [vmem:[#allocation27_spill] sm:$0xff] %v24958_v51  ;;  %26072 = vst [vmem:[#allocation22_spill] sm:$0xff] %v24960_v10  ;;  %v24962_v54 = vpop.f32.mrb[149].mxu0 }
 0x571   : > { %26073 = vst [vmem:[#allocation13_spill] sm:$0xff] %v24962_v54 }
 0x572   : > { %v24964_v19 = vpop.f32.mrb[150].mxu1 }
 0x573   : > { %26074 = vst [vmem:[#allocation10_spill] sm:$0xff] %v24964_v19  ;;  %v24966_v55 = vpop.f32.mrb[150].mxu0  ;;  %v24968_v48 = vpop.f32.mrb[151].mxu1 }
 0x574   : > { %26075 = vst [vmem:[#allocation12_spill] sm:$0xff] %v24966_v55  ;;  %26076 = vst [vmem:[#allocation28_spill] sm:$0xff] %v24968_v48  ;;  %v24970_v50 = vpop.f32.mrb[151].mxu0 }
 0x575   : > { %26077 = vst [vmem:[#allocation17_spill] sm:$0xff] %v24970_v50 }
 0x576   : > { %v24972_v25 = vpop.f32.mrb[152].mxu1 }
 0x577   : > { %26078 = vst [vmem:[#allocation18_spill] sm:$0xff] %v24972_v25  ;;  %v24974_v58 = vpop.f32.mrb[152].mxu0  ;;  %v24976_v3 = vpop.f32.mrb[153].mxu1 }
 0x578   : > { %26079 = vst [vmem:[#allocation21_spill] sm:$0xff] %v24974_v58  ;;  %26080 = vst [vmem:[#allocation20_spill] sm:$0xff] %v24976_v3  ;;  %v24978_v0 = vpop.f32.mrb[153].mxu0 }
 0x579   : > { %26081 = vst [vmem:[#allocation31_spill] sm:$0xff] %v24978_v0 }
 0x57a   : > { %v24980_v13 = vpop.f32.mrb[154].mxu1 }
 0x57b   : > { %26082 = vst [vmem:[#allocation33_spill] sm:$0xff] %v24980_v13  ;;  %v24982_v34 = vpop.f32.mrb[154].mxu0  ;;  %v24984_v27 = vpop.f32.mrb[155].mxu1 }
 0x57c   : > { %26083 = vst [vmem:[#allocation9_spill] sm:$0xff] %v24982_v34  ;;  %26084 = vst [vmem:[#allocation32_spill] sm:$0xff] %v24984_v27  ;;  %v24986_v36 = vpop.f32.mrb[155].mxu0 }
 0x57d   : > { %26085 = vst [vmem:[#allocation37_spill] sm:$0xff] %v24986_v36 }
 0x57e   : > { %v24988_v2 = vpop.f32.mrb[156].mxu1 }
 0x57f   : > { %26086 = vst [vmem:[#allocation38_spill] sm:$0xff] %v24988_v2  ;;  %v24990_v1 = vpop.f32.mrb[156].mxu0  ;;  %v24995_v13 = vpop.f32.mrb[157].mxu1  ;;  %v14521_v2 = vld [vmem:[%s25523_s8] sm:$0xf] }
 0x580   : > { %26087 = vst [vmem:[#allocation35_spill] sm:$0xff] %v24990_v1  ;;  %26088 = vst [vmem:[#allocation40_spill] sm:$0xff] %v24995_v13  ;;  %v24997_v34 = vpop.f32.mrb[157].mxu0 }
 0x581   : > { %26089 = vst [vmem:[#allocation8_spill] sm:$0xff] %v24997_v34 }
 0x582   : > { %v25002_v1 = vpop.f32.mrb[158].mxu1 }
 0x583   : > { %26090 = vst [vmem:[#allocation36_spill] sm:$0xff] %v25002_v1 }
 0x5d6   : > { %v14380_v27 = vpop.permute.xlu1 %14379 }
 0x5f9   : > { %v14333_v56 = vpop.xlane.xlu0 %14332 }
 0x5fa   : > { %v14334_v30 = vmul.f32 0.00024414063, %v14333_v56  ;;  %v25004_v56 = vpop.f32.mrb[158].mxu0 }
 0x5fb   : > { %26091 = vst [vmem:[#allocation23_spill] sm:$0xff] %v25004_v56 }
 0x5fc   : > { %v14336_v5 = vadd.f32 1e-05, %v14334_v30  ;;  %v25006_v30 = vpop.f32.mrb[159].mxu1 }
 0x5fd   : > { %26092 = vst [vmem:[#allocation7_spill] sm:$0xff] %v25006_v30 }
 0x5fe   : > { %17354 = vrsqrt.f32 %v14336_v5  ;;  %v25008_v5 = vpop.f32.mrb[159].mxu0 }
 0x5ff   : > { %26093 = vst [vmem:[#allocation16_spill] sm:$0xff] %v25008_v5 }
 0x608   : > { %v17355_v31 = vpop.eup %17354 }
 0x609   : > { %v14338_v20 = vmul.f32 %v17355_v31, %v14335_v39 }
 0x60b   : > { %14341 = vperm.xlu0 %16642, %v14338_v20  }
 0x60f   : > { %14524 = vperm.xlu0 %16642, %v14521_v2  }
 0x68a   : > { %v14342_v36 = vpop.permute.xlu0 %14341 }
 0x68b   : > { %v14344_v39 = vmul.f32 %v14342_v36, %v24715_v21  ;;  %v14345_v31 = vmul.f32 %v14342_v36, %v24719_v47  ;;  %v14346_v20 = vmul.f32 %v14342_v36, %v24723_v62  ;;  %v14347_v34 = vmul.f32 %v14342_v36, %v24727_v14 }
 0x68c   : > { %v14348_v13 = vmul.f32 %v14342_v36, %v24735_v11  ;;  %v14349_v2 = vmul.f32 %v14342_v36, %v24741_v38  ;;  %v14350_v1 = vmul.f32 %v14342_v36, %v24749_v28  ;;  %v14351_v56 = vmul.f32 %v14342_v36, %v24756_v40 }
 0x68d   : > { %v14352_v30 = vmul.f32 %v14342_v36, %v24763_v46  ;;  %v14353_v5 = vmul.f32 %v14342_v36, %v24770_v9  ;;  %v14354_v21 = vmul.f32 %v14342_v36, %v24777_v15  ;;  %v14355_v47 = vmul.f32 %v14342_v36, %v24784_v37 }
 0x68e   : > { %v14356_v62 = vmul.f32 %v14342_v36, %v24791_v33  ;;  %v14357_v14 = vmul.f32 %v14342_v36, %v24798_v44  ;;  %v14358_v11 = vmul.f32 %v14342_v36, %v24805_v32  ;;  %v14359_v38 = vmul.f32 %v14342_v36, %v24812_v57 }
 0x68f   : > { %v14360_v28 = vmul.f32 %v14342_v36, %v24819_v7  ;;  %v14361_v40 = vmul.f32 %v14342_v36, %v24826_v61  ;;  %v14362_v46 = vmul.f32 %v14342_v36, %v24833_v42  ;;  %v14363_v9 = vmul.f32 %v14342_v36, %v24840_v23 }
 0x690   : > { %v14364_v15 = vmul.f32 %v14342_v36, %v24847_v43  ;;  %v14365_v37 = vmul.f32 %v14342_v36, %v24854_v63  ;;  %v14366_v33 = vmul.f32 %v14342_v36, %v24861_v59  ;;  %v14367_v44 = vmul.f32 %v14342_v36, %v24868_v16 }
 0x691   : > { %v14368_v32 = vmul.f32 %v14342_v36, %v24875_v12  ;;  %v14369_v57 = vmul.f32 %v14342_v36, %v24882_v49  ;;  %v14370_v7 = vmul.f32 %v14342_v36, %v24889_v22  ;;  %v14371_v61 = vmul.f32 %v14342_v36, %v24896_v29 }
 0x692   : > { %v14372_v42 = vmul.f32 %v14342_v36, %v24903_v8  ;;  %v14373_v23 = vmul.f32 %v14342_v36, %v24910_v6  ;;  %v14374_v43 = vmul.f32 %v14342_v36, %v24917_v18  ;;  %v14375_v63 = vmul.f32 %v14342_v36, %v24924_v41 }
 0x693   : > { %v25042_v59 = vadd.f32 %v14380_v27, %v14344_v39  ;;  %v25044_v16 = vadd.f32 %v14380_v27, %v14345_v31  ;;  %v25046_v12 = vadd.f32 %v14380_v27, %v14346_v20  ;;  %v25048_v49 = vadd.f32 %v14380_v27, %v14347_v34 }
 0x694   : > { %v25050_v22 = vadd.f32 %v14380_v27, %v14348_v13  ;;  %v25052_v29 = vadd.f32 %v14380_v27, %v14349_v2  ;;  %v25054_v0 = vadd.f32 %v14380_v27, %v14350_v1  ;;  %v25056_v8 = vadd.f32 %v14380_v27, %v14351_v56 }
 0x695   : > { %v25058_v6 = vadd.f32 %v14380_v27, %v14352_v30  ;;  %v25060_v18 = vadd.f32 %v14380_v27, %v14353_v5  ;;  %v25062_v41 = vadd.f32 %v14380_v27, %v14354_v21  ;;  %v25064_v36 = vadd.f32 %v14380_v27, %v14355_v47 }
 0x696   : > { %v25066_v39 = vadd.f32 %v14380_v27, %v14356_v62  ;;  %v25068_v34 = vadd.f32 %v14380_v27, %v14357_v14  ;;  %v25070_v13 = vadd.f32 %v14380_v27, %v14358_v11  ;;  %v25072_v31 = vadd.f32 %v14380_v27, %v14359_v38 }
 0x697   : > { %v25074_v1 = vadd.f32 %v14380_v27, %v14360_v28  ;;  %v25076_v56 = vadd.f32 %v14380_v27, %v14361_v40  ;;  %v25078_v30 = vadd.f32 %v14380_v27, %v14362_v46  ;;  %v25080_v5 = vadd.f32 %v14380_v27, %v14363_v9 }
 0x698   : > { %v25082_v20 = vadd.f32 %v14380_v27, %v14364_v15  ;;  %v25084_v2 = vadd.f32 %v14380_v27, %v14365_v37  ;;  %v25086_v21 = vadd.f32 %v14380_v27, %v14366_v33  ;;  %v25088_v47 = vadd.f32 %v14380_v27, %v14367_v44  ;;  %v14454_v15 = vpop.permute.xlu1 %14453 }
 0x699   : > { %v25090_v62 = vadd.f32 %v14380_v27, %v14368_v32  ;;  %v25092_v14 = vadd.f32 %v14380_v27, %v14369_v57  ;;  %v25094_v11 = vadd.f32 %v14380_v27, %v14370_v7  ;;  %v25096_v38 = vadd.f32 %v14380_v27, %v14371_v61 }
 0x69a   : > { %v25098_v28 = vadd.f32 %v14380_v27, %v14372_v42  ;;  %v25100_v40 = vadd.f32 %v14380_v27, %v14373_v23  ;;  %v25102_v46 = vadd.f32 %v14380_v27, %v14374_v43  ;;  %v25104_v9 = vadd.f32 %v14380_v27, %v14375_v63 }
 0x69b   : > { %v25107_v37 = vmul.f32 %v14454_v15, %v25042_v59  ;;  %v25110_v33 = vmul.f32 %v14454_v15, %v25044_v16  ;;  %v25113_v44 = vmul.f32 %v14454_v15, %v25046_v12  ;;  %v25116_v32 = vmul.f32 %v14454_v15, %v25048_v49 }
 0x69c   : > { %26094 = vst [vmem:[#allocation41_spill] sm:$0xff] %v25104_v9  ;;  %v25119_v57 = vmul.f32 %v14454_v15, %v25050_v22  ;;  %v25122_v7 = vmul.f32 %v14454_v15, %v25052_v29  ;;  %v25125_v27 = vmul.f32 %v14454_v15, %v25054_v0  ;;  %v25128_v61 = vmul.f32 %v14454_v15, %v25056_v8 }
 0x69d   : > { %v25131_v42 = vmul.f32 %v14454_v15, %v25058_v6  ;;  %v25134_v23 = vmul.f32 %v14454_v15, %v25060_v18  ;;  %v25137_v43 = vmul.f32 %v14454_v15, %v25062_v41  ;;  %v25140_v63 = vmul.f32 %v14454_v15, %v25064_v36 }
 0x69e   : > { %v25143_v58 = vmul.f32 %v14454_v15, %v25066_v39  ;;  %v25146_v3 = vmul.f32 %v14454_v15, %v25068_v34  ;;  %v25149_v25 = vmul.f32 %v14454_v15, %v25070_v13  ;;  %v25152_v50 = vmul.f32 %v14454_v15, %v25072_v31 }
 0x69f   : > { %v25155_v55 = vmul.f32 %v14454_v15, %v25074_v1  ;;  %v25158_v48 = vmul.f32 %v14454_v15, %v25076_v56  ;;  %v25161_v19 = vmul.f32 %v14454_v15, %v25078_v30  ;;  %v25164_v54 = vmul.f32 %v14454_v15, %v25080_v5 }
 0x6a0   : > { %v25167_v51 = vmul.f32 %v14454_v15, %v25082_v20  ;;  %v25170_v10 = vmul.f32 %v14454_v15, %v25084_v2  ;;  %v25173_v35 = vmul.f32 %v14454_v15, %v25086_v21  ;;  %v25176_v53 = vmul.f32 %v14454_v15, %v25088_v47 }
 0x6a1   : > { %v25179_v45 = vmul.f32 %v14454_v15, %v25090_v62  ;;  %v25182_v24 = vmul.f32 %v14454_v15, %v25092_v14  ;;  %v25185_v4 = vmul.f32 %v14454_v15, %v25094_v11  ;;  %v25188_v26 = vmul.f32 %v14454_v15, %v25096_v38 }
 0x6a2   : > { %v25191_v60 = vmul.f32 %v14454_v15, %v25098_v28  ;;  %v25194_v52 = vmul.f32 %v14454_v15, %v25100_v40  ;;  %v25197_v17 = vmul.f32 %v14454_v15, %v25102_v46  ;;  %vm14414_vm11 = vcmp.ge.f32.partialorder %v25042_v59, 0.0 }
 0x6a3   : > { %26095 = vst [vmem:[#allocation42_spill] sm:$0xff] %v25179_v45  ;;  %v25200_v45 = vmul.f32 %v14454_v15, %v25104_v9  ;;  %vm14415_vm12 = vcmp.ge.f32.partialorder %v25044_v16, 0.0  ;;  %vm14416_vm13 = vcmp.ge.f32.partialorder %v25046_v12, 0.0  ;;  %vm14417_vm14 = vcmp.ge.f32.partialorder %v25048_v49, 0.0 }
 0x6a4   : > { %26096 = vst [vmem:[#allocation43_spill] sm:$0xff] %v25197_v17  ;;  %vm14418_vm15 = vcmp.ge.f32.partialorder %v25050_v22, 0.0  ;;  %vm14419_vm0 = vcmp.ge.f32.partialorder %v25052_v29, 0.0  ;;  %vm14436_vm7 = vcmp.ge.f32.partialorder %v25086_v21, 0.0  ;;  %vm14437_vm8 = vcmp.ge.f32.partialorder %v25088_v47, 0.0 }
 0x6a5   : > { %26097 = vst [vmem:[#allocation15_spill] sm:$0xff] %v25200_v45  ;;  %vm14438_vm9 = vcmp.ge.f32.partialorder %v25090_v62, 0.0  ;;  %vm14439_vm10 = vcmp.ge.f32.partialorder %v25092_v14, 0.0  ;;  %vm14440_vm1 = vcmp.ge.f32.partialorder %v25094_v11, 0.0  ;;  %vm14441_vm2 = vcmp.ge.f32.partialorder %v25096_v38, 0.0 }
 0x6a6   : > { %vm14442_vm3 = vcmp.ge.f32.partialorder %v25098_v28, 0.0  ;;  %vm14443_vm4 = vcmp.ge.f32.partialorder %v25100_v40, 0.0  ;;  %vm14444_vm5 = vcmp.ge.f32.partialorder %v25102_v46, 0.0  ;;  %vm14445_vm6 = vcmp.ge.f32.partialorder %v25104_v9, 0.0 }
 0x6a7   : > { %v25238_v15 = vsel %vm14414_vm11, %v25042_v59, %v25107_v37  ;;  %v25244_v45 = vsel %vm14415_vm12, %v25044_v16, %v25110_v33  ;;  %v25250_v17 = vsel %vm14416_vm13, %v25046_v12, %v25113_v44  ;;  %v25256_v9 = vsel %vm14417_vm14, %v25048_v49, %v25116_v32  ;;  %v26137_v33 = vld [vmem:[#allocation44_spill] sm:$0xff]  ;;  %v26138_v32 = vld [vmem:[#allocation22_spill] sm:$0xff] }
 0x6a8   : > { %v25262_v59 = vsel %vm14418_vm15, %v25050_v22, %v25119_v57  ;;  %v25268_v16 = vsel %vm14419_vm0, %v25052_v29, %v25122_v7  ;;  %vm26098_vm11 = vcmp.ge.f32.partialorder %v25054_v0, 0.0  ;;  %vm26099_vm12 = vcmp.ge.f32.partialorder %v25056_v8, 0.0  ;;  %v26139_v7 = vld [vmem:[#allocation27_spill] sm:$0xff] }
 0x6a9   : > { %v25274_v12 = vsel %vm26098_vm11, %v25054_v0, %v25125_v27  ;;  %v25280_v49 = vsel %vm26099_vm12, %v25056_v8, %v25128_v61  ;;  %vm26100_vm13 = vcmp.ge.f32.partialorder %v25058_v6, 0.0  ;;  %vm26101_vm14 = vcmp.ge.f32.partialorder %v25060_v18, 0.0  ;;  %v26140_v61 = vld [vmem:[#allocation13_spill] sm:$0xff] }
 0x6aa   : > { %v25286_v22 = vsel %vm26100_vm13, %v25058_v6, %v25131_v42  ;;  %v25292_v29 = vsel %vm26101_vm14, %v25060_v18, %v25134_v23  ;;  %vm26102_vm15 = vcmp.ge.f32.partialorder %v25062_v41, 0.0  ;;  %vm26103_vm0 = vcmp.ge.f32.partialorder %v25064_v36, 0.0  ;;  %v26141_v23 = vld [vmem:[#allocation10_spill] sm:$0xff] }
 0x6ab   : > { %v25298_v0 = vsel %vm26102_vm15, %v25062_v41, %v25137_v43  ;;  %v25304_v8 = vsel %vm26103_vm0, %v25064_v36, %v25140_v63  ;;  %vm26104_vm11 = vcmp.ge.f32.partialorder %v25066_v39, 0.0  ;;  %vm26105_vm12 = vcmp.ge.f32.partialorder %v25068_v34, 0.0  ;;  %v26142_v63 = vld [vmem:[#allocation28_spill] sm:$0xff] }
 0x6ac   : > { %v25310_v6 = vsel %vm26104_vm11, %v25066_v39, %v25143_v58  ;;  %v25316_v18 = vsel %vm26105_vm12, %v25068_v34, %v25146_v3  ;;  %vm26106_vm13 = vcmp.ge.f32.partialorder %v25070_v13, 0.0  ;;  %vm26107_vm14 = vcmp.ge.f32.partialorder %v25072_v31, 0.0 }
 0x6ad   : > { %v25322_v41 = vsel %vm26106_vm13, %v25070_v13, %v25149_v25  ;;  %v25328_v36 = vsel %vm26107_vm14, %v25072_v31, %v25152_v50  ;;  %vm26108_vm15 = vcmp.ge.f32.partialorder %v25074_v1, 0.0  ;;  %vm26109_vm0 = vcmp.ge.f32.partialorder %v25076_v56, 0.0 }
 0x6ae   : > { %v25334_v58 = vsel %vm26108_vm15, %v25074_v1, %v25155_v55  ;;  %v25340_v3 = vsel %vm26109_vm0, %v25076_v56, %v25158_v48  ;;  %vm26110_vm11 = vcmp.ge.f32.partialorder %v25078_v30, 0.0  ;;  %vm26111_vm12 = vcmp.ge.f32.partialorder %v25080_v5, 0.0  ;;  %v14525_v55 = vpop.permute.xlu0 %14524  ;;  %v26127_v1 = vld [vmem:[#allocation41_spill] sm:$0xff] }
 0x6af   : > { %v25346_v25 = vsel %vm26110_vm11, %v25078_v30, %v25161_v19  ;;  %v25352_v50 = vsel %vm26111_vm12, %v25080_v5, %v25164_v54  ;;  %vm26112_vm13 = vcmp.ge.f32.partialorder %v25082_v20, 0.0  ;;  %vm26113_vm14 = vcmp.ge.f32.partialorder %v25084_v2, 0.0  ;;  %v26130_v5 = vld [vmem:[#allocation48_spill] sm:$0xff] }
 0x6b0   : > { %v25358_v39 = vsel %vm26112_vm13, %v25082_v20, %v25167_v51  ;;  %v25364_v48 = vsel %vm26113_vm14, %v25084_v2, %v25170_v10  ;;  %v25370_v19 = vsel %vm14436_vm7, %v25086_v21, %v25173_v35  ;;  %v25376_v54 = vsel %vm14437_vm8, %v25088_v47, %v25176_v53  ;;  %v26117_v51 = vld [vmem:[#allocation42_spill] sm:$0xff]  ;;  %v26131_v2 = vld [vmem:[#allocation47_spill] sm:$0xff] }
 0x6b1   : > { %26114 = vst [vmem:[#allocation19_spill] sm:$0xff] %v25364_v48  ;;  %26115 = vst [vmem:[#allocation5_spill] sm:$0xff] %v25370_v19  ;;  %v25382_v34 = vsel %vm14438_vm9, %v25090_v62, %v26117_v51  ;;  %v25388_v10 = vsel %vm14439_vm10, %v25092_v14, %v25182_v24  ;;  %v25394_v35 = vsel %vm14440_vm1, %v25094_v11, %v25185_v4  ;;  %v26124_v4 = vld [vmem:[#allocation43_spill] sm:$0xff]  ;;  %v26133_v62 = vld [vmem:[#allocation50_spill] sm:$0xff] }
 0x6b2   : > { %26116 = vst [vmem:[#allocation4_spill] sm:$0xff] %v25376_v54  ;;  %26118 = vst [vmem:[#allocation29_spill] sm:$0xff] %v25382_v34  ;;  %v25400_v53 = vsel %vm14441_vm2, %v25096_v38, %v25188_v26  ;;  %v25406_v13 = vsel %vm14442_vm3, %v25098_v28, %v25191_v60  ;;  %v25412_v24 = vsel %vm14443_vm4, %v25100_v40, %v25194_v52  ;;  %v26126_v26 = vld [vmem:[#allocation15_spill] sm:$0xff]  ;;  %v26129_v60 = vld [vmem:[#allocation26_spill] sm:$0xff] }
 0x6b3   : > { %26119 = vst [vmem:[#allocation14_spill] sm:$0xff] %v25388_v10  ;;  %26120 = vst [vmem:[#allocation30_spill] sm:$0xff] %v25394_v35  ;;  %v25418_v31 = vsel %vm14444_vm5, %v25102_v46, %v26124_v4  ;;  %v25424_v56 = vsel %vm14445_vm6, %v26127_v1, %v26126_v26  ;;  %v14598_v30 = vadd.f32 %v26129_v60, %v14525_v55  ;;  %v26132_v52 = vld [vmem:[#allocation49_spill] sm:$0xff]  ;;  %v26134_v11 = vld [vmem:[#allocation11_spill] sm:$0xff] }
 0x6b4   : > { %26121 = vst [vmem:[#allocation24_spill] sm:$0xff] %v25400_v53  ;;  %26122 = vst [vmem:[#allocation45_spill] sm:$0xff] %v25406_v13  ;;  %v14600_v20 = vadd.f32 %v26130_v5, %v14525_v55  ;;  %v14669_v21 = vadd.f32 %v26131_v2, %v14525_v55  ;;  %v14671_v47 = vadd.f32 %v26132_v52, %v14525_v55  ;;  %v26135_v28 = vld [vmem:[#allocation39_spill] sm:$0xff]  ;;  %v26143_v4 = vld [vmem:[#allocation12_spill] sm:$0xff] }
 0x6b5   : > { %26123 = vst [vmem:[#allocation25_spill] sm:$0xff] %v25412_v24  ;;  %26125 = vst [vmem:[#allocation46_spill] sm:$0xff] %v25418_v31  ;;  %v14740_v14 = vadd.f32 %v26133_v62, %v14525_v55  ;;  %v14742_v38 = vadd.f32 %v26134_v11, %v14525_v55  ;;  %v14811_v40 = vadd.f32 %v26135_v28, %v14525_v55  ;;  %v26136_v46 = vld [vmem:[#allocation51_spill] sm:$0xff]  ;;  %v26144_v1 = vld [vmem:[#allocation17_spill] sm:$0xff] }
 0x6b6   : > { %26128 = vst [vmem:[#allocation34_spill] sm:$0xff] %v25424_v56  ;;  %v14813_v37 = vadd.f32 %v26136_v46, %v14525_v55  ;;  %v14882_v44 = vadd.f32 %v26137_v33, %v14525_v55  ;;  %v14884_v57 = vadd.f32 %v26138_v32, %v14525_v55  ;;  %v14953_v27 = vadd.f32 %v26139_v7, %v14525_v55  ;;  %v26145_v5 = vld [vmem:[#allocation18_spill] sm:$0xff]  ;;  %v26146_v52 = vld [vmem:[#allocation20_spill] sm:$0xff]  ;;  %v26147_v11 = vld [vmem:[#allocation21_spill] sm:$0xff] }
 0x6b7   : > { %v14955_v42 = vadd.f32 %v26140_v61, %v14525_v55  ;;  %v15024_v43 = vadd.f32 %v26141_v23, %v14525_v55  ;;  %v15026_v51 = vadd.f32 %v26142_v63, %v14525_v55  ;;  %v15095_v26 = vadd.f32 %v26143_v4, %v14525_v55  ;;  %v26148_v46 = vld [vmem:[#allocation31_spill] sm:$0xff]  ;;  %v26149_v32 = vld [vmem:[#allocation33_spill] sm:$0xff]  ;;  %v26150_v56 = vld [vmem:[#allocation32_spill] sm:$0xff] }
 0x6b8   : > { %v15097_v60 = vadd.f32 %v26144_v1, %v14525_v55  ;;  %v15166_v2 = vadd.f32 %v26145_v5, %v14525_v55  ;;  %v15168_v62 = vadd.f32 %v26146_v52, %v14525_v55  ;;  %v15237_v28 = vadd.f32 %v26147_v11, %v14525_v55  ;;  %v26151_v31 = vld [vmem:[#allocation9_spill] sm:$0xff]  ;;  %v26153_v13 = vld [vmem:[#allocation38_spill] sm:$0xff]  ;;  %v26154_v53 = vld [vmem:[#allocation40_spill] sm:$0xff] }
 0x6b9   : > { %v15239_v33 = vadd.f32 %v26148_v46, %v14525_v55  ;;  %v15308_v7 = vadd.f32 %v26149_v32, %v14525_v55  ;;  %v15310_v61 = vadd.f32 %v26150_v56, %v14525_v55  ;;  %v15379_v23 = vadd.f32 %v26151_v31, %v14525_v55  ;;  %v26152_v24 = vld [vmem:[#allocation37_spill] sm:$0xff]  ;;  %v26155_v35 = vld [vmem:[#allocation35_spill] sm:$0xff]  ;;  %v26156_v10 = vld [vmem:[#allocation8_spill] sm:$0xff] }
 0x6ba   : > { %v15381_v63 = vadd.f32 %v26152_v24, %v14525_v55  ;;  %v15450_v4 = vadd.f32 %v26153_v13, %v14525_v55  ;;  %v15452_v1 = vadd.f32 %v26154_v53, %v14525_v55  ;;  %v15521_v5 = vadd.f32 %v26155_v35, %v14525_v55  ;;  %v26157_v34 = vld [vmem:[#allocation36_spill] sm:$0xff]  ;;  %v26158_v54 = vld [vmem:[#allocation7_spill] sm:$0xff] }
 0x6bb   : > { %v15523_v52 = vadd.f32 %v26156_v10, %v14525_v55  ;;  %v15592_v11 = vadd.f32 %v26157_v34, %v14525_v55  ;;  %v15594_v46 = vadd.f32 %v26158_v54, %v14525_v55  ;;  %v26159_v19 = vld [vmem:[#allocation23_spill] sm:$0xff]  ;;  %v26160_v48 = vld [vmem:[#allocation16_spill] sm:$0xff]  ;;  %v15667_v31 = vadd.f32 %v14598_v30, %v25238_v15 }
 0x6bc   : > { %v15663_v32 = vadd.f32 %v26159_v19, %v14525_v55  ;;  %v15665_v56 = vadd.f32 %v26160_v48, %v14525_v55  ;;  %v15668_v24 = vadd.f32 %v14600_v20, %v25244_v45  ;;  %v15669_v13 = vadd.f32 %v14669_v21, %v25250_v17 }
 0x6bd   : > { %v15670_v53 = vadd.f32 %v14671_v47, %v25256_v9  ;;  %v15671_v35 = vadd.f32 %v14740_v14, %v25262_v59  ;;  %v15672_v10 = vadd.f32 %v14742_v38, %v25268_v16  ;;  %v15673_v34 = vadd.f32 %v14811_v40, %v25274_v12  ;;  %v26166_v14 = vld [vmem:[#allocation30_spill] sm:$0xff]  ;;  %v26167_v38 = vld [vmem:[#allocation24_spill] sm:$0xff] }
 0x6be   : > { %v15674_v54 = vadd.f32 %v14813_v37, %v25280_v49  ;;  %v15675_v19 = vadd.f32 %v14882_v44, %v25286_v22  ;;  %v15676_v55 = vadd.f32 %v14884_v57, %v25292_v29  ;;  %v15677_v15 = vadd.f32 %v14953_v27, %v25298_v0  ;;  %v26170_v37 = vld [vmem:[#allocation46_spill] sm:$0xff] }
 0x6bf   : > { %v15678_v45 = vadd.f32 %v14955_v42, %v25304_v8  ;;  %v15679_v17 = vadd.f32 %v15024_v43, %v25310_v6  ;;  %v15680_v9 = vadd.f32 %v15026_v51, %v25316_v18  ;;  %v15681_v59 = vadd.f32 %v15095_v26, %v25322_v41  ;;  %v26161_v8 = vld [vmem:[#allocation19_spill] sm:$0xff]  ;;  %v26162_v6 = vld [vmem:[#allocation5_spill] sm:$0xff]  ;;  %v26163_v18 = vld [vmem:[#allocation4_spill] sm:$0xff] }
 0x6c0   : > { %v15682_v16 = vadd.f32 %v15097_v60, %v25328_v36  ;;  %v15683_v12 = vadd.f32 %v15166_v2, %v25334_v58  ;;  %v15684_v49 = vadd.f32 %v15168_v62, %v25340_v3  ;;  %v15685_v22 = vadd.f32 %v15237_v28, %v25346_v25  ;;  %v26164_v41 = vld [vmem:[#allocation29_spill] sm:$0xff]  ;;  %v26165_v36 = vld [vmem:[#allocation14_spill] sm:$0xff] }
 0x6c1   : > { %v15686_v29 = vadd.f32 %v15239_v33, %v25352_v50  ;;  %v15687_v0 = vadd.f32 %v15308_v7, %v25358_v39  ;;  %v15688_v48 = vadd.f32 %v15310_v61, %v26161_v8  ;;  %v15689_v30 = vadd.f32 %v15379_v23, %v26162_v6  ;;  %v26168_v25 = vld [vmem:[#allocation45_spill] sm:$0xff]  ;;  %v26171_v57 = vld [vmem:[#allocation34_spill] sm:$0xff] }
 0x6c2   : > { %v15690_v20 = vadd.f32 %v15381_v63, %v26163_v18  ;;  %v15691_v21 = vadd.f32 %v15450_v4, %v26164_v41  ;;  %v15692_v47 = vadd.f32 %v15452_v1, %v26165_v36  ;;  %v15693_v58 = vadd.f32 %v15521_v5, %v26166_v14  ;;  %v26169_v39 = vld [vmem:[#allocation25_spill] sm:$0xff] }
 0x6c3   : > { %v15694_v3 = vadd.f32 %v15523_v52, %v26167_v38  ;;  %v15695_v50 = vadd.f32 %v15592_v11, %v26168_v25  ;;  %v15696_v40 = vadd.f32 %v15594_v46, %v26169_v39  ;;  %v15697_v44 = vadd.f32 %v15663_v32, %v26170_v37 }
 0x6c4   : > { %v15698_v27 = vadd.f32 %v15665_v56, %v26171_v57  ;;  %v15731_v42 = vcombine.low %v15667_v31, %v15668_v24  ;;  %v15732_v43 = vcombine.low %v15669_v13, %v15670_v53  ;;  %v15733_v51 = vcombine.low %v15671_v35, %v15672_v10 }
 0x6c5   : > { %v15734_v26 = vcombine.low %v15673_v34, %v15674_v54  ;;  %v15735_v60 = vcombine.low %v15675_v19, %v15676_v55  ;;  %v15736_v2 = vcombine.low %v15677_v15, %v15678_v45  ;;  %v15737_v62 = vcombine.low %v15679_v17, %v15680_v9 }
 0x6c6   : > { %v15738_v28 = vcombine.low %v15681_v59, %v15682_v16  ;;  %v15739_v33 = vcombine.low %v15683_v12, %v15684_v49  ;;  %v15740_v7 = vcombine.low %v15685_v22, %v15686_v29  ;;  %v15741_v61 = vcombine.low %v15687_v0, %v15688_v48  ;;  %15763 = vst [vmem:[%s25490_s19] sm:$0xff] %v15731_v42 }
 0x6c7   : > { %v15742_v23 = vcombine.low %v15689_v30, %v15690_v20  ;;  %15764 = vst [vmem:[%s25490_s19 + $0x8] sm:$0xff] %v15732_v43  ;;  %15765 = vst [vmem:[%s25490_s19 + $0x10] sm:$0xff] %v15733_v51  ;;  %v15743_v63 = vcombine.low %v15691_v21, %v15692_v47  ;;  %v15744_v4 = vcombine.low %v15693_v58, %v15694_v3 }
 0x6c8   : > { %15766 = vst [vmem:[%s25490_s19 + $0x18] sm:$0xff] %v15734_v26  ;;  %v15745_v1 = vcombine.low %v15695_v50, %v15696_v40  ;;  %v15746_v5 = vcombine.low %v15697_v44, %v15698_v27  ;;  %15767 = vst [vmem:[%s25490_s19 + $0x20] sm:$0xff] %v15735_v60 }
 0x6c9   : > { %15768 = vst [vmem:[%s25490_s19 + $0x28] sm:$0xff] %v15736_v2  ;;  %15769 = vst [vmem:[%s25490_s19 + $0x30] sm:$0xff] %v15737_v62 }
 0x6ca   : > { %15770 = vst [vmem:[%s25490_s19 + $0x38] sm:$0xff] %v15738_v28  ;;  %15771 = vst [vmem:[%s25490_s19 + $0x40] sm:$0xff] %v15739_v33 }
 0x6cb   : > { %15772 = vst [vmem:[%s25490_s19 + $0x48] sm:$0xff] %v15740_v7  ;;  %15773 = vst [vmem:[%s25490_s19 + $0x50] sm:$0xff] %v15741_v61 }
 0x6cc   : > { %15774 = vst [vmem:[%s25490_s19 + $0x58] sm:$0xff] %v15742_v23  ;;  %15775 = vst [vmem:[%s25490_s19 + $0x60] sm:$0xff] %v15743_v63 }
 0x6cd   : > { %15776 = vst [vmem:[%s25490_s19 + $0x68] sm:$0xff] %v15744_v4  ;;  %15777 = vst [vmem:[%s25490_s19 + $0x70] sm:$0xff] %v15745_v1 }
 0x6ce   : > { %15778 = vst [vmem:[%s25490_s19 + $0x78] sm:$0xff] %v15746_v5 }
 0x6cf PF: > { %s21_s11 = sadd.s32 1, %s17660_s11  }
 0x6d0   : > { %p18_p4 = scmp.ge.s32.totalorder %s21_s11, 4  }
 0x6d2   :  { %20 = sbr.rel (!%p18_p4) target bundleno = 3 (0x3), region = 94 }

</bundles_post_ra>
